<compile_context>
chip_gen: v6e
topology: v6e:2x2x1
jax: 0.10.0
libtpu: 0.0.40
codegen_flags: <defaults>
</compile_context>

<pallas_src>
import numpy as np
import jax
import jax.numpy as jnp
from jax.experimental import pallas as pl
from jax.experimental.pallas import tpu as pltpu

KSIZE = 5
DILATION = 1
PADDING_ARG = 0
ADJ_PAD = DILATION * (KSIZE - 1) - PADDING_ARG   # = 4
BN_EPS = 1e-5
LENET1_REVERSED_OUT = [12, 4]                    # LENET1 config reversed (variant=1)


# ---------------------------------------------------------------------------
# Host-side constant construction (hoisted, done once)
# ---------------------------------------------------------------------------
def _upsample_pad_matrix(src, tgt, pad):
    """(tgt + 2*pad, src) 0/1 matrix: nearest upsample src->tgt using torch's
    rule src_idx = floor(dst * src / tgt) (integer math), then zero padding."""
    u = np.zeros((tgt + 2 * pad, src), np.float32)
    dst = np.arange(tgt)
    u[dst + pad, (dst * src) // tgt] = 1.0
    return u


def _conv_band_matrices(w, oh, ph):
    """w: (Cout, Cin, 5, 5) torch conv weight.
    Returns (5, Cout*oh, Cin*ph) with B[kj, co*oh + o, ci*ph + o + ki] = w[co, ci, ki, kj],
    so  out[:, ow] += B[kj] @ x_pad[:, kj + ow]  accumulated over kj is the conv."""
    cout, cin, k, _ = w.shape
    bands = np.zeros((k, cout * oh, cin * ph), np.float32)
    co = np.arange(cout)[:, None]
    ci = np.arange(cin)[None, :]
    for kj in range(k):
        for ki in range(k):
            for o in range(oh):
                bands[kj, co * oh + o, ci * ph + o + ki] = w[:, :, ki, kj]
    return bands


def init_params(key, block_inputs, out_channels):
    """PyTorch-default Conv2d / BatchNorm2d initialisation."""
    params = []
    for (cin, _, _), cout in zip(block_inputs, out_channels):
        key, kw, kb = jax.random.split(key, 3)
        bound = 1.0 / np.sqrt(cin * KSIZE * KSIZE)
        params.append({
            "w": jax.random.uniform(kw, (cout, cin, KSIZE, KSIZE), jnp.float32,
                                    -bound, bound),
            "b": jax.random.uniform(kb, (cout,), jnp.float32, -bound, bound),
            "gamma": jnp.ones((cout,), jnp.float32),   # BatchNorm2d defaults
            "beta": jnp.zeros((cout,), jnp.float32),
        })
    return params


def prepare_lenet_dec(params, block_inputs, out_channels, input_hw):
    """One-time host-side preparation of every kernel-ready constant matrix."""
    h_in, w_in = input_hw
    dims, blocks = [], []
    for p, (cin, th, tw), cout in zip(params, block_inputs, out_channels):
        ph, pw = th + 2 * ADJ_PAD, tw + 2 * ADJ_PAD
        oh, ow = ph - KSIZE + 1, pw - KSIZE + 1

        u_h = _upsample_pad_matrix(h_in, th, ADJ_PAD)                  # (ph, h_in)
        u_w = _upsample_pad_matrix(w_in, tw, ADJ_PAD)                  # (pw, w_in)
        bh = np.kron(np.eye(cin, dtype=np.float32), u_h)               # (cin*ph, cin*h_in)
        uwt = np.ascontiguousarray(u_w.T)                              # (w_in, pw)

        bands = _conv_band_matrices(np.asarray(p["w"], np.float32), oh, ph)

        bias_r = np.repeat(np.asarray(p["b"], np.float32), oh)[:, None]     # (cout*oh, 1)
        gamma_r = np.repeat(np.asarray(p["gamma"], np.float32), oh)[:, None]
        beta_r = np.repeat(np.asarray(p["beta"], np.float32), oh)[:, None]

        g = np.kron(np.eye(cout, dtype=np.float32),
                    np.ones((1, oh), np.float32))                      # (cout, cout*oh)
        gt = np.ascontiguousarray(g.T)                                 # (cout*oh, cout)

        blocks.append((
            jnp.asarray(bh), jnp.asarray(uwt),
            jnp.asarray(bands, dtype=jnp.bfloat16),                    # bf16 MXU operands
            jnp.asarray(bias_r), jnp.asarray(gamma_r), jnp.asarray(beta_r),
            jnp.asarray(g), jnp.asarray(gt)))
        dims.append(dict(cin=cin, cout=cout, h_in=h_in, w_in=w_in,
                         ph=ph, pw=pw, oh=oh, ow=ow))
        h_in, w_in = oh, ow                                            # next block input size
    return {"blocks": blocks, "dims": dims}


# ---------------------------------------------------------------------------
# Fused Pallas kernel: whole decoder (upsample + pad + conv + BN + ReLU, x2 blocks)
# ---------------------------------------------------------------------------
def _make_kernel(block_dims, n_batch):
    def kernel(*refs):
        x_ref, o_ref = refs[0], refs[-1]
        blk_refs = refs[1:-1]

        # Per-sample activation in (C*H, W) layout, f32.
        acts = [x_ref[n] for n in range(n_batch)]

        for bi, d in enumerate(block_dims):
            (bh_ref, uwt_ref, band_ref, bias_ref,
             gamma_ref, beta_ref, g_ref, gt_ref) = blk_refs[8 * bi: 8 * bi + 8]
            oh, ow, cout = d["oh"], d["ow"], d["cout"]
            rows = cout * oh

            # ---- upsample + zero-pad + 5x5 conv (+ bias) per sample --------
            ys = []
            for n in range(n_batch):
                xp = jnp.dot(bh_ref[...], acts[n],
                             preferred_element_type=jnp.float32)       # (Cin*PH, W_in)
                xp = jnp.dot(xp, uwt_ref[...],
                             preferred_element_type=jnp.float32)       # (Cin*PH, PW)
                xpb = xp.astype(jnp.bfloat16)                          # MXU fast path
                acc = jnp.zeros((rows, ow), jnp.float32)
                for kj in range(KSIZE):                                # 5 static taps
                    acc = acc + jnp.dot(band_ref[kj], xpb[:, kj:kj + ow],
                                        preferred_element_type=jnp.float32)
                ys.append(acc + bias_ref[...])                         # (Cout*OH, OW)

            # ---- BatchNorm2d (training batch stats, single pass) + ReLU ----
            row_sum = jnp.sum(ys[0], axis=1, keepdims=True)
            row_sq = jnp.sum(ys[0] * ys[0], axis=1, keepdims=True)
            for y in ys[1:]:
                row_sum = row_sum + jnp.sum(y, axis=1, keepdims=True)
                row_sq = row_sq + jnp.sum(y * y, axis=1, keepdims=True)
            inv_cnt = 1.0 / float(n_batch * oh * ow)
            mean_c = jnp.dot(g_ref[...], row_sum,
                             preferred_element_type=jnp.float32) * inv_cnt   # (Cout, 1)
            ex2_c = jnp.dot(g_ref[...], row_sq,
                            preferred_element_type=jnp.float32) * inv_cnt
            var_c = jnp.maximum(ex2_c - mean_c * mean_c, 0.0)                # biased var
            mean_r = jnp.dot(gt_ref[...], mean_c,
                             preferred_element_type=jnp.float32)             # (rows, 1)
            var_r = jnp.dot(gt_ref[...], var_c,
                            preferred_element_type=jnp.float32)
            scale_r = gamma_ref[...] * jax.lax.rsqrt(var_r + BN_EPS)          # EUP rsqrt
            acts = [jnp.maximum((y - mean_r) * scale_r + beta_ref[...], 0.0)
                    for y in ys]

        rows_out = block_dims[-1]["cout"] * block_dims[-1]["oh"]
        for n in range(n_batch):
            o_ref[n * rows_out:(n + 1) * rows_out, :] = acts[n]

    return kernel


def lenet_dec_forward(x, prepared):
    """x: (N, Cin, H, W) NCHW float32 -> (N, Cout_last, OH_last, OW_last)."""
    dims = prepared["dims"]
    d0, dl = dims[0], dims[-1]
    n = x.shape[0]

    # Free row-major merge: NCHW -> (N, C*H, W).
    x2 = x.reshape(n, d0["cin"] * d0["h_in"], d0["w_in"]).astype(jnp.float32)

    flat_inputs = [x2]
    for blk in prepared["blocks"]:
        flat_inputs.extend(blk)

    def full_spec(arr):
        ndim = arr.ndim

        def imap(i):
            return (0,) * ndim

        return pl.BlockSpec(arr.shape, imap)

    rows_out = n * dl["cout"] * dl["oh"]
    y2 = pl.pallas_call(
        _make_kernel(dims, n),
        grid=(1,),
        in_specs=[full_spec(a) for a in flat_inputs],
        out_specs=pl.BlockSpec((rows_out, dl["ow"]), lambda i: (0, 0)),
        out_shape=jax.ShapeDtypeStruct((rows_out, dl["ow"]), jnp.float32),
        compiler_params=pltpu.CompilerParams(dimension_semantics=("arbitrary",)),
    )(*flat_inputs)

    # Free row-major split: (N*Cout*OH, OW) -> NCHW, no transpose needed.
    return y2.reshape(n, dl["cout"], dl["oh"], dl["ow"])


# ---------------------------------------------------------------------------
if __name__ == "__main__":
    key = jax.random.PRNGKey(0)
    key, kx = jax.random.split(key)

    # block_inputs: per decoder block, (in_channels, upsample_H, upsample_W),
    # exactly as LeNetDec.__init__ consumes them (variant=1 -> out_channels [12, 4]).
    block_inputs = ((12, 8, 8), (12, 16, 16))
    out_channels = LENET1_REVERSED_OUT

    x = jax.random.normal(kx, (2, 12, 4, 4), jnp.float32)   # NCHW encoder output

    params = init_params(key, block_inputs, out_channels)
    prepared = prepare_lenet_dec(params, block_inputs, out_channels, input_hw=(4, 4))

    fwd = jax.jit(lambda xx: lenet_dec_forward(xx, prepared))
    out = jax.block_until_ready(fwd(x))

    # Block 0: 4x4 -> up 8x8 -> pad 16x16 -> conv5 -> (2, 12, 12, 12)
    # Block 1: 12x12 -> up 16x16 -> pad 24x24 -> conv5 -> (2, 4, 20, 20)
    assert out.shape == (2, 4, 20, 20), out.shape
    assert bool(jnp.all(out >= 0.0)), "ReLU output must be non-negative"
    assert bool(jnp.all(jnp.isfinite(out)))
    print("KERNEL_OK")
</pallas_src>

<mosaic_0001>
module attributes {stable_mosaic.version = 11 : i64} {
  func.func @kernel(%arg0: i32, %arg1: memref<2x48x4xf32, #tpu.memory_space<vmem>>, %arg2: memref<192x48xf32, #tpu.memory_space<vmem>>, %arg3: memref<4x16xf32, #tpu.memory_space<vmem>>, %arg4: memref<5x144x192xbf16, #tpu.memory_space<vmem>>, %arg5: memref<144x1xf32, #tpu.memory_space<vmem>>, %arg6: memref<144x1xf32, #tpu.memory_space<vmem>>, %arg7: memref<144x1xf32, #tpu.memory_space<vmem>>, %arg8: memref<12x144xf32, #tpu.memory_space<vmem>>, %arg9: memref<144x12xf32, #tpu.memory_space<vmem>>, %arg10: memref<288x144xf32, #tpu.memory_space<vmem>>, %arg11: memref<12x24xf32, #tpu.memory_space<vmem>>, %arg12: memref<5x80x288xbf16, #tpu.memory_space<vmem>>, %arg13: memref<80x1xf32, #tpu.memory_space<vmem>>, %arg14: memref<80x1xf32, #tpu.memory_space<vmem>>, %arg15: memref<80x1xf32, #tpu.memory_space<vmem>>, %arg16: memref<4x80xf32, #tpu.memory_space<vmem>>, %arg17: memref<80x4xf32, #tpu.memory_space<vmem>>, %arg18: memref<160x20xf32, #tpu.memory_space<vmem>>) attributes {dimension_semantics = [#tpu.dimension_semantics<arbitrary>], iteration_bounds = array<i64: 1>, scalar_prefetch = 0 : i64, scratch_operands = 0 : i64, tpu.core_type = #tpu.core_type<tc>, window_params = [{pipeline_mode = #tpu.pipeline_mode<synchronous>, transform_indices = @transform_0, window_bounds = array<i64: 2, 48, 4>}, {pipeline_mode = #tpu.pipeline_mode<synchronous>, transform_indices = @transform_1, window_bounds = array<i64: 192, 48>}, {pipeline_mode = #tpu.pipeline_mode<synchronous>, transform_indices = @transform_2, window_bounds = array<i64: 4, 16>}, {pipeline_mode = #tpu.pipeline_mode<synchronous>, transform_indices = @transform_3, window_bounds = array<i64: 5, 144, 192>}, {pipeline_mode = #tpu.pipeline_mode<synchronous>, transform_indices = @transform_4, window_bounds = array<i64: 144, 1>}, {pipeline_mode = #tpu.pipeline_mode<synchronous>, transform_indices = @transform_5, window_bounds = array<i64: 144, 1>}, {pipeline_mode = #tpu.pipeline_mode<synchronous>, transform_indices = @transform_6, window_bounds = array<i64: 144, 1>}, {pipeline_mode = #tpu.pipeline_mode<synchronous>, transform_indices = @transform_7, window_bounds = array<i64: 12, 144>}, {pipeline_mode = #tpu.pipeline_mode<synchronous>, transform_indices = @transform_8, window_bounds = array<i64: 144, 12>}, {pipeline_mode = #tpu.pipeline_mode<synchronous>, transform_indices = @transform_9, window_bounds = array<i64: 288, 144>}, {pipeline_mode = #tpu.pipeline_mode<synchronous>, transform_indices = @transform_10, window_bounds = array<i64: 12, 24>}, {pipeline_mode = #tpu.pipeline_mode<synchronous>, transform_indices = @transform_11, window_bounds = array<i64: 5, 80, 288>}, {pipeline_mode = #tpu.pipeline_mode<synchronous>, transform_indices = @transform_12, window_bounds = array<i64: 80, 1>}, {pipeline_mode = #tpu.pipeline_mode<synchronous>, transform_indices = @transform_13, window_bounds = array<i64: 80, 1>}, {pipeline_mode = #tpu.pipeline_mode<synchronous>, transform_indices = @transform_14, window_bounds = array<i64: 80, 1>}, {pipeline_mode = #tpu.pipeline_mode<synchronous>, transform_indices = @transform_15, window_bounds = array<i64: 4, 80>}, {pipeline_mode = #tpu.pipeline_mode<synchronous>, transform_indices = @transform_16, window_bounds = array<i64: 80, 4>}, {pipeline_mode = #tpu.pipeline_mode<synchronous>, transform_indices = @transform_17, window_bounds = array<i64: 160, 20>}]} {
    %c0 = arith.constant 0 : index
    %c0_0 = arith.constant 0 : index
    %c0_1 = arith.constant 0 : index
    %0 = vector.load %arg1[%c0, %c0_0, %c0_1] : memref<2x48x4xf32, #tpu.memory_space<vmem>>, vector<1x48x4xf32>
    %1 = vector.shape_cast %0 : vector<1x48x4xf32> to vector<48x4xf32>
    %c1 = arith.constant 1 : index
    %c0_2 = arith.constant 0 : index
    %c0_3 = arith.constant 0 : index
    %2 = vector.load %arg1[%c1, %c0_2, %c0_3] : memref<2x48x4xf32, #tpu.memory_space<vmem>>, vector<1x48x4xf32>
    %3 = vector.shape_cast %2 : vector<1x48x4xf32> to vector<48x4xf32>
    %c0_4 = arith.constant 0 : index
    %c0_5 = arith.constant 0 : index
    %4 = vector.load %arg2[%c0_4, %c0_5] : memref<192x48xf32, #tpu.memory_space<vmem>>, vector<192x48xf32>
    %cst = arith.constant dense<0.000000e+00> : vector<192x4xf32>
    %5 = tpu.matmul %4, %1, %cst {dimension_numbers = #tpu.dot_dimension_numbers<[1], [0], [0], [1], [0, 0, 1, 1], [], []>} : vector<192x48xf32>, vector<48x4xf32>, vector<192x4xf32> -> vector<192x4xf32>
    %c0_6 = arith.constant 0 : index
    %c0_7 = arith.constant 0 : index
    %6 = vector.load %arg3[%c0_6, %c0_7] : memref<4x16xf32, #tpu.memory_space<vmem>>, vector<4x16xf32>
    %cst_8 = arith.constant dense<0.000000e+00> : vector<192x16xf32>
    %7 = tpu.matmul %5, %6, %cst_8 {dimension_numbers = #tpu.dot_dimension_numbers<[1], [0], [0], [1], [0, 0, 1, 1], [], []>} : vector<192x4xf32>, vector<4x16xf32>, vector<192x16xf32> -> vector<192x16xf32>
    %8 = arith.truncf %7 : vector<192x16xf32> to vector<192x16xbf16>
    %cst_9 = arith.constant 0.000000e+00 : f32
    %9 = vector.broadcast %cst_9 : f32 to vector<144x12xf32>
    %c0_10 = arith.constant 0 : index
    %c0_11 = arith.constant 0 : index
    %c0_12 = arith.constant 0 : index
    %10 = vector.load %arg4[%c0_10, %c0_11, %c0_12] : memref<5x144x192xbf16, #tpu.memory_space<vmem>>, vector<1x144x192xbf16>
    %11 = vector.shape_cast %10 : vector<1x144x192xbf16> to vector<144x192xbf16>
    %12 = vector.extract_strided_slice %8 {offsets = [0, 0], sizes = [192, 12], strides = [1, 1]} : vector<192x16xbf16> to vector<192x12xbf16>
    %cst_13 = arith.constant dense<0.000000e+00> : vector<144x12xf32>
    %13 = tpu.matmul %11, %12, %cst_13 {dimension_numbers = #tpu.dot_dimension_numbers<[1], [0], [0], [1], [0, 0, 1, 1], [], []>} : vector<144x192xbf16>, vector<192x12xbf16>, vector<144x12xf32> -> vector<144x12xf32>
    %14 = arith.addf %9, %13 : vector<144x12xf32>
    %c1_14 = arith.constant 1 : index
    %c0_15 = arith.constant 0 : index
    %c0_16 = arith.constant 0 : index
    %15 = vector.load %arg4[%c1_14, %c0_15, %c0_16] : memref<5x144x192xbf16, #tpu.memory_space<vmem>>, vector<1x144x192xbf16>
    %16 = vector.shape_cast %15 : vector<1x144x192xbf16> to vector<144x192xbf16>
    %17 = vector.extract_strided_slice %8 {offsets = [0, 1], sizes = [192, 12], strides = [1, 1]} : vector<192x16xbf16> to vector<192x12xbf16>
    %cst_17 = arith.constant dense<0.000000e+00> : vector<144x12xf32>
    %18 = tpu.matmul %16, %17, %cst_17 {dimension_numbers = #tpu.dot_dimension_numbers<[1], [0], [0], [1], [0, 0, 1, 1], [], []>} : vector<144x192xbf16>, vector<192x12xbf16>, vector<144x12xf32> -> vector<144x12xf32>
    %19 = arith.addf %14, %18 : vector<144x12xf32>
    %c2 = arith.constant 2 : index
    %c0_18 = arith.constant 0 : index
    %c0_19 = arith.constant 0 : index
    %20 = vector.load %arg4[%c2, %c0_18, %c0_19] : memref<5x144x192xbf16, #tpu.memory_space<vmem>>, vector<1x144x192xbf16>
    %21 = vector.shape_cast %20 : vector<1x144x192xbf16> to vector<144x192xbf16>
    %22 = vector.extract_strided_slice %8 {offsets = [0, 2], sizes = [192, 12], strides = [1, 1]} : vector<192x16xbf16> to vector<192x12xbf16>
    %cst_20 = arith.constant dense<0.000000e+00> : vector<144x12xf32>
    %23 = tpu.matmul %21, %22, %cst_20 {dimension_numbers = #tpu.dot_dimension_numbers<[1], [0], [0], [1], [0, 0, 1, 1], [], []>} : vector<144x192xbf16>, vector<192x12xbf16>, vector<144x12xf32> -> vector<144x12xf32>
    %24 = arith.addf %19, %23 : vector<144x12xf32>
    %c3 = arith.constant 3 : index
    %c0_21 = arith.constant 0 : index
    %c0_22 = arith.constant 0 : index
    %25 = vector.load %arg4[%c3, %c0_21, %c0_22] : memref<5x144x192xbf16, #tpu.memory_space<vmem>>, vector<1x144x192xbf16>
    %26 = vector.shape_cast %25 : vector<1x144x192xbf16> to vector<144x192xbf16>
    %27 = vector.extract_strided_slice %8 {offsets = [0, 3], sizes = [192, 12], strides = [1, 1]} : vector<192x16xbf16> to vector<192x12xbf16>
    %cst_23 = arith.constant dense<0.000000e+00> : vector<144x12xf32>
    %28 = tpu.matmul %26, %27, %cst_23 {dimension_numbers = #tpu.dot_dimension_numbers<[1], [0], [0], [1], [0, 0, 1, 1], [], []>} : vector<144x192xbf16>, vector<192x12xbf16>, vector<144x12xf32> -> vector<144x12xf32>
    %29 = arith.addf %24, %28 : vector<144x12xf32>
    %c4 = arith.constant 4 : index
    %c0_24 = arith.constant 0 : index
    %c0_25 = arith.constant 0 : index
    %30 = vector.load %arg4[%c4, %c0_24, %c0_25] : memref<5x144x192xbf16, #tpu.memory_space<vmem>>, vector<1x144x192xbf16>
    %31 = vector.shape_cast %30 : vector<1x144x192xbf16> to vector<144x192xbf16>
    %32 = vector.extract_strided_slice %8 {offsets = [0, 4], sizes = [192, 12], strides = [1, 1]} : vector<192x16xbf16> to vector<192x12xbf16>
    %cst_26 = arith.constant dense<0.000000e+00> : vector<144x12xf32>
    %33 = tpu.matmul %31, %32, %cst_26 {dimension_numbers = #tpu.dot_dimension_numbers<[1], [0], [0], [1], [0, 0, 1, 1], [], []>} : vector<144x192xbf16>, vector<192x12xbf16>, vector<144x12xf32> -> vector<144x12xf32>
    %34 = arith.addf %29, %33 : vector<144x12xf32>
    %c0_27 = arith.constant 0 : index
    %c0_28 = arith.constant 0 : index
    %35 = vector.load %arg5[%c0_27, %c0_28] : memref<144x1xf32, #tpu.memory_space<vmem>>, vector<144x1xf32>
    %36 = vector.broadcast %35 : vector<144x1xf32> to vector<144x12xf32>
    %37 = arith.addf %34, %36 : vector<144x12xf32>
    %c0_29 = arith.constant 0 : index
    %c0_30 = arith.constant 0 : index
    %38 = vector.load %arg2[%c0_29, %c0_30] : memref<192x48xf32, #tpu.memory_space<vmem>>, vector<192x48xf32>
    %cst_31 = arith.constant dense<0.000000e+00> : vector<192x4xf32>
    %39 = tpu.matmul %38, %3, %cst_31 {dimension_numbers = #tpu.dot_dimension_numbers<[1], [0], [0], [1], [0, 0, 1, 1], [], []>} : vector<192x48xf32>, vector<48x4xf32>, vector<192x4xf32> -> vector<192x4xf32>
    %c0_32 = arith.constant 0 : index
    %c0_33 = arith.constant 0 : index
    %40 = vector.load %arg3[%c0_32, %c0_33] : memref<4x16xf32, #tpu.memory_space<vmem>>, vector<4x16xf32>
    %cst_34 = arith.constant dense<0.000000e+00> : vector<192x16xf32>
    %41 = tpu.matmul %39, %40, %cst_34 {dimension_numbers = #tpu.dot_dimension_numbers<[1], [0], [0], [1], [0, 0, 1, 1], [], []>} : vector<192x4xf32>, vector<4x16xf32>, vector<192x16xf32> -> vector<192x16xf32>
    %42 = arith.truncf %41 : vector<192x16xf32> to vector<192x16xbf16>
    %cst_35 = arith.constant 0.000000e+00 : f32
    %43 = vector.broadcast %cst_35 : f32 to vector<144x12xf32>
    %c0_36 = arith.constant 0 : index
    %c0_37 = arith.constant 0 : index
    %c0_38 = arith.constant 0 : index
    %44 = vector.load %arg4[%c0_36, %c0_37, %c0_38] : memref<5x144x192xbf16, #tpu.memory_space<vmem>>, vector<1x144x192xbf16>
    %45 = vector.shape_cast %44 : vector<1x144x192xbf16> to vector<144x192xbf16>
    %46 = vector.extract_strided_slice %42 {offsets = [0, 0], sizes = [192, 12], strides = [1, 1]} : vector<192x16xbf16> to vector<192x12xbf16>
    %cst_39 = arith.constant dense<0.000000e+00> : vector<144x12xf32>
    %47 = tpu.matmul %45, %46, %cst_39 {dimension_numbers = #tpu.dot_dimension_numbers<[1], [0], [0], [1], [0, 0, 1, 1], [], []>} : vector<144x192xbf16>, vector<192x12xbf16>, vector<144x12xf32> -> vector<144x12xf32>
    %48 = arith.addf %43, %47 : vector<144x12xf32>
    %c1_40 = arith.constant 1 : index
    %c0_41 = arith.constant 0 : index
    %c0_42 = arith.constant 0 : index
    %49 = vector.load %arg4[%c1_40, %c0_41, %c0_42] : memref<5x144x192xbf16, #tpu.memory_space<vmem>>, vector<1x144x192xbf16>
    %50 = vector.shape_cast %49 : vector<1x144x192xbf16> to vector<144x192xbf16>
    %51 = vector.extract_strided_slice %42 {offsets = [0, 1], sizes = [192, 12], strides = [1, 1]} : vector<192x16xbf16> to vector<192x12xbf16>
    %cst_43 = arith.constant dense<0.000000e+00> : vector<144x12xf32>
    %52 = tpu.matmul %50, %51, %cst_43 {dimension_numbers = #tpu.dot_dimension_numbers<[1], [0], [0], [1], [0, 0, 1, 1], [], []>} : vector<144x192xbf16>, vector<192x12xbf16>, vector<144x12xf32> -> vector<144x12xf32>
    %53 = arith.addf %48, %52 : vector<144x12xf32>
    %c2_44 = arith.constant 2 : index
    %c0_45 = arith.constant 0 : index
    %c0_46 = arith.constant 0 : index
    %54 = vector.load %arg4[%c2_44, %c0_45, %c0_46] : memref<5x144x192xbf16, #tpu.memory_space<vmem>>, vector<1x144x192xbf16>
    %55 = vector.shape_cast %54 : vector<1x144x192xbf16> to vector<144x192xbf16>
    %56 = vector.extract_strided_slice %42 {offsets = [0, 2], sizes = [192, 12], strides = [1, 1]} : vector<192x16xbf16> to vector<192x12xbf16>
    %cst_47 = arith.constant dense<0.000000e+00> : vector<144x12xf32>
    %57 = tpu.matmul %55, %56, %cst_47 {dimension_numbers = #tpu.dot_dimension_numbers<[1], [0], [0], [1], [0, 0, 1, 1], [], []>} : vector<144x192xbf16>, vector<192x12xbf16>, vector<144x12xf32> -> vector<144x12xf32>
    %58 = arith.addf %53, %57 : vector<144x12xf32>
    %c3_48 = arith.constant 3 : index
    %c0_49 = arith.constant 0 : index
    %c0_50 = arith.constant 0 : index
    %59 = vector.load %arg4[%c3_48, %c0_49, %c0_50] : memref<5x144x192xbf16, #tpu.memory_space<vmem>>, vector<1x144x192xbf16>
    %60 = vector.shape_cast %59 : vector<1x144x192xbf16> to vector<144x192xbf16>
    %61 = vector.extract_strided_slice %42 {offsets = [0, 3], sizes = [192, 12], strides = [1, 1]} : vector<192x16xbf16> to vector<192x12xbf16>
    %cst_51 = arith.constant dense<0.000000e+00> : vector<144x12xf32>
    %62 = tpu.matmul %60, %61, %cst_51 {dimension_numbers = #tpu.dot_dimension_numbers<[1], [0], [0], [1], [0, 0, 1, 1], [], []>} : vector<144x192xbf16>, vector<192x12xbf16>, vector<144x12xf32> -> vector<144x12xf32>
    %63 = arith.addf %58, %62 : vector<144x12xf32>
    %c4_52 = arith.constant 4 : index
    %c0_53 = arith.constant 0 : index
    %c0_54 = arith.constant 0 : index
    %64 = vector.load %arg4[%c4_52, %c0_53, %c0_54] : memref<5x144x192xbf16, #tpu.memory_space<vmem>>, vector<1x144x192xbf16>
    %65 = vector.shape_cast %64 : vector<1x144x192xbf16> to vector<144x192xbf16>
    %66 = vector.extract_strided_slice %42 {offsets = [0, 4], sizes = [192, 12], strides = [1, 1]} : vector<192x16xbf16> to vector<192x12xbf16>
    %cst_55 = arith.constant dense<0.000000e+00> : vector<144x12xf32>
    %67 = tpu.matmul %65, %66, %cst_55 {dimension_numbers = #tpu.dot_dimension_numbers<[1], [0], [0], [1], [0, 0, 1, 1], [], []>} : vector<144x192xbf16>, vector<192x12xbf16>, vector<144x12xf32> -> vector<144x12xf32>
    %68 = arith.addf %63, %67 : vector<144x12xf32>
    %c0_56 = arith.constant 0 : index
    %c0_57 = arith.constant 0 : index
    %69 = vector.load %arg5[%c0_56, %c0_57] : memref<144x1xf32, #tpu.memory_space<vmem>>, vector<144x1xf32>
    %70 = vector.broadcast %69 : vector<144x1xf32> to vector<144x12xf32>
    %71 = arith.addf %68, %70 : vector<144x12xf32>
    %cst_58 = arith.constant dense<0.000000e+00> : vector<144xf32>
    %72 = vector.multi_reduction <add>, %37, %cst_58 [1] : vector<144x12xf32> to vector<144xf32>
    %73 = vector.shape_cast %72 : vector<144xf32> to vector<144x1xf32>
    %74 = arith.mulf %37, %37 : vector<144x12xf32>
    %cst_59 = arith.constant dense<0.000000e+00> : vector<144xf32>
    %75 = vector.multi_reduction <add>, %74, %cst_59 [1] : vector<144x12xf32> to vector<144xf32>
    %76 = vector.shape_cast %75 : vector<144xf32> to vector<144x1xf32>
    %cst_60 = arith.constant dense<0.000000e+00> : vector<144xf32>
    %77 = vector.multi_reduction <add>, %71, %cst_60 [1] : vector<144x12xf32> to vector<144xf32>
    %78 = vector.shape_cast %77 : vector<144xf32> to vector<144x1xf32>
    %79 = arith.addf %73, %78 : vector<144x1xf32>
    %80 = arith.mulf %71, %71 : vector<144x12xf32>
    %cst_61 = arith.constant dense<0.000000e+00> : vector<144xf32>
    %81 = vector.multi_reduction <add>, %80, %cst_61 [1] : vector<144x12xf32> to vector<144xf32>
    %82 = vector.shape_cast %81 : vector<144xf32> to vector<144x1xf32>
    %83 = arith.addf %76, %82 : vector<144x1xf32>
    %c0_62 = arith.constant 0 : index
    %c0_63 = arith.constant 0 : index
    %84 = vector.load %arg8[%c0_62, %c0_63] : memref<12x144xf32, #tpu.memory_space<vmem>>, vector<12x144xf32>
    %cst_64 = arith.constant dense<0.000000e+00> : vector<12x1xf32>
    %85 = tpu.matmul %84, %79, %cst_64 {dimension_numbers = #tpu.dot_dimension_numbers<[1], [0], [0], [1], [0, 0, 1, 1], [], []>} : vector<12x144xf32>, vector<144x1xf32>, vector<12x1xf32> -> vector<12x1xf32>
    %cst_65 = arith.constant 0.00347222225 : f32
    %86 = vector.broadcast %cst_65 : f32 to vector<12x1xf32>
    %87 = arith.mulf %85, %86 : vector<12x1xf32>
    %c0_66 = arith.constant 0 : index
    %c0_67 = arith.constant 0 : index
    %88 = vector.load %arg8[%c0_66, %c0_67] : memref<12x144xf32, #tpu.memory_space<vmem>>, vector<12x144xf32>
    %cst_68 = arith.constant dense<0.000000e+00> : vector<12x1xf32>
    %89 = tpu.matmul %88, %83, %cst_68 {dimension_numbers = #tpu.dot_dimension_numbers<[1], [0], [0], [1], [0, 0, 1, 1], [], []>} : vector<12x144xf32>, vector<144x1xf32>, vector<12x1xf32> -> vector<12x1xf32>
    %cst_69 = arith.constant 0.00347222225 : f32
    %90 = vector.broadcast %cst_69 : f32 to vector<12x1xf32>
    %91 = arith.mulf %89, %90 : vector<12x1xf32>
    %92 = arith.mulf %87, %87 : vector<12x1xf32>
    %93 = arith.subf %91, %92 : vector<12x1xf32>
    %cst_70 = arith.constant 0.000000e+00 : f32
    %94 = vector.broadcast %cst_70 : f32 to vector<12x1xf32>
    %95 = arith.maximumf %93, %94 : vector<12x1xf32>
    %c0_71 = arith.constant 0 : index
    %c0_72 = arith.constant 0 : index
    %96 = vector.load %arg9[%c0_71, %c0_72] : memref<144x12xf32, #tpu.memory_space<vmem>>, vector<144x12xf32>
    %cst_73 = arith.constant dense<0.000000e+00> : vector<144x1xf32>
    %97 = tpu.matmul %96, %87, %cst_73 {dimension_numbers = #tpu.dot_dimension_numbers<[1], [0], [0], [1], [0, 0, 1, 1], [], []>} : vector<144x12xf32>, vector<12x1xf32>, vector<144x1xf32> -> vector<144x1xf32>
    %c0_74 = arith.constant 0 : index
    %c0_75 = arith.constant 0 : index
    %98 = vector.load %arg9[%c0_74, %c0_75] : memref<144x12xf32, #tpu.memory_space<vmem>>, vector<144x12xf32>
    %cst_76 = arith.constant dense<0.000000e+00> : vector<144x1xf32>
    %99 = tpu.matmul %98, %95, %cst_76 {dimension_numbers = #tpu.dot_dimension_numbers<[1], [0], [0], [1], [0, 0, 1, 1], [], []>} : vector<144x12xf32>, vector<12x1xf32>, vector<144x1xf32> -> vector<144x1xf32>
    %c0_77 = arith.constant 0 : index
    %c0_78 = arith.constant 0 : index
    %100 = vector.load %arg6[%c0_77, %c0_78] : memref<144x1xf32, #tpu.memory_space<vmem>>, vector<144x1xf32>
    %cst_79 = arith.constant 9.99999974E-6 : f32
    %101 = vector.broadcast %cst_79 : f32 to vector<144x1xf32>
    %102 = arith.addf %99, %101 : vector<144x1xf32>
    %103 = math.rsqrt %102 : vector<144x1xf32>
    %104 = arith.mulf %100, %103 : vector<144x1xf32>
    %105 = vector.broadcast %97 : vector<144x1xf32> to vector<144x12xf32>
    %106 = arith.subf %37, %105 : vector<144x12xf32>
    %107 = vector.broadcast %104 : vector<144x1xf32> to vector<144x12xf32>
    %108 = arith.mulf %106, %107 : vector<144x12xf32>
    %c0_80 = arith.constant 0 : index
    %c0_81 = arith.constant 0 : index
    %109 = vector.load %arg7[%c0_80, %c0_81] : memref<144x1xf32, #tpu.memory_space<vmem>>, vector<144x1xf32>
    %110 = vector.broadcast %109 : vector<144x1xf32> to vector<144x12xf32>
    %111 = arith.addf %108, %110 : vector<144x12xf32>
    %cst_82 = arith.constant 0.000000e+00 : f32
    %112 = vector.broadcast %cst_82 : f32 to vector<144x12xf32>
    %113 = arith.maximumf %111, %112 : vector<144x12xf32>
    %114 = vector.broadcast %97 : vector<144x1xf32> to vector<144x12xf32>
    %115 = arith.subf %71, %114 : vector<144x12xf32>
    %116 = vector.broadcast %104 : vector<144x1xf32> to vector<144x12xf32>
    %117 = arith.mulf %115, %116 : vector<144x12xf32>
    %c0_83 = arith.constant 0 : index
    %c0_84 = arith.constant 0 : index
    %118 = vector.load %arg7[%c0_83, %c0_84] : memref<144x1xf32, #tpu.memory_space<vmem>>, vector<144x1xf32>
    %119 = vector.broadcast %118 : vector<144x1xf32> to vector<144x12xf32>
    %120 = arith.addf %117, %119 : vector<144x12xf32>
    %cst_85 = arith.constant 0.000000e+00 : f32
    %121 = vector.broadcast %cst_85 : f32 to vector<144x12xf32>
    %122 = arith.maximumf %120, %121 : vector<144x12xf32>
    %c0_86 = arith.constant 0 : index
    %c0_87 = arith.constant 0 : index
    %123 = vector.load %arg10[%c0_86, %c0_87] : memref<288x144xf32, #tpu.memory_space<vmem>>, vector<288x144xf32>
    %cst_88 = arith.constant dense<0.000000e+00> : vector<288x12xf32>
    %124 = tpu.matmul %123, %113, %cst_88 {dimension_numbers = #tpu.dot_dimension_numbers<[1], [0], [0], [1], [0, 0, 1, 1], [], []>} : vector<288x144xf32>, vector<144x12xf32>, vector<288x12xf32> -> vector<288x12xf32>
    %c0_89 = arith.constant 0 : index
    %c0_90 = arith.constant 0 : index
    %125 = vector.load %arg11[%c0_89, %c0_90] : memref<12x24xf32, #tpu.memory_space<vmem>>, vector<12x24xf32>
    %cst_91 = arith.constant dense<0.000000e+00> : vector<288x24xf32>
    %126 = tpu.matmul %124, %125, %cst_91 {dimension_numbers = #tpu.dot_dimension_numbers<[1], [0], [0], [1], [0, 0, 1, 1], [], []>} : vector<288x12xf32>, vector<12x24xf32>, vector<288x24xf32> -> vector<288x24xf32>
    %127 = arith.truncf %126 : vector<288x24xf32> to vector<288x24xbf16>
    %cst_92 = arith.constant 0.000000e+00 : f32
    %128 = vector.broadcast %cst_92 : f32 to vector<80x20xf32>
    %c0_93 = arith.constant 0 : index
    %c0_94 = arith.constant 0 : index
    %c0_95 = arith.constant 0 : index
    %129 = vector.load %arg12[%c0_93, %c0_94, %c0_95] : memref<5x80x288xbf16, #tpu.memory_space<vmem>>, vector<1x80x288xbf16>
    %130 = vector.shape_cast %129 : vector<1x80x288xbf16> to vector<80x288xbf16>
    %131 = vector.extract_strided_slice %127 {offsets = [0, 0], sizes = [288, 20], strides = [1, 1]} : vector<288x24xbf16> to vector<288x20xbf16>
    %cst_96 = arith.constant dense<0.000000e+00> : vector<80x20xf32>
    %132 = tpu.matmul %130, %131, %cst_96 {dimension_numbers = #tpu.dot_dimension_numbers<[1], [0], [0], [1], [0, 0, 1, 1], [], []>} : vector<80x288xbf16>, vector<288x20xbf16>, vector<80x20xf32> -> vector<80x20xf32>
    %133 = arith.addf %128, %132 : vector<80x20xf32>
    %c1_97 = arith.constant 1 : index
    %c0_98 = arith.constant 0 : index
    %c0_99 = arith.constant 0 : index
    %134 = vector.load %arg12[%c1_97, %c0_98, %c0_99] : memref<5x80x288xbf16, #tpu.memory_space<vmem>>, vector<1x80x288xbf16>
    %135 = vector.shape_cast %134 : vector<1x80x288xbf16> to vector<80x288xbf16>
    %136 = vector.extract_strided_slice %127 {offsets = [0, 1], sizes = [288, 20], strides = [1, 1]} : vector<288x24xbf16> to vector<288x20xbf16>
    %cst_100 = arith.constant dense<0.000000e+00> : vector<80x20xf32>
    %137 = tpu.matmul %135, %136, %cst_100 {dimension_numbers = #tpu.dot_dimension_numbers<[1], [0], [0], [1], [0, 0, 1, 1], [], []>} : vector<80x288xbf16>, vector<288x20xbf16>, vector<80x20xf32> -> vector<80x20xf32>
    %138 = arith.addf %133, %137 : vector<80x20xf32>
    %c2_101 = arith.constant 2 : index
    %c0_102 = arith.constant 0 : index
    %c0_103 = arith.constant 0 : index
    %139 = vector.load %arg12[%c2_101, %c0_102, %c0_103] : memref<5x80x288xbf16, #tpu.memory_space<vmem>>, vector<1x80x288xbf16>
    %140 = vector.shape_cast %139 : vector<1x80x288xbf16> to vector<80x288xbf16>
    %141 = vector.extract_strided_slice %127 {offsets = [0, 2], sizes = [288, 20], strides = [1, 1]} : vector<288x24xbf16> to vector<288x20xbf16>
    %cst_104 = arith.constant dense<0.000000e+00> : vector<80x20xf32>
    %142 = tpu.matmul %140, %141, %cst_104 {dimension_numbers = #tpu.dot_dimension_numbers<[1], [0], [0], [1], [0, 0, 1, 1], [], []>} : vector<80x288xbf16>, vector<288x20xbf16>, vector<80x20xf32> -> vector<80x20xf32>
    %143 = arith.addf %138, %142 : vector<80x20xf32>
    %c3_105 = arith.constant 3 : index
    %c0_106 = arith.constant 0 : index
    %c0_107 = arith.constant 0 : index
    %144 = vector.load %arg12[%c3_105, %c0_106, %c0_107] : memref<5x80x288xbf16, #tpu.memory_space<vmem>>, vector<1x80x288xbf16>
    %145 = vector.shape_cast %144 : vector<1x80x288xbf16> to vector<80x288xbf16>
    %146 = vector.extract_strided_slice %127 {offsets = [0, 3], sizes = [288, 20], strides = [1, 1]} : vector<288x24xbf16> to vector<288x20xbf16>
    %cst_108 = arith.constant dense<0.000000e+00> : vector<80x20xf32>
    %147 = tpu.matmul %145, %146, %cst_108 {dimension_numbers = #tpu.dot_dimension_numbers<[1], [0], [0], [1], [0, 0, 1, 1], [], []>} : vector<80x288xbf16>, vector<288x20xbf16>, vector<80x20xf32> -> vector<80x20xf32>
    %148 = arith.addf %143, %147 : vector<80x20xf32>
    %c4_109 = arith.constant 4 : index
    %c0_110 = arith.constant 0 : index
    %c0_111 = arith.constant 0 : index
    %149 = vector.load %arg12[%c4_109, %c0_110, %c0_111] : memref<5x80x288xbf16, #tpu.memory_space<vmem>>, vector<1x80x288xbf16>
    %150 = vector.shape_cast %149 : vector<1x80x288xbf16> to vector<80x288xbf16>
    %151 = vector.extract_strided_slice %127 {offsets = [0, 4], sizes = [288, 20], strides = [1, 1]} : vector<288x24xbf16> to vector<288x20xbf16>
    %cst_112 = arith.constant dense<0.000000e+00> : vector<80x20xf32>
    %152 = tpu.matmul %150, %151, %cst_112 {dimension_numbers = #tpu.dot_dimension_numbers<[1], [0], [0], [1], [0, 0, 1, 1], [], []>} : vector<80x288xbf16>, vector<288x20xbf16>, vector<80x20xf32> -> vector<80x20xf32>
    %153 = arith.addf %148, %152 : vector<80x20xf32>
    %c0_113 = arith.constant 0 : index
    %c0_114 = arith.constant 0 : index
    %154 = vector.load %arg13[%c0_113, %c0_114] : memref<80x1xf32, #tpu.memory_space<vmem>>, vector<80x1xf32>
    %155 = vector.broadcast %154 : vector<80x1xf32> to vector<80x20xf32>
    %156 = arith.addf %153, %155 : vector<80x20xf32>
    %c0_115 = arith.constant 0 : index
    %c0_116 = arith.constant 0 : index
    %157 = vector.load %arg10[%c0_115, %c0_116] : memref<288x144xf32, #tpu.memory_space<vmem>>, vector<288x144xf32>
    %cst_117 = arith.constant dense<0.000000e+00> : vector<288x12xf32>
    %158 = tpu.matmul %157, %122, %cst_117 {dimension_numbers = #tpu.dot_dimension_numbers<[1], [0], [0], [1], [0, 0, 1, 1], [], []>} : vector<288x144xf32>, vector<144x12xf32>, vector<288x12xf32> -> vector<288x12xf32>
    %c0_118 = arith.constant 0 : index
    %c0_119 = arith.constant 0 : index
    %159 = vector.load %arg11[%c0_118, %c0_119] : memref<12x24xf32, #tpu.memory_space<vmem>>, vector<12x24xf32>
    %cst_120 = arith.constant dense<0.000000e+00> : vector<288x24xf32>
    %160 = tpu.matmul %158, %159, %cst_120 {dimension_numbers = #tpu.dot_dimension_numbers<[1], [0], [0], [1], [0, 0, 1, 1], [], []>} : vector<288x12xf32>, vector<12x24xf32>, vector<288x24xf32> -> vector<288x24xf32>
    %161 = arith.truncf %160 : vector<288x24xf32> to vector<288x24xbf16>
    %cst_121 = arith.constant 0.000000e+00 : f32
    %162 = vector.broadcast %cst_121 : f32 to vector<80x20xf32>
    %c0_122 = arith.constant 0 : index
    %c0_123 = arith.constant 0 : index
    %c0_124 = arith.constant 0 : index
    %163 = vector.load %arg12[%c0_122, %c0_123, %c0_124] : memref<5x80x288xbf16, #tpu.memory_space<vmem>>, vector<1x80x288xbf16>
    %164 = vector.shape_cast %163 : vector<1x80x288xbf16> to vector<80x288xbf16>
    %165 = vector.extract_strided_slice %161 {offsets = [0, 0], sizes = [288, 20], strides = [1, 1]} : vector<288x24xbf16> to vector<288x20xbf16>
    %cst_125 = arith.constant dense<0.000000e+00> : vector<80x20xf32>
    %166 = tpu.matmul %164, %165, %cst_125 {dimension_numbers = #tpu.dot_dimension_numbers<[1], [0], [0], [1], [0, 0, 1, 1], [], []>} : vector<80x288xbf16>, vector<288x20xbf16>, vector<80x20xf32> -> vector<80x20xf32>
    %167 = arith.addf %162, %166 : vector<80x20xf32>
    %c1_126 = arith.constant 1 : index
    %c0_127 = arith.constant 0 : index
    %c0_128 = arith.constant 0 : index
    %168 = vector.load %arg12[%c1_126, %c0_127, %c0_128] : memref<5x80x288xbf16, #tpu.memory_space<vmem>>, vector<1x80x288xbf16>
    %169 = vector.shape_cast %168 : vector<1x80x288xbf16> to vector<80x288xbf16>
    %170 = vector.extract_strided_slice %161 {offsets = [0, 1], sizes = [288, 20], strides = [1, 1]} : vector<288x24xbf16> to vector<288x20xbf16>
    %cst_129 = arith.constant dense<0.000000e+00> : vector<80x20xf32>
    %171 = tpu.matmul %169, %170, %cst_129 {dimension_numbers = #tpu.dot_dimension_numbers<[1], [0], [0], [1], [0, 0, 1, 1], [], []>} : vector<80x288xbf16>, vector<288x20xbf16>, vector<80x20xf32> -> vector<80x20xf32>
    %172 = arith.addf %167, %171 : vector<80x20xf32>
    %c2_130 = arith.constant 2 : index
    %c0_131 = arith.constant 0 : index
    %c0_132 = arith.constant 0 : index
    %173 = vector.load %arg12[%c2_130, %c0_131, %c0_132] : memref<5x80x288xbf16, #tpu.memory_space<vmem>>, vector<1x80x288xbf16>
    %174 = vector.shape_cast %173 : vector<1x80x288xbf16> to vector<80x288xbf16>
    %175 = vector.extract_strided_slice %161 {offsets = [0, 2], sizes = [288, 20], strides = [1, 1]} : vector<288x24xbf16> to vector<288x20xbf16>
    %cst_133 = arith.constant dense<0.000000e+00> : vector<80x20xf32>
    %176 = tpu.matmul %174, %175, %cst_133 {dimension_numbers = #tpu.dot_dimension_numbers<[1], [0], [0], [1], [0, 0, 1, 1], [], []>} : vector<80x288xbf16>, vector<288x20xbf16>, vector<80x20xf32> -> vector<80x20xf32>
    %177 = arith.addf %172, %176 : vector<80x20xf32>
    %c3_134 = arith.constant 3 : index
    %c0_135 = arith.constant 0 : index
    %c0_136 = arith.constant 0 : index
    %178 = vector.load %arg12[%c3_134, %c0_135, %c0_136] : memref<5x80x288xbf16, #tpu.memory_space<vmem>>, vector<1x80x288xbf16>
    %179 = vector.shape_cast %178 : vector<1x80x288xbf16> to vector<80x288xbf16>
    %180 = vector.extract_strided_slice %161 {offsets = [0, 3], sizes = [288, 20], strides = [1, 1]} : vector<288x24xbf16> to vector<288x20xbf16>
    %cst_137 = arith.constant dense<0.000000e+00> : vector<80x20xf32>
    %181 = tpu.matmul %179, %180, %cst_137 {dimension_numbers = #tpu.dot_dimension_numbers<[1], [0], [0], [1], [0, 0, 1, 1], [], []>} : vector<80x288xbf16>, vector<288x20xbf16>, vector<80x20xf32> -> vector<80x20xf32>
    %182 = arith.addf %177, %181 : vector<80x20xf32>
    %c4_138 = arith.constant 4 : index
    %c0_139 = arith.constant 0 : index
    %c0_140 = arith.constant 0 : index
    %183 = vector.load %arg12[%c4_138, %c0_139, %c0_140] : memref<5x80x288xbf16, #tpu.memory_space<vmem>>, vector<1x80x288xbf16>
    %184 = vector.shape_cast %183 : vector<1x80x288xbf16> to vector<80x288xbf16>
    %185 = vector.extract_strided_slice %161 {offsets = [0, 4], sizes = [288, 20], strides = [1, 1]} : vector<288x24xbf16> to vector<288x20xbf16>
    %cst_141 = arith.constant dense<0.000000e+00> : vector<80x20xf32>
    %186 = tpu.matmul %184, %185, %cst_141 {dimension_numbers = #tpu.dot_dimension_numbers<[1], [0], [0], [1], [0, 0, 1, 1], [], []>} : vector<80x288xbf16>, vector<288x20xbf16>, vector<80x20xf32> -> vector<80x20xf32>
    %187 = arith.addf %182, %186 : vector<80x20xf32>
    %c0_142 = arith.constant 0 : index
    %c0_143 = arith.constant 0 : index
    %188 = vector.load %arg13[%c0_142, %c0_143] : memref<80x1xf32, #tpu.memory_space<vmem>>, vector<80x1xf32>
    %189 = vector.broadcast %188 : vector<80x1xf32> to vector<80x20xf32>
    %190 = arith.addf %187, %189 : vector<80x20xf32>
    %cst_144 = arith.constant dense<0.000000e+00> : vector<80xf32>
    %191 = vector.multi_reduction <add>, %156, %cst_144 [1] : vector<80x20xf32> to vector<80xf32>
    %192 = vector.shape_cast %191 : vector<80xf32> to vector<80x1xf32>
    %193 = arith.mulf %156, %156 : vector<80x20xf32>
    %cst_145 = arith.constant dense<0.000000e+00> : vector<80xf32>
    %194 = vector.multi_reduction <add>, %193, %cst_145 [1] : vector<80x20xf32> to vector<80xf32>
    %195 = vector.shape_cast %194 : vector<80xf32> to vector<80x1xf32>
    %cst_146 = arith.constant dense<0.000000e+00> : vector<80xf32>
    %196 = vector.multi_reduction <add>, %190, %cst_146 [1] : vector<80x20xf32> to vector<80xf32>
    %197 = vector.shape_cast %196 : vector<80xf32> to vector<80x1xf32>
    %198 = arith.addf %192, %197 : vector<80x1xf32>
    %199 = arith.mulf %190, %190 : vector<80x20xf32>
    %cst_147 = arith.constant dense<0.000000e+00> : vector<80xf32>
    %200 = vector.multi_reduction <add>, %199, %cst_147 [1] : vector<80x20xf32> to vector<80xf32>
    %201 = vector.shape_cast %200 : vector<80xf32> to vector<80x1xf32>
    %202 = arith.addf %195, %201 : vector<80x1xf32>
    %c0_148 = arith.constant 0 : index
    %c0_149 = arith.constant 0 : index
    %203 = vector.load %arg16[%c0_148, %c0_149] : memref<4x80xf32, #tpu.memory_space<vmem>>, vector<4x80xf32>
    %cst_150 = arith.constant dense<0.000000e+00> : vector<4x1xf32>
    %204 = tpu.matmul %203, %198, %cst_150 {dimension_numbers = #tpu.dot_dimension_numbers<[1], [0], [0], [1], [0, 0, 1, 1], [], []>} : vector<4x80xf32>, vector<80x1xf32>, vector<4x1xf32> -> vector<4x1xf32>
    %cst_151 = arith.constant 1.250000e-03 : f32
    %205 = vector.broadcast %cst_151 : f32 to vector<4x1xf32>
    %206 = arith.mulf %204, %205 : vector<4x1xf32>
    %c0_152 = arith.constant 0 : index
    %c0_153 = arith.constant 0 : index
    %207 = vector.load %arg16[%c0_152, %c0_153] : memref<4x80xf32, #tpu.memory_space<vmem>>, vector<4x80xf32>
    %cst_154 = arith.constant dense<0.000000e+00> : vector<4x1xf32>
    %208 = tpu.matmul %207, %202, %cst_154 {dimension_numbers = #tpu.dot_dimension_numbers<[1], [0], [0], [1], [0, 0, 1, 1], [], []>} : vector<4x80xf32>, vector<80x1xf32>, vector<4x1xf32> -> vector<4x1xf32>
    %cst_155 = arith.constant 1.250000e-03 : f32
    %209 = vector.broadcast %cst_155 : f32 to vector<4x1xf32>
    %210 = arith.mulf %208, %209 : vector<4x1xf32>
    %211 = arith.mulf %206, %206 : vector<4x1xf32>
    %212 = arith.subf %210, %211 : vector<4x1xf32>
    %cst_156 = arith.constant 0.000000e+00 : f32
    %213 = vector.broadcast %cst_156 : f32 to vector<4x1xf32>
    %214 = arith.maximumf %212, %213 : vector<4x1xf32>
    %c0_157 = arith.constant 0 : index
    %c0_158 = arith.constant 0 : index
    %215 = vector.load %arg17[%c0_157, %c0_158] : memref<80x4xf32, #tpu.memory_space<vmem>>, vector<80x4xf32>
    %cst_159 = arith.constant dense<0.000000e+00> : vector<80x1xf32>
    %216 = tpu.matmul %215, %206, %cst_159 {dimension_numbers = #tpu.dot_dimension_numbers<[1], [0], [0], [1], [0, 0, 1, 1], [], []>} : vector<80x4xf32>, vector<4x1xf32>, vector<80x1xf32> -> vector<80x1xf32>
    %c0_160 = arith.constant 0 : index
    %c0_161 = arith.constant 0 : index
    %217 = vector.load %arg17[%c0_160, %c0_161] : memref<80x4xf32, #tpu.memory_space<vmem>>, vector<80x4xf32>
    %cst_162 = arith.constant dense<0.000000e+00> : vector<80x1xf32>
    %218 = tpu.matmul %217, %214, %cst_162 {dimension_numbers = #tpu.dot_dimension_numbers<[1], [0], [0], [1], [0, 0, 1, 1], [], []>} : vector<80x4xf32>, vector<4x1xf32>, vector<80x1xf32> -> vector<80x1xf32>
    %c0_163 = arith.constant 0 : index
    %c0_164 = arith.constant 0 : index
    %219 = vector.load %arg14[%c0_163, %c0_164] : memref<80x1xf32, #tpu.memory_space<vmem>>, vector<80x1xf32>
    %cst_165 = arith.constant 9.99999974E-6 : f32
    %220 = vector.broadcast %cst_165 : f32 to vector<80x1xf32>
    %221 = arith.addf %218, %220 : vector<80x1xf32>
    %222 = math.rsqrt %221 : vector<80x1xf32>
    %223 = arith.mulf %219, %222 : vector<80x1xf32>
    %224 = vector.broadcast %216 : vector<80x1xf32> to vector<80x20xf32>
    %225 = arith.subf %156, %224 : vector<80x20xf32>
    %226 = vector.broadcast %223 : vector<80x1xf32> to vector<80x20xf32>
    %227 = arith.mulf %225, %226 : vector<80x20xf32>
    %c0_166 = arith.constant 0 : index
    %c0_167 = arith.constant 0 : index
    %228 = vector.load %arg15[%c0_166, %c0_167] : memref<80x1xf32, #tpu.memory_space<vmem>>, vector<80x1xf32>
    %229 = vector.broadcast %228 : vector<80x1xf32> to vector<80x20xf32>
    %230 = arith.addf %227, %229 : vector<80x20xf32>
    %cst_168 = arith.constant 0.000000e+00 : f32
    %231 = vector.broadcast %cst_168 : f32 to vector<80x20xf32>
    %232 = arith.maximumf %230, %231 : vector<80x20xf32>
    %233 = vector.broadcast %216 : vector<80x1xf32> to vector<80x20xf32>
    %234 = arith.subf %190, %233 : vector<80x20xf32>
    %235 = vector.broadcast %223 : vector<80x1xf32> to vector<80x20xf32>
    %236 = arith.mulf %234, %235 : vector<80x20xf32>
    %c0_169 = arith.constant 0 : index
    %c0_170 = arith.constant 0 : index
    %237 = vector.load %arg15[%c0_169, %c0_170] : memref<80x1xf32, #tpu.memory_space<vmem>>, vector<80x1xf32>
    %238 = vector.broadcast %237 : vector<80x1xf32> to vector<80x20xf32>
    %239 = arith.addf %236, %238 : vector<80x20xf32>
    %cst_171 = arith.constant 0.000000e+00 : f32
    %240 = vector.broadcast %cst_171 : f32 to vector<80x20xf32>
    %241 = arith.maximumf %239, %240 : vector<80x20xf32>
    %c0_172 = arith.constant 0 : index
    %c0_173 = arith.constant 0 : index
    %242 = vector.load %arg18[%c0_172, %c0_173] : memref<160x20xf32, #tpu.memory_space<vmem>>, vector<80x20xf32>
    tpu.vector_store %arg18[%c0_172, %c0_173], %232 {strides = array<i32>} : memref<160x20xf32, #tpu.memory_space<vmem>>, vector<80x20xf32>,
    %c80 = arith.constant 80 : index
    %c0_174 = arith.constant 0 : index
    %243 = vector.load %arg18[%c80, %c0_174] : memref<160x20xf32, #tpu.memory_space<vmem>>, vector<80x20xf32>
    tpu.vector_store %arg18[%c80, %c0_174], %241 {strides = array<i32>} : memref<160x20xf32, #tpu.memory_space<vmem>>, vector<80x20xf32>,
    return
  }
  func.func @transform_0(%arg0: i32) -> (i32, i32, i32) {
    %c0_i32 = arith.constant 0 : i32
    %c0_i32_0 = arith.constant 0 : i32
    %c0_i32_1 = arith.constant 0 : i32
    %c0_i32_2 = arith.constant 0 : i32
    return %c0_i32, %c0_i32_0, %c0_i32_1 : i32, i32, i32
  }
  func.func @transform_1(%arg0: i32) -> (i32, i32) {
    %c0_i32 = arith.constant 0 : i32
    %c0_i32_0 = arith.constant 0 : i32
    %c0_i32_1 = arith.constant 0 : i32
    return %c0_i32, %c0_i32_0 : i32, i32
  }
  func.func @transform_2(%arg0: i32) -> (i32, i32) {
    %c0_i32 = arith.constant 0 : i32
    %c0_i32_0 = arith.constant 0 : i32
    %c0_i32_1 = arith.constant 0 : i32
    return %c0_i32, %c0_i32_0 : i32, i32
  }
  func.func @transform_3(%arg0: i32) -> (i32, i32, i32) {
    %c0_i32 = arith.constant 0 : i32
    %c0_i32_0 = arith.constant 0 : i32
    %c0_i32_1 = arith.constant 0 : i32
    %c0_i32_2 = arith.constant 0 : i32
    return %c0_i32, %c0_i32_0, %c0_i32_1 : i32, i32, i32
  }
  func.func @transform_4(%arg0: i32) -> (i32, i32) {
    %c0_i32 = arith.constant 0 : i32
    %c0_i32_0 = arith.constant 0 : i32
    %c0_i32_1 = arith.constant 0 : i32
    return %c0_i32, %c0_i32_0 : i32, i32
  }
  func.func @transform_5(%arg0: i32) -> (i32, i32) {
    %c0_i32 = arith.constant 0 : i32
    %c0_i32_0 = arith.constant 0 : i32
    %c0_i32_1 = arith.constant 0 : i32
    return %c0_i32, %c0_i32_0 : i32, i32
  }
  func.func @transform_6(%arg0: i32) -> (i32, i32) {
    %c0_i32 = arith.constant 0 : i32
    %c0_i32_0 = arith.constant 0 : i32
    %c0_i32_1 = arith.constant 0 : i32
    return %c0_i32, %c0_i32_0 : i32, i32
  }
  func.func @transform_7(%arg0: i32) -> (i32, i32) {
    %c0_i32 = arith.constant 0 : i32
    %c0_i32_0 = arith.constant 0 : i32
    %c0_i32_1 = arith.constant 0 : i32
    return %c0_i32, %c0_i32_0 : i32, i32
  }
  func.func @transform_8(%arg0: i32) -> (i32, i32) {
    %c0_i32 = arith.constant 0 : i32
    %c0_i32_0 = arith.constant 0 : i32
    %c0_i32_1 = arith.constant 0 : i32
    return %c0_i32, %c0_i32_0 : i32, i32
  }
  func.func @transform_9(%arg0: i32) -> (i32, i32) {
    %c0_i32 = arith.constant 0 : i32
    %c0_i32_0 = arith.constant 0 : i32
    %c0_i32_1 = arith.constant 0 : i32
    return %c0_i32, %c0_i32_0 : i32, i32
  }
  func.func @transform_10(%arg0: i32) -> (i32, i32) {
    %c0_i32 = arith.constant 0 : i32
    %c0_i32_0 = arith.constant 0 : i32
    %c0_i32_1 = arith.constant 0 : i32
    return %c0_i32, %c0_i32_0 : i32, i32
  }
  func.func @transform_11(%arg0: i32) -> (i32, i32, i32) {
    %c0_i32 = arith.constant 0 : i32
    %c0_i32_0 = arith.constant 0 : i32
    %c0_i32_1 = arith.constant 0 : i32
    %c0_i32_2 = arith.constant 0 : i32
    return %c0_i32, %c0_i32_0, %c0_i32_1 : i32, i32, i32
  }
  func.func @transform_12(%arg0: i32) -> (i32, i32) {
    %c0_i32 = arith.constant 0 : i32
    %c0_i32_0 = arith.constant 0 : i32
    %c0_i32_1 = arith.constant 0 : i32
    return %c0_i32, %c0_i32_0 : i32, i32
  }
  func.func @transform_13(%arg0: i32) -> (i32, i32) {
    %c0_i32 = arith.constant 0 : i32
    %c0_i32_0 = arith.constant 0 : i32
    %c0_i32_1 = arith.constant 0 : i32
    return %c0_i32, %c0_i32_0 : i32, i32
  }
  func.func @transform_14(%arg0: i32) -> (i32, i32) {
    %c0_i32 = arith.constant 0 : i32
    %c0_i32_0 = arith.constant 0 : i32
    %c0_i32_1 = arith.constant 0 : i32
    return %c0_i32, %c0_i32_0 : i32, i32
  }
  func.func @transform_15(%arg0: i32) -> (i32, i32) {
    %c0_i32 = arith.constant 0 : i32
    %c0_i32_0 = arith.constant 0 : i32
    %c0_i32_1 = arith.constant 0 : i32
    return %c0_i32, %c0_i32_0 : i32, i32
  }
  func.func @transform_16(%arg0: i32) -> (i32, i32) {
    %c0_i32 = arith.constant 0 : i32
    %c0_i32_0 = arith.constant 0 : i32
    %c0_i32_1 = arith.constant 0 : i32
    return %c0_i32, %c0_i32_0 : i32, i32
  }
  func.func @transform_17(%arg0: i32) -> (i32, i32) {
    %c0_i32 = arith.constant 0 : i32
    %c0_i32_0 = arith.constant 0 : i32
    %c0_i32_1 = arith.constant 0 : i32
    return %c0_i32, %c0_i32_0 : i32, i32
  }
}

</mosaic_0001>

<bundles_post_ra>
// kernel: _lambda_.1
= control target key start
LH: loop header
LB: loop body
LE: loop exit
PB: predicated region body
PF: predicated region fallthrough
CT: control target
= control target key end

     0   :  { %s17026_s0 = inlined_call_operand.vmem [shape: f32[2,48,4], index: 0, kind: input, shape index: {}]   ;;  %s17027_s1 = inlined_call_operand.hbm [shape: f32[192,48], index: 1, kind: input, shape index: {}]   ;;  %s17028_s2 = inlined_call_operand.hbm [shape: f32[4,16], index: 2, kind: input, shape index: {}]   ;;  %s17029_s3 = inlined_call_operand.hbm [shape: bf16[5,144,192], index: 3, kind: input, shape index: {}]   ;;  %s17030_s4 = inlined_call_operand.hbm [shape: f32[144,1], index: 4, kind: input, shape index: {}]   ;;  %s17031_s5 = inlined_call_operand.vmem [shape: f32[144,1], index: 5, kind: input, shape index: {}]   ;;  %s17032_s6 = inlined_call_operand.vmem [shape: f32[144,1], index: 6, kind: input, shape index: {}]   ;;  %s17033_s7 = inlined_call_operand.hbm [shape: f32[12,144], index: 7, kind: input, shape index: {}]   ;;  %s17034_s8 = inlined_call_operand.hbm [shape: f32[144,12], index: 8, kind: input, shape index: {}]   ;;  %s17035_s9 = inlined_call_operand.hbm [shape: f32[288,144], index: 9, kind: input, shape index: {}]   ;;  %s17036_s10 = inlined_call_operand.hbm [shape: f32[12,24], index: 10, kind: input, shape index: {}]   ;;  %s17037_s11 = inlined_call_operand.vmem [shape: bf16[5,80,288], index: 11, kind: input, shape index: {}]   ;;  %s17038_s12 = inlined_call_operand.hbm [shape: f32[80,1], index: 12, kind: input, shape index: {}]   ;;  %s17039_s13 = inlined_call_operand.vmem [shape: f32[80,1], index: 13, kind: input, shape index: {}]   ;;  %s17040_s14 = inlined_call_operand.vmem [shape: f32[80,1], index: 14, kind: input, shape index: {}]   ;;  %s17041_s15 = inlined_call_operand.hbm [shape: f32[4,80], index: 15, kind: input, shape index: {}]   ;;  %s17042_s16 = inlined_call_operand.hbm [shape: f32[80,4], index: 16, kind: input, shape index: {}]   ;;  %s17043_s17 = inlined_call_operand.vmem [shape: f32[160,20], index: 17, kind: output, shape index: {}]  }
   0x1   :  { %17158 = sst [smem:[#allocation61_spill]] %s17026_s0 }
   0x2   :  { %17159 = sst [smem:[#allocation62_spill]] %s17027_s1 }
   0x3   :  { %22 = vsyncpa [#allocation3], 0 }
   0x4   :  { %23 = vsyncpa [#allocation5], 0 }
   0x5   :  { %24 = vsyncpa [#allocation8], 0 }
   0x6   :  { %25 = vsyncpa [#allocation11], 0 }
   0x7   :  { %26 = vsyncpa [#allocation14], 0 }
   0x8   :  { %27 = vsyncpa [#allocation17], 0  ;;  %s12716_s24 = smov [#allocation4]  }
   0x9   :  { %s48_s25 = sshll.u32 %s12716_s24, 4  ;;  %s49_s25 = int_to_ptr.vmem [resolvable:$true] %s48_s25 }
   0xa   :  { %s12492_s26 = scalar_lea.vmem %s49_s25, 64  ;;  %p12497_p1 = scmp.lt.s32.totalorder %s49_s25, %s49_s25 }
   0xb   :  { %p12493_p0 = scmp.ne.s32.totalorder %s49_s25, %s12492_s26  ;;  %p12498_p2 = scmp.lt.s32.totalorder %s12492_s26, %s12492_s26 }
   0xd   :  { %p12499_p3 = por %p12498_p2, %p12497_p1 }
   0xf   :  { %p12500_p4 = pnand %p12499_p3, %p12493_p0 }
  0x11   :  { %12503 = shalt.err (!%p12500_p4)
}
  0x12   :  { %51 = dma.hbm_to_vmem [thread:$0]  %s17028_s2, 64, %s49_s25, [#allocation5]  }
  0x13   :  { %s12717_s29 = smov [#allocation7]   ;;  %s12718_s30 = smov [#allocation10]  }
  0x14   :  { %s69_s0 = sshll.u32 %s12717_s29, 4  ;;  %s97_s18 = sshll.u32 %s12718_s30, 4  ;;  %s70_s0 = int_to_ptr.vmem [resolvable:$true] %s69_s0  ;;  %s98_s18 = int_to_ptr.vmem [resolvable:$true] %s97_s18 }
  0x15   :  { %s12512_s19 = scalar_lea.vmem %s70_s0, 2304  ;;  %p12517_p6 = scmp.lt.s32.totalorder %s70_s0, %s70_s0 }
  0x16   :  { %p12513_p5 = scmp.ne.s32.totalorder %s70_s0, %s12512_s19  ;;  %p12518_p7 = scmp.lt.s32.totalorder %s12512_s19, %s12512_s19 }
  0x18   :  { %p12519_p8 = por %p12518_p7, %p12517_p6 }
  0x1a   :  { %p12520_p9 = pnand %p12519_p8, %p12513_p5 }
  0x1c   :  { %12523 = shalt.err (!%p12520_p9)
}
  0x1d   :  { %s12719_s1 = smov 128   ;;  %s12720_s20 = smov 8  }
  0x1e   :  { %75 = dma.hbm_to_vmem [thread:$0]  %s17030_s4, 2304, %s70_s0, [#allocation8], %s12719_s1, %s12719_s1, %s12720_s20  }
  0x1f   :  { %s12532_s2 = scalar_lea.vmem %s98_s18, 2304  ;;  %p12537_p11 = scmp.lt.s32.totalorder %s98_s18, %s98_s18 }
  0x20   :  { %p12533_p10 = scmp.ne.s32.totalorder %s98_s18, %s12532_s2  ;;  %p12538_p12 = scmp.lt.s32.totalorder %s12532_s2, %s12532_s2 }
  0x22   :  { %p12539_p13 = por %p12538_p12, %p12537_p11 }
  0x24   :  { %p12540_p0 = pnand %p12539_p13, %p12533_p10 }
  0x26   :  { %12543 = shalt.err (!%p12540_p0)
}
  0x27   :  { %103 = dma.hbm_to_vmem [thread:$0]  %s17034_s8, 2304, %s98_s18, [#allocation11], %s12719_s1, %s12719_s1, %s12720_s20  }
  0x28   :  { %s12721_s25 = smov [#allocation13]   ;;  %s12722_s27 = smov [#allocation16]  }
  0x29   :  { %s121_s26 = sshll.u32 %s12721_s25, 4  ;;  %s152_s4 = sshll.u32 %s12722_s27, 4  ;;  %s122_s26 = int_to_ptr.vmem [resolvable:$true] %s121_s26  ;;  %s153_s4 = int_to_ptr.vmem [resolvable:$true] %s152_s4 }
  0x2a   :  { %s12552_s28 = scalar_lea.vmem %s122_s26, 256  ;;  %p12557_p2 = scmp.lt.s32.totalorder %s122_s26, %s122_s26 }
  0x2b   :  { %p12553_p1 = scmp.ne.s32.totalorder %s122_s26, %s12552_s28  ;;  %p12558_p3 = scmp.lt.s32.totalorder %s12552_s28, %s12552_s28 }
  0x2d   :  { %p12559_p4 = por %p12558_p3, %p12557_p2 }
  0x2f   :  { %p12560_p5 = pnand %p12559_p4, %p12553_p1 }
  0x31   :  { %12563 = shalt.err (!%p12560_p5)
}
  0x32   :  { %127 = dma.hbm_to_vmem [thread:$0]  %s17036_s10, 256, %s122_s26, [#allocation14], %s12719_s1, %s12719_s1, %s12720_s20  }
  0x33   :  { %s12572_s8 = scalar_lea.vmem %s153_s4, 64  ;;  %p12577_p7 = scmp.lt.s32.totalorder %s153_s4, %s153_s4 }
  0x34   :  { %p12573_p6 = scmp.ne.s32.totalorder %s153_s4, %s12572_s8  ;;  %p12578_p8 = scmp.lt.s32.totalorder %s12572_s8, %s12572_s8 }
  0x36   :  { %p12579_p9 = por %p12578_p8, %p12577_p7 }
  0x38   :  { %p12580_p10 = pnand %p12579_p9, %p12573_p6 }
  0x3a   :  { %12583 = shalt.err (!%p12580_p10)
}
  0x3b   :  { %155 = dma.hbm_to_vmem [thread:$0]  %s17041_s15, 64, %s153_s4, [#allocation17]  }
  0x3c   :  { %s12723_s19 = smov [#allocation2]   ;;  %s12724_s22 = smov [#allocation6]  }
  0x3d   :  { %s35_s21 = sshll.u32 %s12723_s19, 4  ;;  %s57_s2 = sshll.u32 %s12724_s22, 4  ;;  %s36_s21 = int_to_ptr.vmem [resolvable:$true] %s35_s21  ;;  %s58_s2 = int_to_ptr.vmem [resolvable:$true] %s57_s2 }
  0x3e   :  { %s12592_s23 = scalar_lea.vmem %s36_s21, 3072  ;;  %p12597_p12 = scmp.lt.s32.totalorder %s36_s21, %s36_s21 }
  0x3f   :  { %p12593_p11 = scmp.ne.s32.totalorder %s36_s21, %s12592_s23  ;;  %p12598_p13 = scmp.lt.s32.totalorder %s12592_s23, %s12592_s23 }
  0x41   :  { %p12599_p0 = por %p12598_p13, %p12597_p12 }
  0x43   :  { %p12600_p1 = pnand %p12599_p0, %p12593_p11 }
  0x45   :  { %12603 = shalt.err (!%p12600_p1)
}
  0x46   :  { %s17160_s25 = sld [smem:[#allocation62_spill]]  ;;  %s12612_s15 = scalar_lea.vmem %s58_s2, 11520 }
  0x47   :  { %p12613_p2 = scmp.ne.s32.totalorder %s58_s2, %s12612_s15  ;;  %p12617_p3 = scmp.lt.s32.totalorder %s58_s2, %s58_s2 }
  0x48   :  { %p12618_p4 = scmp.lt.s32.totalorder %s12612_s15, %s12612_s15 }
  0x4a   :  { %p12619_p5 = por %p12618_p4, %p12617_p3 }
  0x4c   :  { %41 = dma.hbm_to_vmem [thread:$0]  %s17160_s25, 3072, %s36_s21, [#allocation3], %s12719_s1, %s12719_s1, %s12720_s20  }
  0x4d   :  { %p12620_p6 = pnand %p12619_p5, %p12613_p2 }
  0x4f   :  { %12623 = shalt.err (!%p12620_p6)
}
  0x50   :  { %63 = dma.hbm_to_vmem [thread:$0]  %s17029_s3, 11520, %s58_s2, [#allocation5], %s12719_s1, %s12719_s1, %s12720_s20  }
  0x51   :  { %s12725_s4 = smov [#allocation9]  }
  0x52   :  { %s85_s28 = sshll.u32 %s12725_s4, 4  ;;  %s86_s28 = int_to_ptr.vmem [resolvable:$true] %s85_s28 }
  0x53   :  { %s12632_s29 = scalar_lea.vmem %s86_s28, 512  ;;  %p12637_p8 = scmp.lt.s32.totalorder %s86_s28, %s86_s28 }
  0x54   :  { %p12633_p7 = scmp.ne.s32.totalorder %s86_s28, %s12632_s29  ;;  %p12638_p9 = scmp.lt.s32.totalorder %s12632_s29, %s12632_s29 }
  0x56   :  { %p12639_p10 = por %p12638_p9, %p12637_p8 }
  0x58   :  { %p12640_p11 = pnand %p12639_p10, %p12633_p7 }
  0x5a   :  { %12643 = shalt.err (!%p12640_p11)
}
  0x5b   :  { %s12726_s0 = smov 256   ;;  %s12727_s8 = smov 16  }
  0x5c   :  { %91 = dma.hbm_to_vmem [thread:$0]  %s17033_s7, 512, %s86_s28, [#allocation8], %s12726_s0, %s12726_s0, %s12727_s8  }
  0x5d   :  { %s12728_s19 = smov [#allocation12]   ;;  %s12729_s22 = smov [#allocation15]  }
  0x5e   :  { %s109_s21 = sshll.u32 %s12728_s19, 4  ;;  %s135_s3 = sshll.u32 %s12729_s22, 4  ;;  %s110_s21 = int_to_ptr.vmem [resolvable:$true] %s109_s21  ;;  %s136_s3 = int_to_ptr.vmem [resolvable:$true] %s135_s3 }
  0x5f   :  { %s12652_s2 = scalar_lea.vmem %s110_s21, 9216  ;;  %p12657_p13 = scmp.lt.s32.totalorder %s110_s21, %s110_s21 }
  0x60   :  { %p12653_p12 = scmp.ne.s32.totalorder %s110_s21, %s12652_s2  ;;  %p12658_p0 = scmp.lt.s32.totalorder %s12652_s2, %s12652_s2 }
  0x62   :  { %p12659_p1 = por %p12658_p0, %p12657_p13 }
  0x64   :  { %p12660_p2 = pnand %p12659_p1, %p12653_p12 }
  0x66   :  { %12663 = shalt.err (!%p12660_p2)
}
  0x67   :  { %115 = dma.hbm_to_vmem [thread:$0]  %s17035_s9, 9216, %s110_s21, [#allocation11], %s12726_s0, %s12726_s0, %s12727_s8  }
  0x68   :  { %s12672_s24 = scalar_lea.vmem %s136_s3, 1280  ;;  %p12677_p4 = scmp.lt.s32.totalorder %s136_s3, %s136_s3 }
  0x69   :  { %p12673_p3 = scmp.ne.s32.totalorder %s136_s3, %s12672_s24  ;;  %p12678_p5 = scmp.lt.s32.totalorder %s12672_s24, %s12672_s24 }
  0x6b   :  { %p12679_p6 = por %p12678_p5, %p12677_p4 }
  0x6d   :  { %p12680_p7 = pnand %p12679_p6, %p12673_p3 }
  0x6f   :  { %12683 = shalt.err (!%p12680_p7)
}
  0x70   :  { %141 = dma.hbm_to_vmem [thread:$0]  %s17038_s12, 1280, %s136_s3, [#allocation14], %s12719_s1, %s12719_s1, %s12720_s20  }
  0x71   :  { %s12730_s15 = smov [#allocation18]  }
  0x72   :  { %s161_s26 = sshll.u32 %s12730_s15, 4  ;;  %s162_s26 = int_to_ptr.vmem [resolvable:$true] %s161_s26 }
  0x73   :  { %s12692_s27 = scalar_lea.vmem %s162_s26, 1280  ;;  %p12697_p9 = scmp.lt.s32.totalorder %s162_s26, %s162_s26 }
  0x74   :  { %p12693_p8 = scmp.ne.s32.totalorder %s162_s26, %s12692_s27  ;;  %p12698_p10 = scmp.lt.s32.totalorder %s12692_s27, %s12692_s27 }
  0x76   :  { %p12699_p11 = por %p12698_p10, %p12697_p9 }
  0x78   :  { %p12700_p12 = pnand %p12699_p11, %p12693_p8 }
  0x7a   :  { %12703 = shalt.err (!%p12700_p12)
}
  0x7b   :  { %167 = dma.hbm_to_vmem [thread:$0]  %s17042_s16, 1280, %s162_s26, [#allocation17], %s12719_s1, %s12719_s1, %s12720_s20  }
  0x7c   :  { %12704 = dma.done.wait [#allocation3], 3072  }
  0x7d   :  { %12705 = vsyncadd [#allocation3], 4294964224 }
  0x7e   :  { %12706 = dma.done.wait [#allocation5], 11584  }
  0x7f   :  { %12707 = vsyncadd [#allocation5], 4294955712 }
  0x80   :  { %12708 = dma.done.wait [#allocation8], 2816  }
  0x81   :  { %12709 = vsyncadd [#allocation8], 4294964480 }
  0x82   :  { %12710 = dma.done.wait [#allocation11], 11520  }
  0x83   :  { %12711 = vsyncadd [#allocation11], 4294955776 }
  0x84   :  { %12712 = dma.done.wait [#allocation14], 1536  }
  0x85   :  { %12713 = vsyncadd [#allocation14], 4294965760 }
  0x86   :  { %12714 = dma.done.wait [#allocation17], 1344  }
  0x87   :  { %12715 = vsyncadd [#allocation17], 4294965952  ;;  %s17161_s29 = sld [smem:[#allocation61_spill]]  ;;  %vm239_vm0 = vcmask 392192   ;;  %v215_v3 = vld [vmem:[#allocation2] sm:$0xff]  ;;  %v216_v7 = vld [vmem:[#allocation2 + $0x8] sm:$0xff] }
  0x88   :  { %11249 = vmatprep.mubr.msk.f32.mxu0 %vm239_vm0, %v215_v3  ;;  %v217_v8 = vld [vmem:[#allocation2 + $0x10] sm:$0xff]  ;;  %v218_v9 = vld [vmem:[#allocation2 + $0x18] sm:$0xff]  ;;  %v219_v10 = vld [vmem:[#allocation2 + $0x20] sm:$0xff]  ;;  %vm571_vm1 = vcmask 1043456   ;;  %vm498_vm2 = vcmask 31744   ;;  %v17045_v55 = vmov 0  }
  0x89   :  { %v220_v11 = vld [vmem:[#allocation2 + $0x28] sm:$0xff]  ;;  %v221_v12 = vld [vmem:[#allocation2 + $0x30] sm:$0xff]  ;;  %v222_v13 = vld [vmem:[#allocation2 + $0x38] sm:$0xff]  ;;  %11930 = vset.pattern.permute.xlu1 %v17045_v55  ;;  %11929 = vset.pattern.permute.xlu0 %v17045_v55  ;;  %vm938_vm3 = vcmask 523264   ;;  %s12732_s3 = smov 125   ;;  %s12733_s2 = smov 127  }
  0x8a   :  { %v223_v14 = vld [vmem:[#allocation2 + $0x40] sm:$0xff]  ;;  %v224_v15 = vld [vmem:[#allocation2 + $0x48] sm:$0xff]  ;;  %v225_v16 = vld [vmem:[#allocation2 + $0x50] sm:$0xff]  ;;  %s12734_s23 = smov 126   ;;  %s12735_s10 = smov 124   ;;  %vm3475_vm4 = vcmask 97280  }
  0x8b   :  { %v226_v17 = vld [vmem:[#allocation2 + $0x58] sm:$0xff]  ;;  %v227_v18 = vld [vmem:[#allocation2 + $0x60] sm:$0xff]  ;;  %v228_v19 = vld [vmem:[#allocation2 + $0x68] sm:$0xff]  ;;  %vm3768_vm5 = vcmask 130048   ;;  %vm12737_vm6 = vmmov 0   ;;  %vm5798_vm7 = vcmask 261120  }
  0x8c   :  { %v229_v20 = vld [vmem:[#allocation2 + $0x70] sm:$0xff]  ;;  %v230_v21 = vld [vmem:[#allocation2 + $0x78] sm:$0xff]  ;;  %v231_v22 = vld [vmem:[#allocation2 + $0x80] sm:$0xff]  ;;  %vm8849_vm8 = vcmask 162816   ;;  %vm9011_vm9 = vcmask 654336  }
  0x8d   :  { %v207_v0 = vld [vmem:[%s17161_s29 + $0x28] sm:$0xff]  ;;  %v206_v1 = vld [vmem:[%s17161_s29 + $0x20] sm:$0xff]  ;;  %v205_v2 = vld [vmem:[%s17161_s29 + $0x18] sm:$0xff] }
  0x8e   :  { %11237 = vmatprep.subr.mxu0 %v207_v0  ;;  %v204_v4 = vld [vmem:[%s17161_s29 + $0x10] sm:$0xff]  ;;  %v203_v5 = vld [vmem:[%s17161_s29 + $0x8] sm:$0xff]  ;;  %v202_v6 = vld [vmem:[%s17161_s29] sm:$0xff] }
  0x8f   :  { %11238 = vmatpush3.msra.mxu0 %v207_v0  ;;  %v232_v23 = vld [vmem:[#allocation2 + $0x88] sm:$0xff]  ;;  %v233_v24 = vld [vmem:[#allocation2 + $0x90] sm:$0xff]  ;;  %v234_v25 = vld [vmem:[#allocation2 + $0x98] sm:$0xff] }
  0x90   :  { %11239 = vmatprep.subr.mxu0 %v206_v1  ;;  %v235_v26 = vld [vmem:[#allocation2 + $0xa0] sm:$0xff]  ;;  %v236_v27 = vld [vmem:[#allocation2 + $0xa8] sm:$0xff]  ;;  %v237_v28 = vld [vmem:[#allocation2 + $0xb0] sm:$0xff] }
  0x91   :  { %11240 = vmatpush3.msra.mxu0 %v206_v1  ;;  %v238_v29 = vld [vmem:[#allocation2 + $0xb8] sm:$0xff]  ;;  %v12924_v30 = vld [vmem:[#allocation4] sm:$0xf]  ;;  %v11933_v56 = vld [vmem:[#allocation6 + $0x4] ss:$8 sps:$4 sm:$0xff]  }
  0x92   :  { %11241 = vmatprep.subr.mxu0 %v205_v2  ;;  %11285 = vmatprep.subr.msk.mxu1 %vm571_vm1, %v12924_v30 }
  0x93   :  { %11242 = vmatpush3.msra.mxu0 %v205_v2  ;;  %11286 = vmatpush3.msk.msra.mxu1 %vm571_vm1, %v12924_v30 }
  0x94   :  { %11243 = vmatprep.subr.mxu0 %v204_v4  ;;  %966 = vmatprep.subr.bf16.mxu1 %v17045_v55 }
  0x95   :  { %11244 = vmatpush3.msra.mxu0 %v204_v4 }
  0x96   :  { %11245 = vmatprep.subr.mxu0 %v203_v5 }
  0x97   :  { %11246 = vmatpush3.msra.mxu0 %v203_v5 }
  0x98   :  { %11247 = vmatprep.subr.mxu0 %v202_v6 }
  0x99   :  { %11248 = vmatpush3.msra.mxu0 %v202_v6 }
  0x9a   :  { %11250 = vmatmul.mubr.msk.f32.vlgmr.msra.gmra.mxu0 %vm239_vm0, %v216_v7  ;;  %1179 = vmatprep.subr.bf16.mxu0 %v17045_v55 }
  0x9b   :  { %11252 = vmatprep.mubr.msk.f32.mxu0 %vm239_vm0, %v217_v8 }
  0x9e   :  { %11253 = vmatmul.mubr.msk.f32.gmra.mxu0 %vm239_vm0, %v218_v9 }
  0x9f   :  { %11255 = vmatprep.mubr.msk.f32.mxu0 %vm239_vm0, %v219_v10 }
  0xa2   :  { %11256 = vmatmul.mubr.msk.f32.gmra.mxu0 %vm239_vm0, %v220_v11 }
  0xa3   :  { %11258 = vmatprep.mubr.msk.f32.mxu0 %vm239_vm0, %v221_v12 }
  0xa6   :  { %11259 = vmatmul.mubr.msk.f32.gmra.mxu0 %vm239_vm0, %v222_v13 }
  0xa7   :  { %11261 = vmatprep.mubr.msk.f32.mxu0 %vm239_vm0, %v223_v14 }
  0xaa   :  { %11262 = vmatmul.mubr.msk.f32.gmra.mxu0 %vm239_vm0, %v224_v15 }
  0xab   :  { %11264 = vmatprep.mubr.msk.f32.mxu0 %vm239_vm0, %v225_v16 }
  0xae   :  { %11265 = vmatmul.mubr.msk.f32.gmra.mxu0 %vm239_vm0, %v226_v17 }
  0xaf   :  { %11267 = vmatprep.mubr.msk.f32.mxu0 %vm239_vm0, %v227_v18 }
  0xb2   :  { %11268 = vmatmul.mubr.msk.f32.gmra.mxu0 %vm239_vm0, %v228_v19 }
  0xb3   :  { %11270 = vmatprep.mubr.msk.f32.mxu0 %vm239_vm0, %v229_v20 }
  0xb6   :  { %11271 = vmatmul.mubr.msk.f32.gmra.mxu0 %vm239_vm0, %v230_v21 }
  0xb7   :  { %11273 = vmatprep.mubr.msk.f32.mxu0 %vm239_vm0, %v231_v22 }
  0xba   :  { %11274 = vmatmul.mubr.msk.f32.gmra.mxu0 %vm239_vm0, %v232_v23 }
  0xbb   :  { %11276 = vmatprep.mubr.msk.f32.mxu0 %vm239_vm0, %v233_v24 }
  0xbe   :  { %11277 = vmatmul.mubr.msk.f32.gmra.mxu0 %vm239_vm0, %v234_v25 }
  0xbf   :  { %11279 = vmatprep.mubr.msk.f32.mxu0 %vm239_vm0, %v235_v26 }
  0xc2   :  { %11280 = vmatmul.mubr.msk.f32.gmra.mxu0 %vm239_vm0, %v236_v27 }
  0xc3   :  { %11282 = vmatprep.mubr.msk.f32.mxu0 %vm239_vm0, %v237_v28 }
  0xc6   :  { %11283 = vmatmul.mubr.msk.f32.gmra.mxu0 %vm239_vm0, %v238_v29  ;;  %v11931_v29 = vld [vmem:[#allocation6] ss:$8 sps:$4 sm:$0xff]  }
  0xc7   :  { %9836 = vmatprep.mubr.msk.bf16.mxu0 %vm938_vm3, %v11933_v56 }
 0x15a   :  { %v11251_v31 = vpop.f32.mrf.mxu0 }
 0x15c   :  { %v378_v32 = vpop.f32.mrf.mxu0 }
 0x15d   :  { %11287 = vmatprep.mubr.msk.f32.mxu1 %vm498_vm2, %v378_v32  ;;  %v11936_v32 = vld [vmem:[#allocation6 + $0x10] ss:$8 sps:$4 sm:$0xff]  }
 0x15e   :  { %v11254_v33 = vpop.f32.mrf.mxu0  ;;  %11288 = vmatmul.mubr.msk.f32.vlgmr.msra.gmra.mxu1 %vm498_vm2, %v11251_v31  ;;  %v11934_v31 = vld [vmem:[#allocation6 + $0x14] ss:$8 sps:$4 sm:$0xff]  }
 0x160   :  { %v388_v34 = vpop.f32.mrf.mxu0 }
 0x161   :  { %11290 = vmatprep.mubr.msk.f32.mxu1 %vm498_vm2, %v388_v34  ;;  %v13066_v34 = vld [vmem:[#allocation6 + $0x94] ss:$8 sps:$4 sm:$0xff]  }
 0x162   :  { %v11257_v35 = vpop.f32.mrf.mxu0  ;;  %11291 = vmatmul.mubr.msk.f32.gmra.mxu1 %vm498_vm2, %v11254_v33  ;;  %v11937_v33 = vld [vmem:[#allocation6 + $0x24] ss:$8 sps:$4 sm:$0xff]  }
 0x164   :  { %v398_v36 = vpop.f32.mrf.mxu0 }
 0x165   :  { %11293 = vmatprep.mubr.msk.f32.mxu1 %vm498_vm2, %v398_v36  ;;  %v11940_v36 = vld [vmem:[#allocation6 + $0x34] ss:$8 sps:$4 sm:$0xff]  }
 0x166   :  { %v11260_v37 = vpop.f32.mrf.mxu0  ;;  %11294 = vmatmul.mubr.msk.f32.gmra.mxu1 %vm498_vm2, %v11257_v35  ;;  %v11939_v35 = vld [vmem:[#allocation6 + $0x20] ss:$8 sps:$4 sm:$0xff]  }
 0x168   :  { %v408_v38 = vpop.f32.mrf.mxu0 }
 0x169   :  { %11296 = vmatprep.mubr.msk.f32.mxu1 %vm498_vm2, %v408_v38  ;;  %v11943_v38 = vld [vmem:[#allocation6 + $0x44] ss:$8 sps:$4 sm:$0xff]  }
 0x16a   :  { %v11263_v39 = vpop.f32.mrf.mxu0  ;;  %11297 = vmatmul.mubr.msk.f32.gmra.mxu1 %vm498_vm2, %v11260_v37  ;;  %v11942_v37 = vld [vmem:[#allocation6 + $0x30] ss:$8 sps:$4 sm:$0xff]  }
 0x16c   :  { %v418_v40 = vpop.f32.mrf.mxu0 }
 0x16d   :  { %11299 = vmatprep.mubr.msk.f32.mxu1 %vm498_vm2, %v418_v40  ;;  %v11946_v40 = vld [vmem:[#allocation6 + $0x54] ss:$8 sps:$4 sm:$0xff]  }
 0x16e   :  { %v11266_v41 = vpop.f32.mrf.mxu0  ;;  %11300 = vmatmul.mubr.msk.f32.gmra.mxu1 %vm498_vm2, %v11263_v39  ;;  %v11945_v39 = vld [vmem:[#allocation6 + $0x40] ss:$8 sps:$4 sm:$0xff]  }
 0x170   :  { %v428_v42 = vpop.f32.mrf.mxu0 }
 0x171   :  { %11302 = vmatprep.mubr.msk.f32.mxu1 %vm498_vm2, %v428_v42  ;;  %v11949_v42 = vld [vmem:[#allocation6 + $0x64] ss:$8 sps:$4 sm:$0xff]  }
 0x172   :  { %v11269_v43 = vpop.f32.mrf.mxu0  ;;  %11303 = vmatmul.mubr.msk.f32.gmra.mxu1 %vm498_vm2, %v11266_v41  ;;  %v11948_v41 = vld [vmem:[#allocation6 + $0x50] ss:$8 sps:$4 sm:$0xff]  }
 0x174   :  { %v438_v44 = vpop.f32.mrf.mxu0 }
 0x175   :  { %11305 = vmatprep.mubr.msk.f32.mxu1 %vm498_vm2, %v438_v44  ;;  %v11952_v44 = vld [vmem:[#allocation6 + $0x74] ss:$8 sps:$4 sm:$0xff]  }
 0x176   :  { %v11272_v45 = vpop.f32.mrf.mxu0  ;;  %11306 = vmatmul.mubr.msk.f32.gmra.mxu1 %vm498_vm2, %v11269_v43  ;;  %v11951_v43 = vld [vmem:[#allocation6 + $0x60] ss:$8 sps:$4 sm:$0xff]  }
 0x178   :  { %v448_v46 = vpop.f32.mrf.mxu0 }
 0x179   :  { %11308 = vmatprep.mubr.msk.f32.mxu1 %vm498_vm2, %v448_v46  ;;  %v11955_v46 = vld [vmem:[#allocation6 + $0x84] ss:$8 sps:$4 sm:$0xff]  }
 0x17a   :  { %v11275_v47 = vpop.f32.mrf.mxu0  ;;  %11309 = vmatmul.mubr.msk.f32.gmra.mxu1 %vm498_vm2, %v11272_v45  ;;  %v11954_v45 = vld [vmem:[#allocation6 + $0x70] ss:$8 sps:$4 sm:$0xff]  }
 0x17c   :  { %v458_v48 = vpop.f32.mrf.mxu0 }
 0x17d   :  { %11311 = vmatprep.mubr.msk.f32.mxu1 %vm498_vm2, %v458_v48  ;;  %v11957_v48 = vld [vmem:[#allocation6 + $0x80] ss:$8 sps:$4 sm:$0xff]  }
 0x17e   :  { %v11278_v49 = vpop.f32.mrf.mxu0  ;;  %11312 = vmatmul.mubr.msk.f32.gmra.mxu1 %vm498_vm2, %v11275_v47 }
 0x180   :  { %v468_v50 = vpop.f32.mrf.mxu0 }
 0x181   :  { %11314 = vmatprep.mubr.msk.f32.mxu1 %vm498_vm2, %v468_v50 }
 0x182   :  { %v11281_v51 = vpop.f32.mrf.mxu0  ;;  %11315 = vmatmul.mubr.msk.f32.gmra.mxu1 %vm498_vm2, %v11278_v49  ;;  %v11960_v49 = vld [vmem:[#allocation6 + $0x1b4] ss:$8 sps:$4 sm:$0xff]  }
 0x184   :  { %v478_v52 = vpop.f32.mrf.mxu0 }
 0x185   :  { %11317 = vmatprep.mubr.msk.f32.mxu1 %vm498_vm2, %v478_v52 }
 0x186   :  { %v11284_v53 = vpop.f32.mrf.mxu0  ;;  %11318 = vmatmul.mubr.msk.f32.gmra.mxu1 %vm498_vm2, %v11281_v51 }
 0x188   :  { %v488_v54 = vpop.f32.mrf.mxu0 }
 0x189   :  { %11320 = vmatprep.mubr.msk.f32.mxu1 %vm498_vm2, %v488_v54 }
 0x18a   :  { %11321 = vmatmul.mubr.msk.f32.gmra.mxu1 %vm498_vm2, %v11284_v53 }
 0x18b   :  { %9809 = vmatprep.mubr.msk.bf16.mxu1 %vm938_vm3, %v13066_v34 }
 0x21e   :  { %v11289_v57 = vpop.f32.mrf.mxu1 }
 0x220   :  { %v641_v58 = vpop.f32.mrf.mxu1 }
 0x221   :  { %v12976_v15 = vpack.c.bf16 %v11289_v57, %v641_v58 }
 0x222   :  { %v11292_v59 = vpop.f32.mrf.mxu1 }
 0x224   :  { %v651_v60 = vpop.f32.mrf.mxu1 }
 0x225   :  { %v12992_v22 = vpack.c.bf16 %v11292_v59, %v651_v60 }
 0x226   :  { %v11295_v61 = vpop.f32.mrf.mxu1 }
 0x228   :  { %v661_v62 = vpop.f32.mrf.mxu1 }
 0x229   :  { %v12967_v11 = vpack.c.bf16 %v11295_v61, %v661_v62 }
 0x22a   :  { %v11298_v63 = vpop.f32.mrf.mxu1 }
 0x22c   :  { %v671_v0 = vpop.f32.mrf.mxu1 }
 0x22d   :  { %v12986_v19 = vpack.c.bf16 %v11298_v63, %v671_v0 }
 0x22e   :  { %v11301_v1 = vpop.f32.mrf.mxu1 }
 0x230   :  { %v681_v2 = vpop.f32.mrf.mxu1 }
 0x231   :  { %v12963_v8 = vpack.c.bf16 %v11301_v1, %v681_v2 }
 0x232   :  { %v11304_v3 = vpop.f32.mrf.mxu1 }
 0x234   :  { %v691_v4 = vpop.f32.mrf.mxu1 }
 0x235   :  { %v12959_v5 = vpack.c.bf16 %v11304_v3, %v691_v4  ;;  %v9741_v3 = vld [vmem:[%s17161_s29 + $0x58] sm:$0xff] }
 0x236   :  { %v11307_v6 = vpop.f32.mrf.mxu1 }
 0x237   :  { %1680 = vrot.lane.b32.xlu1 %v12959_v5, %s12732_s3 }
 0x238   :  { %v701_v7 = vpop.f32.mrf.mxu1 }
 0x239   :  { %v12978_v16 = vpack.c.bf16 %v11307_v6, %v701_v7  ;;  %v11961_v6 = vld [vmem:[#allocation6 + $0x1c4] ss:$8 sps:$4 sm:$0xff]  }
 0x23a   :  { %v11310_v9 = vpop.f32.mrf.mxu1 }
 0x23b   :  { %1678 = vrot.lane.b32.xlu1 %v12963_v8, %s12732_s3 }
 0x23c   :  { %v711_v10 = vpop.f32.mrf.mxu1 }
 0x23d   :  { %v12969_v12 = vpack.c.bf16 %v11310_v9, %v711_v10  ;;  %v9739_v9 = vld [vmem:[%s17161_s29 + $0x48] sm:$0xff] }
 0x23e   :  { %v11313_v13 = vpop.f32.mrf.mxu1 }
 0x23f   :  { %1674 = vrot.lane.b32.xlu1 %v12967_v11, %s12732_s3  ;;  %1684 = vrot.lane.b32.xlu0 %v12969_v12, %s12732_s3 }
 0x240   :  { %1180 = vmatpush1.bf16.msra.mxu0 %v12969_v12  ;;  %v721_v14 = vpop.f32.mrf.mxu1 }
 0x241   :  { %1181 = vmatprep.subr.bf16.mxu0 %v17045_v55  ;;  %v12997_v25 = vpack.c.bf16 %v11313_v13, %v721_v14  ;;  %v11964_v13 = vld [vmem:[#allocation6 + $0x1d4] ss:$8 sps:$4 sm:$0xff]  }
 0x242   :  { %v11316_v17 = vpop.f32.mrf.mxu1 }
 0x243   :  { %1670 = vrot.lane.b32.xlu1 %v12976_v15, %s12732_s3  ;;  %1682 = vrot.lane.b32.xlu0 %v12978_v16, %s12732_s3 }
 0x244   :  { %1182 = vmatpush1.bf16.msra.mxu0 %v12978_v16  ;;  %v731_v18 = vpop.f32.mrf.mxu1 }
 0x245   :  { %1183 = vmatprep.subr.bf16.mxu0 %v17045_v55  ;;  %v13007_v28 = vpack.c.bf16 %v11316_v17, %v731_v18  ;;  %v11966_v18 = vld [vmem:[#allocation6 + $0x1d0] ss:$8 sps:$4 sm:$0xff]  }
 0x246   :  { %v11319_v20 = vpop.f32.mrf.mxu1 }
 0x247   :  { %1676 = vrot.lane.b32.xlu0 %v12986_v19, %s12732_s3 }
 0x248   :  { %1184 = vmatpush1.bf16.msra.mxu0 %v12959_v5  ;;  %v741_v21 = vpop.f32.mrf.mxu1 }
 0x249   :  { %v12994_v23 = vpack.c.bf16 %v11319_v20, %v741_v21  ;;  %1185 = vmatprep.subr.bf16.mxu0 %v17045_v55 }
 0x24a   :  { %v11322_v24 = vpop.f32.mrf.mxu1 }
 0x24b   :  { %1672 = vrot.lane.b32.xlu0 %v12992_v22, %s12732_s3  ;;  %1690 = vrot.lane.b32.xlu1 %v12994_v23, %s12732_s3 }
 0x24c   :  { %1186 = vmatpush1.bf16.msra.mxu0 %v12963_v8  ;;  %v751_v26 = vpop.f32.mrf.mxu1 }
 0x24d   :  { %v13004_v27 = vpack.c.bf16 %v11322_v24, %v751_v26  ;;  %1187 = vmatprep.subr.bf16.mxu0 %v17045_v55  ;;  %v11973_v24 = vld [vmem:[#allocation6 + $0xa4] ss:$8 sps:$4 sm:$0xff]  }
 0x24f   :  { %1686 = vrot.lane.b32.xlu1 %v12997_v25, %s12732_s3  ;;  %1692 = vrot.lane.b32.xlu0 %v13004_v27, %s12732_s3 }
 0x250   :  { %1188 = vmatpush1.bf16.msra.mxu0 %v12986_v19 }
 0x251   :  { %1189 = vmatprep.subr.bf16.mxu0 %v17045_v55 }
 0x253   :  { %914 = vrot.lane.b32.xlu1 %v12978_v16, %s12733_s2  ;;  %1688 = vrot.lane.b32.xlu0 %v13007_v28, %s12732_s3 }
 0x254   :  { %1190 = vmatpush1.bf16.msra.mxu0 %v12967_v11 }
 0x255   :  { %1191 = vmatprep.subr.bf16.mxu0 %v17045_v55 }
 0x257   :  { %910 = vrot.lane.b32.xlu1 %v12963_v8, %s12733_s2  ;;  %916 = vrot.lane.b32.xlu0 %v12969_v12, %s12733_s2 }
 0x258   :  { %1192 = vmatpush1.bf16.msra.mxu0 %v12992_v22 }
 0x259   :  { %1193 = vmatprep.subr.bf16.mxu0 %v17045_v55 }
 0x25b   :  { %906 = vrot.lane.b32.xlu1 %v12967_v11, %s12733_s2  ;;  %912 = vrot.lane.b32.xlu0 %v12959_v5, %s12733_s2 }
 0x25c   :  { %1194 = vmatpush1.bf16.msra.mxu0 %v12976_v15 }
 0x25d   :  { %1203 = vmatprep.subr.bf16.mxu0 %v17045_v55 }
 0x25f   :  { %902 = vrot.lane.b32.xlu1 %v12976_v15, %s12733_s2  ;;  %908 = vrot.lane.b32.xlu0 %v12986_v19, %s12733_s2 }
 0x260   :  { %1204 = vmatpush2.bf16.msra.mxu0 %v13004_v27 }
 0x261   :  { %1205 = vmatprep.subr.bf16.mxu0 %v17045_v55 }
 0x263   :  { %922 = vrot.lane.b32.xlu1 %v12994_v23, %s12733_s2  ;;  %904 = vrot.lane.b32.xlu0 %v12992_v22, %s12733_s2 }
 0x264   :  { %1206 = vmatpush2.bf16.msra.mxu0 %v12994_v23 }
 0x265   :  { %1207 = vmatprep.subr.bf16.mxu0 %v17045_v55 }
 0x267   :  { %918 = vrot.lane.b32.xlu1 %v12997_v25, %s12733_s2  ;;  %924 = vrot.lane.b32.xlu0 %v13004_v27, %s12733_s2 }
 0x268   :  { %1208 = vmatpush2.bf16.msra.mxu0 %v13007_v28 }
 0x269   :  { %1209 = vmatprep.subr.bf16.mxu0 %v17045_v55 }
 0x26b   :  { %1396 = vrot.lane.b32.xlu1 %v12978_v16, %s12734_s23  ;;  %920 = vrot.lane.b32.xlu0 %v13007_v28, %s12733_s2 }
 0x26c   :  { %1210 = vmatpush2.bf16.msra.mxu0 %v12997_v25 }
 0x26d   :  { %1733 = vmatprep.subr.bf16.mxu0 %v17045_v55 }
 0x26f   :  { %1392 = vrot.lane.b32.xlu1 %v12963_v8, %s12734_s23  ;;  %1398 = vrot.lane.b32.xlu0 %v12969_v12, %s12734_s23 }
 0x270   :  { %1212 = vmatmul.mubr.bf16.vlgmr.msra.gmra.mxu0 %v11931_v29  ;;  %v11978_v29 = vld [vmem:[#allocation6 + $0x1f0] ss:$8 sps:$4 sm:$0xff]  }
 0x271   :  { %9837 = vmatprep.mubr.msk.bf16.mxu0 %vm938_vm3, %v11934_v31  ;;  %v11979_v31 = vld [vmem:[#allocation6 + $0xb4] ss:$8 sps:$4 sm:$0xff]  }
 0x273   :  { %1388 = vrot.lane.b32.xlu1 %v12967_v11, %s12734_s23  ;;  %1394 = vrot.lane.b32.xlu0 %v12959_v5, %s12734_s23 }
 0x277   :  { %1384 = vrot.lane.b32.xlu1 %v12976_v15, %s12734_s23  ;;  %1390 = vrot.lane.b32.xlu0 %v12986_v19, %s12734_s23 }
 0x278   :  { %1220 = vmatmul.mubr.bf16.gmra.mxu0 %v11936_v32  ;;  %v11981_v32 = vld [vmem:[#allocation6 + $0x204] ss:$8 sps:$4 sm:$0xff]  }
 0x279   :  { %9838 = vmatprep.mubr.msk.bf16.mxu0 %vm938_vm3, %v11937_v33 }
 0x27b   :  { %1404 = vrot.lane.b32.xlu1 %v12994_v23, %s12734_s23  ;;  %1386 = vrot.lane.b32.xlu0 %v12992_v22, %s12734_s23 }
 0x27f   :  { %1400 = vrot.lane.b32.xlu1 %v12997_v25, %s12734_s23  ;;  %1406 = vrot.lane.b32.xlu0 %v13004_v27, %s12734_s23 }
 0x280   :  { %1228 = vmatmul.mubr.bf16.gmra.mxu0 %v11939_v35 }
 0x281   :  { %9839 = vmatprep.mubr.msk.bf16.mxu0 %vm938_vm3, %v11940_v36  ;;  %v11983_v36 = vld [vmem:[#allocation6 + $0xb0] ss:$8 sps:$4 sm:$0xff]  }
 0x283   :  { %1968 = vrot.lane.b32.xlu1 %v12978_v16, %s12735_s10  ;;  %1402 = vrot.lane.b32.xlu0 %v13007_v28, %s12734_s23  ;;  %v9736_v16 = vld [vmem:[%s17161_s29 + $0x30] sm:$0xff] }
 0x287   :  { %1964 = vrot.lane.b32.xlu1 %v12963_v8, %s12735_s10  ;;  %1970 = vrot.lane.b32.xlu0 %v12969_v12, %s12735_s10  ;;  %v9740_v8 = vld [vmem:[%s17161_s29 + $0x50] sm:$0xff]  ;;  %v9738_v12 = vld [vmem:[%s17161_s29 + $0x40] sm:$0xff] }
 0x288   :  { %1236 = vmatmul.mubr.bf16.gmra.mxu0 %v11942_v37  ;;  %v11984_v37 = vld [vmem:[#allocation6 + $0x200] ss:$8 sps:$4 sm:$0xff]  }
 0x289   :  { %9840 = vmatprep.mubr.msk.bf16.mxu0 %vm938_vm3, %v11943_v38  ;;  %v11985_v38 = vld [vmem:[#allocation6 + $0xc4] ss:$8 sps:$4 sm:$0xff]  }
 0x28b   :  { %1960 = vrot.lane.b32.xlu1 %v12967_v11, %s12735_s10  ;;  %1966 = vrot.lane.b32.xlu0 %v12959_v5, %s12735_s10  ;;  %v11958_v5 = vld [vmem:[#allocation6 + $0x1b0] ss:$8 sps:$4 sm:$0xff]   ;;  %v11963_v11 = vld [vmem:[#allocation6 + $0x1c0] ss:$8 sps:$4 sm:$0xff]  }
 0x28f   :  { %1956 = vrot.lane.b32.xlu1 %v12976_v15, %s12735_s10  ;;  %1962 = vrot.lane.b32.xlu0 %v12986_v19, %s12735_s10  ;;  %v9737_v15 = vld [vmem:[%s17161_s29 + $0x38] sm:$0xff]  ;;  %v11970_v19 = vld [vmem:[#allocation6 + $0x1e4] ss:$8 sps:$4 sm:$0xff]  }
 0x290   :  { %1244 = vmatmul.mubr.bf16.gmra.mxu0 %v11945_v39  ;;  %v11987_v39 = vld [vmem:[#allocation6 + $0x214] ss:$8 sps:$4 sm:$0xff]  }
 0x291   :  { %9841 = vmatprep.mubr.msk.bf16.mxu0 %vm938_vm3, %v11946_v40 }
 0x293   :  { %1976 = vrot.lane.b32.xlu1 %v12994_v23, %s12735_s10  ;;  %1958 = vrot.lane.b32.xlu0 %v12992_v22, %s12735_s10  ;;  %v11967_v22 = vld [vmem:[#allocation6 + $0x90] ss:$8 sps:$4 sm:$0xff]   ;;  %v11972_v23 = vld [vmem:[#allocation6 + $0x1e0] ss:$8 sps:$4 sm:$0xff]  }
 0x297   :  { %1972 = vrot.lane.b32.xlu1 %v12997_v25, %s12735_s10  ;;  %1978 = vrot.lane.b32.xlu0 %v13004_v27, %s12735_s10  ;;  %v11975_v25 = vld [vmem:[#allocation6 + $0x1f4] ss:$8 sps:$4 sm:$0xff]  }
 0x298   :  { %1252 = vmatmul.mubr.bf16.gmra.mxu0 %v11948_v41 }
 0x299   :  { %9842 = vmatprep.mubr.msk.bf16.mxu0 %vm938_vm3, %v11949_v42  ;;  %v11989_v42 = vld [vmem:[#allocation6 + $0xc0] ss:$8 sps:$4 sm:$0xff]  }
 0x29b   :  { %1974 = vrot.lane.b32.xlu0 %v13007_v28, %s12735_s10  ;;  %v11977_v28 = vld [vmem:[#allocation6 + $0xa0] ss:$8 sps:$4 sm:$0xff]  }
 0x2a0   :  { %1260 = vmatmul.mubr.bf16.gmra.mxu0 %v11951_v43  ;;  %v11990_v43 = vld [vmem:[#allocation6 + $0x210] ss:$8 sps:$4 sm:$0xff]  }
 0x2a1   :  { %9843 = vmatprep.mubr.msk.bf16.mxu0 %vm938_vm3, %v11952_v44  ;;  %v11991_v44 = vld [vmem:[#allocation6 + $0xd4] ss:$8 sps:$4 sm:$0xff]  }
 0x2a8   :  { %1268 = vmatmul.mubr.bf16.gmra.mxu0 %v11954_v45  ;;  %v11993_v45 = vld [vmem:[#allocation6 + $0x224] ss:$8 sps:$4 sm:$0xff]  }
 0x2a9   :  { %9844 = vmatprep.mubr.msk.bf16.mxu0 %vm938_vm3, %v11955_v46  ;;  %v1681_v47 = vpop.permute.xlu1 %1680 }
 0x2ad   :  { %v1679_v50 = vpop.permute.xlu1 %1678 }
 0x2b0   :  { %1276 = vmatmul.mubr.bf16.gmra.mxu0 %v11957_v48  ;;  %v11995_v48 = vld [vmem:[#allocation6 + $0xd0] ss:$8 sps:$4 sm:$0xff]  }
 0x2b1   :  { %v1685_v51 = vpop.permute.xlu0 %1684  ;;  %9890 = vmatprep.mubr.msk.bf16.mxu0 %vm938_vm3, %v11960_v49  ;;  %v1675_v53 = vpop.permute.xlu1 %1674  ;;  %v11996_v49 = vld [vmem:[#allocation6 + $0x220] ss:$8 sps:$4 sm:$0xff]  }
 0x2b2   :  { %1734 = vmatpush1.bf16.msra.mxu0 %v1685_v51  ;;  %v11999_v51 = vld [vmem:[#allocation6 + $0x234] ss:$8 sps:$4 sm:$0xff]  }
 0x2b3   :  { %1735 = vmatprep.subr.bf16.mxu0 %v17045_v55 }
 0x2b5   :  { %v1683_v52 = vpop.permute.xlu0 %1682  ;;  %v1671_v56 = vpop.permute.xlu1 %1670 }
 0x2b6   :  { %1736 = vmatpush1.bf16.msra.mxu0 %v1683_v52 }
 0x2b7   :  { %1737 = vmatprep.subr.bf16.mxu0 %v17045_v55 }
 0x2b9   :  { %v1677_v54 = vpop.permute.xlu0 %1676 }
 0x2ba   :  { %1738 = vmatpush1.bf16.msra.mxu0 %v1681_v47 }
 0x2bb   :  { %1739 = vmatprep.subr.bf16.mxu0 %v17045_v55 }
 0x2bd   :  { %v1673_v57 = vpop.permute.xlu0 %1672  ;;  %v1691_v58 = vpop.permute.xlu1 %1690 }
 0x2be   :  { %1740 = vmatpush1.bf16.msra.mxu0 %v1679_v50  ;;  %v11997_v50 = vld [vmem:[#allocation6 + $0xe4] ss:$8 sps:$4 sm:$0xff]  }
 0x2bf   :  { %1741 = vmatprep.subr.bf16.mxu0 %v17045_v55 }
 0x2c1   :  { %v1693_v59 = vpop.permute.xlu0 %1692  ;;  %v1687_v61 = vpop.permute.xlu1 %1686 }
 0x2c2   :  { %1742 = vmatpush1.bf16.msra.mxu0 %v1677_v54  ;;  %v12001_v54 = vld [vmem:[#allocation6 + $0xe0] ss:$8 sps:$4 sm:$0xff]  }
 0x2c3   :  { %1743 = vmatprep.subr.bf16.mxu0 %v17045_v55 }
 0x2c5   :  { %v1689_v60 = vpop.permute.xlu0 %1688  ;;  %v915_v63 = vpop.permute.xlu1 %914 }
 0x2c6   :  { %1744 = vmatpush1.bf16.msra.mxu0 %v1675_v53 }
 0x2c7   :  { %1745 = vmatprep.subr.bf16.mxu0 %v17045_v55 }
 0x2c9   :  { %v917_v62 = vpop.permute.xlu0 %916  ;;  %v911_v1 = vpop.permute.xlu1 %910 }
 0x2ca   :  { %967 = vmatpush1.bf16.msra.mxu1 %v917_v62  ;;  %1746 = vmatpush1.bf16.msra.mxu0 %v1673_v57  ;;  %v12003_v57 = vld [vmem:[#allocation6 + $0xf4] ss:$8 sps:$4 sm:$0xff]   ;;  %v12006_v62 = vld [vmem:[#allocation6 + $0x104] ss:$8 sps:$4 sm:$0xff]  }
 0x2cb   :  { %968 = vmatprep.subr.bf16.mxu1 %v17045_v55  ;;  %1747 = vmatprep.subr.bf16.mxu0 %v17045_v55 }
 0x2cd   :  { %v913_v0 = vpop.permute.xlu0 %912  ;;  %v907_v4 = vpop.permute.xlu1 %906 }
 0x2ce   :  { %969 = vmatpush1.bf16.msra.mxu1 %v915_v63  ;;  %1748 = vmatpush1.bf16.msra.mxu0 %v1671_v56  ;;  %v12002_v56 = vld [vmem:[#allocation6 + $0x230] ss:$8 sps:$4 sm:$0xff]   ;;  %v12223_v63 = vld [vmem:[#allocation2 + $0x8] sm:$0xff] }
 0x2cf   :  { %970 = vmatprep.subr.bf16.mxu1 %v17045_v55  ;;  %1757 = vmatprep.subr.bf16.mxu0 %v17045_v55 }
 0x2d1   :  { %v909_v2 = vpop.permute.xlu0 %908  ;;  %v903_v10 = vpop.permute.xlu1 %902 }
 0x2d2   :  { %971 = vmatpush1.bf16.msra.mxu1 %v913_v0  ;;  %1758 = vmatpush2.bf16.msra.mxu0 %v1693_v59  ;;  %v12222_v59 = vld [vmem:[#allocation2] sm:$0xff]  ;;  %v12224_v0 = vld [vmem:[#allocation2 + $0x10] sm:$0xff] }
 0x2d3   :  { %972 = vmatprep.subr.bf16.mxu1 %v17045_v55  ;;  %1759 = vmatprep.subr.bf16.mxu0 %v17045_v55 }
 0x2d5   :  { %v905_v7 = vpop.permute.xlu0 %904  ;;  %v923_v17 = vpop.permute.xlu1 %922 }
 0x2d6   :  { %973 = vmatpush1.bf16.msra.mxu1 %v911_v1  ;;  %1760 = vmatpush2.bf16.msra.mxu0 %v1691_v58  ;;  %v12225_v1 = vld [vmem:[#allocation2 + $0x18] sm:$0xff] }
 0x2d7   :  { %974 = vmatprep.subr.bf16.mxu1 %v17045_v55  ;;  %1761 = vmatprep.subr.bf16.mxu0 %v17045_v55 }
 0x2d9   :  { %v925_v14 = vpop.permute.xlu0 %924  ;;  %v919_v21 = vpop.permute.xlu1 %918 }
 0x2da   :  { %975 = vmatpush1.bf16.msra.mxu1 %v909_v2  ;;  %1762 = vmatpush2.bf16.msra.mxu0 %v1689_v60  ;;  %v12008_v2 = vld [vmem:[#allocation6 + $0x100] ss:$8 sps:$4 sm:$0xff]  }
 0x2db   :  { %976 = vmatprep.subr.bf16.mxu1 %v17045_v55  ;;  %1763 = vmatprep.subr.bf16.mxu0 %v17045_v55 }
 0x2dd   :  { %v921_v20 = vpop.permute.xlu0 %920  ;;  %v1397_v27 = vpop.permute.xlu1 %1396 }
 0x2de   :  { %977 = vmatpush1.bf16.msra.mxu1 %v907_v4  ;;  %1764 = vmatpush2.bf16.msra.mxu0 %v1687_v61  ;;  %v12005_v61 = vld [vmem:[#allocation6 + $0xf0] ss:$8 sps:$4 sm:$0xff]   ;;  %v12009_v4 = vld [vmem:[#allocation6 + $0x114] ss:$8 sps:$4 sm:$0xff]  }
 0x2df   :  { %978 = vmatprep.subr.bf16.mxu1 %v17045_v55  ;;  %11323 = vmatprep.subr.mxu0 %v9741_v3 }
 0x2e1   :  { %1766 = vmatmul.mubr.bf16.vlgmr.msra.gmra.mxu0 %v11958_v5  ;;  %v1399_v26 = vpop.permute.xlu0 %1398  ;;  %v1393_v35 = vpop.permute.xlu1 %1392 }
 0x2e2   :  { %979 = vmatpush1.bf16.msra.mxu1 %v905_v7  ;;  %9891 = vmatprep.mubr.msk.bf16.mxu0 %vm938_vm3, %v11961_v6  ;;  %v12227_v6 = vld [vmem:[#allocation2 + $0x28] sm:$0xff]  ;;  %v12228_v7 = vld [vmem:[#allocation2 + $0x30] sm:$0xff] }
 0x2e3   :  { %980 = vmatprep.subr.bf16.mxu1 %v17045_v55  ;;  %11324 = vmatpush3.msra.mxu0 %v9741_v3  ;;  %v12226_v3 = vld [vmem:[#allocation2 + $0x20] sm:$0xff] }
 0x2e4   :  { %11325 = vmatprep.subr.mxu0 %v9740_v8 }
 0x2e5   :  { %11326 = vmatpush3.msra.mxu0 %v9740_v8  ;;  %v1395_v33 = vpop.permute.xlu0 %1394  ;;  %v1389_v41 = vpop.permute.xlu1 %1388 }
 0x2e6   :  { %981 = vmatpush1.bf16.msra.mxu1 %v903_v10  ;;  %11327 = vmatprep.subr.mxu0 %v9739_v9  ;;  %v12011_v10 = vld [vmem:[#allocation6 + $0x110] ss:$8 sps:$4 sm:$0xff]  }
 0x2e7   :  { %990 = vmatprep.subr.bf16.mxu1 %v17045_v55  ;;  %11328 = vmatpush3.msra.mxu0 %v9739_v9  ;;  %v12229_v9 = vld [vmem:[#allocation2 + $0x38] sm:$0xff] }
 0x2e8   :  { %11329 = vmatprep.subr.mxu0 %v9738_v12 }
 0x2e9   :  { %1774 = vmatmul.mubr.bf16.gmra.mxu0 %v11963_v11  ;;  %v1391_v40 = vpop.permute.xlu0 %1390  ;;  %v1385_v47 = vpop.permute.xlu1 %1384  ;;  %v12230_v11 = vld [vmem:[#allocation2 + $0x40] sm:$0xff] }
 0x2ea   :  { %991 = vmatpush2.bf16.msra.mxu1 %v925_v14  ;;  %9892 = vmatprep.mubr.msk.bf16.mxu0 %vm938_vm3, %v11964_v13 }
 0x2eb   :  { %992 = vmatprep.subr.bf16.mxu1 %v17045_v55  ;;  %11330 = vmatpush3.msra.mxu0 %v9738_v12  ;;  %v12014_v12 = vld [vmem:[#allocation6 + $0x124] ss:$8 sps:$4 sm:$0xff]  }
 0x2ec   :  { %11331 = vmatprep.subr.mxu0 %v9737_v15 }
 0x2ed   :  { %11332 = vmatpush3.msra.mxu0 %v9737_v15  ;;  %v1387_v46 = vpop.permute.xlu0 %1386  ;;  %v1405_v53 = vpop.permute.xlu1 %1404  ;;  %v12231_v15 = vld [vmem:[#allocation2 + $0x48] sm:$0xff] }
 0x2ee   :  { %993 = vmatpush2.bf16.msra.mxu1 %v923_v17  ;;  %11333 = vmatprep.subr.mxu0 %v9736_v16 }
 0x2ef   :  { %994 = vmatprep.subr.bf16.mxu1 %v17045_v55  ;;  %11334 = vmatpush3.msra.mxu0 %v9736_v16  ;;  %v12232_v16 = vld [vmem:[#allocation2 + $0x50] sm:$0xff] }
 0x2f0   :  { %11371 = vmatprep.subr.msk.mxu0 %vm571_vm1, %v12924_v30 }
 0x2f1   :  { %1782 = vmatmul.mubr.bf16.gmra.mxu0 %v11966_v18  ;;  %v1407_v52 = vpop.permute.xlu0 %1406  ;;  %v1401_v60 = vpop.permute.xlu1 %1400 }
 0x2f2   :  { %995 = vmatpush2.bf16.msra.mxu1 %v921_v20  ;;  %9893 = vmatprep.mubr.msk.bf16.mxu0 %vm938_vm3, %v11970_v19  ;;  %v12233_v19 = vld [vmem:[#allocation2 + $0x58] sm:$0xff]  ;;  %v12012_v20 = vld [vmem:[#allocation6 + $0x120] ss:$8 sps:$4 sm:$0xff]  }
 0x2f3   :  { %996 = vmatprep.subr.bf16.mxu1 %v17045_v55 }
 0x2f5   :  { %v1403_v58 = vpop.permute.xlu0 %1402 }
 0x2f6   :  { %997 = vmatpush2.bf16.msra.mxu1 %v919_v21  ;;  %v12234_v21 = vld [vmem:[#allocation2 + $0x60] sm:$0xff] }
 0x2f7   :  { %1447 = vmatprep.subr.bf16.mxu1 %v17045_v55 }
 0x2f9   :  { %999 = vmatmul.mubr.bf16.vlgmr.msra.gmra.mxu1 %v11967_v22  ;;  %1790 = vmatmul.mubr.bf16.gmra.mxu0 %v11972_v23  ;;  %v12015_v23 = vld [vmem:[#allocation6 + $0x134] ss:$8 sps:$4 sm:$0xff]  }
 0x2fa   :  { %1448 = vmatpush1.bf16.msra.mxu1 %v1399_v26  ;;  %9810 = vmatprep.mubr.msk.bf16.mxu1 %vm938_vm3, %v11973_v24  ;;  %v12235_v26 = vld [vmem:[#allocation2 + $0x68] sm:$0xff] }
 0x2fb   :  { %1449 = vmatprep.subr.bf16.mxu1 %v17045_v55  ;;  %9894 = vmatprep.mubr.msk.bf16.mxu0 %vm938_vm3, %v11975_v25  ;;  %v1971_v25 = vpop.permute.xlu0 %1970 }
 0x2fe   :  { %1450 = vmatpush1.bf16.msra.mxu1 %v1397_v27  ;;  %v12236_v27 = vld [vmem:[#allocation2 + $0x70] sm:$0xff] }
 0x2ff   :  { %1451 = vmatprep.subr.bf16.mxu1 %v17045_v55 }
 0x301   :  { %1007 = vmatmul.mubr.bf16.gmra.mxu1 %v11977_v28  ;;  %1798 = vmatmul.mubr.bf16.gmra.mxu0 %v11978_v29 }
 0x302   :  { %1452 = vmatpush1.bf16.msra.mxu1 %v1395_v33  ;;  %9811 = vmatprep.mubr.msk.bf16.mxu1 %vm938_vm3, %v11979_v31  ;;  %v1969_v31 = vpop.permute.xlu1 %1968  ;;  %v12017_v33 = vld [vmem:[#allocation6 + $0x130] ss:$8 sps:$4 sm:$0xff]  }
 0x303   :  { %1453 = vmatprep.subr.bf16.mxu1 %v17045_v55  ;;  %9895 = vmatprep.mubr.msk.bf16.mxu0 %vm938_vm3, %v11981_v32  ;;  %v12237_v32 = vld [vmem:[#allocation2 + $0x78] sm:$0xff] }
 0x306   :  { %1454 = vmatpush1.bf16.msra.mxu1 %v1393_v35  ;;  %v12238_v35 = vld [vmem:[#allocation2 + $0x80] sm:$0xff] }
 0x307   :  { %1455 = vmatprep.subr.bf16.mxu1 %v17045_v55 }
 0x309   :  { %1015 = vmatmul.mubr.bf16.gmra.mxu1 %v11983_v36  ;;  %1806 = vmatmul.mubr.bf16.gmra.mxu0 %v11984_v37  ;;  %v12018_v37 = vld [vmem:[#allocation6 + $0x144] ss:$8 sps:$4 sm:$0xff]  }
 0x30a   :  { %1456 = vmatpush1.bf16.msra.mxu1 %v1391_v40  ;;  %9812 = vmatprep.mubr.msk.bf16.mxu1 %vm938_vm3, %v11985_v38  ;;  %v12239_v40 = vld [vmem:[#allocation2 + $0x88] sm:$0xff] }
 0x30b   :  { %1457 = vmatprep.subr.bf16.mxu1 %v17045_v55  ;;  %9896 = vmatprep.mubr.msk.bf16.mxu0 %vm938_vm3, %v11987_v39  ;;  %v1967_v39 = vpop.permute.xlu0 %1966 }
 0x30e   :  { %1458 = vmatpush1.bf16.msra.mxu1 %v1389_v41  ;;  %v12240_v41 = vld [vmem:[#allocation2 + $0x90] sm:$0xff] }
 0x30f   :  { %1459 = vmatprep.subr.bf16.mxu1 %v17045_v55 }
 0x311   :  { %1023 = vmatmul.mubr.bf16.gmra.mxu1 %v11989_v42  ;;  %1814 = vmatmul.mubr.bf16.gmra.mxu0 %v11990_v43 }
 0x312   :  { %1460 = vmatpush1.bf16.msra.mxu1 %v1387_v46  ;;  %9813 = vmatprep.mubr.msk.bf16.mxu1 %vm938_vm3, %v11991_v44  ;;  %v1965_v44 = vpop.permute.xlu1 %1964  ;;  %v12020_v46 = vld [vmem:[#allocation6 + $0x140] ss:$8 sps:$4 sm:$0xff]  }
 0x313   :  { %1461 = vmatprep.subr.bf16.mxu1 %v17045_v55  ;;  %9897 = vmatprep.mubr.msk.bf16.mxu0 %vm938_vm3, %v11993_v45  ;;  %v12241_v45 = vld [vmem:[#allocation2 + $0x98] sm:$0xff] }
 0x316   :  { %1462 = vmatpush1.bf16.msra.mxu1 %v1385_v47  ;;  %v12242_v47 = vld [vmem:[#allocation2 + $0xa0] sm:$0xff] }
 0x317   :  { %1471 = vmatprep.subr.bf16.mxu1 %v17045_v55 }
 0x319   :  { %1031 = vmatmul.mubr.bf16.gmra.mxu1 %v11995_v48  ;;  %1822 = vmatmul.mubr.bf16.gmra.mxu0 %v11996_v49  ;;  %v12021_v49 = vld [vmem:[#allocation6 + $0x154] ss:$8 sps:$4 sm:$0xff]  }
 0x31a   :  { %1472 = vmatpush2.bf16.msra.mxu1 %v1407_v52  ;;  %9814 = vmatprep.mubr.msk.bf16.mxu1 %vm938_vm3, %v11997_v50  ;;  %v12243_v52 = vld [vmem:[#allocation2 + $0xa8] sm:$0xff] }
 0x31b   :  { %1473 = vmatprep.subr.bf16.mxu1 %v17045_v55  ;;  %9898 = vmatprep.mubr.msk.bf16.mxu0 %vm938_vm3, %v11999_v51  ;;  %v1963_v51 = vpop.permute.xlu0 %1962 }
 0x31e   :  { %1474 = vmatpush2.bf16.msra.mxu1 %v1405_v53  ;;  %v12244_v53 = vld [vmem:[#allocation2 + $0xb0] sm:$0xff] }
 0x31f   :  { %1475 = vmatprep.subr.bf16.mxu1 %v17045_v55 }
 0x321   :  { %1039 = vmatmul.mubr.bf16.gmra.mxu1 %v12001_v54  ;;  %1830 = vmatmul.mubr.bf16.gmra.mxu0 %v12002_v56 }
 0x322   :  { %1476 = vmatpush2.bf16.msra.mxu1 %v1403_v58  ;;  %9815 = vmatprep.mubr.msk.bf16.mxu1 %vm938_vm3, %v12003_v57  ;;  %v1961_v57 = vpop.permute.xlu1 %1960  ;;  %v12245_v58 = vld [vmem:[#allocation2 + $0xb8] sm:$0xff] }
 0x323   :  { %1477 = vmatprep.subr.bf16.mxu1 %v17045_v55  ;;  %11335 = vmatprep.mubr.msk.f32.mxu0 %vm239_vm0, %v12222_v59  ;;  %v12023_v59 = vld [vmem:[#allocation6 + $0x150] ss:$8 sps:$4 sm:$0xff]  }
 0x326   :  { %1478 = vmatpush2.bf16.msra.mxu1 %v1401_v60  ;;  %v12024_v60 = vld [vmem:[#allocation6 + $0x164] ss:$8 sps:$4 sm:$0xff]  }
 0x327   :  { %2019 = vmatprep.subr.bf16.mxu1 %v17045_v55 }
 0x329   :  { %1047 = vmatmul.mubr.bf16.gmra.mxu1 %v12005_v61  ;;  %11336 = vmatmul.mubr.msk.f32.vlgmr.msra.gmra.mxu0 %vm239_vm0, %v12223_v63  ;;  %v1959_v63 = vpop.permute.xlu0 %1958 }
 0x32a   :  { %11338 = vmatprep.mubr.msk.f32.mxu0 %vm239_vm0, %v12224_v0  ;;  %9816 = vmatprep.mubr.msk.bf16.mxu1 %vm938_vm3, %v12006_v62 }
 0x32b   :  { %11372 = vmatpush3.msk.msra.mxu0 %vm571_vm1, %v12924_v30 }
 0x32c   :  { %2875 = vmatprep.subr.bf16.mxu0 %v17045_v55 }
 0x32d   :  { %11339 = vmatmul.mubr.msk.f32.gmra.mxu0 %vm239_vm0, %v12225_v1 }
 0x32e   :  { %11341 = vmatprep.mubr.msk.f32.mxu0 %vm239_vm0, %v12226_v3  ;;  %v12026_v3 = vld [vmem:[#allocation6 + $0x160] ss:$8 sps:$4 sm:$0xff]  }
 0x330   :  { %v13194_v5 = vpop.f32.mrf.mxu0 }
 0x331   :  { %1055 = vmatmul.mubr.bf16.gmra.mxu1 %v12008_v2  ;;  %11342 = vmatmul.mubr.msk.f32.gmra.mxu0 %vm239_vm0, %v12227_v6  ;;  %v1957_v2 = vpop.permute.xlu1 %1956 }
 0x332   :  { %11344 = vmatprep.mubr.msk.f32.mxu0 %vm239_vm0, %v12228_v7  ;;  %9817 = vmatprep.mubr.msk.bf16.mxu1 %vm938_vm3, %v12009_v4  ;;  %v1215_v30 = vpop.f32.mrf.mxu0  ;;  %v12027_v4 = vld [vmem:[#allocation6 + $0x174] ss:$8 sps:$4 sm:$0xff]  }
 0x333   :  { %v1979_v30 = vpop.permute.xlu0 %1978 }
 0x334   :  { %v13199_v8 = vpop.f32.mrf.mxu0 }
 0x335   :  { %11345 = vmatmul.mubr.msk.f32.gmra.mxu0 %vm239_vm0, %v12229_v9 }
 0x336   :  { %11347 = vmatprep.mubr.msk.f32.mxu0 %vm239_vm0, %v12230_v11  ;;  %v1218_v13 = vpop.f32.mrf.mxu0  ;;  %v1977_v11 = vpop.permute.xlu1 %1976 }
 0x337   :  { %v12030_v13 = vld [vmem:[#allocation6 + $0x184] ss:$8 sps:$4 sm:$0xff]  }
 0x338   :  { %v13203_v14 = vpop.f32.mrf.mxu0 }
 0x339   :  { %1063 = vmatmul.mubr.bf16.gmra.mxu1 %v12011_v10  ;;  %11348 = vmatmul.mubr.msk.f32.gmra.mxu0 %vm239_vm0, %v12231_v15 }
 0x33a   :  { %11350 = vmatprep.mubr.msk.f32.mxu0 %vm239_vm0, %v12232_v16  ;;  %9863 = vmatprep.mubr.msk.bf16.mxu1 %vm938_vm3, %v12014_v12  ;;  %v1223_v17 = vpop.f32.mrf.mxu0  ;;  %v12029_v12 = vld [vmem:[#allocation6 + $0x170] ss:$8 sps:$4 sm:$0xff]  }
 0x33b   :  { %v1975_v17 = vpop.permute.xlu0 %1974 }
 0x33c   :  { %v13208_v18 = vpop.f32.mrf.mxu0 }
 0x33d   :  { %11351 = vmatmul.mubr.msk.f32.gmra.mxu0 %vm239_vm0, %v12233_v19 }
 0x33e   :  { %11353 = vmatprep.mubr.msk.f32.mxu0 %vm239_vm0, %v12234_v21  ;;  %v1226_v22 = vpop.f32.mrf.mxu0  ;;  %v1973_v21 = vpop.permute.xlu1 %1972 }
 0x33f   :  { %v12032_v22 = vld [vmem:[#allocation6 + $0x180] ss:$8 sps:$4 sm:$0xff]  }
 0x340   :  { %v13212_v24 = vpop.f32.mrf.mxu0 }
 0x341   :  { %1480 = vmatmul.mubr.bf16.vlgmr.msra.gmra.mxu1 %v12012_v20  ;;  %11354 = vmatmul.mubr.msk.f32.gmra.mxu0 %vm239_vm0, %v12235_v26 }
 0x342   :  { %2020 = vmatpush1.bf16.msra.mxu1 %v1971_v25  ;;  %11356 = vmatprep.mubr.msk.f32.mxu0 %vm239_vm0, %v12236_v27  ;;  %v1231_v28 = vpop.f32.mrf.mxu0 }
 0x343   :  { %2021 = vmatprep.subr.bf16.mxu1 %v17045_v55  ;;  %9864 = vmatprep.mubr.msk.bf16.mxu1 %vm938_vm3, %v12015_v23  ;;  %v12033_v23 = vld [vmem:[#allocation6 + $0x194] ss:$8 sps:$4 sm:$0xff]  }
 0x344   :  { %v13218_v29 = vpop.f32.mrf.mxu0 }
 0x345   :  { %11357 = vmatmul.mubr.msk.f32.gmra.mxu0 %vm239_vm0, %v12237_v32  ;;  %v12036_v32 = vld [vmem:[#allocation6 + $0x1a4] ss:$8 sps:$4 sm:$0xff]  }
 0x346   :  { %2022 = vmatpush1.bf16.msra.mxu1 %v1969_v31  ;;  %11359 = vmatprep.mubr.msk.f32.mxu0 %vm239_vm0, %v12238_v35  ;;  %v1234_v36 = vpop.f32.mrf.mxu0  ;;  %v12035_v31 = vld [vmem:[#allocation6 + $0x190] ss:$8 sps:$4 sm:$0xff]   ;;  %v12038_v35 = vld [vmem:[#allocation6 + $0x1a0] ss:$8 sps:$4 sm:$0xff]  }
 0x347   :  { %2023 = vmatprep.subr.bf16.mxu1 %v17045_v55  ;;  %v12041_v36 = vld [vmem:[#allocation6 + $0x244] ss:$8 sps:$4 sm:$0xff]  }
 0x348   :  { %v13223_v38 = vpop.f32.mrf.mxu0 }
 0x349   :  { %1488 = vmatmul.mubr.bf16.gmra.mxu1 %v12017_v33  ;;  %11360 = vmatmul.mubr.msk.f32.gmra.mxu0 %vm239_vm0, %v12239_v40  ;;  %v12044_v40 = vld [vmem:[#allocation6 + $0x250] ss:$8 sps:$4 sm:$0xff]  }
 0x34a   :  { %2024 = vmatpush1.bf16.msra.mxu1 %v1967_v39  ;;  %11362 = vmatprep.mubr.msk.f32.mxu0 %vm239_vm0, %v12240_v41  ;;  %v1239_v42 = vpop.f32.mrf.mxu0  ;;  %v12042_v39 = vld [vmem:[#allocation6 + $0x254] ss:$8 sps:$4 sm:$0xff]   ;;  %v12045_v41 = vld [vmem:[#allocation6 + $0x264] ss:$8 sps:$4 sm:$0xff]  }
 0x34b   :  { %2025 = vmatprep.subr.bf16.mxu1 %v17045_v55  ;;  %9865 = vmatprep.mubr.msk.bf16.mxu1 %vm938_vm3, %v12018_v37  ;;  %v12039_v37 = vld [vmem:[#allocation6 + $0x240] ss:$8 sps:$4 sm:$0xff]  }
 0x34c   :  { %v13229_v43 = vpop.f32.mrf.mxu0  ;;  %v12047_v42 = vld [vmem:[#allocation6 + $0x260] ss:$8 sps:$4 sm:$0xff]  }
 0x34d   :  { %11363 = vmatmul.mubr.msk.f32.gmra.mxu0 %vm239_vm0, %v12241_v45  ;;  %v12050_v45 = vld [vmem:[#allocation6 + $0x270] ss:$8 sps:$4 sm:$0xff]  }
 0x34e   :  { %2026 = vmatpush1.bf16.msra.mxu1 %v1965_v44  ;;  %11365 = vmatprep.mubr.msk.f32.mxu0 %vm239_vm0, %v12242_v47  ;;  %v1242_v48 = vpop.f32.mrf.mxu0  ;;  %v12048_v44 = vld [vmem:[#allocation6 + $0x274] ss:$8 sps:$4 sm:$0xff]  }
 0x34f   :  { %2027 = vmatprep.subr.bf16.mxu1 %v17045_v55 }
 0x350   :  { %v13234_v50 = vpop.f32.mrf.mxu0 }
 0x351   :  { %1496 = vmatmul.mubr.bf16.gmra.mxu1 %v12020_v46  ;;  %11366 = vmatmul.mubr.msk.f32.gmra.mxu0 %vm239_vm0, %v12243_v52  ;;  %v12051_v46 = vld [vmem:[#allocation6 + $0x284] ss:$8 sps:$4 sm:$0xff]   ;;  %v12054_v52 = vld [vmem:[#allocation6 + $0x294] ss:$8 sps:$4 sm:$0xff]  }
 0x352   :  { %2028 = vmatpush1.bf16.msra.mxu1 %v1963_v51  ;;  %11368 = vmatprep.mubr.msk.f32.mxu0 %vm239_vm0, %v12244_v53  ;;  %v1247_v54 = vpop.f32.mrf.mxu0  ;;  %v12053_v51 = vld [vmem:[#allocation6 + $0x280] ss:$8 sps:$4 sm:$0xff]  }
 0x353   :  { %2029 = vmatprep.subr.bf16.mxu1 %v17045_v55  ;;  %9866 = vmatprep.mubr.msk.bf16.mxu1 %vm938_vm3, %v12021_v49 }
 0x354   :  { %v13240_v56 = vpop.f32.mrf.mxu0 }
 0x355   :  { %11369 = vmatmul.mubr.msk.f32.gmra.mxu0 %vm239_vm0, %v12245_v58 }
 0x356   :  { %2030 = vmatpush1.bf16.msra.mxu1 %v1961_v57  ;;  %v1250_v61 = vpop.f32.mrf.mxu0 }
 0x357   :  { %2031 = vmatprep.subr.bf16.mxu1 %v17045_v55 }
 0x358   :  { %v13244_v62 = vpop.f32.mrf.mxu0 }
 0x359   :  { %1504 = vmatmul.mubr.bf16.gmra.mxu1 %v12023_v59  ;;  %v12056_v59 = vld [vmem:[#allocation6 + $0x290] ss:$8 sps:$4 sm:$0xff]  }
 0x35a   :  { %2032 = vmatpush1.bf16.msra.mxu1 %v1959_v63  ;;  %9867 = vmatprep.mubr.msk.bf16.mxu1 %vm938_vm3, %v12024_v60  ;;  %v1255_v0 = vpop.f32.mrf.mxu0  ;;  %v12057_v60 = vld [vmem:[#allocation6 + $0x2a4] ss:$8 sps:$4 sm:$0xff]  }
 0x35b   :  { %2033 = vmatprep.subr.bf16.mxu1 %v17045_v55 }
 0x35c   :  { %v13248_v1 = vpop.f32.mrf.mxu0 }
 0x35e   :  { %2034 = vmatpush1.bf16.msra.mxu1 %v1957_v2  ;;  %v1258_v6 = vpop.f32.mrf.mxu0 }
 0x35f   :  { %2043 = vmatprep.subr.bf16.mxu1 %v17045_v55 }
 0x360   :  { %v13251_v7 = vpop.f32.mrf.mxu0 }
 0x361   :  { %1512 = vmatmul.mubr.bf16.gmra.mxu1 %v12026_v3  ;;  %v12059_v3 = vld [vmem:[#allocation6 + $0x2a0] ss:$8 sps:$4 sm:$0xff]  }
 0x362   :  { %2044 = vmatpush2.bf16.msra.mxu1 %v1979_v30  ;;  %9868 = vmatprep.mubr.msk.bf16.mxu1 %vm938_vm3, %v12027_v4  ;;  %v1263_v9 = vpop.f32.mrf.mxu0  ;;  %v12060_v4 = vld [vmem:[#allocation6 + $0x2b4] ss:$8 sps:$4 sm:$0xff]  }
 0x363   :  { %2045 = vmatprep.subr.bf16.mxu1 %v17045_v55 }
 0x364   :  { %v13255_v10 = vpop.f32.mrf.mxu0 }
 0x366   :  { %2046 = vmatpush2.bf16.msra.mxu1 %v1977_v11  ;;  %v1266_v15 = vpop.f32.mrf.mxu0 }
 0x367   :  { %2047 = vmatprep.subr.bf16.mxu1 %v17045_v55 }
 0x368   :  { %v13258_v16 = vpop.f32.mrf.mxu0 }
 0x369   :  { %1520 = vmatmul.mubr.bf16.gmra.mxu1 %v12029_v12 }
 0x36a   :  { %2048 = vmatpush2.bf16.msra.mxu1 %v1975_v17  ;;  %9869 = vmatprep.mubr.msk.bf16.mxu1 %vm938_vm3, %v12030_v13  ;;  %v1271_v19 = vpop.f32.mrf.mxu0  ;;  %v12062_v17 = vld [vmem:[#allocation6 + $0x2b0] ss:$8 sps:$4 sm:$0xff]  }
 0x36b   :  { %2049 = vmatprep.subr.bf16.mxu1 %v17045_v55  ;;  %v12063_v19 = vld [vmem:[#allocation6 + $0x2c4] ss:$8 sps:$4 sm:$0xff]  }
 0x36c   :  { %v13262_v20 = vpop.f32.mrf.mxu0 }
 0x36e   :  { %2050 = vmatpush2.bf16.msra.mxu1 %v1973_v21  ;;  %v1274_v25 = vpop.f32.mrf.mxu0 }
 0x36f   :  { %2770 = vmatprep.subr.bf16.mxu1 %v17045_v55 }
 0x370   :  { %v13265_v26 = vpop.f32.mrf.mxu0 }
 0x371   :  { %1528 = vmatmul.mubr.bf16.gmra.mxu1 %v12032_v22 }
 0x372   :  { %9870 = vmatprep.mubr.msk.bf16.mxu1 %vm938_vm3, %v12033_v23  ;;  %v1279_v27 = vpop.f32.mrf.mxu0 }
 0x374   :  { %v13268_v28 = vpop.f32.mrf.mxu0 }
 0x376   :  { %v1282_v33 = vpop.f32.mrf.mxu0 }
 0x379   :  { %1536 = vmatmul.mubr.bf16.gmra.mxu1 %v12035_v31 }
 0x37a   :  { %9871 = vmatprep.mubr.msk.bf16.mxu1 %vm938_vm3, %v12036_v32 }
 0x381   :  { %1544 = vmatmul.mubr.bf16.gmra.mxu1 %v12038_v35  ;;  %v12065_v35 = vld [vmem:[#allocation6 + $0x2c0] ss:$8 sps:$4 sm:$0xff]  }
 0x382   :  { %9917 = vmatprep.mubr.msk.bf16.mxu1 %vm938_vm3, %v12041_v36 }
 0x389   :  { %2052 = vmatmul.mubr.bf16.vlgmr.msra.gmra.mxu1 %v12039_v37 }
 0x38a   :  { %9918 = vmatprep.mubr.msk.bf16.mxu1 %vm938_vm3, %v12042_v39 }
 0x391   :  { %2060 = vmatmul.mubr.bf16.gmra.mxu1 %v12044_v40 }
 0x392   :  { %9919 = vmatprep.mubr.msk.bf16.mxu1 %vm938_vm3, %v12045_v41 }
 0x399   :  { %2068 = vmatmul.mubr.bf16.gmra.mxu1 %v12047_v42 }
 0x39a   :  { %9920 = vmatprep.mubr.msk.bf16.mxu1 %vm938_vm3, %v12048_v44 }
 0x3a1   :  { %v13275_v47 = vpop.f32.mrf.mxu0  ;;  %2076 = vmatmul.mubr.bf16.gmra.mxu1 %v12050_v45 }
 0x3a2   :  { %9921 = vmatprep.mubr.msk.bf16.mxu1 %vm938_vm3, %v12051_v46 }
 0x3a3   :  { %v1769_v48 = vpop.f32.mrf.mxu0 }
 0x3a5   :  { %v13278_v49 = vpop.f32.mrf.mxu0 }
 0x3a7   :  { %v1772_v53 = vpop.f32.mrf.mxu0 }
 0x3a9   :  { %v13280_v54 = vpop.f32.mrf.mxu0  ;;  %2084 = vmatmul.mubr.bf16.gmra.mxu1 %v12053_v51 }
 0x3aa   :  { %9922 = vmatprep.mubr.msk.bf16.mxu1 %vm938_vm3, %v12054_v52 }
 0x3ab   :  { %v1777_v57 = vpop.f32.mrf.mxu0 }
 0x3ad   :  { %v13283_v58 = vpop.f32.mrf.mxu0 }
 0x3af   :  { %v1780_v61 = vpop.f32.mrf.mxu0 }
 0x3b1   :  { %v13285_v63 = vpop.f32.mrf.mxu0  ;;  %2092 = vmatmul.mubr.bf16.gmra.mxu1 %v12056_v59 }
 0x3b2   :  { %9923 = vmatprep.mubr.msk.bf16.mxu1 %vm938_vm3, %v12057_v60 }
 0x3b3   :  { %v1785_v0 = vpop.f32.mrf.mxu0 }
 0x3b5   :  { %v13288_v2 = vpop.f32.mrf.mxu0 }
 0x3b7   :  { %v1788_v6 = vpop.f32.mrf.mxu0 }
 0x3b9   :  { %v13290_v30 = vpop.f32.mrf.mxu1  ;;  %v13292_v9 = vpop.f32.mrf.mxu0  ;;  %2100 = vmatmul.mubr.bf16.gmra.mxu1 %v12059_v3 }
 0x3ba   :  { %9924 = vmatprep.mubr.msk.bf16.mxu1 %vm938_vm3, %v12060_v4 }
 0x3bb   :  { %v1002_v11 = vpop.f32.mrf.mxu1  ;;  %v1793_v12 = vpop.f32.mrf.mxu0 }
 0x3bd   :  { %v13295_v13 = vpop.f32.mrf.mxu1  ;;  %v13297_v15 = vpop.f32.mrf.mxu0 }
 0x3bf   :  { %v1005_v21 = vpop.f32.mrf.mxu1  ;;  %v1796_v22 = vpop.f32.mrf.mxu0 }
 0x3c1   :  { %v13299_v23 = vpop.f32.mrf.mxu1  ;;  %v13301_v25 = vpop.f32.mrf.mxu0  ;;  %2108 = vmatmul.mubr.bf16.gmra.mxu1 %v12062_v17 }
 0x3c2   :  { %9925 = vmatprep.mubr.msk.bf16.mxu1 %vm938_vm3, %v12063_v19 }
 0x3c3   :  { %v1010_v27 = vpop.f32.mrf.mxu1  ;;  %v1801_v31 = vpop.f32.mrf.mxu0 }
 0x3c5   :  { %v13304_v32 = vpop.f32.mrf.mxu1  ;;  %v13306_v33 = vpop.f32.mrf.mxu0 }
 0x3c7   :  { %v1013_v36 = vpop.f32.mrf.mxu1  ;;  %v1804_v37 = vpop.f32.mrf.mxu0 }
 0x3c9   :  { %v13308_v39 = vpop.f32.mrf.mxu1  ;;  %v13310_v40 = vpop.f32.mrf.mxu0  ;;  %2116 = vmatmul.mubr.bf16.gmra.mxu1 %v12065_v35 }
 0x3ca   :  { %9975 = vmatprep.mubr.msk.bf16.mxu1 %vm938_vm3, %v13066_v34 }
 0x3cb   :  { %v1018_v41 = vpop.f32.mrf.mxu1  ;;  %v1809_v42 = vpop.f32.mrf.mxu0 }
 0x3cd   :  { %v13314_v44 = vpop.f32.mrf.mxu1  ;;  %v13316_v45 = vpop.f32.mrf.mxu0 }
 0x3cf   :  { %v1021_v46 = vpop.f32.mrf.mxu1  ;;  %v1812_v48 = vpop.f32.mrf.mxu0 }
 0x3d1   :  { %v13318_v51 = vpop.f32.mrf.mxu1  ;;  %v13320_v52 = vpop.f32.mrf.mxu0 }
 0x3d3   :  { %v1026_v53 = vpop.f32.mrf.mxu1  ;;  %v1817_v57 = vpop.f32.mrf.mxu0 }
 0x3d5   :  { %v13322_v59 = vpop.f32.mrf.mxu1  ;;  %v13324_v60 = vpop.f32.mrf.mxu0 }
 0x3d7   :  { %v1029_v61 = vpop.f32.mrf.mxu1  ;;  %v1820_v34 = vpop.f32.mrf.mxu0 }
 0x3d9   :  { %v13326_v0 = vpop.f32.mrf.mxu1  ;;  %v13328_v3 = vpop.f32.mrf.mxu0 }
 0x3db   :  { %v1034_v4 = vpop.f32.mrf.mxu1  ;;  %v1825_v6 = vpop.f32.mrf.mxu0 }
 0x3dd   :  { %v13330_v11 = vpop.f32.mrf.mxu1  ;;  %v13332_v12 = vpop.f32.mrf.mxu0 }
 0x3df   :  { %v1037_v17 = vpop.f32.mrf.mxu1  ;;  %v1828_v19 = vpop.f32.mrf.mxu0 }
 0x3e1   :  { %v13334_v21 = vpop.f32.mrf.mxu1  ;;  %v13336_v22 = vpop.f32.mrf.mxu0 }
 0x3e3   :  { %v1042_v27 = vpop.f32.mrf.mxu1  ;;  %v1833_v31 = vpop.f32.mrf.mxu0 }
 0x3e5   :  { %v13338_v35 = vpop.f32.mrf.mxu1  ;;  %v13340_v36 = vpop.f32.mrf.mxu0 }
 0x3e6   :  { %17162 = vst [vmem:[#allocation25_spill] sm:$0xff] %v13340_v36  ;;  %v1217_v36 = vadd.f32 %v13199_v8, %v13295_v13 }
 0x3e7   :  { %v1045_v37 = vpop.f32.mrf.mxu1  ;;  %v1836_v41 = vpop.f32.mrf.mxu0 }
 0x3e9   :  { %v13342_v42 = vpop.f32.mrf.mxu1  ;;  %v11337_v46 = vpop.f32.mrf.mxu0 }
 0x3eb   :  { %v1050_v48 = vpop.f32.mrf.mxu1  ;;  %v2334_v53 = vpop.f32.mrf.mxu0 }
 0x3ec   :  { %11373 = vmatprep.mubr.msk.f32.mxu0 %vm498_vm2, %v2334_v53 }
 0x3ed   :  { %v13345_v57 = vpop.f32.mrf.mxu1  ;;  %v11340_v61 = vpop.f32.mrf.mxu0  ;;  %11374 = vmatmul.mubr.msk.f32.vlgmr.msra.gmra.mxu0 %vm498_vm2, %v11337_v46 }
 0x3ef   :  { %v1053_v34 = vpop.f32.mrf.mxu1  ;;  %v2344_v4 = vpop.f32.mrf.mxu0 }
 0x3f0   :  { %11376 = vmatprep.mubr.msk.f32.mxu0 %vm498_vm2, %v2344_v4 }
 0x3f1   :  { %v13349_v6 = vpop.f32.mrf.mxu1  ;;  %v11343_v17 = vpop.f32.mrf.mxu0  ;;  %11377 = vmatmul.mubr.msk.f32.gmra.mxu0 %vm498_vm2, %v11340_v61 }
 0x3f3   :  { %v1058_v19 = vpop.f32.mrf.mxu1  ;;  %v2354_v27 = vpop.f32.mrf.mxu0 }
 0x3f4   :  { %11379 = vmatprep.mubr.msk.f32.mxu0 %vm498_vm2, %v2354_v27 }
 0x3f5   :  { %v13353_v31 = vpop.f32.mrf.mxu1  ;;  %v11346_v37 = vpop.f32.mrf.mxu0  ;;  %11380 = vmatmul.mubr.msk.f32.gmra.mxu0 %vm498_vm2, %v11343_v17 }
 0x3f7   :  { %v1061_v41 = vpop.f32.mrf.mxu1  ;;  %v2364_v46 = vpop.f32.mrf.mxu0 }
 0x3f8   :  { %11382 = vmatprep.mubr.msk.f32.mxu0 %vm498_vm2, %v2364_v46  ;;  %v1214_v41 = vadd.f32 %v13194_v5, %v13290_v30 }
 0x3f9   :  { %v13357_v48 = vpop.f32.mrf.mxu1  ;;  %v11349_v53 = vpop.f32.mrf.mxu0  ;;  %11383 = vmatmul.mubr.msk.f32.gmra.mxu0 %vm498_vm2, %v11346_v37 }
 0x3fb   :  { %v1066_v34 = vpop.f32.mrf.mxu1  ;;  %v2374_v61 = vpop.f32.mrf.mxu0 }
 0x3fc   :  { %11385 = vmatprep.mubr.msk.f32.mxu0 %vm498_vm2, %v2374_v61 }
 0x3fd   :  { %v13361_v4 = vpop.f32.mrf.mxu1  ;;  %v11352_v19 = vpop.f32.mrf.mxu0  ;;  %11386 = vmatmul.mubr.msk.f32.gmra.mxu0 %vm498_vm2, %v11349_v53 }
 0x3ff   :  { %v1069_v27 = vpop.f32.mrf.mxu1  ;;  %v2384_v17 = vpop.f32.mrf.mxu0 }
 0x400   :  { %11388 = vmatprep.mubr.msk.f32.mxu0 %vm498_vm2, %v2384_v17 }
 0x401   :  { %v1481_v46 = vpop.f32.mrf.mxu1  ;;  %v11355_v55 = vpop.f32.mrf.mxu0  ;;  %11389 = vmatmul.mubr.msk.f32.gmra.mxu0 %vm498_vm2, %v11352_v19  ;;  %v1222_v19 = vadd.f32 %v13203_v14, %v13299_v23 }
 0x402   :  { %v13368_v37 = vadd.f32 %v1481_v46, %v1214_v41 }
 0x403   :  { %v1483_v34 = vpop.f32.mrf.mxu1  ;;  %v2394_v61 = vpop.f32.mrf.mxu0 }
 0x404   :  { %11391 = vmatprep.mubr.msk.f32.mxu0 %vm498_vm2, %v2394_v61 }
 0x405   :  { %v1484_v53 = vpop.f32.mrf.mxu1  ;;  %v11358_v27 = vpop.f32.mrf.mxu0  ;;  %11392 = vmatmul.mubr.msk.f32.gmra.mxu0 %vm498_vm2, %v11355_v55  ;;  %v1225_v55 = vadd.f32 %v13208_v18, %v13304_v32 }
 0x406   :  { %v13374_v5 = vadd.f32 %v1484_v53, %v1217_v36 }
 0x407   :  { %v1486_v30 = vpop.f32.mrf.mxu1  ;;  %v2404_v17 = vpop.f32.mrf.mxu0 }
 0x408   :  { %11394 = vmatprep.mubr.msk.f32.mxu0 %vm498_vm2, %v2404_v17 }
 0x409   :  { %v1489_v41 = vpop.f32.mrf.mxu1  ;;  %v11361_v46 = vpop.f32.mrf.mxu0  ;;  %11395 = vmatmul.mubr.msk.f32.gmra.mxu0 %vm498_vm2, %v11358_v27  ;;  %v1230_v27 = vadd.f32 %v13212_v24, %v13308_v39 }
 0x40a   :  { %v13380_v8 = vadd.f32 %v1489_v41, %v1222_v19  ;;  %v1233_v41 = vadd.f32 %v13218_v29, %v13314_v44  ;;  %v12246_v29 = vld [vmem:[#allocation6 + $0x4] ss:$8 sps:$4 sm:$0xff]  }
 0x40b   :  { %v1491_v13 = vpop.f32.mrf.mxu1  ;;  %v2414_v34 = vpop.f32.mrf.mxu0 }
 0x40c   :  { %11397 = vmatprep.mubr.msk.f32.mxu0 %vm498_vm2, %v2414_v34 }
 0x40d   :  { %v1492_v36 = vpop.f32.mrf.mxu1  ;;  %v11364_v61 = vpop.f32.mrf.mxu0  ;;  %11398 = vmatmul.mubr.msk.f32.gmra.mxu0 %vm498_vm2, %v11361_v46 }
 0x40e   :  { %v13386_v14 = vadd.f32 %v1492_v36, %v1225_v55  ;;  %v1238_v55 = vadd.f32 %v13223_v38, %v13318_v51  ;;  %v1246_v38 = vadd.f32 %v13234_v50, %v13326_v0  ;;  %v1257_v50 = vadd.f32 %v13248_v1, %v13338_v35 }
 0x40f   :  { %v1494_v23 = vpop.f32.mrf.mxu1  ;;  %v2424_v53 = vpop.f32.mrf.mxu0  ;;  %v1270_v1 = vadd.f32 %v13258_v16, %v13349_v6  ;;  %v1281_v16 = vadd.f32 %v13268_v28, %v13361_v4  ;;  %v1840_v28 = vadd.f32 %v13280_v54, %v13380_v8 }
 0x410   :  { %11400 = vmatprep.mubr.msk.f32.mxu0 %vm498_vm2, %v2424_v53  ;;  %v1241_v23 = vadd.f32 %v13229_v43, %v13322_v59  ;;  %v1254_v43 = vadd.f32 %v13244_v62, %v13334_v21  ;;  %v1265_v62 = vadd.f32 %v13255_v10, %v13345_v57  ;;  %v1278_v10 = vadd.f32 %v13265_v26, %v13357_v48 }
 0x411   :  { %v1497_v30 = vpop.f32.mrf.mxu1  ;;  %v11367_v17 = vpop.f32.mrf.mxu0  ;;  %11401 = vmatmul.mubr.msk.f32.gmra.mxu0 %vm498_vm2, %v11364_v61  ;;  %v1839_v26 = vadd.f32 %v13278_v49, %v13374_v5 }
 0x412   :  { %v13392_v18 = vadd.f32 %v1497_v30, %v1230_v27 }
 0x413   :  { %v1499_v32 = vpop.f32.mrf.mxu1  ;;  %v2434_v19 = vpop.f32.mrf.mxu0 }
 0x414   :  { %11403 = vmatprep.mubr.msk.f32.mxu0 %vm498_vm2, %v2434_v19  ;;  %v1249_v19 = vadd.f32 %v13240_v56, %v13330_v11  ;;  %v1262_v56 = vadd.f32 %v13251_v7, %v13342_v42  ;;  %v1273_v7 = vadd.f32 %v13262_v20, %v13353_v31  ;;  %v1838_v20 = vadd.f32 %v13275_v47, %v13368_v37 }
 0x415   :  { %v1500_v46 = vpop.f32.mrf.mxu1  ;;  %v11370_v13 = vpop.f32.mrf.mxu0  ;;  %11404 = vmatmul.mubr.msk.f32.gmra.mxu0 %vm498_vm2, %v11367_v17  ;;  %v1841_v47 = vadd.f32 %v13283_v58, %v13386_v14  ;;  %v1842_v49 = vadd.f32 %v13285_v63, %v13392_v18 }
 0x416   :  { %v13398_v24 = vadd.f32 %v1500_v46, %v1233_v41 }
 0x417   :  { %v1502_v39 = vpop.f32.mrf.mxu1  ;;  %v2444_v34 = vpop.f32.mrf.mxu0 }
 0x418   :  { %11406 = vmatprep.mubr.msk.f32.mxu0 %vm498_vm2, %v2444_v34  ;;  %v1843_v54 = vadd.f32 %v13288_v2, %v13398_v24 }
 0x419   :  { %v1505_v36 = vpop.f32.mrf.mxu1  ;;  %11407 = vmatmul.mubr.msk.f32.gmra.mxu0 %vm498_vm2, %v11370_v13 }
 0x41a   :  { %v13404_v61 = vadd.f32 %v1505_v36, %v1238_v55  ;;  %9984 = vmatprep.mubr.msk.bf16.mxu0 %vm938_vm3, %v12246_v29 }
 0x41b   :  { %v1507_v44 = vpop.f32.mrf.mxu1 }
 0x41c   :  { %v1844_v58 = vadd.f32 %v13292_v9, %v13404_v61 }
 0x41d   :  { %v1508_v53 = vpop.f32.mrf.mxu1 }
 0x41e   :  { %v13409_v27 = vadd.f32 %v1508_v53, %v1241_v23 }
 0x41f   :  { %v1510_v30 = vpop.f32.mrf.mxu1 }
 0x420   :  { %v1845_v63 = vadd.f32 %v13297_v15, %v13409_v27 }
 0x421   :  { %v1513_v51 = vpop.f32.mrf.mxu1 }
 0x422   :  { %v13413_v17 = vadd.f32 %v1513_v51, %v1246_v38 }
 0x423   :  { %v1515_v32 = vpop.f32.mrf.mxu1 }
 0x424   :  { %v1846_v2 = vadd.f32 %v13301_v25, %v13413_v17 }
 0x425   :  { %v1516_v41 = vpop.f32.mrf.mxu1 }
 0x426   :  { %v13417_v46 = vadd.f32 %v1516_v41, %v1249_v19 }
 0x427   :  { %v1518_v13 = vpop.f32.mrf.mxu1 }
 0x428   :  { %v1847_v9 = vadd.f32 %v13306_v33, %v13417_v46 }
 0x429   :  { %v1521_v59 = vpop.f32.mrf.mxu1 }
 0x42a   :  { %v13421_v39 = vadd.f32 %v1521_v59, %v1254_v43 }
 0x42b   :  { %v1523_v34 = vpop.f32.mrf.mxu1 }
 0x42c   :  { %v1848_v15 = vadd.f32 %v13310_v40, %v13421_v39 }
 0x42d   :  { %v1524_v0 = vpop.f32.mrf.mxu1 }
 0x42e   :  { %v13425_v55 = vadd.f32 %v1524_v0, %v1257_v50 }
 0x42f   :  { %v1526_v36 = vpop.f32.mrf.mxu1 }
 0x430   :  { %v1849_v25 = vadd.f32 %v13316_v45, %v13425_v55 }
 0x431   :  { %v1529_v11 = vpop.f32.mrf.mxu1 }
 0x432   :  { %v13429_v29 = vadd.f32 %v1529_v11, %v1262_v56 }
 0x433   :  { %v1531_v44 = vpop.f32.mrf.mxu1 }
 0x434   :  { %v1850_v33 = vadd.f32 %v13320_v52, %v13429_v29 }
 0x435   :  { %v1532_v21 = vpop.f32.mrf.mxu1 }
 0x436   :  { %v13433_v23 = vadd.f32 %v1532_v21, %v1265_v62 }
 0x437   :  { %v1534_v53 = vpop.f32.mrf.mxu1 }
 0x438   :  { %v1851_v40 = vadd.f32 %v13324_v60, %v13433_v23 }
 0x439   :  { %v1537_v35 = vpop.f32.mrf.mxu1 }
 0x43a   :  { %v13437_v30 = vadd.f32 %v1537_v35, %v1270_v1 }
 0x43b   :  { %v1539_v38 = vpop.f32.mrf.mxu1 }
 0x43c   :  { %v1852_v45 = vadd.f32 %v13328_v3, %v13437_v30  ;;  %v17163_v3 = vld [vmem:[#allocation25_spill] sm:$0xff] }
 0x43d   :  { %v1540_v42 = vpop.f32.mrf.mxu1 }
 0x43e   :  { %v13441_v51 = vadd.f32 %v1540_v42, %v1273_v7 }
 0x43f   :  { %v1542_v32 = vpop.f32.mrf.mxu1 }
 0x440   :  { %v1853_v52 = vadd.f32 %v13332_v12, %v13441_v51 }
 0x441   :  { %v1545_v57 = vpop.f32.mrf.mxu1 }
 0x442   :  { %v13445_v19 = vadd.f32 %v1545_v57, %v1278_v10 }
 0x443   :  { %v1547_v41 = vpop.f32.mrf.mxu1 }
 0x444   :  { %v1854_v60 = vadd.f32 %v13336_v22, %v13445_v19 }
 0x445   :  { %v1548_v6 = vpop.f32.mrf.mxu1 }
 0x446   :  { %v13449_v13 = vadd.f32 %v1548_v6, %v1281_v16 }
 0x447   :  { %v1550_v43 = vpop.f32.mrf.mxu1 }
 0x448   :  { %v1855_v30 = vadd.f32 %v17163_v3, %v13449_v13  ;;  %v12252_v3 = vld [vmem:[#allocation6 + $0x34] ss:$8 sps:$4 sm:$0xff]  }
 0x449   :  { %v2053_v31 = vpop.f32.mrf.mxu1 }
 0x44a   :  { %v13453_v59 = vadd.f32 %v2053_v31, %v1838_v20 }
 0x44b   :  { %v2055_v34 = vpop.f32.mrf.mxu1 }
 0x44d   :  { %v2056_v48 = vpop.f32.mrf.mxu1 }
 0x44e   :  { %v13457_v50 = vadd.f32 %v2056_v48, %v1839_v26 }
 0x44f   :  { %v2058_v0 = vpop.f32.mrf.mxu1 }
 0x451   :  { %v2061_v4 = vpop.f32.mrf.mxu1 }
 0x452   :  { %v13461_v36 = vadd.f32 %v2061_v4, %v1840_v28 }
 0x453   :  { %v2063_v56 = vpop.f32.mrf.mxu1 }
 0x455   :  { %v2064_v37 = vpop.f32.mrf.mxu1 }
 0x456   :  { %v13465_v11 = vadd.f32 %v2064_v37, %v1841_v47 }
 0x457   :  { %v2066_v44 = vpop.f32.mrf.mxu1 }
 0x459   :  { %v2069_v5 = vpop.f32.mrf.mxu1 }
 0x45a   :  { %v13469_v62 = vadd.f32 %v2069_v5, %v1842_v49 }
 0x45b   :  { %v2071_v21 = vpop.f32.mrf.mxu1 }
 0x45d   :  { %v2072_v8 = vpop.f32.mrf.mxu1 }
 0x45e   :  { %v13473_v53 = vadd.f32 %v2072_v8, %v1843_v54 }
 0x45f   :  { %v2074_v1 = vpop.f32.mrf.mxu1 }
 0x461   :  { %v2077_v14 = vpop.f32.mrf.mxu1 }
 0x462   :  { %v13477_v35 = vadd.f32 %v2077_v14, %v1844_v58 }
 0x463   :  { %v2079_v38 = vpop.f32.mrf.mxu1 }
 0x465   :  { %v2080_v18 = vpop.f32.mrf.mxu1 }
 0x466   :  { %v13481_v7 = vadd.f32 %v2080_v18, %v1845_v63 }
 0x467   :  { %v2082_v42 = vpop.f32.mrf.mxu1 }
 0x469   :  { %v2085_v24 = vpop.f32.mrf.mxu1 }
 0x46a   :  { %v13485_v32 = vadd.f32 %v2085_v24, %v1846_v2 }
 0x46b   :  { %v2087_v10 = vpop.f32.mrf.mxu1 }
 0x46d   :  { %v2088_v61 = vpop.f32.mrf.mxu1 }
 0x46e   :  { %v13489_v57 = vadd.f32 %v2088_v61, %v1847_v9 }
 0x46f   :  { %v2090_v41 = vpop.f32.mrf.mxu1 }
 0x471   :  { %v2093_v27 = vpop.f32.mrf.mxu1 }
 0x472   :  { %v13493_v16 = vadd.f32 %v2093_v27, %v1848_v15 }
 0x473   :  { %v2095_v6 = vpop.f32.mrf.mxu1 }
 0x474   :  { %v17164_v6 = vmov 0  }
 0x475   :  { %v2096_v17 = vpop.f32.mrf.mxu1 }
 0x476   :  { %v13497_v43 = vadd.f32 %v2096_v17, %v1849_v25 }
 0x477   :  { %v2098_v20 = vpop.f32.mrf.mxu1 }
 0x479   :  { %v2101_v46 = vpop.f32.mrf.mxu1 }
 0x47a   :  { %v13501_v31 = vadd.f32 %v2101_v46, %v1850_v33 }
 0x47b   :  { %v2103_v34 = vpop.f32.mrf.mxu1 }
 0x47d   :  { %v2104_v39 = vpop.f32.mrf.mxu1 }
 0x47e   :  { %v13505_v26 = vadd.f32 %v2104_v39, %v1851_v40 }
 0x47f   :  { %v2106_v48 = vpop.f32.mrf.mxu1 }
 0x481   :  { %v2109_v55 = vpop.f32.mrf.mxu1 }
 0x482   :  { %v13509_v0 = vadd.f32 %v2109_v55, %v1852_v45 }
 0x483   :  { %v2111_v28 = vpop.f32.mrf.mxu1 }
 0x485   :  { %v2112_v29 = vpop.f32.mrf.mxu1 }
 0x486   :  { %v13513_v4 = vadd.f32 %v2112_v29, %v1853_v52  ;;  %v12247_v29 = vld [vmem:[#allocation6] ss:$8 sps:$4 sm:$0xff]  }
 0x487   :  { %v2114_v56 = vpop.f32.mrf.mxu1 }
 0x488   :  { %v12248_v56 = vld [vmem:[#allocation6 + $0x14] ss:$8 sps:$4 sm:$0xff]  }
 0x489   :  { %v2117_v23 = vpop.f32.mrf.mxu1 }
 0x48a   :  { %v13517_v47 = vadd.f32 %v2117_v23, %v1854_v60  ;;  %v12249_v60 = vld [vmem:[#allocation6 + $0x10] ss:$8 sps:$4 sm:$0xff]   ;;  %v12250_v23 = vld [vmem:[#allocation6 + $0x24] ss:$8 sps:$4 sm:$0xff]  }
 0x48b   :  { %v2119_v37 = vpop.f32.mrf.mxu1 }
 0x48c   :  { %v12251_v37 = vld [vmem:[#allocation6 + $0x20] ss:$8 sps:$4 sm:$0xff]  }
 0x48d   :  { %v2120_v44 = vpop.f32.mrf.mxu1 }
 0x48e   :  { %v13521_v49 = vadd.f32 %v2120_v44, %v1855_v30  ;;  %v12253_v30 = vld [vmem:[#allocation6 + $0x30] ss:$8 sps:$4 sm:$0xff]   ;;  %v12254_v44 = vld [vmem:[#allocation6 + $0x44] ss:$8 sps:$4 sm:$0xff]  }
 0x48f   :  { %v2122_v5 = vpop.f32.mrf.mxu1 }
 0x490   :  { %v12255_v5 = vld [vmem:[#allocation6 + $0x40] ss:$8 sps:$4 sm:$0xff]  }
 0x4ad   :  { %v11375_v21 = vpop.f32.mrf.mxu0 }
 0x4af   :  { %v2591_v12 = vpop.f32.mrf.mxu0 }
 0x4b0   :  { %v13546_v20 = vpack.c.bf16 %v11375_v21, %v2591_v12  ;;  %v12256_v21 = vld [vmem:[#allocation6 + $0x54] ss:$8 sps:$4 sm:$0xff]   ;;  %v2156_v12 = vld [vmem:[#allocation7 + $0x70] sm:$0xff] }
 0x4b1   :  { %v11378_v51 = vpop.f32.mrf.mxu0 }
 0x4b3   :  { %v2601_v54 = vpop.f32.mrf.mxu0 }
 0x4b4   :  { %v13556_v40 = vpack.c.bf16 %v11378_v51, %v2601_v54  ;;  %v12257_v51 = vld [vmem:[#allocation6 + $0x50] ss:$8 sps:$4 sm:$0xff]   ;;  %v12258_v54 = vld [vmem:[#allocation6 + $0x64] ss:$8 sps:$4 sm:$0xff]  }
 0x4b5   :  { %v11381_v8 = vpop.f32.mrf.mxu0 }
 0x4b7   :  { %v2611_v1 = vpop.f32.mrf.mxu0 }
 0x4b8   :  { %v13536_v15 = vpack.c.bf16 %v11381_v8, %v2611_v1  ;;  %v2155_v8 = vld [vmem:[#allocation7 + $0x68] sm:$0xff]  ;;  %v2157_v1 = vld [vmem:[#allocation7 + $0x78] sm:$0xff] }
 0x4b9   :  { %v11384_v58 = vpop.f32.mrf.mxu0 }
 0x4bb   :  { %v2621_v14 = vpop.f32.mrf.mxu0 }
 0x4bc   :  { %v13548_v33 = vpack.c.bf16 %v11384_v58, %v2621_v14  ;;  %v2153_v58 = vld [vmem:[#allocation7 + $0x58] sm:$0xff]  ;;  %v2154_v14 = vld [vmem:[#allocation7 + $0x60] sm:$0xff] }
 0x4bd   :  { %v11387_v22 = vpop.f32.mrf.mxu0 }
 0x4bf   :  { %v2631_v19 = vpop.f32.mrf.mxu0 }
 0x4c0   :  { %v13527_v10 = vpack.c.bf16 %v11387_v22, %v2631_v19  ;;  %v12259_v22 = vld [vmem:[#allocation6 + $0x60] ss:$8 sps:$4 sm:$0xff]   ;;  %v12260_v19 = vld [vmem:[#allocation6 + $0x74] ss:$8 sps:$4 sm:$0xff]  }
 0x4c1   :  { %v11390_v38 = vpop.f32.mrf.mxu0 }
 0x4c3   :  { %v2641_v63 = vpop.f32.mrf.mxu0 }
 0x4c4   :  { %v13538_v27 = vpack.c.bf16 %v11390_v38, %v2641_v63  ;;  %v2151_v38 = vld [vmem:[#allocation7 + $0x48] sm:$0xff]  ;;  %v2152_v63 = vld [vmem:[#allocation7 + $0x50] sm:$0xff] }
 0x4c5   :  { %v11393_v18 = vpop.f32.mrf.mxu0 }
 0x4c7   :  { %v2651_v42 = vpop.f32.mrf.mxu0 }
 0x4c8   :  { %v13523_v2 = vpack.c.bf16 %v11393_v18, %v2651_v42  ;;  %v2149_v18 = vld [vmem:[#allocation7 + $0x38] sm:$0xff]  ;;  %v2150_v42 = vld [vmem:[#allocation7 + $0x40] sm:$0xff] }
 0x4c9   :  { %v11396_v13 = vpop.f32.mrf.mxu0 }
 0x4ca   :  { %2746 = vrot.lane.b32.xlu1 %v13523_v2, %s12733_s2 }
 0x4cb   :  { %v2661_v24 = vpop.f32.mrf.mxu0 }
 0x4cc   :  { %v13529_v9 = vpack.c.bf16 %v11396_v13, %v2661_v24  ;;  %v12262_v13 = vld [vmem:[#allocation6 + $0x84] ss:$8 sps:$4 sm:$0xff]   ;;  %v2147_v24 = vld [vmem:[#allocation7 + $0x28] sm:$0xff] }
 0x4cd   :  { %v11399_v61 = vpop.f32.mrf.mxu0 }
 0x4ce   :  { %2742 = vrot.lane.b32.xlu1 %v13527_v10, %s12733_s2  ;;  %2748 = vrot.lane.b32.xlu0 %v13529_v9, %s12733_s2 }
 0x4cf   :  { %2876 = vmatpush1.bf16.msra.mxu0 %v13529_v9  ;;  %v2671_v41 = vpop.f32.mrf.mxu0 }
 0x4d0   :  { %2877 = vmatprep.subr.bf16.mxu0 %v17164_v6  ;;  %v13561_v45 = vpack.c.bf16 %v11399_v61, %v2671_v41  ;;  %v2145_v61 = vld [vmem:[#allocation7 + $0x18] sm:$0xff]  ;;  %v2146_v41 = vld [vmem:[#allocation7 + $0x20] sm:$0xff] }
 0x4d1   :  { %v11402_v25 = vpop.f32.mrf.mxu0 }
 0x4d2   :  { %2738 = vrot.lane.b32.xlu1 %v13536_v15, %s12733_s2  ;;  %2744 = vrot.lane.b32.xlu0 %v13538_v27, %s12733_s2 }
 0x4d3   :  { %2878 = vmatpush1.bf16.msra.mxu0 %v13523_v2  ;;  %v2681_v17 = vpop.f32.mrf.mxu0 }
 0x4d4   :  { %2879 = vmatprep.subr.bf16.mxu0 %v17164_v6  ;;  %v13571_v52 = vpack.c.bf16 %v11402_v25, %v2681_v17  ;;  %v12264_v17 = vld [vmem:[#allocation6 + $0x1b4] ss:$8 sps:$4 sm:$0xff]  }
 0x4d5   :  { %v11405_v46 = vpop.f32.mrf.mxu0 }
 0x4d6   :  { %2734 = vrot.lane.b32.xlu1 %v13546_v20, %s12733_s2  ;;  %2740 = vrot.lane.b32.xlu0 %v13548_v33, %s12733_s2 }
 0x4d7   :  { %2880 = vmatpush1.bf16.msra.mxu0 %v13538_v27  ;;  %v2691_v34 = vpop.f32.mrf.mxu0 }
 0x4d8   :  { %v13558_v39 = vpack.c.bf16 %v11405_v46, %v2691_v34  ;;  %2881 = vmatprep.subr.bf16.mxu0 %v17164_v6 }
 0x4d9   :  { %v11408_v48 = vpop.f32.mrf.mxu0 }
 0x4da   :  { %2736 = vrot.lane.b32.xlu0 %v13556_v40, %s12733_s2  ;;  %2754 = vrot.lane.b32.xlu1 %v13558_v39, %s12733_s2 }
 0x4db   :  { %2882 = vmatpush1.bf16.msra.mxu0 %v13527_v10  ;;  %v2701_v55 = vpop.f32.mrf.mxu0 }
 0x4dc   :  { %v13568_v28 = vpack.c.bf16 %v11408_v48, %v2701_v55  ;;  %2883 = vmatprep.subr.bf16.mxu0 %v17164_v6  ;;  %v2158_v55 = vld [vmem:[#allocation7 + $0x80] sm:$0xff] }
 0x4de   :  { %2750 = vrot.lane.b32.xlu1 %v13561_v45, %s12733_s2  ;;  %2756 = vrot.lane.b32.xlu0 %v13568_v28, %s12733_s2 }
 0x4df   :  { %2884 = vmatpush1.bf16.msra.mxu0 %v13548_v33 }
 0x4e0   :  { %2885 = vmatprep.subr.bf16.mxu0 %v17164_v6 }
 0x4e2   :  { %2992 = vrot.lane.b32.xlu1 %v13523_v2, %s12734_s23  ;;  %2752 = vrot.lane.b32.xlu0 %v13571_v52, %s12733_s2 }
 0x4e3   :  { %2886 = vmatpush1.bf16.msra.mxu0 %v13536_v15 }
 0x4e4   :  { %2887 = vmatprep.subr.bf16.mxu0 %v17164_v6 }
 0x4e6   :  { %2988 = vrot.lane.b32.xlu1 %v13527_v10, %s12734_s23  ;;  %2994 = vrot.lane.b32.xlu0 %v13529_v9, %s12734_s23 }
 0x4e7   :  { %2888 = vmatpush1.bf16.msra.mxu0 %v13556_v40 }
 0x4e8   :  { %2889 = vmatprep.subr.bf16.mxu0 %v17164_v6 }
 0x4ea   :  { %2984 = vrot.lane.b32.xlu1 %v13536_v15, %s12734_s23  ;;  %2990 = vrot.lane.b32.xlu0 %v13538_v27, %s12734_s23 }
 0x4eb   :  { %2890 = vmatpush1.bf16.msra.mxu0 %v13546_v20 }
 0x4ec   :  { %2899 = vmatprep.subr.bf16.mxu0 %v17164_v6 }
 0x4ee   :  { %2980 = vrot.lane.b32.xlu1 %v13546_v20, %s12734_s23  ;;  %2986 = vrot.lane.b32.xlu0 %v13548_v33, %s12734_s23 }
 0x4ef   :  { %2900 = vmatpush2.bf16.msra.mxu0 %v13568_v28 }
 0x4f0   :  { %2901 = vmatprep.subr.bf16.mxu0 %v17164_v6 }
 0x4f2   :  { %3000 = vrot.lane.b32.xlu1 %v13558_v39, %s12734_s23  ;;  %2982 = vrot.lane.b32.xlu0 %v13556_v40, %s12734_s23 }
 0x4f3   :  { %2902 = vmatpush2.bf16.msra.mxu0 %v13558_v39 }
 0x4f4   :  { %2903 = vmatprep.subr.bf16.mxu0 %v17164_v6 }
 0x4f6   :  { %2996 = vrot.lane.b32.xlu1 %v13561_v45, %s12734_s23  ;;  %3002 = vrot.lane.b32.xlu0 %v13568_v28, %s12734_s23 }
 0x4f7   :  { %2904 = vmatpush2.bf16.msra.mxu0 %v13571_v52 }
 0x4f8   :  { %2905 = vmatprep.subr.bf16.mxu0 %v17164_v6 }
 0x4fa   :  { %3312 = vrot.lane.b32.xlu1 %v13529_v9, %s12735_s10  ;;  %2998 = vrot.lane.b32.xlu0 %v13571_v52, %s12734_s23 }
 0x4fb   :  { %2906 = vmatpush2.bf16.msra.mxu0 %v13561_v45 }
 0x4fc   :  { %3175 = vmatprep.subr.bf16.mxu0 %v17164_v6 }
 0x4fe   :  { %3310 = vrot.lane.b32.xlu1 %v13523_v2, %s12735_s10  ;;  %3153 = vrot.lane.b32.xlu0 %v13529_v9, %s12732_s3 }
 0x4ff   :  { %2908 = vmatmul.mubr.bf16.vlgmr.msra.gmra.mxu0 %v12247_v29 }
 0x500   :  { %9985 = vmatprep.mubr.msk.bf16.mxu0 %vm938_vm3, %v12248_v56 }
 0x502   :  { %3308 = vrot.lane.b32.xlu1 %v13538_v27, %s12735_s10  ;;  %3151 = vrot.lane.b32.xlu0 %v13523_v2, %s12732_s3  ;;  %v12261_v2 = vld [vmem:[#allocation6 + $0x70] ss:$8 sps:$4 sm:$0xff]  }
 0x506   :  { %3306 = vrot.lane.b32.xlu1 %v13527_v10, %s12735_s10  ;;  %3149 = vrot.lane.b32.xlu0 %v13538_v27, %s12732_s3 }
 0x507   :  { %2916 = vmatmul.mubr.bf16.gmra.mxu0 %v12249_v60 }
 0x508   :  { %9986 = vmatprep.mubr.msk.bf16.mxu0 %vm938_vm3, %v12250_v23 }
 0x50a   :  { %3304 = vrot.lane.b32.xlu1 %v13548_v33, %s12735_s10  ;;  %3147 = vrot.lane.b32.xlu0 %v13527_v10, %s12732_s3  ;;  %v2148_v10 = vld [vmem:[#allocation7 + $0x30] sm:$0xff] }
 0x50e   :  { %3302 = vrot.lane.b32.xlu1 %v13536_v15, %s12735_s10  ;;  %3145 = vrot.lane.b32.xlu0 %v13548_v33, %s12732_s3  ;;  %v2144_v33 = vld [vmem:[#allocation7 + $0x10] sm:$0xff] }
 0x50f   :  { %2924 = vmatmul.mubr.bf16.gmra.mxu0 %v12251_v37 }
 0x510   :  { %9987 = vmatprep.mubr.msk.bf16.mxu0 %vm938_vm3, %v12252_v3 }
 0x512   :  { %3300 = vrot.lane.b32.xlu1 %v13556_v40, %s12735_s10  ;;  %3143 = vrot.lane.b32.xlu0 %v13536_v15, %s12732_s3  ;;  %v12263_v15 = vld [vmem:[#allocation6 + $0x80] ss:$8 sps:$4 sm:$0xff]  }
 0x516   :  { %3298 = vrot.lane.b32.xlu1 %v13546_v20, %s12735_s10  ;;  %3141 = vrot.lane.b32.xlu0 %v13556_v40, %s12732_s3  ;;  %v2159_v40 = vld [vmem:[#allocation7 + $0x88] sm:$0xff] }
 0x517   :  { %2932 = vmatmul.mubr.bf16.gmra.mxu0 %v12253_v30 }
 0x518   :  { %9988 = vmatprep.mubr.msk.bf16.mxu0 %vm938_vm3, %v12254_v44 }
 0x51a   :  { %3320 = vrot.lane.b32.xlu1 %v13568_v28, %s12735_s10  ;;  %3139 = vrot.lane.b32.xlu0 %v13546_v20, %s12732_s3  ;;  %v2143_v20 = vld [vmem:[#allocation7 + $0x8] sm:$0xff] }
 0x51e   :  { %3318 = vrot.lane.b32.xlu1 %v13558_v39, %s12735_s10  ;;  %3161 = vrot.lane.b32.xlu0 %v13568_v28, %s12732_s3 }
 0x51f   :  { %2940 = vmatmul.mubr.bf16.gmra.mxu0 %v12255_v5 }
 0x520   :  { %9989 = vmatprep.mubr.msk.bf16.mxu0 %vm938_vm3, %v12256_v21 }
 0x522   :  { %3316 = vrot.lane.b32.xlu1 %v13571_v52, %s12735_s10  ;;  %3159 = vrot.lane.b32.xlu0 %v13558_v39, %s12732_s3  ;;  %v2142_v39 = vld [vmem:[#allocation7] sm:$0xff] }
 0x526   :  { %3314 = vrot.lane.b32.xlu1 %v13561_v45, %s12735_s10  ;;  %3157 = vrot.lane.b32.xlu0 %v13571_v52, %s12732_s3 }
 0x527   :  { %2948 = vmatmul.mubr.bf16.gmra.mxu0 %v12257_v51 }
 0x528   :  { %9990 = vmatprep.mubr.msk.bf16.mxu0 %vm938_vm3, %v12258_v54 }
 0x52a   :  { %2232 = vperm.xlu1 %11930, %v2156_v12   ;;  %3155 = vrot.lane.b32.xlu0 %v13561_v45, %s12732_s3 }
 0x52e   :  { %2227 = vperm.xlu1 %11930, %v2155_v8   ;;  %2237 = vperm.xlu0 %11929, %v2157_v1  }
 0x52f   :  { %2956 = vmatmul.mubr.bf16.gmra.mxu0 %v12259_v22  ;;  %v12265_v22 = vld [vmem:[#allocation6 + $0x90] ss:$8 sps:$4 sm:$0xff]  }
 0x530   :  { %9991 = vmatprep.mubr.msk.bf16.mxu0 %vm938_vm3, %v12260_v19 }
 0x532   :  { %2217 = vperm.xlu1 %11930, %v2153_v58   ;;  %2222 = vperm.xlu0 %11929, %v2154_v14  }
 0x536   :  { %2207 = vperm.xlu1 %11930, %v2151_v38   ;;  %2212 = vperm.xlu0 %11929, %v2152_v63   ;;  %v12266_v38 = vld [vmem:[#allocation6 + $0xa4] ss:$8 sps:$4 sm:$0xff]  }
 0x537   :  { %2964 = vmatmul.mubr.bf16.gmra.mxu0 %v12261_v2  ;;  %v12267_v2 = vld [vmem:[#allocation6 + $0xa0] ss:$8 sps:$4 sm:$0xff]  }
 0x538   :  { %9992 = vmatprep.mubr.msk.bf16.mxu0 %vm938_vm3, %v12262_v13 }
 0x53a   :  { %2197 = vperm.xlu1 %11930, %v2149_v18   ;;  %2202 = vperm.xlu0 %11929, %v2150_v42  }
 0x53c   :  { %v2747_v9 = vpop.permute.xlu1 %2746 }
 0x53e   :  { %2187 = vperm.xlu1 %11930, %v2147_v24   ;;  %2192 = vperm.xlu0 %11929, %v2148_v10   ;;  %v12268_v24 = vld [vmem:[#allocation6 + $0xb4] ss:$8 sps:$4 sm:$0xff]  }
 0x53f   :  { %2972 = vmatmul.mubr.bf16.gmra.mxu0 %v12263_v15 }
 0x540   :  { %v2743_v27 = vpop.permute.xlu1 %2742  ;;  %v2749_v25 = vpop.permute.xlu0 %2748  ;;  %10002 = vmatprep.mubr.msk.bf16.mxu0 %vm938_vm3, %v12264_v17 }
 0x541   :  { %2771 = vmatpush1.bf16.msra.mxu1 %v2749_v25 }
 0x542   :  { %2177 = vperm.xlu1 %11930, %v2145_v61   ;;  %2182 = vperm.xlu0 %11929, %v2146_v41   ;;  %v12269_v41 = vld [vmem:[#allocation6 + $0xb0] ss:$8 sps:$4 sm:$0xff]  }
 0x543   :  { %2772 = vmatprep.subr.bf16.mxu1 %v17164_v6 }
 0x544   :  { %v2739_v46 = vpop.permute.xlu1 %2738  ;;  %v2745_v34 = vpop.permute.xlu0 %2744 }
 0x545   :  { %2773 = vmatpush1.bf16.msra.mxu1 %v2747_v9 }
 0x546   :  { %2167 = vperm.xlu1 %11930, %v2143_v20   ;;  %2172 = vperm.xlu0 %11929, %v2144_v33   ;;  %v12271_v20 = vld [vmem:[#allocation6 + $0xc0] ss:$8 sps:$4 sm:$0xff]  }
 0x547   :  { %2774 = vmatprep.subr.bf16.mxu1 %v17164_v6 }
 0x548   :  { %v2735_v48 = vpop.permute.xlu1 %2734  ;;  %v2741_v45 = vpop.permute.xlu0 %2740 }
 0x549   :  { %2775 = vmatpush1.bf16.msra.mxu1 %v2745_v34  ;;  %v12272_v34 = vld [vmem:[#allocation6 + $0xd4] ss:$8 sps:$4 sm:$0xff]  }
 0x54a   :  { %2247 = vperm.xlu1 %11930, %v2159_v40   ;;  %2162 = vperm.xlu0 %11929, %v2142_v39  }
 0x54b   :  { %2776 = vmatprep.subr.bf16.mxu1 %v17164_v6 }
 0x54c   :  { %v2737_v28 = vpop.permute.xlu0 %2736  ;;  %v2755_v52 = vpop.permute.xlu1 %2754 }
 0x54d   :  { %2777 = vmatpush1.bf16.msra.mxu1 %v2743_v27  ;;  %v12270_v27 = vld [vmem:[#allocation6 + $0xc4] ss:$8 sps:$4 sm:$0xff]  }
 0x54e   :  { %2242 = vperm.xlu0 %11929, %v2158_v55   ;;  %2778 = vmatprep.subr.bf16.mxu1 %v17164_v6  ;;  %v12274_v55 = vld [vmem:[#allocation6 + $0xe4] ss:$8 sps:$4 sm:$0xff]  }
 0x550   :  { %v2751_v29 = vpop.permute.xlu1 %2750  ;;  %v2757_v56 = vpop.permute.xlu0 %2756 }
 0x551   :  { %2779 = vmatpush1.bf16.msra.mxu1 %v2741_v45 }
 0x552   :  { %2780 = vmatprep.subr.bf16.mxu1 %v17164_v6 }
 0x554   :  { %v2993_v60 = vpop.permute.xlu1 %2992  ;;  %v2753_v23 = vpop.permute.xlu0 %2752 }
 0x555   :  { %2781 = vmatpush1.bf16.msra.mxu1 %v2739_v46 }
 0x556   :  { %2782 = vmatprep.subr.bf16.mxu1 %v17164_v6 }
 0x558   :  { %v2989_v37 = vpop.permute.xlu1 %2988  ;;  %v2995_v3 = vpop.permute.xlu0 %2994 }
 0x559   :  { %2783 = vmatpush1.bf16.msra.mxu1 %v2737_v28 }
 0x55a   :  { %2784 = vmatprep.subr.bf16.mxu1 %v17164_v6 }
 0x55c   :  { %v13683_v30 = vpop.permute.xlu1 %2984  ;;  %v2991_v44 = vpop.permute.xlu0 %2990 }
 0x55d   :  { %2785 = vmatpush1.bf16.msra.mxu1 %v2735_v48  ;;  %v12273_v48 = vld [vmem:[#allocation6 + $0xd0] ss:$8 sps:$4 sm:$0xff]  }
 0x55e   :  { %2794 = vmatprep.subr.bf16.mxu1 %v17164_v6 }
 0x560   :  { %v13686_v5 = vpop.permute.xlu1 %2980  ;;  %v2987_v21 = vpop.permute.xlu0 %2986 }
 0x561   :  { %2795 = vmatpush2.bf16.msra.mxu1 %v2757_v56 }
 0x562   :  { %2796 = vmatprep.subr.bf16.mxu1 %v17164_v6 }
 0x564   :  { %v13689_v12 = vpop.permute.xlu1 %3000  ;;  %v2983_v51 = vpop.permute.xlu0 %2982 }
 0x565   :  { %2797 = vmatpush2.bf16.msra.mxu1 %v2755_v52 }
 0x566   :  { %2798 = vmatprep.subr.bf16.mxu1 %v17164_v6 }
 0x568   :  { %v13692_v54 = vpop.permute.xlu1 %2996  ;;  %v13694_v8 = vpop.permute.xlu0 %3002 }
 0x569   :  { %2799 = vmatpush2.bf16.msra.mxu1 %v2753_v23  ;;  %v12276_v23 = vld [vmem:[#allocation6 + $0xf4] ss:$8 sps:$4 sm:$0xff]  }
 0x56a   :  { %2800 = vmatprep.subr.bf16.mxu1 %v17164_v6 }
 0x56c   :  { %v13697_v1 = vpop.permute.xlu1 %3312  ;;  %v13699_v58 = vpop.permute.xlu0 %2998 }
 0x56d   :  { %2801 = vmatpush2.bf16.msra.mxu1 %v2751_v29  ;;  %v12275_v29 = vld [vmem:[#allocation6 + $0xe0] ss:$8 sps:$4 sm:$0xff]  }
 0x56e   :  { %3016 = vmatprep.subr.bf16.mxu1 %v17164_v6 }
 0x570   :  { %v13702_v14 = vpop.permute.xlu1 %3310  ;;  %2803 = vmatmul.mubr.bf16.vlgmr.msra.gmra.mxu1 %v12265_v22  ;;  %v3154_v19 = vpop.permute.xlu0 %3153 }
 0x571   :  { %3017 = vmatpush1.bf16.msra.mxu1 %v2995_v3  ;;  %3176 = vmatpush1.bf16.msra.mxu0 %v3154_v19  ;;  %v12277_v3 = vld [vmem:[#allocation6 + $0xf0] ss:$8 sps:$4 sm:$0xff]  }
 0x572   :  { %3018 = vmatprep.subr.bf16.mxu1 %v17164_v6  ;;  %3177 = vmatprep.subr.bf16.mxu0 %v17164_v6 }
 0x573   :  { %9976 = vmatprep.mubr.msk.bf16.mxu1 %vm938_vm3, %v12266_v38  ;;  %v12283_v38 = vld [vmem:[#allocation6 + $0x114] ss:$8 sps:$4 sm:$0xff]  }
 0x574   :  { %v13707_v63 = vpop.permute.xlu1 %3308  ;;  %v3152_v18 = vpop.permute.xlu0 %3151 }
 0x575   :  { %3019 = vmatpush1.bf16.msra.mxu1 %v2993_v60  ;;  %3178 = vmatpush1.bf16.msra.mxu0 %v3152_v18 }
 0x576   :  { %3020 = vmatprep.subr.bf16.mxu1 %v17164_v6  ;;  %3179 = vmatprep.subr.bf16.mxu0 %v17164_v6 }
 0x578   :  { %v13711_v42 = vpop.permute.xlu1 %3306  ;;  %2811 = vmatmul.mubr.bf16.gmra.mxu1 %v12267_v2  ;;  %v3150_v13 = vpop.permute.xlu0 %3149  ;;  %v12284_v2 = vld [vmem:[#allocation6 + $0x1d4] ss:$8 sps:$4 sm:$0xff]  }
 0x579   :  { %3021 = vmatpush1.bf16.msra.mxu1 %v2991_v44  ;;  %3180 = vmatpush1.bf16.msra.mxu0 %v3150_v13 }
 0x57a   :  { %3022 = vmatprep.subr.bf16.mxu1 %v17164_v6  ;;  %3181 = vmatprep.subr.bf16.mxu0 %v17164_v6 }
 0x57b   :  { %9977 = vmatprep.mubr.msk.bf16.mxu1 %vm938_vm3, %v12268_v24 }
 0x57c   :  { %v13716_v10 = vpop.permute.xlu1 %3304  ;;  %v3148_v9 = vpop.permute.xlu0 %3147 }
 0x57d   :  { %3023 = vmatpush1.bf16.msra.mxu1 %v2989_v37  ;;  %3182 = vmatpush1.bf16.msra.mxu0 %v3148_v9 }
 0x57e   :  { %3024 = vmatprep.subr.bf16.mxu1 %v17164_v6  ;;  %3183 = vmatprep.subr.bf16.mxu0 %v17164_v6 }
 0x580   :  { %v13720_v61 = vpop.permute.xlu1 %3302  ;;  %2819 = vmatmul.mubr.bf16.gmra.mxu1 %v12269_v41  ;;  %v3146_v15 = vpop.permute.xlu0 %3145 }
 0x581   :  { %3025 = vmatpush1.bf16.msra.mxu1 %v2987_v21  ;;  %3184 = vmatpush1.bf16.msra.mxu0 %v3146_v15  ;;  %v12280_v21 = vld [vmem:[#allocation6 + $0x1c4] ss:$8 sps:$4 sm:$0xff]   ;;  %v12285_v15 = vld [vmem:[#allocation6 + $0x110] ss:$8 sps:$4 sm:$0xff]  }
 0x582   :  { %3026 = vmatprep.subr.bf16.mxu1 %v17164_v6  ;;  %3185 = vmatprep.subr.bf16.mxu0 %v17164_v6 }
 0x583   :  { %9978 = vmatprep.mubr.msk.bf16.mxu1 %vm938_vm3, %v12270_v27 }
 0x584   :  { %v13725_v25 = vpop.permute.xlu1 %3300  ;;  %v3144_v17 = vpop.permute.xlu0 %3143 }
 0x585   :  { %3027 = vmatpush1.bf16.msra.mxu1 %v13683_v30  ;;  %3186 = vmatpush1.bf16.msra.mxu0 %v3144_v17  ;;  %v12278_v30 = vld [vmem:[#allocation6 + $0x1b0] ss:$8 sps:$4 sm:$0xff]  }
 0x586   :  { %3028 = vmatprep.subr.bf16.mxu1 %v17164_v6  ;;  %3187 = vmatprep.subr.bf16.mxu0 %v17164_v6  ;;  %v12286_v17 = vld [vmem:[#allocation6 + $0x1d0] ss:$8 sps:$4 sm:$0xff]  }
 0x588   :  { %2827 = vmatmul.mubr.bf16.gmra.mxu1 %v12271_v20  ;;  %v3142_v33 = vpop.permute.xlu0 %3141  ;;  %v13730_v46 = vpop.permute.xlu1 %3298 }
 0x589   :  { %3029 = vmatpush1.bf16.msra.mxu1 %v2983_v51  ;;  %3188 = vmatpush1.bf16.msra.mxu0 %v3142_v33  ;;  %v12287_v33 = vld [vmem:[#allocation6 + $0x124] ss:$8 sps:$4 sm:$0xff]  }
 0x58a   :  { %3030 = vmatprep.subr.bf16.mxu1 %v17164_v6  ;;  %3189 = vmatprep.subr.bf16.mxu0 %v17164_v6 }
 0x58b   :  { %9979 = vmatprep.mubr.msk.bf16.mxu1 %vm938_vm3, %v12272_v34  ;;  %v12288_v34 = vld [vmem:[#allocation6 + $0x1e4] ss:$8 sps:$4 sm:$0xff]  }
 0x58c   :  { %v3140_v40 = vpop.permute.xlu0 %3139  ;;  %v13738_v39 = vpop.permute.xlu1 %3320 }
 0x58d   :  { %3031 = vmatpush1.bf16.msra.mxu1 %v13686_v5  ;;  %3190 = vmatpush1.bf16.msra.mxu0 %v3140_v40  ;;  %v12279_v5 = vld [vmem:[#allocation6 + $0x104] ss:$8 sps:$4 sm:$0xff]  }
 0x58e   :  { %3040 = vmatprep.subr.bf16.mxu1 %v17164_v6  ;;  %3199 = vmatprep.subr.bf16.mxu0 %v17164_v6 }
 0x590   :  { %2835 = vmatmul.mubr.bf16.gmra.mxu1 %v12273_v48  ;;  %v3162_v45 = vpop.permute.xlu0 %3161  ;;  %v13744_v52 = vpop.permute.xlu1 %3318 }
 0x591   :  { %3041 = vmatpush2.bf16.msra.mxu1 %v13694_v8  ;;  %3200 = vmatpush2.bf16.msra.mxu0 %v3162_v45  ;;  %v12289_v45 = vld [vmem:[#allocation6 + $0x120] ss:$8 sps:$4 sm:$0xff]  }
 0x592   :  { %3042 = vmatprep.subr.bf16.mxu1 %v17164_v6  ;;  %3201 = vmatprep.subr.bf16.mxu0 %v17164_v6 }
 0x593   :  { %9980 = vmatprep.mubr.msk.bf16.mxu1 %vm938_vm3, %v12274_v55 }
 0x594   :  { %v3160_v28 = vpop.permute.xlu0 %3159  ;;  %v13752_v60 = vpop.permute.xlu1 %3316 }
 0x595   :  { %3043 = vmatpush2.bf16.msra.mxu1 %v13689_v12  ;;  %3202 = vmatpush2.bf16.msra.mxu0 %v3160_v28  ;;  %v12290_v28 = vld [vmem:[#allocation6 + $0x1e0] ss:$8 sps:$4 sm:$0xff]  }
 0x596   :  { %3044 = vmatprep.subr.bf16.mxu1 %v17164_v6  ;;  %3203 = vmatprep.subr.bf16.mxu0 %v17164_v6 }
 0x598   :  { %2843 = vmatmul.mubr.bf16.gmra.mxu1 %v12275_v29  ;;  %v3158_v56 = vpop.permute.xlu0 %3157  ;;  %v13757_v44 = vpop.permute.xlu1 %3314 }
 0x599   :  { %3045 = vmatpush2.bf16.msra.mxu1 %v13699_v58  ;;  %3204 = vmatpush2.bf16.msra.mxu0 %v3158_v56  ;;  %v12282_v58 = vld [vmem:[#allocation6 + $0x1c0] ss:$8 sps:$4 sm:$0xff]   ;;  %v12292_v56 = vld [vmem:[#allocation6 + $0x1f4] ss:$8 sps:$4 sm:$0xff]  }
 0x59a   :  { %3046 = vmatprep.subr.bf16.mxu1 %v17164_v6  ;;  %3205 = vmatprep.subr.bf16.mxu0 %v17164_v6 }
 0x59b   :  { %9981 = vmatprep.mubr.msk.bf16.mxu1 %vm938_vm3, %v12276_v23 }
 0x59c   :  { %v3156_v37 = vpop.permute.xlu0 %3155 }
 0x59d   :  { %3047 = vmatpush2.bf16.msra.mxu1 %v13692_v54  ;;  %3206 = vmatpush2.bf16.msra.mxu0 %v3156_v37  ;;  %v12281_v54 = vld [vmem:[#allocation6 + $0x100] ss:$8 sps:$4 sm:$0xff]  }
 0x59e   :  { %3334 = vmatprep.subr.bf16.mxu1 %v17164_v6 }
 0x5a0   :  { %2851 = vmatmul.mubr.bf16.gmra.mxu1 %v12277_v3  ;;  %3208 = vmatmul.mubr.bf16.vlgmr.msra.gmra.mxu0 %v12278_v30  ;;  %v12293_v30 = vld [vmem:[#allocation6 + $0x130] ss:$8 sps:$4 sm:$0xff]  }
 0x5a1   :  { %9982 = vmatprep.mubr.msk.bf16.mxu1 %vm938_vm3, %v12279_v5  ;;  %10003 = vmatprep.mubr.msk.bf16.mxu0 %vm938_vm3, %v12280_v21  ;;  %v12294_v5 = vld [vmem:[#allocation6 + $0x1f0] ss:$8 sps:$4 sm:$0xff]  }
 0x5a5   :  { %v13761_v12 = vpop.permute.xlu1 %2232 }
 0x5a6   :  { %17165 = vst [vmem:[#allocation25_spill] sm:$0xff] %v13761_v12  ;;  %v13765_v51 = vadd.f32 %v13761_v12, %v13509_v0 }
 0x5a8   :  { %17166 = vst [vmem:[#allocation26_spill] sm:$0xff] %v13765_v51  ;;  %2859 = vmatmul.mubr.bf16.gmra.mxu1 %v12281_v54  ;;  %v3518_v8 = vsel %vm3475_vm4, %v13765_v51, 0.0  ;;  %3216 = vmatmul.mubr.bf16.gmra.mxu0 %v12282_v58 }
 0x5a9   :  { %v13769_v22 = vpop.permute.xlu1 %2227  ;;  %v13771_v19 = vpop.permute.xlu0 %2237  ;;  %3519 = vadd.xlane.f32.xlu0 %v3518_v8  ;;  %9983 = vmatprep.mubr.msk.bf16.mxu1 %vm938_vm3, %v12283_v38 }
 0x5aa   :  { %17167 = vst [vmem:[#allocation27_spill] sm:$0xff] %v13769_v22  ;;  %17168 = vst [vmem:[#allocation28_spill] sm:$0xff] %v13771_v19  ;;  %v13776_v18 = vadd.f32 %v13769_v22, %v13505_v26  ;;  %v13780_v0 = vadd.f32 %v13771_v19, %v13513_v4  ;;  %10004 = vmatprep.mubr.msk.bf16.mxu0 %vm938_vm3, %v12284_v2 }
 0x5ac   :  { %17169 = vst [vmem:[#allocation29_spill] sm:$0xff] %v13776_v18  ;;  %17170 = vst [vmem:[#allocation30_spill] sm:$0xff] %v13780_v0  ;;  %v3521_v13 = vsel %vm3475_vm4, %v13780_v0, 0.0  ;;  %v3515_v24 = vsel %vm3475_vm4, %v13776_v18, 0.0 }
 0x5ad   :  { %v13787_v9 = vpop.permute.xlu1 %2217  ;;  %v13789_v41 = vpop.permute.xlu0 %2222  ;;  %3522 = vadd.xlane.f32.xlu1 %v3521_v13  ;;  %3516 = vadd.xlane.f32.xlu0 %v3515_v24  ;;  %v12297_v24 = vld [vmem:[#allocation6 + $0x140] ss:$8 sps:$4 sm:$0xff]  }
 0x5ae   :  { %17171 = vst [vmem:[#allocation31_spill] sm:$0xff] %v13787_v9  ;;  %17172 = vst [vmem:[#allocation32_spill] sm:$0xff] %v13789_v41  ;;  %v13793_v26 = vadd.f32 %v13789_v41, %v13501_v31  ;;  %v13797_v4 = vadd.f32 %v13787_v9, %v13497_v43 }
 0x5b0   :  { %17173 = vst [vmem:[#allocation33_spill] sm:$0xff] %v13793_v26  ;;  %17174 = vst [vmem:[#allocation34_spill] sm:$0xff] %v13797_v4  ;;  %2867 = vmatmul.mubr.bf16.gmra.mxu1 %v12285_v15  ;;  %v3512_v27 = vsel %vm3475_vm4, %v13793_v26, 0.0  ;;  %3224 = vmatmul.mubr.bf16.gmra.mxu0 %v12286_v17  ;;  %v3509_v31 = vsel %vm3475_vm4, %v13797_v4, 0.0  ;;  %v12298_v15 = vld [vmem:[#allocation6 + $0x200] ss:$8 sps:$4 sm:$0xff]  }
 0x5b1   :  { %v13801_v20 = vpop.permute.xlu0 %2212  ;;  %3513 = vadd.xlane.f32.xlu0 %v3512_v27  ;;  %9993 = vmatprep.mubr.msk.bf16.mxu1 %vm938_vm3, %v12287_v33  ;;  %v13811_v40 = vpop.permute.xlu1 %2207  ;;  %v12300_v33 = vld [vmem:[#allocation6 + $0x214] ss:$8 sps:$4 sm:$0xff]  }
 0x5b2   :  { %17175 = vst [vmem:[#allocation35_spill] sm:$0xff] %v13801_v20  ;;  %10005 = vmatprep.mubr.msk.bf16.mxu0 %vm938_vm3, %v12288_v34  ;;  %v13807_v43 = vadd.f32 %v13801_v20, %v13493_v16  ;;  %17177 = vst [vmem:[#allocation37_spill] sm:$0xff] %v13811_v40  ;;  %v13815_v48 = vadd.f32 %v13811_v40, %v13489_v57  ;;  %v12291_v16 = vld [vmem:[#allocation6 + $0x134] ss:$8 sps:$4 sm:$0xff]  }
 0x5b4   :  { %17176 = vst [vmem:[#allocation36_spill] sm:$0xff] %v13807_v43  ;;  %17178 = vst [vmem:[#allocation38_spill] sm:$0xff] %v13815_v48  ;;  %v3506_v55 = vsel %vm3475_vm4, %v13807_v43, 0.0  ;;  %v3503_v23 = vsel %vm3475_vm4, %v13815_v48, 0.0 }
 0x5b5   :  { %3510 = vadd.xlane.f32.xlu0 %v3509_v31  ;;  %v13819_v29 = vpop.permute.xlu0 %2202  ;;  %v13831_v37 = vpop.permute.xlu1 %2197 }
 0x5b6   :  { %17179 = vst [vmem:[#allocation39_spill] sm:$0xff] %v13819_v29  ;;  %v13827_v57 = vadd.f32 %v13819_v29, %v13485_v32  ;;  %17181 = vst [vmem:[#allocation41_spill] sm:$0xff] %v13831_v37  ;;  %v13839_v3 = vadd.f32 %v13831_v37, %v13481_v7  ;;  %v12296_v7 = vld [vmem:[#allocation6 + $0x204] ss:$8 sps:$4 sm:$0xff]  }
 0x5b8   :  { %3049 = vmatmul.mubr.bf16.vlgmr.msra.gmra.mxu1 %v12289_v45  ;;  %3232 = vmatmul.mubr.bf16.gmra.mxu0 %v12290_v28  ;;  %17180 = vst [vmem:[#allocation40_spill] sm:$0xff] %v13827_v57  ;;  %17182 = vst [vmem:[#allocation42_spill] sm:$0xff] %v13839_v3  ;;  %v3500_v32 = vsel %vm3475_vm4, %v13827_v57, 0.0  ;;  %v3497_v58 = vsel %vm3475_vm4, %v13839_v3, 0.0 }
 0x5b9   :  { %3335 = vmatpush1.bf16.msra.mxu1 %v13697_v1  ;;  %3507 = vadd.xlane.f32.xlu0 %v3506_v55  ;;  %v13843_v21 = vpop.permute.xlu0 %2192 }
 0x5ba   :  { %3336 = vmatprep.subr.bf16.mxu1 %v17164_v6  ;;  %9994 = vmatprep.mubr.msk.bf16.mxu1 %vm938_vm3, %v12291_v16  ;;  %17183 = vst [vmem:[#allocation43_spill] sm:$0xff] %v13843_v21  ;;  %v13851_v8 = vadd.f32 %v13843_v21, %v13477_v35  ;;  %v12301_v16 = vld [vmem:[#allocation6 + $0x150] ss:$8 sps:$4 sm:$0xff]  }
 0x5bb   :  { %10006 = vmatprep.mubr.msk.bf16.mxu0 %vm938_vm3, %v12292_v56  ;;  %v12302_v56 = vld [vmem:[#allocation6 + $0x210] ss:$8 sps:$4 sm:$0xff]  }
 0x5bc   :  { %17184 = vst [vmem:[#allocation44_spill] sm:$0xff] %v13851_v8  ;;  %v3494_v35 = vsel %vm3475_vm4, %v13851_v8, 0.0 }
 0x5bd   :  { %3337 = vmatpush1.bf16.msra.mxu1 %v13702_v14  ;;  %3504 = vadd.xlane.f32.xlu0 %v3503_v23  ;;  %v12295_v14 = vld [vmem:[#allocation6 + $0x144] ss:$8 sps:$4 sm:$0xff]   ;;  %v13869_v17 = vpop.permute.xlu0 %2182 }
 0x5be   :  { %3338 = vmatprep.subr.bf16.mxu1 %v17164_v6  ;;  %v13877_v34 = vadd.f32 %v13869_v17, %v13469_v62 }
 0x5bf   :  { %v13835_v1 = vpop.f32.mrf.mxu0 }
 0x5c0   :  { %3057 = vmatmul.mubr.bf16.gmra.mxu1 %v12293_v30  ;;  %3240 = vmatmul.mubr.bf16.gmra.mxu0 %v12294_v5  ;;  %17186 = vst [vmem:[#allocation46_spill] sm:$0xff] %v13877_v34  ;;  %v3488_v62 = vsel %vm3475_vm4, %v13877_v34, 0.0 }
 0x5c1   :  { %3339 = vmatpush1.bf16.msra.mxu1 %v13707_v63  ;;  %3501 = vadd.xlane.f32.xlu0 %v3500_v32  ;;  %v2911_v54 = vpop.f32.mrf.mxu0  ;;  %v13857_v63 = vpop.permute.xlu1 %2187  ;;  %v12304_v32 = vld [vmem:[#allocation6 + $0x224] ss:$8 sps:$4 sm:$0xff]  }
 0x5c2   :  { %3340 = vmatprep.subr.bf16.mxu1 %v17164_v6  ;;  %9995 = vmatprep.mubr.msk.bf16.mxu1 %vm938_vm3, %v12295_v14  ;;  %v13863_v13 = vadd.f32 %v13857_v63, %v13473_v53  ;;  %v13895_v30 = vpop.permute.xlu0 %2172 }
 0x5c3   :  { %10007 = vmatprep.mubr.msk.bf16.mxu0 %vm938_vm3, %v12296_v7  ;;  %v13855_v38 = vpop.f32.mrf.mxu0  ;;  %v13903_v5 = vadd.f32 %v13895_v30, %v13461_v36 }
 0x5c4   :  { %17185 = vst [vmem:[#allocation45_spill] sm:$0xff] %v13863_v13  ;;  %v3491_v31 = vsel %vm3475_vm4, %v13863_v13, 0.0 }
 0x5c5   :  { %3341 = vmatpush1.bf16.msra.mxu1 %v13711_v42  ;;  %3498 = vadd.xlane.f32.xlu0 %v3497_v58  ;;  %v2914_v2 = vpop.f32.mrf.mxu0  ;;  %v12299_v42 = vld [vmem:[#allocation6 + $0x154] ss:$8 sps:$4 sm:$0xff]   ;;  %17188 = vst [vmem:[#allocation48_spill] sm:$0xff] %v13903_v5  ;;  %v3482_v36 = vsel %vm3475_vm4, %v13903_v5, 0.0 }
 0x5c6   :  { %3342 = vmatprep.subr.bf16.mxu1 %v17164_v6  ;;  %v12305_v2 = vld [vmem:[#allocation6 + $0x160] ss:$8 sps:$4 sm:$0xff]  }
 0x5c7   :  { %v13867_v27 = vpop.f32.mrf.mxu0 }
 0x5c8   :  { %3065 = vmatmul.mubr.bf16.gmra.mxu1 %v12297_v24  ;;  %3248 = vmatmul.mubr.bf16.gmra.mxu0 %v12298_v15  ;;  %v12306_v24 = vld [vmem:[#allocation6 + $0x220] ss:$8 sps:$4 sm:$0xff]   ;;  %v13921_v15 = vpop.permute.xlu0 %2162 }
 0x5c9   :  { %3343 = vmatpush1.bf16.msra.mxu1 %v13716_v10  ;;  %3495 = vadd.xlane.f32.xlu0 %v3494_v35  ;;  %v2919_v53 = vpop.f32.mrf.mxu0  ;;  %v13883_v10 = vpop.permute.xlu1 %2177 }
 0x5ca   :  { %3344 = vmatprep.subr.bf16.mxu1 %v17164_v6  ;;  %9996 = vmatprep.mubr.msk.bf16.mxu1 %vm938_vm3, %v12299_v42  ;;  %v13889_v28 = vadd.f32 %v13883_v10, %v13465_v11  ;;  %v12308_v42 = vld [vmem:[#allocation6 + $0x234] ss:$8 sps:$4 sm:$0xff]   ;;  %v13929_v53 = vadd.f32 %v13921_v15, %v13453_v59 }
 0x5cb   :  { %10008 = vmatprep.mubr.msk.bf16.mxu0 %vm938_vm3, %v12300_v33  ;;  %v13881_v45 = vpop.f32.mrf.mxu0 }
 0x5cc   :  { %17187 = vst [vmem:[#allocation47_spill] sm:$0xff] %v13889_v28  ;;  %v3485_v14 = vsel %vm3475_vm4, %v13889_v28, 0.0  ;;  %17190 = vst [vmem:[#allocation50_spill] sm:$0xff] %v13929_v53  ;;  %v3476_v59 = vsel %vm3475_vm4, %v13929_v53, 0.0 }
 0x5cd   :  { %3345 = vmatpush1.bf16.msra.mxu1 %v13720_v61  ;;  %3492 = vadd.xlane.f32.xlu0 %v3491_v31  ;;  %v2922_v55 = vpop.f32.mrf.mxu0  ;;  %v12303_v61 = vld [vmem:[#allocation6 + $0x164] ss:$8 sps:$4 sm:$0xff]  }
 0x5ce   :  { %3346 = vmatprep.subr.bf16.mxu1 %v17164_v6 }
 0x5cf   :  { %v13893_v23 = vpop.f32.mrf.mxu0 }
 0x5d0   :  { %3073 = vmatmul.mubr.bf16.gmra.mxu1 %v12301_v16  ;;  %3256 = vmatmul.mubr.bf16.gmra.mxu0 %v12302_v56  ;;  %v12310_v56 = vld [vmem:[#allocation6 + $0x230] ss:$8 sps:$4 sm:$0xff]  }
 0x5d1   :  { %3347 = vmatpush1.bf16.msra.mxu1 %v13725_v25  ;;  %3489 = vadd.xlane.f32.xlu0 %v3488_v62  ;;  %v2927_v11 = vpop.f32.mrf.mxu0  ;;  %v13909_v25 = vpop.permute.xlu1 %2167  ;;  %v12309_v62 = vld [vmem:[#allocation6 + $0x170] ss:$8 sps:$4 sm:$0xff]  }
 0x5d2   :  { %3348 = vmatprep.subr.bf16.mxu1 %v17164_v6  ;;  %9997 = vmatprep.mubr.msk.bf16.mxu1 %vm938_vm3, %v12303_v61  ;;  %v13915_v58 = vadd.f32 %v13909_v25, %v13457_v50  ;;  %v13947_v11 = vpop.permute.xlu0 %2242 }
 0x5d3   :  { %10009 = vmatprep.mubr.msk.bf16.mxu0 %vm938_vm3, %v12304_v32  ;;  %v13907_v54 = vpop.f32.mrf.mxu0  ;;  %17193 = vst [vmem:[#allocation53_spill] sm:$0xff] %v13947_v11  ;;  %v13954_v32 = vadd.f32 %v13947_v11, %v13517_v47 }
 0x5d4   :  { %17189 = vst [vmem:[#allocation49_spill] sm:$0xff] %v13915_v58  ;;  %v3479_v33 = vsel %vm3475_vm4, %v13915_v58, 0.0 }
 0x5d5   :  { %3349 = vmatpush1.bf16.msra.mxu1 %v13730_v46  ;;  %3486 = vadd.xlane.f32.xlu0 %v3485_v14  ;;  %v2930_v7 = vpop.f32.mrf.mxu0  ;;  %v12307_v46 = vld [vmem:[#allocation6 + $0x174] ss:$8 sps:$4 sm:$0xff]   ;;  %17194 = vst [vmem:[#allocation54_spill] sm:$0xff] %v13954_v32 }
 0x5d6   :  { %3358 = vmatprep.subr.bf16.mxu1 %v17164_v6 }
 0x5d7   :  { %v13919_v35 = vpop.f32.mrf.mxu0 }
 0x5d8   :  { %3081 = vmatmul.mubr.bf16.gmra.mxu1 %v12305_v2  ;;  %3264 = vmatmul.mubr.bf16.gmra.mxu0 %v12306_v24  ;;  %v12312_v2 = vld [vmem:[#allocation6 + $0x180] ss:$8 sps:$4 sm:$0xff]   ;;  %v12313_v24 = vld [vmem:[#allocation6 + $0x194] ss:$8 sps:$4 sm:$0xff]  }
 0x5d9   :  { %3359 = vmatpush2.bf16.msra.mxu1 %v13738_v39  ;;  %3483 = vadd.xlane.f32.xlu0 %v3482_v36  ;;  %v2935_v50 = vpop.f32.mrf.mxu0  ;;  %v13935_v39 = vpop.permute.xlu1 %2247 }
 0x5da   :  { %3360 = vmatprep.subr.bf16.mxu1 %v17164_v6  ;;  %9998 = vmatprep.mubr.msk.bf16.mxu1 %vm938_vm3, %v12307_v46  ;;  %17191 = vst [vmem:[#allocation51_spill] sm:$0xff] %v13935_v39  ;;  %v13941_v16 = vadd.f32 %v13935_v39, %v13521_v49 }
 0x5db   :  { %10010 = vmatprep.mubr.msk.bf16.mxu0 %vm938_vm3, %v12308_v42  ;;  %v13933_v31 = vpop.f32.mrf.mxu0  ;;  %v12314_v42 = vld [vmem:[#allocation6 + $0x190] ss:$8 sps:$4 sm:$0xff]  }
 0x5dc   :  { %17192 = vst [vmem:[#allocation52_spill] sm:$0xff] %v13941_v16  ;;  %v3527_v14 = vsel %vm3475_vm4, %v13941_v16, 0.0  ;;  %v12333_v16 = vld [vmem:[#allocation6 + $0x2c4] ss:$8 sps:$4 sm:$0xff]  }
 0x5dd   :  { %3361 = vmatpush2.bf16.msra.mxu1 %v13744_v52  ;;  %3480 = vadd.xlane.f32.xlu0 %v3479_v33  ;;  %v2938_v55 = vpop.f32.mrf.mxu0  ;;  %v12311_v52 = vld [vmem:[#allocation6 + $0x184] ss:$8 sps:$4 sm:$0xff]  }
 0x5de   :  { %3362 = vmatprep.subr.bf16.mxu1 %v17164_v6  ;;  %v12315_v33 = vld [vmem:[#allocation6 + $0x1a4] ss:$8 sps:$4 sm:$0xff]  }
 0x5df   :  { %v13945_v61 = vpop.f32.mrf.mxu0 }
 0x5e0   :  { %3089 = vmatmul.mubr.bf16.gmra.mxu1 %v12309_v62  ;;  %3272 = vmatmul.mubr.bf16.gmra.mxu0 %v12310_v56  ;;  %v12316_v56 = vld [vmem:[#allocation6 + $0x1a0] ss:$8 sps:$4 sm:$0xff]  }
 0x5e1   :  { %3363 = vmatpush2.bf16.msra.mxu1 %v13752_v60  ;;  %3477 = vadd.xlane.f32.xlu0 %v3476_v59  ;;  %v2943_v49 = vpop.f32.mrf.mxu0 }
 0x5e2   :  { %3364 = vmatprep.subr.bf16.mxu1 %v17164_v6  ;;  %9999 = vmatprep.mubr.msk.bf16.mxu1 %vm938_vm3, %v12311_v52  ;;  %v3524_v6 = vsel %vm3475_vm4, %v13954_v32, 0.0  ;;  %v12317_v49 = vld [vmem:[#allocation6 + $0x244] ss:$8 sps:$4 sm:$0xff]  }
 0x5e3   :  { %v13958_v7 = vpop.f32.mrf.mxu0 }
 0x5e5   :  { %3365 = vmatpush2.bf16.msra.mxu1 %v13757_v44  ;;  %3528 = vadd.xlane.f32.xlu0 %v3527_v14  ;;  %v2946_v60 = vpop.f32.mrf.mxu0 }
 0x5e7   :  { %v13963_v36 = vpop.f32.mrf.mxu0 }
 0x5e8   :  { %3097 = vmatmul.mubr.bf16.gmra.mxu1 %v12312_v2 }
 0x5e9   :  { %3525 = vadd.xlane.f32.xlu0 %v3524_v6  ;;  %10000 = vmatprep.mubr.msk.bf16.mxu1 %vm938_vm3, %v12313_v24  ;;  %v2951_v47 = vpop.f32.mrf.mxu0  ;;  %v12318_v6 = vld [vmem:[#allocation6 + $0x240] ss:$8 sps:$4 sm:$0xff]  }
 0x5ea   :  { %v12319_v47 = vld [vmem:[#allocation6 + $0x254] ss:$8 sps:$4 sm:$0xff]  }
 0x5eb   :  { %v13966_v46 = vpop.f32.mrf.mxu0 }
 0x5ed   :  { %v2954_v50 = vpop.f32.mrf.mxu0 }
 0x5ef   :  { %v13968_v44 = vpop.f32.mrf.mxu0 }
 0x5f0   :  { %3105 = vmatmul.mubr.bf16.gmra.mxu1 %v12314_v42 }
 0x5f1   :  { %10001 = vmatprep.mubr.msk.bf16.mxu1 %vm938_vm3, %v12315_v33  ;;  %v2959_v55 = vpop.f32.mrf.mxu0 }
 0x5f2   :  { %v12320_v55 = vld [vmem:[#allocation6 + $0x250] ss:$8 sps:$4 sm:$0xff]  }
 0x5f3   :  { %v13971_v62 = vpop.f32.mrf.mxu0 }
 0x5f5   :  { %v2962_v59 = vpop.f32.mrf.mxu0 }
 0x5f6   :  { %v12321_v59 = vld [vmem:[#allocation6 + $0x264] ss:$8 sps:$4 sm:$0xff]  }
 0x5f7   :  { %v13973_v52 = vpop.f32.mrf.mxu0 }
 0x5f8   :  { %3113 = vmatmul.mubr.bf16.gmra.mxu1 %v12316_v56  ;;  %v12322_v56 = vld [vmem:[#allocation6 + $0x260] ss:$8 sps:$4 sm:$0xff]  }
 0x5f9   :  { %10011 = vmatprep.mubr.msk.bf16.mxu1 %vm938_vm3, %v12317_v49  ;;  %v2967_v14 = vpop.f32.mrf.mxu0  ;;  %v12323_v49 = vld [vmem:[#allocation6 + $0x274] ss:$8 sps:$4 sm:$0xff]  }
 0x5fa   :  { %v12324_v14 = vld [vmem:[#allocation6 + $0x270] ss:$8 sps:$4 sm:$0xff]  }
 0x5fb   :  { %v13976_v60 = vpop.f32.mrf.mxu0 }
 0x5fd   :  { %v2970_v2 = vpop.f32.mrf.mxu0 }
 0x5fe   :  { %v12325_v2 = vld [vmem:[#allocation6 + $0x284] ss:$8 sps:$4 sm:$0xff]  }
 0x5ff   :  { %v13978_v24 = vpop.f32.mrf.mxu0 }
 0x600   :  { %3367 = vmatmul.mubr.bf16.vlgmr.msra.gmra.mxu1 %v12318_v6  ;;  %v12326_v6 = vld [vmem:[#allocation6 + $0x280] ss:$8 sps:$4 sm:$0xff]  }
 0x601   :  { %10012 = vmatprep.mubr.msk.bf16.mxu1 %vm938_vm3, %v12319_v47  ;;  %v2975_v50 = vpop.f32.mrf.mxu0  ;;  %v12327_v47 = vld [vmem:[#allocation6 + $0x294] ss:$8 sps:$4 sm:$0xff]  }
 0x602   :  { %v12328_v50 = vld [vmem:[#allocation6 + $0x290] ss:$8 sps:$4 sm:$0xff]  }
 0x603   :  { %v13981_v42 = vpop.f32.mrf.mxu0 }
 0x605   :  { %v2978_v33 = vpop.f32.mrf.mxu0 }
 0x606   :  { %v12329_v33 = vld [vmem:[#allocation6 + $0x2a4] ss:$8 sps:$4 sm:$0xff]  }
 0x608   :  { %3375 = vmatmul.mubr.bf16.gmra.mxu1 %v12320_v55 }
 0x609   :  { %10013 = vmatprep.mubr.msk.bf16.mxu1 %vm938_vm3, %v12321_v59  ;;  %v12330_v59 = vld [vmem:[#allocation6 + $0x2a0] ss:$8 sps:$4 sm:$0xff]  }
 0x610   :  { %3383 = vmatmul.mubr.bf16.gmra.mxu1 %v12322_v56  ;;  %v12331_v56 = vld [vmem:[#allocation6 + $0x2b4] ss:$8 sps:$4 sm:$0xff]  }
 0x611   :  { %10014 = vmatprep.mubr.msk.bf16.mxu1 %vm938_vm3, %v12323_v49 }
 0x618   :  { %3391 = vmatmul.mubr.bf16.gmra.mxu1 %v12324_v14 }
 0x619   :  { %10015 = vmatprep.mubr.msk.bf16.mxu1 %vm938_vm3, %v12325_v2 }
 0x620   :  { %3399 = vmatmul.mubr.bf16.gmra.mxu1 %v12326_v6  ;;  %v12332_v6 = vld [vmem:[#allocation6 + $0x2b0] ss:$8 sps:$4 sm:$0xff]  }
 0x621   :  { %10016 = vmatprep.mubr.msk.bf16.mxu1 %vm938_vm3, %v12327_v47 }
 0x628   :  { %3407 = vmatmul.mubr.bf16.gmra.mxu1 %v12328_v50 }
 0x629   :  { %10017 = vmatprep.mubr.msk.bf16.mxu1 %vm938_vm3, %v12329_v33 }
 0x630   :  { %v2804_v55 = vpop.f32.mrf.mxu1  ;;  %3415 = vmatmul.mubr.bf16.gmra.mxu1 %v12330_v59  ;;  %v12334_v59 = vld [vmem:[#allocation6 + $0x2c0] ss:$8 sps:$4 sm:$0xff]  }
 0x631   :  { %10018 = vmatprep.mubr.msk.bf16.mxu1 %vm938_vm3, %v12331_v56  ;;  %v2910_v22 = vadd.f32 %v13835_v1, %v2804_v55 }
 0x632   :  { %v2806_v49 = vpop.f32.mrf.mxu1 }
 0x634   :  { %v2807_v14 = vpop.f32.mrf.mxu1 }
 0x636   :  { %v2809_v32 = vpop.f32.mrf.mxu1 }
 0x638   :  { %v13989_v2 = vpop.f32.mrf.mxu1  ;;  %3423 = vmatmul.mubr.bf16.gmra.mxu1 %v12332_v6 }
 0x639   :  { %10019 = vmatprep.mubr.msk.bf16.mxu1 %vm938_vm3, %v12333_v16 }
 0x63a   :  { %v2814_v47 = vpop.f32.mrf.mxu1 }
 0x63c   :  { %v13992_v50 = vpop.f32.mrf.mxu1 }
 0x63e   :  { %v2817_v33 = vpop.f32.mrf.mxu1 }
 0x640   :  { %v13994_v53 = vpop.f32.mrf.mxu1  ;;  %3431 = vmatmul.mubr.bf16.gmra.mxu1 %v12334_v59 }
 0x642   :  { %v2822_v58 = vpop.f32.mrf.mxu1 }
 0x644   :  { %v13996_v56 = vpop.f32.mrf.mxu1 }
 0x646   :  { %v2825_v49 = vpop.f32.mrf.mxu1 }
 0x648   :  { %v13998_v32 = vpop.f32.mrf.mxu1 }
 0x64a   :  { %v2830_v5 = vpop.f32.mrf.mxu1 }
 0x64c   :  { %v14000_v28 = vpop.f32.mrf.mxu1 }
 0x64e   :  { %v2833_v6 = vpop.f32.mrf.mxu1 }
 0x650   :  { %v14002_v34 = vpop.f32.mrf.mxu1 }
 0x652   :  { %v2838_v16 = vpop.f32.mrf.mxu1 }
 0x654   :  { %v14004_v47 = vpop.f32.mrf.mxu1 }
 0x656   :  { %v2841_v33 = vpop.f32.mrf.mxu1 }
 0x658   :  { %v14006_v13 = vpop.f32.mrf.mxu1 }
 0x65a   :  { %v2846_v8 = vpop.f32.mrf.mxu1 }
 0x65c   :  { %v14008_v59 = vpop.f32.mrf.mxu1 }
 0x65e   :  { %v2849_v58 = vpop.f32.mrf.mxu1 }
 0x660   :  { %v14010_v3 = vpop.f32.mrf.mxu1  ;;  %v3209_v49 = vpop.f32.mrf.mxu0 }
 0x662   :  { %v2854_v39 = vpop.f32.mrf.mxu1  ;;  %v3211_v5 = vpop.f32.mrf.mxu0 }
 0x664   :  { %v14012_v57 = vpop.f32.mrf.mxu1  ;;  %v3212_v6 = vpop.f32.mrf.mxu0 }
 0x666   :  { %v2857_v11 = vpop.f32.mrf.mxu1  ;;  %v3214_v48 = vpop.f32.mrf.mxu0 }
 0x668   :  { %v14014_v16 = vpop.f32.mrf.mxu1  ;;  %v3217_v43 = vpop.f32.mrf.mxu0 }
 0x66a   :  { %v2862_v33 = vpop.f32.mrf.mxu1  ;;  %v3219_v4 = vpop.f32.mrf.mxu0 }
 0x66c   :  { %v14016_v26 = vpop.f32.mrf.mxu1  ;;  %v3220_v8 = vpop.f32.mrf.mxu0 }
 0x66e   :  { %v2865_v18 = vpop.f32.mrf.mxu1  ;;  %v3222_v58 = vpop.f32.mrf.mxu0 }
 0x66f   :  { %v2913_v18 = vadd.f32 %v13855_v38, %v2807_v14 }
 0x670   :  { %v14018_v51 = vpop.f32.mrf.mxu1  ;;  %v3225_v0 = vpop.f32.mrf.mxu0 }
 0x672   :  { %v2870_v39 = vpop.f32.mrf.mxu1  ;;  %v3227_v5 = vpop.f32.mrf.mxu0 }
 0x674   :  { %v14020_v19 = vpop.f32.mrf.mxu1  ;;  %v3228_v12 = vpop.f32.mrf.mxu0 }
 0x676   :  { %v2873_v11 = vpop.f32.mrf.mxu1  ;;  %v3230_v48 = vpop.f32.mrf.mxu0 }
 0x677   :  { %v2918_v11 = vadd.f32 %v13867_v27, %v13989_v2  ;;  %v2926_v27 = vadd.f32 %v13893_v23, %v13994_v53  ;;  %v2934_v23 = vadd.f32 %v13919_v35, %v13998_v32  ;;  %v2942_v35 = vadd.f32 %v13945_v61, %v14002_v34 }
 0x678   :  { %v3050_v41 = vpop.f32.mrf.mxu1  ;;  %v3233_v33 = vpop.f32.mrf.mxu0  ;;  %v2950_v34 = vadd.f32 %v13963_v36, %v14006_v13  ;;  %v2958_v13 = vadd.f32 %v13968_v44, %v14010_v3 }
 0x679   :  { %v3121_v4 = vadd.f32 %v3050_v41, %v2910_v22  ;;  %v2921_v41 = vadd.f32 %v13881_v45, %v13992_v50  ;;  %v2929_v45 = vadd.f32 %v13907_v54, %v13996_v56  ;;  %v2937_v54 = vadd.f32 %v13933_v31, %v14000_v28 }
 0x67a   :  { %v3052_v9 = vpop.f32.mrf.mxu1  ;;  %v3235_v20 = vpop.f32.mrf.mxu0  ;;  %v2945_v28 = vadd.f32 %v13958_v7, %v14004_v47  ;;  %v2953_v7 = vadd.f32 %v13966_v46, %v14008_v59 }
 0x67b   :  { %v14024_v58 = vadd.f32 %v3209_v49, %v3121_v4 }
 0x67c   :  { %v3053_v40 = vpop.f32.mrf.mxu1  ;;  %v3236_v29 = vpop.f32.mrf.mxu0 }
 0x67d   :  { %v3122_v39 = vadd.f32 %v3053_v40, %v2913_v18 }
 0x67e   :  { %v3055_v5 = vpop.f32.mrf.mxu1  ;;  %v3238_v37 = vpop.f32.mrf.mxu0 }
 0x67f   :  { %v14028_v48 = vadd.f32 %v3212_v6, %v3122_v39 }
 0x680   :  { %v3058_v1 = vpop.f32.mrf.mxu1  ;;  %v3241_v55 = vpop.f32.mrf.mxu0 }
 0x681   :  { %v3123_v21 = vadd.f32 %v3058_v1, %v2918_v11 }
 0x682   :  { %v3060_v22 = vpop.f32.mrf.mxu1  ;;  %v3243_v9 = vpop.f32.mrf.mxu0 }
 0x683   :  { %v14032_v20 = vadd.f32 %v3217_v43, %v3123_v21 }
 0x684   :  { %v3061_v38 = vpop.f32.mrf.mxu1  ;;  %v3244_v14 = vpop.f32.mrf.mxu0 }
 0x685   :  { %v3124_v40 = vadd.f32 %v3061_v38, %v2921_v41 }
 0x686   :  { %v3063_v49 = vpop.f32.mrf.mxu1  ;;  %v3246_v37 = vpop.f32.mrf.mxu0 }
 0x687   :  { %v14036_v2 = vadd.f32 %v3220_v8, %v3124_v40 }
 0x688   :  { %v3066_v6 = vpop.f32.mrf.mxu1  ;;  %v3249_v4 = vpop.f32.mrf.mxu0 }
 0x689   :  { %v3125_v18 = vadd.f32 %v3066_v6, %v2926_v27 }
 0x68a   :  { %v3068_v39 = vpop.f32.mrf.mxu1  ;;  %v3251_v5 = vpop.f32.mrf.mxu0 }
 0x68b   :  { %v14040_v43 = vadd.f32 %v3225_v0, %v3125_v18 }
 0x68c   :  { %v3069_v21 = vpop.f32.mrf.mxu1  ;;  %v3252_v50 = vpop.f32.mrf.mxu0 }
 0x68d   :  { %v3126_v11 = vadd.f32 %v3069_v21, %v2929_v45 }
 0x68e   :  { %v3071_v1 = vpop.f32.mrf.mxu1  ;;  %v3254_v22 = vpop.f32.mrf.mxu0 }
 0x68f   :  { %v14044_v53 = vadd.f32 %v3228_v12, %v3126_v11 }
 0x690   :  { %v3074_v8 = vpop.f32.mrf.mxu1  ;;  %v3257_v9 = vpop.f32.mrf.mxu0 }
 0x691   :  { %v3127_v41 = vadd.f32 %v3074_v8, %v2934_v23 }
 0x692   :  { %v3076_v38 = vpop.f32.mrf.mxu1  ;;  %v3259_v40 = vpop.f32.mrf.mxu0 }
 0x693   :  { %v14048_v0 = vadd.f32 %v3233_v33, %v3127_v41 }
 0x694   :  { %v3077_v56 = vpop.f32.mrf.mxu1  ;;  %v3260_v49 = vpop.f32.mrf.mxu0 }
 0x695   :  { %v3128_v37 = vadd.f32 %v3077_v56, %v2937_v54 }
 0x696   :  { %v3079_v27 = vpop.f32.mrf.mxu1  ;;  %v3262_v6 = vpop.f32.mrf.mxu0 }
 0x697   :  { %v14052_v12 = vadd.f32 %v3236_v29, %v3128_v37 }
 0x698   :  { %v3082_v32 = vpop.f32.mrf.mxu1  ;;  %v3265_v18 = vpop.f32.mrf.mxu0 }
 0x699   :  { %v3129_v39 = vadd.f32 %v3082_v32, %v2942_v35  ;;  %v2961_v35 = vadd.f32 %v13971_v62, %v14012_v57 }
 0x69a   :  { %v3084_v5 = vpop.f32.mrf.mxu1  ;;  %v3267_v45 = vpop.f32.mrf.mxu0 }
 0x69b   :  { %v14056_v31 = vadd.f32 %v3241_v55, %v3129_v39  ;;  %v2966_v39 = vadd.f32 %v13973_v52, %v14014_v16 }
 0x69c   :  { %v3085_v33 = vpop.f32.mrf.mxu1  ;;  %v3268_v21 = vpop.f32.mrf.mxu0 }
 0x69d   :  { %v3130_v11 = vadd.f32 %v3085_v33, %v2945_v28 }
 0x69e   :  { %v3087_v1 = vpop.f32.mrf.mxu1  ;;  %v3270_v22 = vpop.f32.mrf.mxu0 }
 0x69f   :  { %v14060_v29 = vadd.f32 %v3244_v14, %v3130_v11 }
 0x6a0   :  { %v3090_v61 = vpop.f32.mrf.mxu1  ;;  %v3273_v23 = vpop.f32.mrf.mxu0 }
 0x6a1   :  { %v3131_v8 = vadd.f32 %v3090_v61, %v2950_v34 }
 0x6a2   :  { %v3092_v41 = vpop.f32.mrf.mxu1  ;;  %v3275_v38 = vpop.f32.mrf.mxu0 }
 0x6a3   :  { %v14064_v47 = vadd.f32 %v3249_v4, %v3131_v8 }
 0x6a4   :  { %v3093_v55 = vpop.f32.mrf.mxu1  ;;  %v3276_v40 = vpop.f32.mrf.mxu0 }
 0x6a5   :  { %v3132_v54 = vadd.f32 %v3093_v55, %v2953_v7 }
 0x6a6   :  { %v3095_v56 = vpop.f32.mrf.mxu1  ;;  %v3278_v37 = vpop.f32.mrf.mxu0 }
 0x6a7   :  { %v14068_v36 = vadd.f32 %v3252_v50, %v3132_v54  ;;  %v2969_v50 = vadd.f32 %v13976_v60, %v14016_v26 }
 0x6a8   :  { %v3098_v14 = vpop.f32.mrf.mxu1 }
 0x6a9   :  { %v3133_v27 = vadd.f32 %v3098_v14, %v2958_v13 }
 0x6aa   :  { %v3100_v6 = vpop.f32.mrf.mxu1 }
 0x6ab   :  { %v14072_v32 = vadd.f32 %v3257_v9, %v3133_v27  ;;  %v2974_v9 = vadd.f32 %v13978_v24, %v14018_v51 }
 0x6ac   :  { %v3101_v46 = vpop.f32.mrf.mxu1 }
 0x6ad   :  { %v3134_v59 = vadd.f32 %v3101_v46, %v2961_v35 }
 0x6ae   :  { %v3103_v4 = vpop.f32.mrf.mxu1 }
 0x6af   :  { %v14076_v5 = vadd.f32 %v3260_v49, %v3134_v59  ;;  %v2977_v49 = vadd.f32 %v13981_v42, %v14020_v19 }
 0x6b0   :  { %v3106_v45 = vpop.f32.mrf.mxu1 }
 0x6b1   :  { %v3135_v3 = vadd.f32 %v3106_v45, %v2966_v39 }
 0x6b2   :  { %v3108_v44 = vpop.f32.mrf.mxu1 }
 0x6b3   :  { %v14080_v28 = vadd.f32 %v3265_v18, %v3135_v3 }
 0x6b4   :  { %v3109_v33 = vpop.f32.mrf.mxu1 }
 0x6b5   :  { %v3136_v57 = vadd.f32 %v3109_v33, %v2969_v50 }
 0x6b6   :  { %v3111_v62 = vpop.f32.mrf.mxu1 }
 0x6b7   :  { %v14084_v11 = vadd.f32 %v3268_v21, %v3136_v57 }
 0x6b8   :  { %v3114_v1 = vpop.f32.mrf.mxu1 }
 0x6b9   :  { %v3137_v52 = vadd.f32 %v3114_v1, %v2974_v9  ;;  %v17205_v9 = vld [vmem:[#allocation39_spill] sm:$0xff] }
 0x6ba   :  { %v3116_v16 = vpop.f32.mrf.mxu1 }
 0x6bb   :  { %v14088_v22 = vadd.f32 %v3273_v23, %v3137_v52 }
 0x6bc   :  { %v3117_v34 = vpop.f32.mrf.mxu1 }
 0x6bd   :  { %v3138_v26 = vadd.f32 %v3117_v34, %v2977_v49  ;;  %v17207_v34 = vld [vmem:[#allocation37_spill] sm:$0xff] }
 0x6be   :  { %v3119_v60 = vpop.f32.mrf.mxu1 }
 0x6bf   :  { %v14090_v18 = vadd.f32 %v3276_v40, %v3138_v26 }
 0x6c0   :  { %v3368_v61 = vpop.f32.mrf.mxu1 }
 0x6c1   :  { %v3439_v8 = vadd.f32 %v3368_v61, %v14024_v58 }
 0x6c2   :  { %v3370_v41 = vpop.f32.mrf.mxu1 }
 0x6c3   :  { %v14094_v51 = vadd.f32 %v3439_v8, %v13921_v15  ;;  %v17209_v41 = vld [vmem:[#allocation35_spill] sm:$0xff] }
 0x6c4   :  { %v3371_v24 = vpop.f32.mrf.mxu1 }
 0x6c5   :  { %17195 = vst [vmem:[#allocation55_spill] sm:$0xff] %v14094_v51  ;;  %v3440_v21 = vadd.f32 %v3371_v24, %v14028_v48  ;;  %v3602_v19 = vsel %vm3475_vm4, %v14094_v51, 0.0 }
 0x6c6   :  { %v3373_v42 = vpop.f32.mrf.mxu1  ;;  %3603 = vadd.xlane.f32.xlu1 %v3602_v19 }
 0x6c7   :  { %v14100_v23 = vadd.f32 %v3440_v21, %v13909_v25 }
 0x6c8   :  { %v3376_v38 = vpop.f32.mrf.mxu1 }
 0x6c9   :  { %17196 = vst [vmem:[#allocation56_spill] sm:$0xff] %v14100_v23  ;;  %v3441_v7 = vadd.f32 %v3376_v38, %v14032_v20  ;;  %v3605_v58 = vsel %vm3475_vm4, %v14100_v23, 0.0  ;;  %v17211_v38 = vld [vmem:[#allocation31_spill] sm:$0xff] }
 0x6ca   :  { %v3378_v55 = vpop.f32.mrf.mxu1  ;;  %3606 = vadd.xlane.f32.xlu1 %v3605_v58 }
 0x6cb   :  { %v14106_v15 = vadd.f32 %v3441_v7, %v13895_v30 }
 0x6cc   :  { %v3379_v48 = vpop.f32.mrf.mxu1 }
 0x6cd   :  { %17197 = vst [vmem:[#allocation57_spill] sm:$0xff] %v14106_v15  ;;  %v3442_v40 = vadd.f32 %v3379_v48, %v14036_v2  ;;  %v3608_v54 = vsel %vm3475_vm4, %v14106_v15, 0.0 }
 0x6ce   :  { %v3381_v56 = vpop.f32.mrf.mxu1  ;;  %3609 = vadd.xlane.f32.xlu1 %v3608_v54 }
 0x6cf   :  { %v14112_v25 = vadd.f32 %v3442_v40, %v13883_v10  ;;  %v17213_v40 = vld [vmem:[#allocation32_spill] sm:$0xff] }
 0x6d0   :  { %v3384_v20 = vpop.f32.mrf.mxu1 }
 0x6d1   :  { %17198 = vst [vmem:[#allocation58_spill] sm:$0xff] %v14112_v25  ;;  %v3443_v37 = vadd.f32 %v3384_v20, %v14040_v43  ;;  %v3611_v13 = vsel %vm3475_vm4, %v14112_v25, 0.0 }
 0x6d2   :  { %v3386_v14 = vpop.f32.mrf.mxu1  ;;  %3612 = vadd.xlane.f32.xlu1 %v3611_v13  ;;  %v17215_v13 = vld [vmem:[#allocation27_spill] sm:$0xff] }
 0x6d3   :  { %v14118_v30 = vadd.f32 %v3443_v37, %v13869_v17  ;;  %v17201_v17 = vld [vmem:[#allocation43_spill] sm:$0xff] }
 0x6d4   :  { %v3387_v2 = vpop.f32.mrf.mxu1 }
 0x6d5   :  { %17199 = vst [vmem:[#allocation59_spill] sm:$0xff] %v14118_v30  ;;  %v3444_v27 = vadd.f32 %v3387_v2, %v14044_v53  ;;  %v3614_v6 = vsel %vm3475_vm4, %v14118_v30, 0.0 }
 0x6d6   :  { %v3389_v35 = vpop.f32.mrf.mxu1  ;;  %3615 = vadd.xlane.f32.xlu1 %v3614_v6 }
 0x6d7   :  { %v14124_v10 = vadd.f32 %v3444_v27, %v13857_v63  ;;  %v17203_v63 = vld [vmem:[#allocation41_spill] sm:$0xff] }
 0x6d8   :  { %v3392_v43 = vpop.f32.mrf.mxu1  ;;  %v17217_v35 = vld [vmem:[#allocation25_spill] sm:$0xff] }
 0x6d9   :  { %17200 = vst [vmem:[#allocation60_spill] sm:$0xff] %v14124_v10  ;;  %v3445_v46 = vadd.f32 %v3392_v43, %v14048_v0  ;;  %v3617_v59 = vsel %vm3475_vm4, %v14124_v10, 0.0 }
 0x6da   :  { %v3394_v4 = vpop.f32.mrf.mxu1  ;;  %3618 = vadd.xlane.f32.xlu1 %v3617_v59 }
 0x6db   :  { %v14130_v39 = vadd.f32 %v3445_v46, %v17201_v17 }
 0x6dc   :  { %v3395_v53 = vpop.f32.mrf.mxu1 }
 0x6dd   :  { %17202 = vst [vmem:[#allocation43_spill] sm:$0xff] %v14130_v39  ;;  %v3446_v45 = vadd.f32 %v3395_v53, %v14052_v12  ;;  %v3620_v3 = vsel %vm3475_vm4, %v14130_v39, 0.0 }
 0x6de   :  { %v3397_v44 = vpop.f32.mrf.mxu1  ;;  %3621 = vadd.xlane.f32.xlu1 %v3620_v3 }
 0x6df   :  { %v14136_v50 = vadd.f32 %v3446_v45, %v17203_v63  ;;  %v17221_v63 = vld [vmem:[#allocation30_spill] sm:$0xff] }
 0x6e0   :  { %v3400_v0 = vpop.f32.mrf.mxu1 }
 0x6e1   :  { %17204 = vst [vmem:[#allocation41_spill] sm:$0xff] %v14136_v50  ;;  %v3447_v33 = vadd.f32 %v3400_v0, %v14056_v31  ;;  %v3623_v57 = vsel %vm3475_vm4, %v14136_v50, 0.0  ;;  %v3545_v0 = vmul.f32 %v17221_v63, %v17221_v63 }
 0x6e2   :  { %v3402_v62 = vpop.f32.mrf.mxu1  ;;  %3624 = vadd.xlane.f32.xlu1 %v3623_v57 }
 0x6e3   :  { %v14142_v1 = vadd.f32 %v3447_v33, %v17205_v9  ;;  %v3593_v9 = vsel %vm3475_vm4, %v3545_v0, 0.0 }
 0x6e4   :  { %v3403_v12 = vpop.f32.mrf.mxu1 }
 0x6e5   :  { %17206 = vst [vmem:[#allocation39_spill] sm:$0xff] %v14142_v1  ;;  %v3448_v52 = vadd.f32 %v3403_v12, %v14060_v29  ;;  %v3626_v16 = vsel %vm3475_vm4, %v14142_v1, 0.0 }
 0x6e6   :  { %v3405_v49 = vpop.f32.mrf.mxu1  ;;  %3627 = vadd.xlane.f32.xlu1 %v3626_v16 }
 0x6e7   :  { %v14148_v26 = vadd.f32 %v3448_v52, %v17207_v34  ;;  %v17222_v52 = vld [vmem:[#allocation26_spill] sm:$0xff] }
 0x6e8   :  { %v3408_v31 = vpop.f32.mrf.mxu1  ;;  %v3544_v16 = vmul.f32 %v17222_v52, %v17222_v52 }
 0x6e9   :  { %17208 = vst [vmem:[#allocation37_spill] sm:$0xff] %v14148_v26  ;;  %v3449_v60 = vadd.f32 %v3408_v31, %v14064_v47  ;;  %v3629_v61 = vsel %vm3475_vm4, %v14148_v26, 0.0 }
 0x6ea   :  { %v3410_v8 = vpop.f32.mrf.mxu1  ;;  %3630 = vadd.xlane.f32.xlu1 %v3629_v61  ;;  %v3590_v31 = vsel %vm3475_vm4, %v3544_v16, 0.0  ;;  %v17223_v61 = vld [vmem:[#allocation29_spill] sm:$0xff] }
 0x6eb   :  { %v14154_v24 = vadd.f32 %v3449_v60, %v17209_v41  ;;  %v3543_v8 = vmul.f32 %v17223_v61, %v17223_v61 }
 0x6ec   :  { %v3411_v29 = vpop.f32.mrf.mxu1 }
 0x6ed   :  { %17210 = vst [vmem:[#allocation35_spill] sm:$0xff] %v14154_v24  ;;  %v3450_v21 = vadd.f32 %v3411_v29, %v14068_v36  ;;  %v3632_v19 = vsel %vm3475_vm4, %v14154_v24, 0.0  ;;  %v3587_v29 = vsel %vm3475_vm4, %v3543_v8, 0.0  ;;  %v17235_v8 = vld [vmem:[#allocation45_spill] sm:$0xff] }
 0x6ee   :  { %v3413_v42 = vpop.f32.mrf.mxu1  ;;  %3633 = vadd.xlane.f32.xlu1 %v3632_v19  ;;  %v17224_v19 = vld [vmem:[#allocation33_spill] sm:$0xff] }
 0x6ef   :  { %v14160_v7 = vadd.f32 %v3450_v21, %v17211_v38  ;;  %v3684_v21 = vmul.f32 %v14154_v24, %v14154_v24  ;;  %v3542_v42 = vmul.f32 %v17224_v19, %v17224_v19  ;;  %v17095_v38 = vmov 0.0  }
 0x6f0   :  { %v3416_v47 = vpop.f32.mrf.mxu1  ;;  %3775 = vmatprep.subr.mxu0 %v17095_v38 }
 0x6f1   :  { %17212 = vst [vmem:[#allocation31_spill] sm:$0xff] %v14160_v7  ;;  %v3451_v58 = vadd.f32 %v3416_v47, %v14072_v32  ;;  %v3635_v55 = vsel %vm3475_vm4, %v14160_v7, 0.0  ;;  %v3685_v60 = vmul.f32 %v14160_v7, %v14160_v7  ;;  %v3722_v47 = vsel %vm3475_vm4, %v3684_v21, 0.0 }
 0x6f2   :  { %v3418_v48 = vpop.f32.mrf.mxu1  ;;  %3636 = vadd.xlane.f32.xlu1 %v3635_v55  ;;  %v3683_v55 = vmul.f32 %v14148_v26, %v14148_v26  ;;  %v17243_v26 = vmov 0.0  }
 0x6f3   :  { %v14166_v54 = vadd.f32 %v3451_v58, %v17213_v40  ;;  %v3725_v41 = vsel %vm3475_vm4, %v3685_v60, 0.0  ;;  %v3584_v58 = vsel %vm3475_vm4, %v3542_v42, 0.0  ;;  %v17225_v48 = vld [vmem:[#allocation34_spill] sm:$0xff]  ;;  %v3680_v60 = vmul.f32 %v14130_v39, %v14130_v39 }
 0x6f4   :  { %v3419_v36 = vpop.f32.mrf.mxu1  ;;  %v3541_v40 = vmul.f32 %v17225_v48, %v17225_v48 }
 0x6f5   :  { %17214 = vst [vmem:[#allocation32_spill] sm:$0xff] %v14166_v54  ;;  %v3452_v56 = vadd.f32 %v3419_v36, %v14076_v5  ;;  %v3638_v20 = vsel %vm3475_vm4, %v14166_v54, 0.0  ;;  %v3686_v12 = vmul.f32 %v14166_v54, %v14166_v54  ;;  %v3719_v36 = vsel %vm3475_vm4, %v3683_v55, 0.0 }
 0x6f6   :  { %v3421_v37 = vpop.f32.mrf.mxu1  ;;  %3639 = vadd.xlane.f32.xlu1 %v3638_v20  ;;  %v3682_v20 = vmul.f32 %v14142_v1, %v14142_v1  ;;  %v3710_v21 = vsel %vm3475_vm4, %v3680_v60, 0.0 }
 0x6f7   :  { %v14172_v14 = vadd.f32 %v3452_v56, %v17215_v13  ;;  %v3728_v34 = vsel %vm3475_vm4, %v3686_v12, 0.0  ;;  %v3581_v56 = vsel %vm3475_vm4, %v3541_v40, 0.0  ;;  %v17226_v37 = vld [vmem:[#allocation36_spill] sm:$0xff] }
 0x6f8   :  { %v3424_v32 = vpop.f32.mrf.mxu1  ;;  %v3540_v13 = vmul.f32 %v17226_v37, %v17226_v37  ;;  %v17234_v12 = vld [vmem:[#allocation44_spill] sm:$0xff] }
 0x6f9   :  { %17216 = vst [vmem:[#allocation27_spill] sm:$0xff] %v14172_v14  ;;  %v3453_v2 = vadd.f32 %v3424_v32, %v14080_v28  ;;  %v3641_v27 = vsel %vm3475_vm4, %v14172_v14, 0.0  ;;  %v17219_v28 = vld [vmem:[#allocation28_spill] sm:$0xff]  ;;  %v17227_v32 = vld [vmem:[#allocation38_spill] sm:$0xff]  ;;  %v3536_v16 = vmul.f32 %v17234_v12, %v17234_v12 }
 0x6fa   :  { %v3426_v6 = vpop.f32.mrf.mxu1  ;;  %3642 = vadd.xlane.f32.xlu1 %v3641_v27 }
 0x6fb   :  { %v14178_v43 = vadd.f32 %v3453_v2, %v17217_v35  ;;  %v3539_v2 = vmul.f32 %v17227_v32, %v17227_v32  ;;  %v3716_v6 = vsel %vm3475_vm4, %v3682_v20, 0.0  ;;  %v3578_v35 = vsel %vm3475_vm4, %v3540_v13, 0.0  ;;  %v17237_v20 = vld [vmem:[#allocation47_spill] sm:$0xff] }
 0x6fc   :  { %v3427_v5 = vpop.f32.mrf.mxu1  ;;  %v3533_v13 = vmul.f32 %v17237_v20, %v17237_v20 }
 0x6fd   :  { %17218 = vst [vmem:[#allocation25_spill] sm:$0xff] %v14178_v43  ;;  %v3454_v46 = vadd.f32 %v3427_v5, %v14084_v11  ;;  %v3644_v59 = vsel %vm3475_vm4, %v14178_v43, 0.0  ;;  %v3688_v4 = vmul.f32 %v14178_v43, %v14178_v43  ;;  %v3687_v11 = vmul.f32 %v14172_v14, %v14172_v14 }
 0x6fe   :  { %v3429_v17 = vpop.f32.mrf.mxu1  ;;  %3645 = vadd.xlane.f32.xlu1 %v3644_v59  ;;  %v17228_v59 = vld [vmem:[#allocation53_spill] sm:$0xff] }
 0x6ff   :  { %v14186_v53 = vadd.f32 %v3454_v46, %v17219_v28  ;;  %v3734_v3 = vsel %vm3475_vm4, %v3688_v4, 0.0  ;;  %v3731_v62 = vsel %vm3475_vm4, %v3687_v11, 0.0  ;;  %v3575_v46 = vsel %vm3475_vm4, %v3539_v2, 0.0 }
 0x700   :  { %v3432_v45 = vpop.f32.mrf.mxu1 }
 0x701   :  { %17220 = vst [vmem:[#allocation28_spill] sm:$0xff] %v14186_v53  ;;  %v3647_v44 = vsel %vm3475_vm4, %v14186_v53, 0.0  ;;  %v3455_v27 = vadd.f32 %v3432_v45, %v14088_v22  ;;  %v3689_v5 = vmul.f32 %v14186_v53, %v14186_v53  ;;  %v17231_v45 = vld [vmem:[#allocation51_spill] sm:$0xff] }
 0x702   :  { %v3434_v33 = vpop.f32.mrf.mxu1  ;;  %3735 = vadd.xlane.f32.xlu1 %v3734_v3  ;;  %3648 = vadd.xlane.f32.xlu0 %v3647_v44  ;;  %v17230_v3 = vld [vmem:[#allocation40_spill] sm:$0xff] }
 0x703   :  { %v14235_v4 = vadd.f32 %v3455_v27, %v17228_v59  ;;  %v3737_v28 = vsel %vm3475_vm4, %v3689_v5, 0.0  ;;  %v3538_v22 = vmul.f32 %v17230_v3, %v17230_v3  ;;  %v17233_v33 = vld [vmem:[#allocation42_spill] sm:$0xff]  ;;  %v3677_v5 = vmul.f32 %v14112_v25, %v14112_v25 }
 0x704   :  { %v3435_v57 = vpop.f32.mrf.mxu1  ;;  %v14280_v27 = vld [vmem:[#allocation9 + $0x8] sm:$0xff] }
 0x705   :  { %17229 = vst [vmem:[#allocation30_spill] sm:$0xff] %v14235_v4  ;;  %v3456_v17 = vadd.f32 %v3435_v57, %v14090_v18  ;;  %v3650_v11 = vsel %vm3475_vm4, %v14235_v4, 0.0  ;;  %v3572_v0 = vsel %vm3475_vm4, %v3538_v22, 0.0  ;;  %10020 = vmatprep.mubr.msk.f32.mxu0 %vm3768_vm5, %v14280_v27 }
 0x706   :  { %3732 = vadd.xlane.f32.xlu1 %v3731_v62  ;;  %3594 = vadd.xlane.f32.xlu0 %v3593_v9  ;;  %v3437_v49 = vpop.f32.mrf.mxu1  ;;  %v3537_v62 = vmul.f32 %v17233_v33, %v17233_v33  ;;  %v3681_v9 = vmul.f32 %v14136_v50, %v14136_v50 }
 0x707   :  { %v14242_v44 = vadd.f32 %v3456_v17, %v17231_v45  ;;  %v14256_v49 = vpop.xlane.xlu0 %3519  ;;  %v3676_v45 = vmul.f32 %v14106_v15, %v14106_v15 }
 0x708   :  { %v3569_v57 = vsel %vm3475_vm4, %v3537_v62, 0.0 }
 0x709   :  { %17232 = vst [vmem:[#allocation26_spill] sm:$0xff] %v14242_v44  ;;  %v3653_v18 = vsel %vm3475_vm4, %v14242_v44, 0.0  ;;  %v3698_v62 = vsel %vm3475_vm4, %v3676_v45, 0.0 }
 0x70a   :  { %3729 = vadd.xlane.f32.xlu1 %v3728_v34  ;;  %3591 = vadd.xlane.f32.xlu0 %v3590_v31  ;;  %v3713_v34 = vsel %vm3475_vm4, %v3681_v9, 0.0  ;;  %v3566_v31 = vsel %vm3475_vm4, %v3536_v16, 0.0  ;;  %v17240_v9 = vld [vmem:[#allocation50_spill] sm:$0xff] }
 0x70b   :  { %v3530_v16 = vmul.f32 %v17240_v9, %v17240_v9 }
 0x70d   :  { %v3548_v60 = vsel %vm3475_vm4, %v3530_v16, 0.0 }
 0x70e   :  { %3726 = vadd.xlane.f32.xlu1 %v3725_v41  ;;  %3588 = vadd.xlane.f32.xlu0 %v3587_v29  ;;  %v3535_v41 = vmul.f32 %v17235_v8, %v17235_v8  ;;  %v14264_v29 = vpop.xlane.xlu0 %3516 }
 0x710   :  { %v3563_v42 = vsel %vm3475_vm4, %v3535_v41, 0.0  ;;  %v3674_v41 = vmul.f32 %v14094_v51, %v14094_v51 }
 0x712   :  { %3723 = vadd.xlane.f32.xlu1 %v3722_v47  ;;  %3585 = vadd.xlane.f32.xlu0 %v3584_v58  ;;  %v3679_v47 = vmul.f32 %v14124_v10, %v14124_v10  ;;  %v17236_v58 = vld [vmem:[#allocation46_spill] sm:$0xff]  ;;  %v14278_v2 = vpop.xlane.xlu0 %3513 }
 0x713   :  { %v3534_v55 = vmul.f32 %v17236_v58, %v17236_v58 }
 0x714   :  { %v3707_v40 = vsel %vm3475_vm4, %v3679_v47, 0.0 }
 0x716   :  { %3720 = vadd.xlane.f32.xlu1 %v3719_v36  ;;  %3582 = vadd.xlane.f32.xlu0 %v3581_v56  ;;  %v3560_v36 = vsel %vm3475_vm4, %v3534_v55, 0.0  ;;  %v3678_v56 = vmul.f32 %v14118_v30, %v14118_v30  ;;  %v14290_v17 = vpop.xlane.xlu0 %3510  ;;  %v3692_v55 = vsel %vm3475_vm4, %v3674_v41, 0.0  ;;  %v4608_v41 = vld [vmem:[%s17032_s6 + $0x78] sm:$0xff] }
 0x71a   :  { %3717 = vadd.xlane.f32.xlu1 %v3716_v6  ;;  %3579 = vadd.xlane.f32.xlu0 %v3578_v35  ;;  %v3704_v6 = vsel %vm3475_vm4, %v3678_v56, 0.0  ;;  %v3557_v35 = vsel %vm3475_vm4, %v3533_v13, 0.0  ;;  %v17242_v56 = vld [vmem:[#allocation54_spill] sm:$0xff] }
 0x71b   :  { %v3546_v13 = vmul.f32 %v17242_v56, %v17242_v56 }
 0x71e   :  { %3738 = vadd.xlane.f32.xlu1 %v3737_v28  ;;  %3576 = vadd.xlane.f32.xlu0 %v3575_v46  ;;  %v17238_v46 = vld [vmem:[#allocation48_spill] sm:$0xff]  ;;  %v3701_v28 = vsel %vm3475_vm4, %v3677_v5, 0.0  ;;  %v3690_v5 = vmul.f32 %v14235_v4, %v14235_v4 }
 0x71f   :  { %v3532_v59 = vmul.f32 %v17238_v46, %v17238_v46 }
 0x721   :  { %v3554_v22 = vsel %vm3475_vm4, %v3532_v59, 0.0  ;;  %v3523_v59 = vpop.xlane.xlu1 %3522 }
 0x722   :  { %3651 = vadd.xlane.f32.xlu1 %v3650_v11  ;;  %3573 = vadd.xlane.f32.xlu0 %v3572_v0  ;;  %v17239_v11 = vld [vmem:[#allocation49_spill] sm:$0xff] }
 0x723   :  { %v3531_v0 = vmul.f32 %v17239_v11, %v17239_v11 }
 0x726   :  { %3654 = vadd.xlane.f32.xlu1 %v3653_v18  ;;  %3570 = vadd.xlane.f32.xlu0 %v3569_v57  ;;  %v3551_v18 = vsel %vm3475_vm4, %v3531_v0, 0.0  ;;  %v3675_v57 = vmul.f32 %v14100_v23, %v14100_v23 }
 0x72a   :  { %3714 = vadd.xlane.f32.xlu1 %v3713_v34  ;;  %3567 = vadd.xlane.f32.xlu0 %v3566_v31  ;;  %v14304_v34 = vpop.xlane.xlu0 %3507  ;;  %v3695_v31 = vsel %vm3475_vm4, %v3675_v57, 0.0 }
 0x72e   :  { %3711 = vadd.xlane.f32.xlu1 %v3710_v21  ;;  %3564 = vadd.xlane.f32.xlu0 %v3563_v42  ;;  %v17241_v21 = vld [vmem:[#allocation52_spill] sm:$0xff]  ;;  %v14312_v47 = vpop.xlane.xlu0 %3504 }
 0x72f   :  { %v3547_v42 = vmul.f32 %v17241_v21, %v17241_v21 }
 0x732   :  { %3708 = vadd.xlane.f32.xlu1 %v3707_v40  ;;  %3561 = vadd.xlane.f32.xlu0 %v3560_v36  ;;  %v3599_v40 = vsel %vm3475_vm4, %v3547_v42, 0.0  ;;  %v3691_v36 = vmul.f32 %v14242_v44, %v14242_v44  ;;  %v4598_v44 = vld [vmem:[%s17032_s6 + $0x28] sm:$0xff] }
 0x736   :  { %3705 = vadd.xlane.f32.xlu1 %v3704_v6  ;;  %3558 = vadd.xlane.f32.xlu0 %v3557_v35  ;;  %v3743_v6 = vsel %vm3475_vm4, %v3691_v36, 0.0  ;;  %v3596_v35 = vsel %vm3475_vm4, %v3546_v13, 0.0 }
 0x73a   :  { %3702 = vadd.xlane.f32.xlu1 %v3701_v28  ;;  %3555 = vadd.xlane.f32.xlu0 %v3554_v22  ;;  %v14324_v28 = vpop.xlane.xlu0 %3501  ;;  %v3740_v22 = vsel %vm3475_vm4, %v3690_v5, 0.0 }
 0x73e   :  { %3699 = vadd.xlane.f32.xlu1 %v3698_v62  ;;  %3552 = vadd.xlane.f32.xlu0 %v3551_v18  ;;  %v14329_v0 = vpop.xlane.xlu0 %3498 }
 0x742   :  { %3696 = vadd.xlane.f32.xlu1 %v3695_v31  ;;  %3549 = vadd.xlane.f32.xlu0 %v3548_v60  ;;  %v14333_v18 = vpop.xlane.xlu0 %3495  ;;  %v4607_v31 = vld [vmem:[%s17032_s6 + $0x70] sm:$0xff] }
 0x746   :  { %3693 = vadd.xlane.f32.xlu1 %v3692_v55  ;;  %3600 = vadd.xlane.f32.xlu0 %v3599_v40  ;;  %v14342_v60 = vpop.xlane.xlu0 %3492  ;;  %v4605_v55 = vld [vmem:[%s17032_s6 + $0x60] sm:$0xff]  ;;  %v4606_v40 = vld [vmem:[%s17032_s6 + $0x68] sm:$0xff] }
 0x74a   :  { %3744 = vadd.xlane.f32.xlu1 %v3743_v6  ;;  %3597 = vadd.xlane.f32.xlu0 %v3596_v35  ;;  %v14355_v36 = vpop.xlane.xlu0 %3489  ;;  %v4603_v6 = vld [vmem:[%s17032_s6 + $0x50] sm:$0xff]  ;;  %v4604_v35 = vld [vmem:[%s17032_s6 + $0x58] sm:$0xff] }
 0x74e   :  { %3741 = vadd.xlane.f32.xlu1 %v3740_v22  ;;  %v4601_v22 = vld [vmem:[%s17032_s6 + $0x40] sm:$0xff] }
 0x74f   :  { %v14327_v45 = vpop.xlane.xlu1 %3603 }
 0x753   :  { %v14331_v62 = vpop.xlane.xlu1 %3606 }
 0x757   :  { %v14335_v57 = vpop.xlane.xlu1 %3609 }
 0x75b   :  { %v14337_v16 = vpop.xlane.xlu1 %3612 }
 0x75f   :  { %4683 = vperm.xlu1 %11930, %v4607_v31   ;;  %v14347_v42 = vpop.xlane.xlu1 %3615  ;;  %v14368_v31 = vpop.xlane.xlu0 %3486 }
 0x760   :  { %4688 = vperm.xlu0 %11929, %v4608_v41   ;;  %v4602_v41 = vld [vmem:[%s17032_s6 + $0x48] sm:$0xff] }
 0x763   :  { %4673 = vperm.xlu1 %11930, %v4605_v55   ;;  %v14357_v13 = vpop.xlane.xlu1 %3618 }
 0x764   :  { %4678 = vperm.xlu0 %11929, %v4606_v40   ;;  %v4599_v40 = vld [vmem:[%s17032_s6 + $0x30] sm:$0xff] }
 0x767   :  { %4663 = vperm.xlu1 %11930, %v4603_v6   ;;  %v3622_v5 = vpop.xlane.xlu1 %3621  ;;  %v4600_v6 = vld [vmem:[%s17032_s6 + $0x38] sm:$0xff] }
 0x768   :  { %4668 = vperm.xlu0 %11929, %v4604_v35   ;;  %v14379_v35 = vpop.xlane.xlu0 %3483 }
 0x76b   :  { %4653 = vperm.xlu1 %11930, %v4601_v22   ;;  %v3625_v55 = vpop.xlane.xlu1 %3624 }
 0x76c   :  { %4658 = vperm.xlu0 %11929, %v4602_v41   ;;  %v14384_v41 = vpop.xlane.xlu0 %3480 }
 0x76f   :  { %4643 = vperm.xlu1 %11930, %v4599_v40   ;;  %v3628_v38 = vpop.xlane.xlu1 %3627 }
 0x770   :  { %4648 = vperm.xlu0 %11929, %v4600_v6   ;;  %v14386_v51 = vpop.xlane.xlu0 %3477 }
 0x773   :  { %v3631_v22 = vpop.xlane.xlu1 %3630 }
 0x774   :  { %4638 = vperm.xlu0 %11929, %v4598_v44   ;;  %v14388_v25 = vpop.xlane.xlu0 %3528 }
 0x777   :  { %v3634_v4 = vpop.xlane.xlu1 %3633 }
 0x778   :  { %v14390_v10 = vpop.xlane.xlu0 %3525 }
 0x77b   :  { %v3637_v23 = vpop.xlane.xlu1 %3636 }
 0x77f   :  { %v3640_v15 = vpop.xlane.xlu1 %3639 }
 0x780   :  { %v3668_v54 = vadd.f32 %v3640_v15, %v14278_v2 }
 0x783   :  { %v3643_v30 = vpop.xlane.xlu1 %3642 }
 0x784   :  { %v3669_v7 = vadd.f32 %v3643_v30, %v14264_v29  ;;  %v3662_v29 = vadd.f32 %v3622_v5, %v14333_v18 }
 0x787   :  { %v3646_v40 = vpop.xlane.xlu1 %3645 }
 0x788   :  { %v3670_v1 = vadd.f32 %v3646_v40, %v14256_v49  ;;  %v3666_v49 = vadd.f32 %v3634_v4, %v14304_v34  ;;  %v3663_v4 = vadd.f32 %v3625_v55, %v14329_v0  ;;  %v3660_v34 = vadd.f32 %v14347_v42, %v14355_v36  ;;  %v14451_v55 = vld [vmem:[#allocation9] sm:$0xff] }
 0x789   :  { %v3658_v0 = vadd.f32 %v14335_v57, %v14379_v35  ;;  %v3657_v42 = vadd.f32 %v14331_v62, %v14384_v41 }
 0x78b   :  { %v14392_v6 = vpop.xlane.xlu1 %3735  ;;  %v3649_v39 = vpop.xlane.xlu0 %3648 }
 0x78c   :  { %v3671_v50 = vadd.f32 %v3649_v39, %v3523_v59 }
 0x78e   :  { %3776 = vmatpush1.msra.mxu0 %v3671_v50  ;;  %v3667_v50 = vadd.f32 %v3637_v23, %v14290_v17 }
 0x78f   :  { %v14395_v44 = vpop.xlane.xlu1 %3732  ;;  %3777 = vmatprep.subr.mxu0 %v17243_v26  ;;  %v14398_v24 = vpop.xlane.xlu0 %3594 }
 0x790   :  { %3778 = vmatpush1.msra.mxu0 %v3670_v1  ;;  %v3665_v1 = vadd.f32 %v3631_v22, %v14312_v47 }
 0x791   :  { %3779 = vmatprep.subr.mxu0 %v17243_v26 }
 0x792   :  { %3780 = vmatpush1.msra.mxu0 %v3669_v7  ;;  %v3664_v7 = vadd.f32 %v3628_v38, %v14324_v28  ;;  %v3661_v38 = vadd.f32 %v14357_v13, %v14342_v60  ;;  %v3659_v28 = vadd.f32 %v14337_v16, %v14368_v31  ;;  %v3656_v16 = vadd.f32 %v14327_v45, %v14386_v51  ;;  %v14454_v45 = vld [vmem:[#allocation9 + $0x18] sm:$0xf] }
 0x793   :  { %v14403_v14 = vpop.xlane.xlu1 %3729  ;;  %3781 = vmatprep.subr.mxu0 %v17243_v26  ;;  %v14406_v39 = vpop.xlane.xlu0 %3591 }
 0x794   :  { %3782 = vmatpush1.msra.mxu0 %v3668_v54 }
 0x795   :  { %3783 = vmatprep.subr.mxu0 %v17243_v26 }
 0x796   :  { %3784 = vmatpush1.msra.mxu0 %v3667_v50 }
 0x797   :  { %v14411_v30 = vpop.xlane.xlu1 %3726  ;;  %3785 = vmatprep.subr.mxu0 %v17243_v26  ;;  %v14414_v15 = vpop.xlane.xlu0 %3588 }
 0x798   :  { %3786 = vmatpush1.msra.mxu0 %v3666_v49 }
 0x799   :  { %3787 = vmatprep.subr.mxu0 %v17243_v26 }
 0x79a   :  { %3788 = vmatpush1.msra.mxu0 %v3665_v1 }
 0x79b   :  { %v14419_v23 = vpop.xlane.xlu1 %3723  ;;  %3789 = vmatprep.subr.mxu0 %v17243_v26  ;;  %v3586_v54 = vpop.xlane.xlu0 %3585 }
 0x79c   :  { %3790 = vmatpush1.msra.mxu0 %v3664_v7 }
 0x79d   :  { %3791 = vmatprep.subr.mxu0 %v17243_v26 }
 0x79e   :  { %3792 = vmatpush1.msra.mxu0 %v3663_v4 }
 0x79f   :  { %v14425_v2 = vpop.xlane.xlu1 %3720  ;;  %3793 = vmatprep.subr.mxu0 %v17243_v26  ;;  %v3583_v17 = vpop.xlane.xlu0 %3582 }
 0x7a0   :  { %3794 = vmatpush1.msra.mxu0 %v3662_v29  ;;  %v3757_v49 = vadd.f32 %v14411_v30, %v3583_v17 }
 0x7a1   :  { %3795 = vmatprep.subr.mxu0 %v17243_v26 }
 0x7a2   :  { %3796 = vmatpush1.msra.mxu0 %v3661_v38 }
 0x7a3   :  { %v14433_v47 = vpop.xlane.xlu1 %3717  ;;  %3797 = vmatprep.subr.mxu0 %v17243_v26  ;;  %v3580_v59 = vpop.xlane.xlu0 %3579 }
 0x7a4   :  { %3798 = vmatpush1.msra.mxu0 %v3660_v34 }
 0x7a5   :  { %3799 = vmatprep.subr.mxu0 %v17243_v26 }
 0x7a6   :  { %3800 = vmatpush1.msra.mxu0 %v3659_v28 }
 0x7a7   :  { %v3739_v18 = vpop.xlane.xlu1 %3738  ;;  %3801 = vmatprep.subr.mxu0 %v17243_v26  ;;  %v3577_v60 = vpop.xlane.xlu0 %3576 }
 0x7a8   :  { %3802 = vmatpush1.msra.mxu0 %v3658_v0  ;;  %v3761_v22 = vadd.f32 %v3739_v18, %v14398_v24  ;;  %v3759_v24 = vadd.f32 %v14395_v44, %v14414_v15  ;;  %v3756_v44 = vadd.f32 %v14419_v23, %v3580_v59  ;;  %v3755_v1 = vadd.f32 %v14425_v2, %v3577_v60 }
 0x7a9   :  { %3803 = vmatprep.subr.mxu0 %v17243_v26 }
 0x7aa   :  { %3804 = vmatpush1.msra.mxu0 %v3657_v42 }
 0x7ab   :  { %v3652_v36 = vpop.xlane.xlu1 %3651  ;;  %3805 = vmatprep.subr.mxu0 %v17243_v26  ;;  %v3574_v13 = vpop.xlane.xlu0 %3573 }
 0x7ac   :  { %3806 = vmatpush1.msra.mxu0 %v3656_v16  ;;  %v3672_v62 = vadd.f32 %v3652_v36, %v14390_v10  ;;  %v14463_v10 = vld [vmem:[#allocation9 + $0x10] sm:$0xf] }
 0x7ad   :  { %3835 = vmatprep.subr.mxu0 %v17243_v26 }
 0x7af   :  { %v3655_v57 = vpop.xlane.xlu1 %3654  ;;  %v3571_v5 = vpop.xlane.xlu0 %3570 }
 0x7b0   :  { %v3673_v31 = vadd.f32 %v3655_v57, %v14388_v25  ;;  %v3760_v25 = vadd.f32 %v14392_v6, %v14406_v39  ;;  %v3758_v6 = vadd.f32 %v14403_v14, %v3586_v54 }
 0x7b2   :  { %3836 = vmatpush2.msra.mxu0 %v3673_v31 }
 0x7b3   :  { %v3715_v35 = vpop.xlane.xlu1 %3714  ;;  %3837 = vmatprep.subr.mxu0 %v17243_v26  ;;  %v3568_v51 = vpop.xlane.xlu0 %3567 }
 0x7b4   :  { %3838 = vmatpush2.msra.mxu0 %v3672_v62  ;;  %v3753_v54 = vadd.f32 %v3715_v35, %v3571_v5  ;;  %v3935_v5 = vld [vmem:[#allocation10] sm:$0xff] }
 0x7b5   :  { %3840 = vmatmul.mubr.f32.vlgmr.msra.gmra.mxu0 %v14451_v55  ;;  %3852 = vmatprep.subr.mxu0 %v17243_v26 }
 0x7b6   :  { %3853 = vmatpush1.msra.mxu0 %v3761_v22  ;;  %10021 = vmatprep.mubr.msk.f32.mxu0 %vm3768_vm5, %v14454_v45 }
 0x7b7   :  { %v3712_v41 = vpop.xlane.xlu1 %3711  ;;  %3854 = vmatprep.subr.mxu0 %v17243_v26  ;;  %v3565_v40 = vpop.xlane.xlu0 %3564  ;;  %11413 = vmatprep.mubr.msk.f32.mxu1 %vm3475_vm4, %v3935_v5 }
 0x7b8   :  { %3855 = vmatpush1.msra.mxu0 %v3760_v25  ;;  %v3752_v23 = vadd.f32 %v3712_v41, %v3568_v51  ;;  %v3939_v41 = vld [vmem:[#allocation10 + $0x20] sm:$0xff] }
 0x7b9   :  { %3845 = vmatmul.mubr.f32.gmra.mxu0 %v14463_v10  ;;  %3856 = vmatprep.subr.mxu0 %v17243_v26 }
 0x7ba   :  { %3857 = vmatpush1.msra.mxu0 %v3759_v24  ;;  %10022 = vmatprep.mubr.msk.f32.mxu0 %vm3768_vm5, %v14280_v27  ;;  %v3754_v27 = vadd.f32 %v14433_v47, %v3574_v13  ;;  %v3941_v24 = vld [vmem:[#allocation10 + $0x30] sm:$0xff] }
 0x7bb   :  { %v3709_v39 = vpop.xlane.xlu1 %3708  ;;  %3858 = vmatprep.subr.mxu0 %v17243_v26  ;;  %v3562_v50 = vpop.xlane.xlu0 %3561 }
 0x7bc   :  { %3859 = vmatpush1.msra.mxu0 %v3758_v6  ;;  %v3751_v2 = vadd.f32 %v3709_v39, %v3565_v40  ;;  %v3940_v40 = vld [vmem:[#allocation10 + $0x28] sm:$0xff]  ;;  %v3942_v6 = vld [vmem:[#allocation10 + $0x38] sm:$0xff]  ;;  %v3943_v39 = vld [vmem:[#allocation10 + $0x40] sm:$0xff] }
 0x7bd   :  { %3860 = vmatprep.subr.mxu0 %v17243_v26 }
 0x7be   :  { %3861 = vmatpush1.msra.mxu0 %v3757_v49  ;;  %v3945_v49 = vld [vmem:[#allocation10 + $0x50] sm:$0xff] }
 0x7bf   :  { %v3706_v15 = vpop.xlane.xlu1 %3705  ;;  %3862 = vmatprep.subr.mxu0 %v17243_v26  ;;  %v3559_v14 = vpop.xlane.xlu0 %3558 }
 0x7c0   :  { %3863 = vmatpush1.msra.mxu0 %v3756_v44  ;;  %v3750_v17 = vadd.f32 %v3706_v15, %v3562_v50  ;;  %v3944_v50 = vld [vmem:[#allocation10 + $0x48] sm:$0xff]  ;;  %v3946_v44 = vld [vmem:[#allocation10 + $0x58] sm:$0xff]  ;;  %v3947_v15 = vld [vmem:[#allocation10 + $0x60] sm:$0xff] }
 0x7c1   :  { %3864 = vmatprep.subr.mxu0 %v17243_v26 }
 0x7c2   :  { %3865 = vmatpush1.msra.mxu0 %v3755_v1  ;;  %v3949_v1 = vld [vmem:[#allocation10 + $0x70] sm:$0xff] }
 0x7c3   :  { %v3703_v7 = vpop.xlane.xlu1 %3702  ;;  %3866 = vmatprep.subr.mxu0 %v17243_v26  ;;  %v3556_v30 = vpop.xlane.xlu0 %3555 }
 0x7c4   :  { %3867 = vmatpush1.msra.mxu0 %v3754_v27  ;;  %v3749_v47 = vadd.f32 %v3703_v7, %v3559_v14  ;;  %v3948_v14 = vld [vmem:[#allocation10 + $0x68] sm:$0xff]  ;;  %v3950_v27 = vld [vmem:[#allocation10 + $0x78] sm:$0xff] }
 0x7c5   :  { %3868 = vmatprep.subr.mxu0 %v17243_v26 }
 0x7c6   :  { %3869 = vmatpush1.msra.mxu0 %v3753_v54 }
 0x7c7   :  { %v3700_v4 = vpop.xlane.xlu1 %3699  ;;  %3870 = vmatprep.subr.mxu0 %v17243_v26  ;;  %v3553_v29 = vpop.xlane.xlu0 %3552 }
 0x7c8   :  { %3871 = vmatpush1.msra.mxu0 %v3752_v23  ;;  %v3748_v59 = vadd.f32 %v3700_v4, %v3556_v30  ;;  %v3951_v30 = vld [vmem:[#allocation10 + $0x80] sm:$0xff] }
 0x7c9   :  { %3872 = vmatprep.subr.mxu0 %v17243_v26 }
 0x7ca   :  { %3873 = vmatpush1.msra.mxu0 %v3751_v2 }
 0x7cb   :  { %v3697_v38 = vpop.xlane.xlu1 %3696  ;;  %3874 = vmatprep.subr.mxu0 %v17243_v26  ;;  %v3550_v34 = vpop.xlane.xlu0 %3549 }
 0x7cc   :  { %3875 = vmatpush1.msra.mxu0 %v3750_v17  ;;  %v3747_v0 = vadd.f32 %v3697_v38, %v3553_v29  ;;  %v3952_v29 = vld [vmem:[#allocation10 + $0x88] sm:$0xff] }
 0x7cd   :  { %3876 = vmatprep.subr.mxu0 %v17243_v26 }
 0x7ce   :  { %3877 = vmatpush1.msra.mxu0 %v3749_v47 }
 0x7cf   :  { %v3694_v28 = vpop.xlane.xlu1 %3693  ;;  %3878 = vmatprep.subr.mxu0 %v17243_v26  ;;  %v3601_v18 = vpop.xlane.xlu0 %3600 }
 0x7d0   :  { %3879 = vmatpush1.msra.mxu0 %v3748_v59  ;;  %v3746_v60 = vadd.f32 %v3694_v28, %v3550_v34 }
 0x7d1   :  { %3880 = vmatprep.subr.mxu0 %v17243_v26 }
 0x7d2   :  { %3881 = vmatpush1.msra.mxu0 %v3747_v0 }
 0x7d3   :  { %v3745_v42 = vpop.xlane.xlu1 %3744  ;;  %3882 = vmatprep.subr.mxu0 %v17243_v26  ;;  %v3598_v36 = vpop.xlane.xlu0 %3597 }
 0x7d4   :  { %v3763_v16 = vadd.f32 %v3745_v42, %v3601_v18  ;;  %3883 = vmatpush1.msra.mxu0 %v3746_v60 }
 0x7d5   :  { %3912 = vmatprep.subr.mxu0 %v17243_v26 }
 0x7d6   :  { %3913 = vmatpush2.msra.mxu0 %v3763_v16 }
 0x7d7   :  { %v3742_v13 = vpop.xlane.xlu1 %3741  ;;  %3914 = vmatprep.subr.mxu0 %v17243_v26 }
 0x7d8   :  { %v3762_v57 = vadd.f32 %v3742_v13, %v3598_v36 }
 0x7da   :  { %3915 = vmatpush2.msra.mxu0 %v3762_v57 }
 0x7db   :  { %3917 = vmatmul.mubr.f32.vlgmr.msra.gmra.mxu0 %v14451_v55  ;;  %v3936_v55 = vld [vmem:[#allocation10 + $0x8] sm:$0xff] }
 0x7dc   :  { %10023 = vmatprep.mubr.msk.f32.mxu0 %vm3768_vm5, %v14454_v45  ;;  %v3937_v45 = vld [vmem:[#allocation10 + $0x10] sm:$0xff] }
 0x7df   :  { %3922 = vmatmul.mubr.f32.gmra.mxu0 %v14463_v10  ;;  %v3938_v10 = vld [vmem:[#allocation10 + $0x18] sm:$0xff] }
 0x7e0   :  { %11444 = vmatprep.mubr.msk.f32.mxu0 %vm3475_vm4, %v3935_v5 }
 0x875   :  { %v3841_v31 = vpop.f32.mrf.mxu0 }
 0x876   :  { %v3850_v25 = vmul.f32 0.0034722222, %v3841_v31 }
 0x877   :  { %v3843_v62 = vpop.f32.mrf.mxu0 }
 0x878   :  { %v3929_v2 = vmul.f32 %v3850_v25, %v3850_v25 }
 0x879   :  { %v3846_v35 = vpop.f32.mrf.mxu0 }
 0x87a   :  { %v3851_v51 = vmul.f32 0.0034722222, %v3846_v35 }
 0x87b   :  { %v3848_v22 = vpop.f32.mrf.mxu0 }
 0x87c   :  { %11409 = vmatprep.subr.msk.mxu1 %vm571_vm1, %v3851_v51  ;;  %v3930_v38 = vmul.f32 %v3851_v51, %v3851_v51 }
 0x87d   :  { %11410 = vmatpush3.msk.msra.mxu1 %vm571_vm1, %v3851_v51 }
 0x87e   :  { %11411 = vmatprep.subr.mxu1 %v3850_v25 }
 0x87f   :  { %11412 = vmatpush3.msra.mxu1 %v3850_v25 }
 0x880   :  { %11414 = vmatmul.mubr.msk.f32.vlgmr.msra.gmra.mxu1 %vm3475_vm4, %v3936_v55  ;;  %4989 = vmatprep.subr.mxu1 %v17243_v26 }
 0x881   :  { %11416 = vmatprep.mubr.msk.f32.mxu1 %vm3475_vm4, %v3937_v45 }
 0x884   :  { %11417 = vmatmul.mubr.msk.f32.gmra.mxu1 %vm3475_vm4, %v3938_v10 }
 0x885   :  { %11419 = vmatprep.mubr.msk.f32.mxu1 %vm3475_vm4, %v3939_v41 }
 0x888   :  { %11420 = vmatmul.mubr.msk.f32.gmra.mxu1 %vm3475_vm4, %v3940_v40 }
 0x889   :  { %11422 = vmatprep.mubr.msk.f32.mxu1 %vm3475_vm4, %v3941_v24 }
 0x88c   :  { %11423 = vmatmul.mubr.msk.f32.gmra.mxu1 %vm3475_vm4, %v3942_v6 }
 0x88d   :  { %11425 = vmatprep.mubr.msk.f32.mxu1 %vm3475_vm4, %v3943_v39 }
 0x890   :  { %11426 = vmatmul.mubr.msk.f32.gmra.mxu1 %vm3475_vm4, %v3944_v50 }
 0x891   :  { %11428 = vmatprep.mubr.msk.f32.mxu1 %vm3475_vm4, %v3945_v49 }
 0x894   :  { %11429 = vmatmul.mubr.msk.f32.gmra.mxu1 %vm3475_vm4, %v3946_v44 }
 0x895   :  { %11431 = vmatprep.mubr.msk.f32.mxu1 %vm3475_vm4, %v3947_v15 }
 0x898   :  { %11432 = vmatmul.mubr.msk.f32.gmra.mxu1 %vm3475_vm4, %v3948_v14 }
 0x899   :  { %11434 = vmatprep.mubr.msk.f32.mxu1 %vm3475_vm4, %v3949_v1 }
 0x89b   :  { %v3918_v7 = vpop.f32.mrf.mxu0 }
 0x89c   :  { %11435 = vmatmul.mubr.msk.f32.gmra.mxu1 %vm3475_vm4, %v3950_v27  ;;  %v3927_v23 = vmul.f32 0.0034722222, %v3918_v7 }
 0x89d   :  { %v3920_v54 = vpop.f32.mrf.mxu0  ;;  %11437 = vmatprep.mubr.msk.f32.mxu1 %vm3475_vm4, %v3951_v30 }
 0x89e   :  { %v3931_v47 = vsub.f32 %v3927_v23, %v3929_v2  ;;  %v4168_v23 = vld [vmem:[%s17031_s5 + $0x18] sm:$0xff] }
 0x89f   :  { %v3923_v4 = vpop.f32.mrf.mxu0 }
 0x8a0   :  { %v3928_v17 = vmul.f32 0.0034722222, %v3923_v4  ;;  %11438 = vmatmul.mubr.msk.f32.gmra.mxu1 %vm3475_vm4, %v3952_v29  ;;  %v3933_v0 = vmax.f32 %v3931_v47, 0.0  ;;  %v4170_v47 = vld [vmem:[%s17031_s5 + $0x28] sm:$0xff] }
 0x8a1   :  { %v3925_v34 = vpop.f32.mrf.mxu0 }
 0x8a2   :  { %v3932_v59 = vsub.f32 %v3928_v17, %v3930_v38 }
 0x8a4   :  { %v3934_v28 = vmax.f32 %v3932_v59, 0.0 }
 0x8a6   :  { %11440 = vmatprep.subr.msk.mxu0 %vm571_vm1, %v3934_v28 }
 0x8a7   :  { %11441 = vmatpush3.msk.msra.mxu0 %vm571_vm1, %v3934_v28 }
 0x8a8   :  { %11442 = vmatprep.subr.mxu0 %v3933_v0 }
 0x8a9   :  { %11443 = vmatpush3.msra.mxu0 %v3933_v0 }
 0x8aa   :  { %11445 = vmatmul.mubr.msk.f32.vlgmr.msra.gmra.mxu0 %vm3475_vm4, %v3936_v55 }
 0x8ab   :  { %11447 = vmatprep.mubr.msk.f32.mxu0 %vm3475_vm4, %v3937_v45 }
 0x8ae   :  { %11448 = vmatmul.mubr.msk.f32.gmra.mxu0 %vm3475_vm4, %v3938_v10 }
 0x8af   :  { %11450 = vmatprep.mubr.msk.f32.mxu0 %vm3475_vm4, %v3939_v41 }
 0x8b2   :  { %11451 = vmatmul.mubr.msk.f32.gmra.mxu0 %vm3475_vm4, %v3940_v40 }
 0x8b3   :  { %11453 = vmatprep.mubr.msk.f32.mxu0 %vm3475_vm4, %v3941_v24 }
 0x8b6   :  { %11454 = vmatmul.mubr.msk.f32.gmra.mxu0 %vm3475_vm4, %v3942_v6 }
 0x8b7   :  { %11456 = vmatprep.mubr.msk.f32.mxu0 %vm3475_vm4, %v3943_v39 }
 0x8ba   :  { %11457 = vmatmul.mubr.msk.f32.gmra.mxu0 %vm3475_vm4, %v3944_v50 }
 0x8bb   :  { %11459 = vmatprep.mubr.msk.f32.mxu0 %vm3475_vm4, %v3945_v49 }
 0x8be   :  { %11460 = vmatmul.mubr.msk.f32.gmra.mxu0 %vm3475_vm4, %v3946_v44 }
 0x8bf   :  { %11462 = vmatprep.mubr.msk.f32.mxu0 %vm3475_vm4, %v3947_v15 }
 0x8c2   :  { %11463 = vmatmul.mubr.msk.f32.gmra.mxu0 %vm3475_vm4, %v3948_v14 }
 0x8c3   :  { %11465 = vmatprep.mubr.msk.f32.mxu0 %vm3475_vm4, %v3949_v1 }
 0x8c6   :  { %11466 = vmatmul.mubr.msk.f32.gmra.mxu0 %vm3475_vm4, %v3950_v27 }
 0x8c7   :  { %11468 = vmatprep.mubr.msk.f32.mxu0 %vm3475_vm4, %v3951_v30 }
 0x8ca   :  { %11469 = vmatmul.mubr.msk.f32.gmra.mxu0 %vm3475_vm4, %v3952_v29 }
 0x940   :  { %v14537_v18 = vpop.f32.mrf.mxu1 }
 0x942   :  { %v14539_v60 = vpop.f32.mrf.mxu1 }
 0x944   :  { %v11418_v42 = vpop.f32.mrf.mxu1 }
 0x945   :  { %4394 = vperm.xlu0 %11929, %v11418_v42   ;;  %v4169_v42 = vld [vmem:[%s17031_s5 + $0x20] sm:$0xff] }
 0x946   :  { %v4086_v16 = vpop.f32.mrf.mxu1 }
 0x947   :  { %4389 = vperm.xlu1 %11930, %v4086_v16  }
 0x948   :  { %v11421_v36 = vpop.f32.mrf.mxu1 }
 0x949   :  { %4404 = vperm.xlu0 %11929, %v11421_v36  }
 0x94a   :  { %v4096_v13 = vpop.f32.mrf.mxu1 }
 0x94b   :  { %4399 = vperm.xlu1 %11930, %v4096_v13  }
 0x94c   :  { %v11424_v57 = vpop.f32.mrf.mxu1 }
 0x94d   :  { %4414 = vperm.xlu0 %11929, %v11424_v57  }
 0x94e   :  { %v4106_v5 = vpop.f32.mrf.mxu1 }
 0x94f   :  { %4409 = vperm.xlu1 %11930, %v4106_v5   ;;  %v4172_v5 = vld [vmem:[%s17031_s5 + $0x38] sm:$0xff] }
 0x950   :  { %v11427_v31 = vpop.f32.mrf.mxu1 }
 0x951   :  { %4424 = vperm.xlu0 %11929, %v11427_v31  }
 0x952   :  { %v4116_v62 = vpop.f32.mrf.mxu1 }
 0x953   :  { %4419 = vperm.xlu1 %11930, %v4116_v62  }
 0x954   :  { %v11430_v35 = vpop.f32.mrf.mxu1 }
 0x955   :  { %4434 = vperm.xlu0 %11929, %v11430_v35  }
 0x956   :  { %v4126_v51 = vpop.f32.mrf.mxu1 }
 0x957   :  { %4429 = vperm.xlu1 %11930, %v4126_v51  }
 0x958   :  { %v11433_v22 = vpop.f32.mrf.mxu1 }
 0x959   :  { %4444 = vperm.xlu0 %11929, %v11433_v22   ;;  %v4171_v22 = vld [vmem:[%s17031_s5 + $0x30] sm:$0xff] }
 0x95a   :  { %v4136_v25 = vpop.f32.mrf.mxu1 }
 0x95b   :  { %4439 = vperm.xlu1 %11930, %v4136_v25  }
 0x95c   :  { %v11436_v55 = vpop.f32.mrf.mxu1 }
 0x95d   :  { %4454 = vperm.xlu0 %11929, %v11436_v55  }
 0x95e   :  { %v4146_v45 = vpop.f32.mrf.mxu1 }
 0x95f   :  { %4449 = vperm.xlu1 %11930, %v4146_v45  }
 0x96a   :  { %v11446_v10 = vpop.f32.mrf.mxu0 }
 0x96c   :  { %v14541_v41 = vpop.f32.mrf.mxu0 }
 0x96e   :  { %v11449_v40 = vpop.f32.mrf.mxu0 }
 0x96f   :  { %v4268_v24 = vadd.f32 1e-05, %v11449_v40 }
 0x970   :  { %v14543_v6 = vpop.f32.mrf.mxu0 }
 0x971   :  { %12166 = vrsqrt.f32 %v4268_v24  ;;  %v4174_v24 = vld [vmem:[%s17031_s5 + $0x48] sm:$0xff] }
 0x972   :  { %v11452_v39 = vpop.f32.mrf.mxu0 }
 0x973   :  { %v4278_v50 = vadd.f32 1e-05, %v11452_v39 }
 0x974   :  { %v4272_v49 = vpop.f32.mrf.mxu0 }
 0x975   :  { %12168 = vrsqrt.f32 %v4278_v50  ;;  %v4273_v44 = vadd.f32 1e-05, %v4272_v49 }
 0x976   :  { %v11455_v15 = vpop.f32.mrf.mxu0 }
 0x977   :  { %12170 = vrsqrt.f32 %v4273_v44  ;;  %v4288_v14 = vadd.f32 1e-05, %v11455_v15  ;;  %v4173_v44 = vld [vmem:[%s17031_s5 + $0x40] sm:$0xff]  ;;  %v4258_v15 = vadd.f32 1e-05, %v11446_v10  ;;  %v4178_v10 = vld [vmem:[%s17031_s5 + $0x68] sm:$0xff] }
 0x978   :  { %v4282_v1 = vpop.f32.mrf.mxu0 }
 0x979   :  { %12172 = vrsqrt.f32 %v4288_v14  ;;  %v4283_v27 = vadd.f32 1e-05, %v4282_v1 }
 0x97a   :  { %v11458_v7 = vpop.f32.mrf.mxu0 }
 0x97b   :  { %12174 = vrsqrt.f32 %v4283_v27  ;;  %v4298_v30 = vadd.f32 1e-05, %v11458_v7  ;;  %v4176_v27 = vld [vmem:[%s17031_s5 + $0x58] sm:$0xff] }
 0x97c   :  { %v4292_v54 = vpop.f32.mrf.mxu0 }
 0x97d   :  { %12176 = vrsqrt.f32 %v4298_v30  ;;  %v4293_v4 = vadd.f32 1e-05, %v4292_v54  ;;  %v4175_v54 = vld [vmem:[%s17031_s5 + $0x50] sm:$0xff] }
 0x97e   :  { %v12167_v29 = vpop.eup %12166  ;;  %v11461_v2 = vpop.f32.mrf.mxu0 }
 0x97f   :  { %12178 = vrsqrt.f32 %v4293_v4  ;;  %v4308_v17 = vadd.f32 1e-05, %v11461_v2  ;;  %v4362_v38 = vmul.f32 %v12167_v29, %v4168_v23  ;;  %v4263_v29 = vadd.f32 1e-05, %v14543_v6 }
 0x980   :  { %v4302_v34 = vpop.f32.mrf.mxu0 }
 0x981   :  { %12180 = vrsqrt.f32 %v4308_v17  ;;  %v4303_v59 = vadd.f32 1e-05, %v4302_v34  ;;  %4502 = vperm.xlu0 %11929, %v4362_v38   ;;  %v4177_v38 = vld [vmem:[%s17031_s5 + $0x60] sm:$0xff] }
 0x982   :  { %v12169_v28 = vpop.eup %12168  ;;  %v11464_v0 = vpop.f32.mrf.mxu0 }
 0x983   :  { %12182 = vrsqrt.f32 %v4303_v59  ;;  %v4318_v16 = vadd.f32 1e-05, %v11464_v0  ;;  %v4364_v36 = vmul.f32 %v12169_v28, %v4170_v47  ;;  %v4180_v28 = vld [vmem:[%s17031_s5 + $0x78] sm:$0xff] }
 0x984   :  { %v12171_v13 = vpop.eup %12170  ;;  %v4312_v57 = vpop.f32.mrf.mxu0 }
 0x985   :  { %12184 = vrsqrt.f32 %v4318_v16  ;;  %v4313_v31 = vadd.f32 1e-05, %v4312_v57  ;;  %4512 = vperm.xlu0 %11929, %v4364_v36   ;;  %v4363_v62 = vmul.f32 %v12171_v13, %v4169_v42 }
 0x986   :  { %v12173_v35 = vpop.eup %12172  ;;  %v11467_v51 = vpop.f32.mrf.mxu0 }
 0x987   :  { %12186 = vrsqrt.f32 %v4313_v31  ;;  %v4328_v25 = vadd.f32 1e-05, %v11467_v51  ;;  %4507 = vperm.xlu1 %11930, %v4363_v62   ;;  %v4366_v55 = vmul.f32 %v12173_v35, %v4172_v5  ;;  %v4596_v5 = vld [vmem:[%s17032_s6 + $0x18] sm:$0xff]  ;;  %v4179_v31 = vld [vmem:[%s17031_s5 + $0x70] sm:$0xff]  ;;  %v4166_v35 = vld [vmem:[%s17031_s5 + $0x8] sm:$0xff] }
 0x988   :  { %v12175_v45 = vpop.eup %12174  ;;  %v4322_v40 = vpop.f32.mrf.mxu0  ;;  %v4253_v51 = vadd.f32 1e-05, %v14541_v41 }
 0x989   :  { %12188 = vrsqrt.f32 %v4328_v25  ;;  %v4323_v39 = vadd.f32 1e-05, %v4322_v40  ;;  %4522 = vperm.xlu0 %11929, %v4366_v55   ;;  %v4365_v50 = vmul.f32 %v12175_v45, %v4171_v22  ;;  %v4597_v25 = vld [vmem:[%s17032_s6 + $0x20] sm:$0xff]  ;;  %v11439_v45 = vpop.f32.mrf.mxu1  ;;  %v4167_v40 = vld [vmem:[%s17031_s5 + $0x10] sm:$0xff] }
 0x98a   :  { %v12177_v49 = vpop.eup %12176  ;;  %v11470_v34 = vpop.f32.mrf.mxu0 }
 0x98b   :  { %4517 = vperm.xlu1 %11930, %v4365_v50   ;;  %v4368_v14 = vmul.f32 %v12177_v49, %v4174_v24  ;;  %12190 = vrsqrt.f32 %v4323_v39  ;;  %v4338_v42 = vadd.f32 1e-05, %v11470_v34  ;;  %v4594_v39 = vld [vmem:[%s17032_s6 + $0x8] sm:$0xff] }
 0x98c   :  { %v12179_v1 = vpop.eup %12178  ;;  %12192 = vrsqrt.f32 %v4258_v15  ;;  %v4332_v16 = vpop.f32.mrf.mxu0  ;;  %v4182_v50 = vld [vmem:[%s17031_s5 + $0x88] sm:$0xff]  ;;  %v4181_v15 = vld [vmem:[%s17031_s5 + $0x80] sm:$0xff] }
 0x98d   :  { %4532 = vperm.xlu0 %11929, %v4368_v14   ;;  %v4367_v7 = vmul.f32 %v12179_v1, %v4173_v44  ;;  %12194 = vrsqrt.f32 %v4263_v29  ;;  %v4333_v13 = vadd.f32 1e-05, %v4332_v16  ;;  %v4595_v14 = vld [vmem:[%s17032_s6 + $0x10] sm:$0xff]  ;;  %v4610_v29 = vld [vmem:[%s17032_s6 + $0x88] sm:$0xff] }
 0x98e   :  { %v12181_v30 = vpop.eup %12180  ;;  %12196 = vrsqrt.f32 %v4338_v42 }
 0x98f   :  { %4527 = vperm.xlu1 %11930, %v4367_v7   ;;  %v4370_v23 = vmul.f32 %v12181_v30, %v4176_v27  ;;  %12198 = vrsqrt.f32 %v4333_v13  ;;  %v4165_v7 = vld [vmem:[%s17031_s5] sm:$0xff] }
 0x990   :  { %v12183_v4 = vpop.eup %12182  ;;  %12200 = vrsqrt.f32 %v4253_v51 }
 0x991   :  { %4542 = vperm.xlu0 %11929, %v4370_v23   ;;  %v4369_v2 = vmul.f32 %v12183_v4, %v4175_v54  ;;  %v14615_v54 = vpop.permute.xlu0 %4688  ;;  %v4156_v23 = vpop.f32.mrf.mxu1 }
 0x992   :  { %v12185_v17 = vpop.eup %12184 }
 0x993   :  { %4537 = vperm.xlu1 %11930, %v4369_v2   ;;  %v4372_v47 = vmul.f32 %v12185_v17, %v4178_v10  ;;  %v4593_v10 = vld [vmem:[%s17032_s6] sm:$0xff]  ;;  %v14628_v2 = vpop.permute.xlu1 %4683 }
 0x994   :  { %v12187_v59 = vpop.eup %12186 }
 0x995   :  { %4552 = vperm.xlu0 %11929, %v4372_v47   ;;  %v4371_v0 = vmul.f32 %v12187_v59, %v4177_v38  ;;  %v14620_v4 = vpop.permute.xlu0 %4678  ;;  %v4810_v38 = vld [vmem:[#allocation12 + $0x8] sm:$0xff] }
 0x996   :  { %v12189_v6 = vpop.eup %12188  ;;  %10062 = vmatprep.mubr.msk.f32.mxu1 %vm3768_vm5, %v4810_v38 }
 0x997   :  { %4547 = vperm.xlu1 %11930, %v4371_v0   ;;  %v4374_v36 = vmul.f32 %v12189_v6, %v4180_v28  ;;  %v14633_v34 = vpop.permute.xlu1 %4673 }
 0x998   :  { %v12191_v57 = vpop.eup %12190 }
 0x999   :  { %4384 = vperm.xlu0 %11929, %v14537_v18   ;;  %v12193_v62 = vpop.eup %12192  ;;  %v4373_v18 = vmul.f32 %v12191_v57, %v4179_v31  ;;  %v14630_v17 = vpop.permute.xlu0 %4668 }
 0x99a   :  { %v4360_v22 = vmul.f32 %v12193_v62, %v4166_v35  ;;  %v12195_v55 = vpop.eup %12194 }
 0x99b   :  { %4562 = vperm.xlu1 %11930, %v4374_v36   ;;  %v4361_v41 = vmul.f32 %v12195_v55, %v4167_v40  ;;  %v12197_v24 = vpop.eup %12196  ;;  %v14637_v59 = vpop.permute.xlu1 %4663 }
 0x99c   :  { %v4376_v49 = vmul.f32 %v12197_v24, %v4182_v50  ;;  %v12199_v44 = vpop.eup %12198 }
 0x99d   :  { %4628 = vperm.xlu0 %11929, %v4596_v5   ;;  %v4375_v1 = vmul.f32 %v12199_v44, %v4181_v15  ;;  %v12201_v27 = vpop.eup %12200  ;;  %v14635_v47 = vpop.permute.xlu0 %4658 }
 0x99e   :  { %v4359_v30 = vmul.f32 %v12201_v27, %v4165_v7 }
 0x99f   :  { %4557 = vperm.xlu1 %11930, %v4373_v18   ;;  %v14641_v0 = vpop.permute.xlu1 %4653 }
 0x9a1   :  { %4492 = vperm.xlu0 %11929, %v4360_v22   ;;  %v14639_v28 = vpop.permute.xlu0 %4648 }
 0x9a3   :  { %4633 = vperm.xlu1 %11930, %v4597_v25   ;;  %v14647_v16 = vpop.permute.xlu1 %4643 }
 0x9a5   :  { %4464 = vperm.xlu0 %11929, %v11439_v45   ;;  %v14643_v42 = vpop.permute.xlu0 %4638 }
 0x9a7   :  { %4497 = vperm.xlu1 %11930, %v4361_v41  }
 0x9a9   :  { %4618 = vperm.xlu0 %11929, %v4594_v39  }
 0x9ab   :  { %4379 = vperm.xlu1 %11930, %v14539_v60   ;;  %v4609_v60 = vld [vmem:[%s17032_s6 + $0x80] sm:$0xff] }
 0x9ad   :  { %4572 = vperm.xlu0 %11929, %v4376_v49  }
 0x9af   :  { %4623 = vperm.xlu1 %11930, %v4595_v14  }
 0x9b1   :  { %4567 = vperm.xlu0 %11929, %v4375_v1  }
 0x9b3   :  { %4487 = vperm.xlu1 %11930, %v4359_v30  }
 0x9b5   :  { %4693 = vperm.xlu0 %11929, %v4609_v60  }
 0x9b7   :  { %4459 = vperm.xlu1 %11930, %v4156_v23  }
 0x9bb   :  { %4613 = vperm.xlu1 %11930, %v4593_v10  }
 0x9bf   :  { %4698 = vperm.xlu1 %11930, %v4610_v29  }
 0x9c0   :  { %v14645_v6 = vpop.permute.xlu0 %4394 }
 0x9c2   :  { %v14649_v36 = vpop.permute.xlu1 %4389 }
 0x9c4   :  { %v14651_v13 = vpop.permute.xlu0 %4404 }
 0x9c6   :  { %v14653_v57 = vpop.permute.xlu1 %4399 }
 0x9c8   :  { %v14655_v5 = vpop.permute.xlu0 %4414 }
 0x9ca   :  { %v14657_v31 = vpop.permute.xlu1 %4409 }
 0x9cc   :  { %v14659_v62 = vpop.permute.xlu0 %4424 }
 0x9ce   :  { %v14661_v35 = vpop.permute.xlu1 %4419 }
 0x9d0   :  { %v14663_v51 = vpop.permute.xlu0 %4434 }
 0x9d2   :  { %v14665_v18 = vpop.permute.xlu1 %4429 }
 0x9d3   :  { %17244 = vst [vmem:[#allocation29_spill] sm:$0xff] %v14665_v18 }
 0x9d4   :  { %v14667_v22 = vpop.permute.xlu0 %4444 }
 0x9d5   :  { %17245 = vst [vmem:[#allocation33_spill] sm:$0xff] %v14667_v22  ;;  %v4480_v10 = vsub.f32 %v17223_v61, %v14667_v22 }
 0x9d6   :  { %v14669_v25 = vpop.permute.xlu1 %4439 }
 0x9d7   :  { %v4479_v43 = vsub.f32 %v17224_v19, %v14669_v25  ;;  %v4477_v19 = vsub.f32 %v17226_v37, %v14665_v18  ;;  %v4475_v37 = vsub.f32 %v17230_v3, %v14661_v35 }
 0x9d8   :  { %v14671_v55 = vpop.permute.xlu0 %4454 }
 0x9d9   :  { %17246 = vst [vmem:[#allocation34_spill] sm:$0xff] %v14671_v55  ;;  %v4482_v30 = vsub.f32 %v17221_v63, %v14671_v55 }
 0x9da   :  { %v14675_v40 = vpop.permute.xlu1 %4449 }
 0x9db   :  { %v4481_v53 = vsub.f32 %v17222_v52, %v14675_v40 }
 0x9fc   :  { %v14673_v45 = vpop.permute.xlu0 %4502 }
 0xa00   :  { %v14677_v41 = vpop.permute.xlu0 %4512 }
 0xa02   :  { %v14679_v24 = vpop.permute.xlu1 %4507 }
 0xa04   :  { %v14681_v39 = vpop.permute.xlu0 %4522 }
 0xa06   :  { %v14683_v50 = vpop.permute.xlu1 %4517 }
 0xa08   :  { %v14685_v49 = vpop.permute.xlu0 %4532 }
 0xa0a   :  { %v14687_v44 = vpop.permute.xlu1 %4527 }
 0xa0c   :  { %v14689_v15 = vpop.permute.xlu0 %4542 }
 0xa0d   :  { %17247 = vst [vmem:[#allocation36_spill] sm:$0xff] %v14689_v15 }
 0xa0e   :  { %v14691_v14 = vpop.permute.xlu1 %4537 }
 0xa10   :  { %v14693_v1 = vpop.permute.xlu0 %4552 }
 0xa11   :  { %v4588_v21 = vmul.f32 %v14693_v1, %v4480_v10 }
 0xa12   :  { %v14695_v27 = vpop.permute.xlu1 %4547 }
 0xa13   :  { %v4587_v61 = vmul.f32 %v14695_v27, %v4479_v43  ;;  %v4476_v43 = vsub.f32 %v17227_v32, %v14659_v62  ;;  %v4474_v32 = vsub.f32 %v17233_v33, %v14655_v5  ;;  %v4472_v33 = vsub.f32 %v17235_v8, %v14651_v13 }
 0xa14   :  { %v14697_v7 = vpop.permute.xlu0 %4384  ;;  %v4471_v8 = vsub.f32 %v17236_v58, %v14653_v57  ;;  %v4469_v58 = vsub.f32 %v17238_v46, %v14649_v36 }
 0xa16   :  { %v14701_v60 = vpop.permute.xlu1 %4562 }
 0xa17   :  { %17248 = vst [vmem:[#allocation38_spill] sm:$0xff] %v14701_v60  ;;  %v4590_v23 = vmul.f32 %v14701_v60, %v4482_v30  ;;  %v4478_v30 = vsub.f32 %v17225_v48, %v14663_v51  ;;  %v4713_v48 = vadd.f32 %v14633_v34, %v4587_v61  ;;  %v4583_v61 = vmul.f32 %v14687_v44, %v4475_v37 }
 0xa18   :  { %v14706_v29 = vpop.permute.xlu0 %4628 }
 0xa19   :  { %v4716_v38 = vadd.f32 %v14615_v54, %v4590_v23  ;;  %v4586_v52 = vmul.f32 %v14689_v15, %v4478_v30  ;;  %v4714_v23 = vadd.f32 %v14620_v4, %v4588_v21  ;;  %v4584_v30 = vmul.f32 %v14685_v49, %v4476_v43 }
 0xa1a   :  { %v14714_v63 = vpop.permute.xlu1 %4557  ;;  %v4731_v3 = vmax.f32 %v4713_v48, 0.0  ;;  %v4709_v48 = vadd.f32 %v14641_v0, %v4583_v61 }
 0xa1b   :  { %v4734_v55 = vmax.f32 %v4716_v38, 0.0  ;;  %v4589_v22 = vmul.f32 %v14714_v63, %v4481_v53  ;;  %v4585_v53 = vmul.f32 %v14691_v14, %v4477_v19  ;;  %v4712_v21 = vadd.f32 %v14630_v17, %v4586_v52 }
 0xa1c   :  { %v14720_v60 = vpop.permute.xlu0 %4492  ;;  %v4473_v52 = vsub.f32 %v17234_v12, %v14657_v31 }
 0xa1d   :  { %17249 = vst [vmem:[#allocation53_spill] sm:$0xff] %v14720_v60  ;;  %4990 = vmatpush1.msra.mxu1 %v4734_v55  ;;  %v4715_v10 = vadd.f32 %v14628_v2, %v4589_v22  ;;  %v4732_v22 = vmax.f32 %v4714_v23, 0.0  ;;  %v4711_v19 = vadd.f32 %v14637_v59, %v4585_v53  ;;  %v4582_v23 = vmul.f32 %v14681_v39, %v4474_v32 }
 0xa1e   :  { %v14727_v38 = vpop.permute.xlu1 %4633  ;;  %4991 = vmatprep.subr.mxu1 %v17243_v26  ;;  %v4730_v43 = vmax.f32 %v4712_v21, 0.0  ;;  %v4581_v53 = vmul.f32 %v14683_v50, %v4473_v52 }
 0xa1f   :  { %v4733_v55 = vmax.f32 %v4715_v10, 0.0  ;;  %v4710_v10 = vadd.f32 %v14635_v47, %v4584_v30  ;;  %v4729_v37 = vmax.f32 %v4711_v19, 0.0  ;;  %v4580_v30 = vmul.f32 %v14677_v41, %v4472_v33 }
 0xa20   :  { %v14740_v18 = vpop.permute.xlu0 %4464  ;;  %v4708_v21 = vadd.f32 %v14639_v28, %v4582_v23  ;;  %v4707_v61 = vadd.f32 %v14647_v16, %v4581_v53  ;;  %v4727_v19 = vmax.f32 %v4709_v48, 0.0  ;;  %v4579_v23 = vmul.f32 %v14679_v24, %v4471_v8 }
 0xa21   :  { %4992 = vmatpush1.msra.mxu1 %v4733_v55  ;;  %17250 = vst [vmem:[#allocation40_spill] sm:$0xff] %v14740_v18  ;;  %v4706_v52 = vadd.f32 %v14643_v42, %v4580_v30 }
 0xa22   :  { %v14738_v15 = vpop.permute.xlu1 %4497  ;;  %4993 = vmatprep.subr.mxu1 %v17243_v26  ;;  %v4725_v48 = vmax.f32 %v4707_v61, 0.0 }
 0xa23   :  { %4994 = vmatpush1.msra.mxu1 %v4732_v22  ;;  %v4728_v22 = vmax.f32 %v4710_v10, 0.0  ;;  %v4726_v10 = vmax.f32 %v4708_v21, 0.0  ;;  %v4724_v30 = vmax.f32 %v4706_v52, 0.0 }
 0xa24   :  { %4995 = vmatprep.subr.mxu1 %v17243_v26  ;;  %v14759_v12 = vpop.permute.xlu0 %4618 }
 0xa25   :  { %4996 = vmatpush1.msra.mxu1 %v4731_v3  ;;  %17252 = vst [vmem:[#allocation42_spill] sm:$0xff] %v14759_v12  ;;  %v4470_v3 = vsub.f32 %v17237_v20, %v14645_v6  ;;  %v4705_v20 = vadd.f32 %v14727_v38, %v4579_v23 }
 0xa26   :  { %v14752_v55 = vpop.permute.xlu1 %4379  ;;  %4997 = vmatprep.subr.mxu1 %v17243_v26 }
 0xa27   :  { %17251 = vst [vmem:[#allocation51_spill] sm:$0xff] %v14752_v55  ;;  %4998 = vmatpush1.msra.mxu1 %v4730_v43  ;;  %v4578_v53 = vmul.f32 %v14673_v45, %v4470_v3  ;;  %v4723_v61 = vmax.f32 %v4705_v20, 0.0 }
 0xa28   :  { %4999 = vmatprep.subr.mxu1 %v17243_v26  ;;  %v14777_v33 = vpop.permute.xlu0 %4572 }
 0xa29   :  { %5000 = vmatpush1.msra.mxu1 %v4729_v37  ;;  %17255 = vst [vmem:[#allocation46_spill] sm:$0xff] %v14777_v33  ;;  %v4468_v37 = vsub.f32 %v17239_v11, %v14697_v7  ;;  %v4704_v21 = vadd.f32 %v14706_v29, %v4578_v53 }
 0xa2a   :  { %v14764_v32 = vpop.permute.xlu1 %4623  ;;  %5001 = vmatprep.subr.mxu1 %v17243_v26 }
 0xa2b   :  { %17253 = vst [vmem:[#allocation44_spill] sm:$0xff] %v14764_v32  ;;  %5002 = vmatpush1.msra.mxu1 %v4728_v22  ;;  %v4577_v22 = vmul.f32 %v14738_v15, %v4469_v58  ;;  %v4576_v46 = vmul.f32 %v14720_v60, %v4468_v37  ;;  %v4722_v23 = vmax.f32 %v4704_v21, 0.0 }
 0xa2c   :  { %5003 = vmatprep.subr.mxu1 %v17243_v26  ;;  %v14798_v52 = vpop.permute.xlu0 %4567 }
 0xa2d   :  { %5004 = vmatpush1.msra.mxu1 %v4727_v19  ;;  %v4467_v19 = vsub.f32 %v17240_v9, %v14752_v55  ;;  %v4703_v11 = vadd.f32 %v14764_v32, %v4577_v22  ;;  %17257 = vst [vmem:[#allocation48_spill] sm:$0xff] %v14798_v52  ;;  %v17259_v9 = vld [vmem:[#allocation52_spill] sm:$0xff] }
 0xa2e   :  { %v14775_v43 = vpop.permute.xlu1 %4487  ;;  %5005 = vmatprep.subr.mxu1 %v17243_v26 }
 0xa2f   :  { %17254 = vst [vmem:[#allocation45_spill] sm:$0xff] %v14775_v43  ;;  %5006 = vmatpush1.msra.mxu1 %v4726_v10  ;;  %v4702_v10 = vadd.f32 %v14759_v12, %v4576_v46  ;;  %v4575_v58 = vmul.f32 %v14775_v43, %v4467_v19  ;;  %v4721_v20 = vmax.f32 %v4703_v11, 0.0 }
 0xa30   :  { %5007 = vmatprep.subr.mxu1 %v17243_v26  ;;  %v14814_v46 = vpop.permute.xlu0 %4693 }
 0xa31   :  { %5008 = vmatpush1.msra.mxu1 %v4725_v48  ;;  %v4484_v48 = vsub.f32 %v17259_v9, %v14740_v18  ;;  %v4720_v21 = vmax.f32 %v4702_v10, 0.0  ;;  %17261 = vst [vmem:[#allocation54_spill] sm:$0xff] %v14814_v46  ;;  %v4809_v10 = vld [vmem:[#allocation12] sm:$0xff]  ;;  %v4811_v9 = vld [vmem:[#allocation12 + $0x10] sm:$0xff] }
 0xa32   :  { %v14789_v8 = vpop.permute.xlu1 %4459  ;;  %5009 = vmatprep.subr.mxu1 %v17243_v26 }
 0xa33   :  { %17256 = vst [vmem:[#allocation47_spill] sm:$0xff] %v14789_v8  ;;  %v4483_v3 = vsub.f32 %v17242_v56, %v14789_v8  ;;  %5010 = vmatpush1.msra.mxu1 %v4724_v30  ;;  %v4592_v30 = vmul.f32 %v14777_v33, %v4484_v48  ;;  %v4814_v48 = vld [vmem:[#allocation12 + $0x28] sm:$0xff] }
 0xa34   :  { %5011 = vmatprep.subr.mxu1 %v17243_v26 }
 0xa35   :  { %5012 = vmatpush1.msra.mxu1 %v4723_v61  ;;  %v4591_v56 = vmul.f32 %v14798_v52, %v4483_v3 }
 0xa36   :  { %v14803_v53 = vpop.permute.xlu1 %4613  ;;  %5013 = vmatprep.subr.mxu1 %v17243_v26 }
 0xa37   :  { %17258 = vst [vmem:[#allocation49_spill] sm:$0xff] %v14803_v53  ;;  %v4701_v37 = vadd.f32 %v14803_v53, %v4575_v58  ;;  %5014 = vmatpush1.msra.mxu1 %v4722_v23  ;;  %v4717_v19 = vadd.f32 %v14814_v46, %v4591_v56  ;;  %v4812_v58 = vld [vmem:[#allocation12 + $0x18] sm:$0xff] }
 0xa38   :  { %5015 = vmatprep.subr.mxu1 %v17243_v26  ;;  %v4816_v56 = vld [vmem:[#allocation12 + $0x38] sm:$0xff] }
 0xa39   :  { %5016 = vmatpush1.msra.mxu1 %v4721_v20  ;;  %v4719_v11 = vmax.f32 %v4701_v37, 0.0  ;;  %v4735_v23 = vmax.f32 %v4717_v19, 0.0  ;;  %v4813_v20 = vld [vmem:[#allocation12 + $0x20] sm:$0xff]  ;;  %v4815_v37 = vld [vmem:[#allocation12 + $0x30] sm:$0xff] }
 0xa3a   :  { %v14812_v22 = vpop.permute.xlu1 %4698  ;;  %5017 = vmatprep.subr.mxu1 %v17243_v26  ;;  %v4819_v19 = vld [vmem:[#allocation12 + $0x50] sm:$0xff] }
 0xa3b   :  { %17260 = vst [vmem:[#allocation50_spill] sm:$0xff] %v14812_v22  ;;  %v4718_v61 = vadd.f32 %v14812_v22, %v4592_v30  ;;  %5018 = vmatpush1.msra.mxu1 %v4720_v21  ;;  %v4818_v30 = vld [vmem:[#allocation12 + $0x48] sm:$0xff]  ;;  %v4817_v21 = vld [vmem:[#allocation12 + $0x40] sm:$0xff] }
 0xa3c   :  { %5019 = vmatprep.subr.mxu1 %v17243_v26 }
 0xa3d   :  { %v4736_v3 = vmax.f32 %v4718_v61, 0.0  ;;  %5020 = vmatpush1.msra.mxu1 %v4719_v11  ;;  %v4820_v61 = vld [vmem:[#allocation12 + $0x58] sm:$0xff]  ;;  %v4822_v11 = vld [vmem:[#allocation12 + $0x68] sm:$0xff] }
 0xa3e   :  { %5049 = vmatprep.subr.mxu1 %v17243_v26 }
 0xa3f   :  { %5050 = vmatpush2.msra.mxu1 %v4736_v3  ;;  %v4821_v3 = vld [vmem:[#allocation12 + $0x60] sm:$0xff] }
 0xa40   :  { %5051 = vmatprep.subr.mxu1 %v17243_v26 }
 0xa41   :  { %5052 = vmatpush2.msra.mxu1 %v4735_v23  ;;  %v4824_v23 = vld [vmem:[#allocation12 + $0x78] sm:$0xff] }
 0xa42   :  { %5054 = vmatmul.mubr.f32.vlgmr.msra.gmra.mxu1 %v4809_v10  ;;  %v4823_v10 = vld [vmem:[#allocation12 + $0x70] sm:$0xff] }
 0xa43   :  { %10063 = vmatprep.mubr.msk.f32.mxu1 %vm3768_vm5, %v4812_v58  ;;  %v4826_v58 = vld [vmem:[#allocation12 + $0x88] sm:$0xff] }
 0xa46   :  { %5059 = vmatmul.mubr.f32.gmra.mxu1 %v4811_v9  ;;  %v4825_v9 = vld [vmem:[#allocation12 + $0x80] sm:$0xff] }
 0xa47   :  { %10064 = vmatprep.mubr.msk.f32.mxu1 %vm3768_vm5, %v4814_v48  ;;  %v4828_v48 = vld [vmem:[#allocation12 + $0x98] sm:$0xff] }
 0xa4a   :  { %5064 = vmatmul.mubr.f32.gmra.mxu1 %v4813_v20  ;;  %v4827_v20 = vld [vmem:[#allocation12 + $0x90] sm:$0xff] }
 0xa4b   :  { %10065 = vmatprep.mubr.msk.f32.mxu1 %vm3768_vm5, %v4816_v56  ;;  %v4830_v56 = vld [vmem:[#allocation12 + $0xa8] sm:$0xff] }
 0xa4e   :  { %5069 = vmatmul.mubr.f32.gmra.mxu1 %v4815_v37  ;;  %v4829_v37 = vld [vmem:[#allocation12 + $0xa0] sm:$0xff] }
 0xa4f   :  { %10066 = vmatprep.mubr.msk.f32.mxu1 %vm3768_vm5, %v4818_v30  ;;  %v4832_v30 = vld [vmem:[#allocation12 + $0xb8] sm:$0xff] }
 0xa52   :  { %5074 = vmatmul.mubr.f32.gmra.mxu1 %v4817_v21  ;;  %v4831_v21 = vld [vmem:[#allocation12 + $0xb0] sm:$0xff] }
 0xa53   :  { %10067 = vmatprep.mubr.msk.f32.mxu1 %vm3768_vm5, %v4820_v61  ;;  %v4834_v61 = vld [vmem:[#allocation12 + $0xc8] sm:$0xff] }
 0xa56   :  { %5079 = vmatmul.mubr.f32.gmra.mxu1 %v4819_v19  ;;  %v4833_v19 = vld [vmem:[#allocation12 + $0xc0] sm:$0xff] }
 0xa57   :  { %10068 = vmatprep.mubr.msk.f32.mxu1 %vm3768_vm5, %v4822_v11  ;;  %v4836_v11 = vld [vmem:[#allocation12 + $0xd8] sm:$0xff] }
 0xa5a   :  { %5084 = vmatmul.mubr.f32.gmra.mxu1 %v4821_v3  ;;  %v4835_v3 = vld [vmem:[#allocation12 + $0xd0] sm:$0xff] }
 0xa5b   :  { %10069 = vmatprep.mubr.msk.f32.mxu1 %vm3768_vm5, %v4824_v23  ;;  %v4838_v23 = vld [vmem:[#allocation12 + $0xe8] sm:$0xff] }
 0xa5e   :  { %5089 = vmatmul.mubr.f32.gmra.mxu1 %v4823_v10  ;;  %v4837_v10 = vld [vmem:[#allocation12 + $0xe0] sm:$0xff] }
 0xa5f   :  { %10070 = vmatprep.mubr.msk.f32.mxu1 %vm3768_vm5, %v4826_v58  ;;  %v4840_v58 = vld [vmem:[#allocation12 + $0xf8] sm:$0xff] }
 0xa62   :  { %5094 = vmatmul.mubr.f32.gmra.mxu1 %v4825_v9  ;;  %v4839_v9 = vld [vmem:[#allocation12 + $0xf0] sm:$0xff] }
 0xa63   :  { %10071 = vmatprep.mubr.msk.f32.mxu1 %vm3768_vm5, %v4828_v48  ;;  %v4842_v48 = vld [vmem:[#allocation12 + $0x108] sm:$0xff] }
 0xa66   :  { %5099 = vmatmul.mubr.f32.gmra.mxu1 %v4827_v20  ;;  %v4841_v20 = vld [vmem:[#allocation12 + $0x100] sm:$0xff] }
 0xa67   :  { %10072 = vmatprep.mubr.msk.f32.mxu1 %vm3768_vm5, %v4830_v56  ;;  %v4844_v56 = vld [vmem:[#allocation12 + $0x118] sm:$0xff] }
 0xa6a   :  { %5104 = vmatmul.mubr.f32.gmra.mxu1 %v4829_v37  ;;  %v5235_v37 = vld [vmem:[#allocation13 + $0x8] sm:$0xf] }
 0xa6b   :  { %10073 = vmatprep.mubr.msk.f32.mxu1 %vm3768_vm5, %v4832_v30  ;;  %v4843_v30 = vld [vmem:[#allocation12 + $0x110] sm:$0xff]  ;;  %11471 = vmatprep.subr.msk.mxu0 %vm571_vm1, %v5235_v37 }
 0xa6c   :  { %11472 = vmatpush3.msk.msra.mxu0 %vm571_vm1, %v5235_v37  ;;  %v4855_v37 = vld [vmem:[#allocation12 + $0x170] sm:$0xff] }
 0xa6e   :  { %5109 = vmatmul.mubr.f32.gmra.mxu1 %v4831_v21  ;;  %v4846_v21 = vld [vmem:[#allocation12 + $0x128] sm:$0xff] }
 0xa6f   :  { %10074 = vmatprep.mubr.msk.f32.mxu1 %vm3768_vm5, %v4834_v61  ;;  %v5234_v61 = vld [vmem:[#allocation13] sm:$0xff] }
 0xa70   :  { %11473 = vmatprep.subr.mxu0 %v5234_v61 }
 0xa71   :  { %11474 = vmatpush3.msra.mxu0 %v5234_v61  ;;  %v4860_v61 = vld [vmem:[#allocation12 + $0x198] sm:$0xff] }
 0xa72   :  { %5114 = vmatmul.mubr.f32.gmra.mxu1 %v4833_v19  ;;  %v4845_v19 = vld [vmem:[#allocation12 + $0x120] sm:$0xff] }
 0xa73   :  { %10075 = vmatprep.mubr.msk.f32.mxu1 %vm3768_vm5, %v4836_v11  ;;  %v4848_v11 = vld [vmem:[#allocation12 + $0x138] sm:$0xff] }
 0xa76   :  { %5119 = vmatmul.mubr.f32.gmra.mxu1 %v4835_v3  ;;  %v4847_v3 = vld [vmem:[#allocation12 + $0x130] sm:$0xff] }
 0xa77   :  { %10076 = vmatprep.mubr.msk.f32.mxu1 %vm3768_vm5, %v4838_v23  ;;  %v4850_v23 = vld [vmem:[#allocation12 + $0x148] sm:$0xff] }
 0xa7a   :  { %5124 = vmatmul.mubr.f32.gmra.mxu1 %v4837_v10  ;;  %v4849_v10 = vld [vmem:[#allocation12 + $0x140] sm:$0xff] }
 0xa7b   :  { %10077 = vmatprep.mubr.msk.f32.mxu1 %vm3768_vm5, %v4840_v58  ;;  %v4852_v58 = vld [vmem:[#allocation12 + $0x158] sm:$0xff] }
 0xa7e   :  { %5129 = vmatmul.mubr.f32.gmra.mxu1 %v4839_v9  ;;  %v4851_v9 = vld [vmem:[#allocation12 + $0x150] sm:$0xff] }
 0xa7f   :  { %10078 = vmatprep.mubr.msk.f32.mxu1 %vm3768_vm5, %v4842_v48  ;;  %v4854_v48 = vld [vmem:[#allocation12 + $0x168] sm:$0xff] }
 0xa82   :  { %5134 = vmatmul.mubr.f32.gmra.mxu1 %v4841_v20  ;;  %v4853_v20 = vld [vmem:[#allocation12 + $0x160] sm:$0xff] }
 0xa83   :  { %10079 = vmatprep.mubr.msk.f32.mxu1 %vm3768_vm5, %v4844_v56  ;;  %v4856_v56 = vld [vmem:[#allocation12 + $0x178] sm:$0xff] }
 0xa86   :  { %5139 = vmatmul.mubr.f32.gmra.mxu1 %v4843_v30  ;;  %v4858_v30 = vld [vmem:[#allocation12 + $0x188] sm:$0xff] }
 0xa87   :  { %10080 = vmatprep.mubr.msk.f32.mxu1 %vm3768_vm5, %v4846_v21  ;;  %v4857_v21 = vld [vmem:[#allocation12 + $0x180] sm:$0xff] }
 0xa8a   :  { %5144 = vmatmul.mubr.f32.gmra.mxu1 %v4845_v19  ;;  %v4859_v19 = vld [vmem:[#allocation12 + $0x190] sm:$0xff] }
 0xa8b   :  { %10081 = vmatprep.mubr.msk.f32.mxu1 %vm3768_vm5, %v4848_v11  ;;  %v4862_v11 = vld [vmem:[#allocation12 + $0x1a8] sm:$0xff] }
 0xa8e   :  { %5149 = vmatmul.mubr.f32.gmra.mxu1 %v4847_v3  ;;  %v4861_v3 = vld [vmem:[#allocation12 + $0x1a0] sm:$0xff] }
 0xa8f   :  { %10082 = vmatprep.mubr.msk.f32.mxu1 %vm3768_vm5, %v4850_v23  ;;  %v4864_v23 = vld [vmem:[#allocation12 + $0x1b8] sm:$0xff] }
 0xa92   :  { %5154 = vmatmul.mubr.f32.gmra.mxu1 %v4849_v10  ;;  %v4863_v10 = vld [vmem:[#allocation12 + $0x1b0] sm:$0xff] }
 0xa93   :  { %10083 = vmatprep.mubr.msk.f32.mxu1 %vm3768_vm5, %v4852_v58  ;;  %v4866_v58 = vld [vmem:[#allocation12 + $0x1c8] sm:$0xff] }
 0xa96   :  { %5159 = vmatmul.mubr.f32.gmra.mxu1 %v4851_v9  ;;  %v4865_v9 = vld [vmem:[#allocation12 + $0x1c0] sm:$0xff] }
 0xa97   :  { %10084 = vmatprep.mubr.msk.f32.mxu1 %vm3768_vm5, %v4854_v48  ;;  %v4868_v48 = vld [vmem:[#allocation12 + $0x1d8] sm:$0xff] }
 0xa9a   :  { %5164 = vmatmul.mubr.f32.gmra.mxu1 %v4853_v20  ;;  %v4867_v20 = vld [vmem:[#allocation12 + $0x1d0] sm:$0xff] }
 0xa9b   :  { %10085 = vmatprep.mubr.msk.f32.mxu1 %vm3768_vm5, %v4856_v56  ;;  %v4870_v56 = vld [vmem:[#allocation12 + $0x1e8] sm:$0xff] }
 0xa9e   :  { %5169 = vmatmul.mubr.f32.gmra.mxu1 %v4855_v37  ;;  %v4869_v37 = vld [vmem:[#allocation12 + $0x1e0] sm:$0xff] }
 0xa9f   :  { %10086 = vmatprep.mubr.msk.f32.mxu1 %vm3768_vm5, %v4858_v30  ;;  %v4872_v30 = vld [vmem:[#allocation12 + $0x1f8] sm:$0xff] }
 0xaa2   :  { %5174 = vmatmul.mubr.f32.gmra.mxu1 %v4857_v21  ;;  %v4871_v21 = vld [vmem:[#allocation12 + $0x1f0] sm:$0xff] }
 0xaa3   :  { %10087 = vmatprep.mubr.msk.f32.mxu1 %vm3768_vm5, %v4860_v61  ;;  %v4874_v61 = vld [vmem:[#allocation12 + $0x208] sm:$0xff] }
 0xaa6   :  { %5179 = vmatmul.mubr.f32.gmra.mxu1 %v4859_v19  ;;  %v4873_v19 = vld [vmem:[#allocation12 + $0x200] sm:$0xff] }
 0xaa7   :  { %10088 = vmatprep.mubr.msk.f32.mxu1 %vm3768_vm5, %v4862_v11  ;;  %v4876_v11 = vld [vmem:[#allocation12 + $0x218] sm:$0xff] }
 0xaaa   :  { %5184 = vmatmul.mubr.f32.gmra.mxu1 %v4861_v3  ;;  %v4875_v3 = vld [vmem:[#allocation12 + $0x210] sm:$0xff] }
 0xaab   :  { %10089 = vmatprep.mubr.msk.f32.mxu1 %vm3768_vm5, %v4864_v23  ;;  %v4878_v23 = vld [vmem:[#allocation12 + $0x228] sm:$0xff] }
 0xaae   :  { %5189 = vmatmul.mubr.f32.gmra.mxu1 %v4863_v10  ;;  %v4877_v10 = vld [vmem:[#allocation12 + $0x220] sm:$0xff] }
 0xaaf   :  { %10090 = vmatprep.mubr.msk.f32.mxu1 %vm3768_vm5, %v4866_v58  ;;  %v4880_v58 = vld [vmem:[#allocation12 + $0x238] sm:$0xff] }
 0xab2   :  { %5194 = vmatmul.mubr.f32.gmra.mxu1 %v4865_v9  ;;  %v4879_v9 = vld [vmem:[#allocation12 + $0x230] sm:$0xff] }
 0xab3   :  { %10091 = vmatprep.mubr.msk.f32.mxu1 %vm3768_vm5, %v4868_v48 }
 0xab6   :  { %5199 = vmatmul.mubr.f32.gmra.mxu1 %v4867_v20 }
 0xab7   :  { %10092 = vmatprep.mubr.msk.f32.mxu1 %vm3768_vm5, %v4870_v56 }
 0xaba   :  { %5204 = vmatmul.mubr.f32.gmra.mxu1 %v4869_v37 }
 0xabb   :  { %10093 = vmatprep.mubr.msk.f32.mxu1 %vm3768_vm5, %v4872_v30 }
 0xabe   :  { %5209 = vmatmul.mubr.f32.gmra.mxu1 %v4871_v21 }
 0xabf   :  { %10094 = vmatprep.mubr.msk.f32.mxu1 %vm3768_vm5, %v4874_v61 }
 0xac2   :  { %5214 = vmatmul.mubr.f32.gmra.mxu1 %v4873_v19 }
 0xac3   :  { %10095 = vmatprep.mubr.msk.f32.mxu1 %vm3768_vm5, %v4876_v11 }
 0xac6   :  { %5219 = vmatmul.mubr.f32.gmra.mxu1 %v4875_v3 }
 0xac7   :  { %10096 = vmatprep.mubr.msk.f32.mxu1 %vm3768_vm5, %v4878_v23 }
 0xaca   :  { %5224 = vmatmul.mubr.f32.gmra.mxu1 %v4877_v10 }
 0xacb   :  { %10097 = vmatprep.mubr.msk.f32.mxu1 %vm3768_vm5, %v4880_v58 }
 0xace   :  { %5229 = vmatmul.mubr.f32.gmra.mxu1 %v4879_v9 }
 0xb02   :  { %v5055_v48 = vpop.f32.mrf.mxu1 }
 0xb03   :  { %11475 = vmatprep.mubr.msk.f32.mxu0 %vm3475_vm4, %v5055_v48 }
 0xb04   :  { %v5057_v20 = vpop.f32.mrf.mxu1 }
 0xb06   :  { %v5060_v56 = vpop.f32.mrf.mxu1 }
 0xb07   :  { %11476 = vmatmul.mubr.msk.f32.vlgmr.msra.gmra.mxu0 %vm3475_vm4, %v5060_v56 }
 0xb08   :  { %v5062_v37 = vpop.f32.mrf.mxu1 }
 0xb0a   :  { %v5065_v30 = vpop.f32.mrf.mxu1 }
 0xb0b   :  { %11478 = vmatprep.mubr.msk.f32.mxu0 %vm3475_vm4, %v5065_v30 }
 0xb0c   :  { %v5067_v21 = vpop.f32.mrf.mxu1 }
 0xb0e   :  { %v5070_v61 = vpop.f32.mrf.mxu1 }
 0xb0f   :  { %11479 = vmatmul.mubr.msk.f32.gmra.mxu0 %vm3475_vm4, %v5070_v61 }
 0xb10   :  { %v5072_v19 = vpop.f32.mrf.mxu1 }
 0xb12   :  { %v5075_v11 = vpop.f32.mrf.mxu1 }
 0xb13   :  { %11481 = vmatprep.mubr.msk.f32.mxu0 %vm3475_vm4, %v5075_v11 }
 0xb14   :  { %v5077_v3 = vpop.f32.mrf.mxu1 }
 0xb16   :  { %v5080_v23 = vpop.f32.mrf.mxu1 }
 0xb17   :  { %11482 = vmatmul.mubr.msk.f32.gmra.mxu0 %vm3475_vm4, %v5080_v23 }
 0xb18   :  { %v5082_v10 = vpop.f32.mrf.mxu1 }
 0xb1a   :  { %v5085_v58 = vpop.f32.mrf.mxu1 }
 0xb1b   :  { %11484 = vmatprep.mubr.msk.f32.mxu0 %vm3475_vm4, %v5085_v58 }
 0xb1c   :  { %v5087_v9 = vpop.f32.mrf.mxu1 }
 0xb1e   :  { %v5090_v48 = vpop.f32.mrf.mxu1 }
 0xb1f   :  { %11485 = vmatmul.mubr.msk.f32.gmra.mxu0 %vm3475_vm4, %v5090_v48 }
 0xb20   :  { %v5092_v20 = vpop.f32.mrf.mxu1 }
 0xb22   :  { %v5095_v56 = vpop.f32.mrf.mxu1 }
 0xb23   :  { %11487 = vmatprep.mubr.msk.f32.mxu0 %vm3475_vm4, %v5095_v56 }
 0xb24   :  { %v5097_v37 = vpop.f32.mrf.mxu1 }
 0xb26   :  { %v5100_v30 = vpop.f32.mrf.mxu1 }
 0xb27   :  { %11488 = vmatmul.mubr.msk.f32.gmra.mxu0 %vm3475_vm4, %v5100_v30 }
 0xb28   :  { %v5102_v21 = vpop.f32.mrf.mxu1 }
 0xb2a   :  { %v5105_v61 = vpop.f32.mrf.mxu1 }
 0xb2b   :  { %11490 = vmatprep.mubr.msk.f32.mxu0 %vm3475_vm4, %v5105_v61 }
 0xb2c   :  { %v5107_v19 = vpop.f32.mrf.mxu1 }
 0xb2e   :  { %v5110_v11 = vpop.f32.mrf.mxu1 }
 0xb2f   :  { %11491 = vmatmul.mubr.msk.f32.gmra.mxu0 %vm3475_vm4, %v5110_v11 }
 0xb30   :  { %v5112_v3 = vpop.f32.mrf.mxu1 }
 0xb32   :  { %v5115_v23 = vpop.f32.mrf.mxu1 }
 0xb33   :  { %11493 = vmatprep.mubr.msk.f32.mxu0 %vm3475_vm4, %v5115_v23 }
 0xb34   :  { %v5117_v10 = vpop.f32.mrf.mxu1 }
 0xb36   :  { %v5120_v58 = vpop.f32.mrf.mxu1 }
 0xb37   :  { %11494 = vmatmul.mubr.msk.f32.gmra.mxu0 %vm3475_vm4, %v5120_v58 }
 0xb38   :  { %v5122_v9 = vpop.f32.mrf.mxu1 }
 0xb3a   :  { %v5125_v48 = vpop.f32.mrf.mxu1 }
 0xb3b   :  { %11496 = vmatprep.mubr.msk.f32.mxu0 %vm3475_vm4, %v5125_v48 }
 0xb3c   :  { %v5127_v20 = vpop.f32.mrf.mxu1 }
 0xb3e   :  { %v5130_v56 = vpop.f32.mrf.mxu1 }
 0xb3f   :  { %11497 = vmatmul.mubr.msk.f32.gmra.mxu0 %vm3475_vm4, %v5130_v56 }
 0xb40   :  { %v5132_v37 = vpop.f32.mrf.mxu1 }
 0xb42   :  { %v5135_v30 = vpop.f32.mrf.mxu1 }
 0xb43   :  { %11499 = vmatprep.mubr.msk.f32.mxu0 %vm3475_vm4, %v5135_v30 }
 0xb44   :  { %v5137_v21 = vpop.f32.mrf.mxu1 }
 0xb46   :  { %v5140_v61 = vpop.f32.mrf.mxu1 }
 0xb47   :  { %11500 = vmatmul.mubr.msk.f32.gmra.mxu0 %vm3475_vm4, %v5140_v61 }
 0xb48   :  { %v5142_v19 = vpop.f32.mrf.mxu1 }
 0xb4a   :  { %v5145_v11 = vpop.f32.mrf.mxu1 }
 0xb4b   :  { %11502 = vmatprep.mubr.msk.f32.mxu0 %vm3475_vm4, %v5145_v11 }
 0xb4c   :  { %v5147_v3 = vpop.f32.mrf.mxu1 }
 0xb4e   :  { %v5150_v23 = vpop.f32.mrf.mxu1 }
 0xb4f   :  { %11503 = vmatmul.mubr.msk.f32.gmra.mxu0 %vm3475_vm4, %v5150_v23 }
 0xb50   :  { %v5152_v10 = vpop.f32.mrf.mxu1 }
 0xb52   :  { %v5155_v58 = vpop.f32.mrf.mxu1 }
 0xb53   :  { %11505 = vmatprep.mubr.msk.f32.mxu0 %vm3475_vm4, %v5155_v58 }
 0xb54   :  { %v5157_v9 = vpop.f32.mrf.mxu1 }
 0xb56   :  { %v5160_v48 = vpop.f32.mrf.mxu1 }
 0xb57   :  { %11506 = vmatmul.mubr.msk.f32.gmra.mxu0 %vm3475_vm4, %v5160_v48 }
 0xb58   :  { %v5162_v20 = vpop.f32.mrf.mxu1 }
 0xb5a   :  { %v5165_v56 = vpop.f32.mrf.mxu1 }
 0xb5b   :  { %11508 = vmatprep.mubr.msk.f32.mxu0 %vm3475_vm4, %v5165_v56 }
 0xb5c   :  { %v5167_v37 = vpop.f32.mrf.mxu1 }
 0xb5e   :  { %v5170_v30 = vpop.f32.mrf.mxu1 }
 0xb5f   :  { %11509 = vmatmul.mubr.msk.f32.gmra.mxu0 %vm3475_vm4, %v5170_v30 }
 0xb60   :  { %v5172_v21 = vpop.f32.mrf.mxu1 }
 0xb62   :  { %v5175_v61 = vpop.f32.mrf.mxu1 }
 0xb63   :  { %11511 = vmatprep.mubr.msk.f32.mxu0 %vm3475_vm4, %v5175_v61 }
 0xb64   :  { %v5177_v19 = vpop.f32.mrf.mxu1 }
 0xb66   :  { %v5180_v11 = vpop.f32.mrf.mxu1 }
 0xb67   :  { %11512 = vmatmul.mubr.msk.f32.gmra.mxu0 %vm3475_vm4, %v5180_v11 }
 0xb68   :  { %v5182_v3 = vpop.f32.mrf.mxu1 }
 0xb6a   :  { %v5185_v23 = vpop.f32.mrf.mxu1 }
 0xb6b   :  { %11514 = vmatprep.mubr.msk.f32.mxu0 %vm3475_vm4, %v5185_v23 }
 0xb6c   :  { %v5187_v10 = vpop.f32.mrf.mxu1 }
 0xb6e   :  { %v5190_v58 = vpop.f32.mrf.mxu1 }
 0xb6f   :  { %11515 = vmatmul.mubr.msk.f32.gmra.mxu0 %vm3475_vm4, %v5190_v58 }
 0xb70   :  { %v5192_v9 = vpop.f32.mrf.mxu1 }
 0xb72   :  { %v5195_v48 = vpop.f32.mrf.mxu1 }
 0xb73   :  { %11517 = vmatprep.mubr.msk.f32.mxu0 %vm3475_vm4, %v5195_v48 }
 0xb74   :  { %v5197_v20 = vpop.f32.mrf.mxu1 }
 0xb76   :  { %v5200_v56 = vpop.f32.mrf.mxu1 }
 0xb77   :  { %11518 = vmatmul.mubr.msk.f32.gmra.mxu0 %vm3475_vm4, %v5200_v56 }
 0xb78   :  { %v5202_v37 = vpop.f32.mrf.mxu1 }
 0xb7a   :  { %v5205_v30 = vpop.f32.mrf.mxu1 }
 0xb7b   :  { %11520 = vmatprep.mubr.msk.f32.mxu0 %vm3475_vm4, %v5205_v30 }
 0xb7c   :  { %v5207_v21 = vpop.f32.mrf.mxu1 }
 0xb7e   :  { %v5210_v61 = vpop.f32.mrf.mxu1 }
 0xb7f   :  { %11521 = vmatmul.mubr.msk.f32.gmra.mxu0 %vm3475_vm4, %v5210_v61 }
 0xb80   :  { %v5212_v19 = vpop.f32.mrf.mxu1 }
 0xb82   :  { %v5215_v11 = vpop.f32.mrf.mxu1 }
 0xb83   :  { %11523 = vmatprep.mubr.msk.f32.mxu0 %vm3475_vm4, %v5215_v11 }
 0xb84   :  { %v5217_v3 = vpop.f32.mrf.mxu1 }
 0xb86   :  { %v5220_v23 = vpop.f32.mrf.mxu1 }
 0xb87   :  { %11524 = vmatmul.mubr.msk.f32.gmra.mxu0 %vm3475_vm4, %v5220_v23 }
 0xb88   :  { %v5222_v10 = vpop.f32.mrf.mxu1 }
 0xb8a   :  { %v5225_v58 = vpop.f32.mrf.mxu1 }
 0xb8b   :  { %11526 = vmatprep.mubr.msk.f32.mxu0 %vm3475_vm4, %v5225_v58 }
 0xb8c   :  { %v5227_v9 = vpop.f32.mrf.mxu1 }
 0xb8e   :  { %v5230_v48 = vpop.f32.mrf.mxu1 }
 0xb8f   :  { %11527 = vmatmul.mubr.msk.f32.gmra.mxu0 %vm3475_vm4, %v5230_v48 }
 0xb90   :  { %v5232_v20 = vpop.f32.mrf.mxu1 }
 0xbc7   :  { %v11477_v56 = vpop.f32.mrf.mxu0 }
 0xbc9   :  { %v5413_v37 = vpop.f32.mrf.mxu0 }
 0xbcf   :  { %v11480_v30 = vpop.f32.mrf.mxu0 }
 0xbd1   :  { %v5423_v21 = vpop.f32.mrf.mxu0 }
 0xbd7   :  { %v11483_v61 = vpop.f32.mrf.mxu0 }
 0xbd9   :  { %v5433_v19 = vpop.f32.mrf.mxu0 }
 0xbdf   :  { %v11486_v11 = vpop.f32.mrf.mxu0 }
 0xbe1   :  { %v5443_v3 = vpop.f32.mrf.mxu0 }
 0xbe7   :  { %v11489_v46 = vpop.f32.mrf.mxu0 }
 0xbe9   :  { %v5453_v22 = vpop.f32.mrf.mxu0 }
 0xbea   :  { %v14907_v43 = vpack.c.bf16 %v11489_v46, %v5453_v22  ;;  %v14927_v46 = vpack.c.bf16 %v11477_v56, %v5413_v37 }
 0xbef   :  { %v11492_v23 = vpop.f32.mrf.mxu0 }
 0xbf1   :  { %v5463_v10 = vpop.f32.mrf.mxu0 }
 0xbf2   :  { %v14903_v20 = vpack.c.bf16 %v11492_v23, %v5463_v10  ;;  %v14923_v10 = vpack.c.bf16 %v11480_v30, %v5423_v21  ;;  %v12068_v30 = vld [vmem:[%s17037_s11 + $0x4] ss:$12 sps:$4 sm:$0xff]  }
 0xbf3   :  { %6082 = vmatprep.mubr.bf16.mxu1 %v12068_v30 }
 0xbf7   :  { %v11495_v53 = vpop.f32.mrf.mxu0 }
 0xbf9   :  { %v5473_v52 = vpop.f32.mrf.mxu0 }
 0xbfa   :  { %v14899_v48 = vpack.c.bf16 %v11495_v53, %v5473_v52  ;;  %v14917_v53 = vpack.c.bf16 %v11483_v61, %v5433_v19 }
 0xbff   :  { %v11498_v58 = vpop.f32.mrf.mxu0 }
 0xc01   :  { %v5483_v9 = vpop.f32.mrf.mxu0 }
 0xc02   :  { %v14895_v33 = vpack.c.bf16 %v11498_v58, %v5483_v9  ;;  %v14911_v58 = vpack.c.bf16 %v11486_v11, %v5443_v3 }
 0xc04   :  { %6306 = vrot.lane.b32.xlu0 %v14895_v33, %s12734_s23 }
 0xc07   :  { %v14915_v52 = vpop.f32.mrf.mxu0 }
 0xc08   :  { %6304 = vrot.lane.b32.xlu0 %v14899_v48, %s12734_s23 }
 0xc09   :  { %v14921_v23 = vpop.f32.mrf.mxu0 }
 0xc0c   :  { %6302 = vrot.lane.b32.xlu0 %v14903_v20, %s12734_s23 }
 0xc0f   :  { %v11504_v22 = vpop.f32.mrf.mxu0 }
 0xc10   :  { %6300 = vrot.lane.b32.xlu0 %v14907_v43, %s12734_s23 }
 0xc11   :  { %v5503_v11 = vpop.f32.mrf.mxu0 }
 0xc14   :  { %6298 = vrot.lane.b32.xlu0 %v14911_v58, %s12734_s23 }
 0xc17   :  { %v11507_v3 = vpop.f32.mrf.mxu0 }
 0xc18   :  { %6296 = vrot.lane.b32.xlu0 %v14917_v53, %s12734_s23 }
 0xc19   :  { %v5513_v61 = vpop.f32.mrf.mxu0 }
 0xc1c   :  { %6294 = vrot.lane.b32.xlu0 %v14923_v10, %s12734_s23 }
 0xc1f   :  { %v11510_v21 = vpop.f32.mrf.mxu0 }
 0xc20   :  { %6292 = vrot.lane.b32.xlu0 %v14927_v46, %s12734_s23 }
 0xc21   :  { %v5523_v56 = vpop.f32.mrf.mxu0 }
 0xc24   :  { %6627 = vrot.lane.b32.xlu0 %v14895_v33, %s12732_s3 }
 0xc27   :  { %v11513_v37 = vpop.f32.mrf.mxu0 }
 0xc28   :  { %6625 = vrot.lane.b32.xlu0 %v14899_v48, %s12732_s3 }
 0xc29   :  { %v5533_v19 = vpop.f32.mrf.mxu0 }
 0xc2c   :  { %6623 = vrot.lane.b32.xlu0 %v14903_v20, %s12732_s3 }
 0xc2f   :  { %v11516_v9 = vpop.f32.mrf.mxu0 }
 0xc30   :  { %6621 = vrot.lane.b32.xlu0 %v14907_v43, %s12732_s3 }
 0xc31   :  { %v5543_v12 = vpop.f32.mrf.mxu0 }
 0xc34   :  { %6619 = vrot.lane.b32.xlu0 %v14911_v58, %s12732_s3 }
 0xc37   :  { %v11519_v18 = vpop.f32.mrf.mxu0 }
 0xc38   :  { %6617 = vrot.lane.b32.xlu0 %v14917_v53, %s12732_s3 }
 0xc39   :  { %v5553_v30 = vpop.f32.mrf.mxu0 }
 0xc3a   :  { %v14956_v60 = vpack.c.bf16 %v11519_v18, %v5553_v30  ;;  %v14973_v18 = vpack.c.bf16 %v11513_v37, %v5533_v19  ;;  %v12078_v19 = vld [vmem:[%s17037_s11 + $0x60] ss:$12 sps:$4 sm:$0xff]  }
 0xc3c   :  { %6615 = vrot.lane.b32.xlu0 %v14923_v10, %s12732_s3 }
 0xc3f   :  { %v11522_v8 = vpop.f32.mrf.mxu0 }
 0xc40   :  { %6613 = vrot.lane.b32.xlu0 %v14927_v46, %s12732_s3 }
 0xc41   :  { %v5563_v32 = vpop.f32.mrf.mxu0 }
 0xc42   :  { %v14950_v55 = vpack.c.bf16 %v11522_v8, %v5563_v32  ;;  %v14965_v32 = vpack.c.bf16 %v11516_v9, %v5543_v12  ;;  %v14981_v12 = vpack.c.bf16 %v11510_v21, %v5523_v56  ;;  %v14989_v8 = vpack.c.bf16 %v11507_v3, %v5513_v61 }
 0xc43   :  { %v14997_v21 = vpack.c.bf16 %v11504_v22, %v5503_v11  ;;  %v15007_v3 = vpack.c.bf16 %v14915_v52, %v14921_v23  ;;  %v12066_v22 = vld [vmem:[%s17037_s11] ss:$12 sps:$4 sm:$0xff]   ;;  %v12071_v52 = vld [vmem:[%s17037_s11 + $0x1c] ss:$12 sps:$4 sm:$0xff]   ;;  %v12069_v23 = vld [vmem:[%s17037_s11 + $0x18] ss:$12 sps:$4 sm:$0xff]  }
 0xc44   :  { %6948 = vrot.lane.b32.xlu0 %v14895_v33, %s12735_s10  ;;  %6322 = vrot.lane.b32.xlu1 %v14950_v55, %s12734_s23  ;;  %v12074_v11 = vld [vmem:[%s17037_s11 + $0x34] ss:$12 sps:$4 sm:$0xff]  }
 0xc45   :  { %10678 = vmatprep.subr.bf16.mxu1 %v14950_v55 }
 0xc46   :  { %10679 = vmatpush3.bf16.msra.mxu1 %v14895_v33 }
 0xc47   :  { %10680 = vmatprep.subr.bf16.mxu1 %v14956_v60  ;;  %v11525_v61 = vpop.f32.mrf.mxu0 }
 0xc48   :  { %6946 = vrot.lane.b32.xlu0 %v14899_v48, %s12735_s10  ;;  %6320 = vrot.lane.b32.xlu1 %v14956_v60, %s12734_s23 }
 0xc49   :  { %v5573_v56 = vpop.f32.mrf.mxu0 }
 0xc4a   :  { %10681 = vmatpush3.bf16.msra.mxu1 %v14899_v48  ;;  %v15072_v37 = vpack.c.bf16 %v11525_v61, %v5573_v56 }
 0xc4b   :  { %10682 = vmatprep.subr.bf16.mxu1 %v14965_v32 }
 0xc4c   :  { %6944 = vrot.lane.b32.xlu0 %v14903_v20, %s12735_s10  ;;  %6318 = vrot.lane.b32.xlu1 %v14965_v32, %s12734_s23 }
 0xc4e   :  { %10683 = vmatpush3.bf16.msra.mxu1 %v14903_v20 }
 0xc4f   :  { %10684 = vmatprep.subr.bf16.mxu1 %v14973_v18 }
 0xc50   :  { %6942 = vrot.lane.b32.xlu0 %v14907_v43, %s12735_s10  ;;  %6316 = vrot.lane.b32.xlu1 %v14973_v18, %s12734_s23 }
 0xc52   :  { %10685 = vmatpush3.bf16.msra.mxu1 %v14907_v43 }
 0xc53   :  { %10686 = vmatprep.subr.bf16.mxu1 %v14981_v12 }
 0xc54   :  { %6940 = vrot.lane.b32.xlu0 %v14911_v58, %s12735_s10  ;;  %6314 = vrot.lane.b32.xlu1 %v14981_v12, %s12734_s23 }
 0xc56   :  { %10687 = vmatpush3.bf16.msra.mxu1 %v14911_v58 }
 0xc57   :  { %10688 = vmatprep.subr.bf16.mxu1 %v14989_v8 }
 0xc58   :  { %6938 = vrot.lane.b32.xlu0 %v14917_v53, %s12735_s10  ;;  %6312 = vrot.lane.b32.xlu1 %v14989_v8, %s12734_s23 }
 0xc5a   :  { %10689 = vmatpush3.bf16.msra.mxu1 %v14917_v53 }
 0xc5b   :  { %10690 = vmatprep.subr.bf16.mxu1 %v14997_v21 }
 0xc5c   :  { %6936 = vrot.lane.b32.xlu0 %v14923_v10, %s12735_s10  ;;  %6310 = vrot.lane.b32.xlu1 %v14997_v21, %s12734_s23 }
 0xc5e   :  { %10691 = vmatpush3.bf16.msra.mxu1 %v14923_v10 }
 0xc5f   :  { %10692 = vmatprep.subr.bf16.mxu1 %v15007_v3 }
 0xc60   :  { %6934 = vrot.lane.b32.xlu0 %v14927_v46, %s12735_s10  ;;  %6308 = vrot.lane.b32.xlu1 %v15007_v3, %s12734_s23 }
 0xc62   :  { %10693 = vmatpush3.bf16.msra.mxu1 %v14927_v46 }
 0xc64   :  { %5758 = vrot.lane.b32.xlu0 %v14895_v33, %s12733_s2  ;;  %6643 = vrot.lane.b32.xlu1 %v14950_v55, %s12732_s3  ;;  %v12072_v33 = vld [vmem:[%s17037_s11 + $0x30] ss:$12 sps:$4 sm:$0xff]  }
 0xc65   :  { %6083 = vmatmul.mubr.bf16.vlgmr.msra.gmra.mxu1 %v12066_v22 }
 0xc66   :  { %6090 = vmatprep.mubr.bf16.mxu1 %v12071_v52 }
 0xc68   :  { %5756 = vrot.lane.b32.xlu0 %v14899_v48, %s12733_s2  ;;  %6641 = vrot.lane.b32.xlu1 %v14956_v60, %s12732_s3  ;;  %v12077_v48 = vld [vmem:[%s17037_s11 + $0x4c] ss:$12 sps:$4 sm:$0xff]  }
 0xc6c   :  { %5754 = vrot.lane.b32.xlu0 %v14903_v20, %s12733_s2  ;;  %6639 = vrot.lane.b32.xlu1 %v14965_v32, %s12732_s3  ;;  %v12075_v20 = vld [vmem:[%s17037_s11 + $0x48] ss:$12 sps:$4 sm:$0xff]  }
 0xc6d   :  { %6091 = vmatmul.mubr.bf16.gmra.mxu1 %v12069_v23 }
 0xc6e   :  { %6098 = vmatprep.mubr.bf16.mxu1 %v12074_v11 }
 0xc70   :  { %5752 = vrot.lane.b32.xlu0 %v14907_v43, %s12733_s2  ;;  %6637 = vrot.lane.b32.xlu1 %v14973_v18, %s12732_s3 }
 0xc74   :  { %5750 = vrot.lane.b32.xlu0 %v14911_v58, %s12733_s2  ;;  %6635 = vrot.lane.b32.xlu1 %v14981_v12, %s12732_s3  ;;  %v12080_v58 = vld [vmem:[%s17037_s11 + $0x64] ss:$12 sps:$4 sm:$0xff]  }
 0xc75   :  { %6099 = vmatmul.mubr.bf16.gmra.mxu1 %v12072_v33 }
 0xc76   :  { %6106 = vmatprep.mubr.bf16.mxu1 %v12077_v48  ;;  %v6307_v43 = vpop.permute.xlu0 %6306 }
 0xc78   :  { %5748 = vrot.lane.b32.xlu0 %v14917_v53, %s12733_s2  ;;  %6633 = vrot.lane.b32.xlu1 %v14989_v8, %s12732_s3 }
 0xc7a   :  { %v6305_v53 = vpop.permute.xlu0 %6304 }
 0xc7c   :  { %5746 = vrot.lane.b32.xlu0 %v14923_v10, %s12733_s2  ;;  %6631 = vrot.lane.b32.xlu1 %v14997_v21, %s12732_s3  ;;  %v12083_v10 = vld [vmem:[%s17037_s11 + $0xf4] ss:$12 sps:$4 sm:$0xff]  }
 0xc7d   :  { %6107 = vmatmul.mubr.bf16.gmra.mxu1 %v12075_v20 }
 0xc7e   :  { %6114 = vmatprep.mubr.bf16.mxu1 %v12080_v58 }
 0xc80   :  { %5744 = vrot.lane.b32.xlu0 %v14927_v46, %s12733_s2  ;;  %6629 = vrot.lane.b32.xlu1 %v15007_v3, %s12732_s3  ;;  %v6303_v46 = vpop.permute.xlu0 %6302 }
 0xc84   :  { %6964 = vrot.lane.b32.xlu1 %v14950_v55, %s12735_s10  ;;  %5776 = vrot.lane.b32.xlu0 %v15072_v37, %s12733_s2  ;;  %v6301_v9 = vpop.permute.xlu0 %6300 }
 0xc85   :  { %6115 = vmatmul.mubr.bf16.gmra.mxu1 %v12078_v19 }
 0xc86   :  { %6393 = vmatprep.mubr.bf16.mxu1 %v12083_v10 }
 0xc88   :  { %6962 = vrot.lane.b32.xlu1 %v14956_v60, %s12735_s10  ;;  %6324 = vrot.lane.b32.xlu0 %v15072_v37, %s12734_s23  ;;  %v6299_v30 = vpop.permute.xlu0 %6298 }
 0xc8c   :  { %6960 = vrot.lane.b32.xlu1 %v14965_v32, %s12735_s10  ;;  %6645 = vrot.lane.b32.xlu0 %v15072_v37, %s12732_s3  ;;  %v6297_v22 = vpop.permute.xlu0 %6296 }
 0xc90   :  { %6958 = vrot.lane.b32.xlu1 %v14973_v18, %s12735_s10  ;;  %6966 = vrot.lane.b32.xlu0 %v15072_v37, %s12735_s10  ;;  %v6295_v52 = vpop.permute.xlu0 %6294 }
 0xc94   :  { %6956 = vrot.lane.b32.xlu1 %v14981_v12, %s12735_s10  ;;  %v6293_v23 = vpop.permute.xlu0 %6292 }
 0xc98   :  { %6954 = vrot.lane.b32.xlu1 %v14989_v8, %s12735_s10  ;;  %v6628_v11 = vpop.permute.xlu0 %6627 }
 0xc9c   :  { %6952 = vrot.lane.b32.xlu1 %v14997_v21, %s12735_s10  ;;  %v6626_v33 = vpop.permute.xlu0 %6625 }
 0xca0   :  { %6950 = vrot.lane.b32.xlu1 %v15007_v3, %s12735_s10  ;;  %v6624_v48 = vpop.permute.xlu0 %6623 }
 0xca4   :  { %5774 = vrot.lane.b32.xlu1 %v14950_v55, %s12733_s2  ;;  %v12119_v55 = vld [vmem:[%s17037_s11 + $0x7c] ss:$12 sps:$4 sm:$0xff]   ;;  %v6622_v58 = vpop.permute.xlu0 %6621 }
 0xca5   :  { %5846 = vmatprep.mubr.bf16.mxu0 %v12119_v55  ;;  %v12084_v55 = vld [vmem:[%s17037_s11 + $0x108] ss:$12 sps:$4 sm:$0xff]  }
 0xca8   :  { %5772 = vrot.lane.b32.xlu1 %v14956_v60, %s12733_s2  ;;  %v11528_v60 = vpop.f32.mrf.mxu0 }
 0xcac   :  { %5770 = vrot.lane.b32.xlu1 %v14965_v32, %s12733_s2 }
 0xcb0   :  { %5768 = vrot.lane.b32.xlu1 %v14973_v18, %s12733_s2  ;;  %v5583_v18 = vpop.f32.mrf.mxu0 }
 0xcb1   :  { %v15123_v61 = vpack.c.bf16 %v11528_v60, %v5583_v18  ;;  %v12087_v18 = vld [vmem:[%s17037_s11 + $0x120] ss:$12 sps:$4 sm:$0xff]  }
 0xcb4   :  { %5766 = vrot.lane.b32.xlu1 %v14981_v12, %s12733_s2 }
 0xcb6   :  { %v6323_v20 = vpop.permute.xlu1 %6322 }
 0xcb7   :  { %10731 = vmatprep.subr.bf16.mxu1 %v6323_v20 }
 0xcb8   :  { %5764 = vrot.lane.b32.xlu1 %v14989_v8, %s12733_s2  ;;  %10732 = vmatpush3.bf16.msra.mxu1 %v6307_v43  ;;  %v6620_v8 = vpop.permute.xlu0 %6619 }
 0xcba   :  { %v6321_v32 = vpop.permute.xlu1 %6320 }
 0xcbb   :  { %10733 = vmatprep.subr.bf16.mxu1 %v6321_v32 }
 0xcbc   :  { %5762 = vrot.lane.b32.xlu1 %v14997_v21, %s12733_s2  ;;  %10734 = vmatpush3.bf16.msra.mxu1 %v6305_v53  ;;  %v6618_v19 = vpop.permute.xlu0 %6617 }
 0xcbe   :  { %v6319_v12 = vpop.permute.xlu1 %6318 }
 0xcbf   :  { %10735 = vmatprep.subr.bf16.mxu1 %v6319_v12 }
 0xcc0   :  { %5760 = vrot.lane.b32.xlu1 %v15007_v3, %s12733_s2  ;;  %10736 = vmatpush3.bf16.msra.mxu1 %v6303_v46  ;;  %v6616_v3 = vpop.permute.xlu0 %6615 }
 0xcc2   :  { %v6317_v43 = vpop.permute.xlu1 %6316 }
 0xcc3   :  { %10737 = vmatprep.subr.bf16.mxu1 %v6317_v43 }
 0xcc4   :  { %10738 = vmatpush3.bf16.msra.mxu1 %v6301_v9  ;;  %5778 = vrot.lane.b32.xlu1 %v15123_v61, %s12733_s2  ;;  %v6614_v46 = vpop.permute.xlu0 %6613  ;;  %v12081_v9 = vld [vmem:[%s17037_s11 + $0xf0] ss:$12 sps:$4 sm:$0xff]  }
 0xcc6   :  { %v6315_v56 = vpop.permute.xlu1 %6314 }
 0xcc7   :  { %10739 = vmatprep.subr.bf16.mxu1 %v6315_v56 }
 0xcc8   :  { %10740 = vmatpush3.bf16.msra.mxu1 %v6299_v30  ;;  %6326 = vrot.lane.b32.xlu1 %v15123_v61, %s12734_s23  ;;  %v12086_v30 = vld [vmem:[%s17037_s11 + $0x10c] ss:$12 sps:$4 sm:$0xff]  }
 0xcca   :  { %v6313_v21 = vpop.permute.xlu1 %6312 }
 0xccb   :  { %10741 = vmatprep.subr.bf16.mxu1 %v6313_v21  ;;  %v12090_v21 = vld [vmem:[%s17037_s11 + $0x138] ss:$12 sps:$4 sm:$0xff]  }
 0xccc   :  { %10742 = vmatpush3.bf16.msra.mxu1 %v6297_v22  ;;  %6647 = vrot.lane.b32.xlu1 %v15123_v61, %s12732_s3 }
 0xcce   :  { %v6311_v53 = vpop.permute.xlu1 %6310 }
 0xccf   :  { %10743 = vmatprep.subr.bf16.mxu1 %v6311_v53 }
 0xcd0   :  { %10744 = vmatpush3.bf16.msra.mxu1 %v6295_v52  ;;  %6968 = vrot.lane.b32.xlu1 %v15123_v61, %s12735_s10  ;;  %v6949_v52 = vpop.permute.xlu0 %6948 }
 0xcd2   :  { %v6309_v10 = vpop.permute.xlu1 %6308 }
 0xcd3   :  { %10745 = vmatprep.subr.bf16.mxu1 %v6309_v10 }
 0xcd4   :  { %10746 = vmatpush3.bf16.msra.mxu1 %v6293_v23  ;;  %v12089_v23 = vld [vmem:[%s17037_s11 + $0x124] ss:$12 sps:$4 sm:$0xff]   ;;  %v6947_v32 = vpop.permute.xlu0 %6946 }
 0xcd6   :  { %v6644_v22 = vpop.permute.xlu1 %6643 }
 0xcd7   :  { %6394 = vmatmul.mubr.bf16.vlgmr.msra.gmra.mxu1 %v12081_v9  ;;  %10784 = vmatprep.subr.bf16.mxu1 %v6644_v22  ;;  %v12093_v9 = vld [vmem:[%s17037_s11 + $0x150] ss:$12 sps:$4 sm:$0xff]  }
 0xcd8   :  { %10785 = vmatpush3.bf16.msra.mxu1 %v6628_v11  ;;  %6401 = vmatprep.mubr.bf16.mxu1 %v12086_v30  ;;  %v6945_v12 = vpop.permute.xlu0 %6944 }
 0xcda   :  { %v6642_v20 = vpop.permute.xlu1 %6641 }
 0xcdb   :  { %10786 = vmatprep.subr.bf16.mxu1 %v6642_v20 }
 0xcdc   :  { %10787 = vmatpush3.bf16.msra.mxu1 %v6626_v33  ;;  %v12092_v33 = vld [vmem:[%s17037_s11 + $0x13c] ss:$12 sps:$4 sm:$0xff]  }
 0xcde   :  { %v6640_v60 = vpop.permute.xlu1 %6639 }
 0xcdf   :  { %6402 = vmatmul.mubr.bf16.gmra.mxu1 %v12084_v55  ;;  %10788 = vmatprep.subr.bf16.mxu1 %v6640_v60  ;;  %v12101_v55 = vld [vmem:[%s17037_s11 + $0x184] ss:$12 sps:$4 sm:$0xff]  }
 0xce0   :  { %10789 = vmatpush3.bf16.msra.mxu1 %v6624_v48  ;;  %6409 = vmatprep.mubr.bf16.mxu1 %v12089_v23  ;;  %v6943_v48 = vpop.permute.xlu0 %6942 }
 0xce2   :  { %v6638_v11 = vpop.permute.xlu1 %6637 }
 0xce3   :  { %10790 = vmatprep.subr.bf16.mxu1 %v6638_v11 }
 0xce4   :  { %10791 = vmatpush3.bf16.msra.mxu1 %v6622_v58  ;;  %v12095_v58 = vld [vmem:[%s17037_s11 + $0x154] ss:$12 sps:$4 sm:$0xff]   ;;  %v6941_v10 = vpop.permute.xlu0 %6940 }
 0xce6   :  { %v6636_v43 = vpop.permute.xlu1 %6635 }
 0xce7   :  { %6410 = vmatmul.mubr.bf16.gmra.mxu1 %v12087_v18  ;;  %10792 = vmatprep.subr.bf16.mxu1 %v6636_v43  ;;  %v12099_v18 = vld [vmem:[%s17037_s11 + $0x180] ss:$12 sps:$4 sm:$0xff]  }
 0xce8   :  { %10793 = vmatpush3.bf16.msra.mxu1 %v6620_v8  ;;  %6417 = vmatprep.mubr.bf16.mxu1 %v12092_v33  ;;  %v6939_v22 = vpop.permute.xlu0 %6938  ;;  %v12104_v33 = vld [vmem:[%s17037_s11 + $0x19c] ss:$12 sps:$4 sm:$0xff]  }
 0xcea   :  { %v6634_v56 = vpop.permute.xlu1 %6633 }
 0xceb   :  { %10794 = vmatprep.subr.bf16.mxu1 %v6634_v56 }
 0xcec   :  { %10795 = vmatpush3.bf16.msra.mxu1 %v6618_v19  ;;  %v12098_v19 = vld [vmem:[%s17037_s11 + $0x16c] ss:$12 sps:$4 sm:$0xff]   ;;  %v6937_v23 = vpop.permute.xlu0 %6936 }
 0xcee   :  { %v6632_v53 = vpop.permute.xlu1 %6631 }
 0xcef   :  { %6418 = vmatmul.mubr.bf16.gmra.mxu1 %v12090_v21  ;;  %10796 = vmatprep.subr.bf16.mxu1 %v6632_v53  ;;  %v12102_v21 = vld [vmem:[%s17037_s11 + $0x198] ss:$12 sps:$4 sm:$0xff]  }
 0xcf0   :  { %10797 = vmatpush3.bf16.msra.mxu1 %v6616_v3  ;;  %6425 = vmatprep.mubr.bf16.mxu1 %v12095_v58  ;;  %v12096_v3 = vld [vmem:[%s17037_s11 + $0x168] ss:$12 sps:$4 sm:$0xff]   ;;  %v6935_v11 = vpop.permute.xlu0 %6934 }
 0xcf2   :  { %v6630_v8 = vpop.permute.xlu1 %6629 }
 0xcf3   :  { %10798 = vmatprep.subr.bf16.mxu1 %v6630_v8  ;;  %v12105_v8 = vld [vmem:[%s17037_s11 + $0x1b0] ss:$12 sps:$4 sm:$0xff]  }
 0xcf4   :  { %10799 = vmatpush3.bf16.msra.mxu1 %v6614_v46  ;;  %v5759_v56 = vpop.permute.xlu0 %5758 }
 0xcf6   :  { %v6965_v30 = vpop.permute.xlu1 %6964 }
 0xcf7   :  { %6426 = vmatmul.mubr.bf16.gmra.mxu1 %v12093_v9  ;;  %10837 = vmatprep.subr.bf16.mxu1 %v6965_v30 }
 0xcf8   :  { %6714 = vmatprep.mubr.bf16.mxu1 %v12098_v19  ;;  %v5757_v53 = vpop.permute.xlu0 %5756 }
 0xcfa   :  { %v6963_v20 = vpop.permute.xlu1 %6962 }
 0xcfc   :  { %v5755_v9 = vpop.permute.xlu0 %5754 }
 0xcfe   :  { %v6961_v46 = vpop.permute.xlu1 %6960 }
 0xcff   :  { %6715 = vmatmul.mubr.bf16.vlgmr.msra.gmra.mxu1 %v12096_v3  ;;  %v17263_v3 = vld [vmem:[#allocation28_spill] sm:$0xff] }
 0xd00   :  { %10838 = vmatpush3.bf16.msra.mxu1 %v6949_v52  ;;  %6722 = vmatprep.mubr.bf16.mxu1 %v12101_v55  ;;  %v5753_v30 = vpop.permute.xlu0 %5752 }
 0xd01   :  { %10839 = vmatprep.subr.bf16.mxu1 %v6963_v20  ;;  %v17262_v20 = vld [vmem:[#allocation34_spill] sm:$0xff] }
 0xd02   :  { %v6959_v60 = vpop.permute.xlu1 %6958  ;;  %v4752_v55 = vsub.f32 %v17263_v3, %v17262_v20  ;;  %v17270_v20 = vld [vmem:[#allocation29_spill] sm:$0xff]  ;;  %v17271_v3 = vld [vmem:[#allocation35_spill] sm:$0xff] }
 0xd04   :  { %10840 = vmatpush3.bf16.msra.mxu1 %v6947_v32  ;;  %v12107_v32 = vld [vmem:[%s17037_s11 + $0x1b4] ss:$12 sps:$4 sm:$0xff]  }
 0xd05   :  { %10841 = vmatprep.subr.bf16.mxu1 %v6961_v46  ;;  %v12113_v46 = vld [vmem:[%s17037_s11 + $0x1e4] ss:$12 sps:$4 sm:$0xff]  }
 0xd06   :  { %v6957_v43 = vpop.permute.xlu1 %6956 }
 0xd07   :  { %6723 = vmatmul.mubr.bf16.gmra.mxu1 %v12099_v18  ;;  %v17265_v18 = vld [vmem:[#allocation38_spill] sm:$0xff] }
 0xd08   :  { %10842 = vmatpush3.bf16.msra.mxu1 %v6945_v12  ;;  %6730 = vmatprep.mubr.bf16.mxu1 %v12104_v33  ;;  %v4770_v33 = vmul.f32 %v4752_v55, %v17265_v18  ;;  %v4747_v55 = vsub.f32 %v17271_v3, %v17270_v20 }
 0xd09   :  { %10843 = vmatprep.subr.bf16.mxu1 %v6959_v60 }
 0xd0a   :  { %v6955_v52 = vpop.permute.xlu1 %6954 }
 0xd0c   :  { %10844 = vmatpush3.bf16.msra.mxu1 %v6943_v48  ;;  %v12110_v48 = vld [vmem:[%s17037_s11 + $0x1cc] ss:$12 sps:$4 sm:$0xff]  }
 0xd0d   :  { %10845 = vmatprep.subr.bf16.mxu1 %v6957_v43 }
 0xd0e   :  { %v6953_v58 = vpop.permute.xlu1 %6952 }
 0xd0f   :  { %6731 = vmatmul.mubr.bf16.gmra.mxu1 %v12102_v21 }
 0xd10   :  { %10846 = vmatpush3.bf16.msra.mxu1 %v6941_v10  ;;  %6738 = vmatprep.mubr.bf16.mxu1 %v12107_v32  ;;  %v5751_v32 = vpop.permute.xlu0 %5750 }
 0xd11   :  { %10847 = vmatprep.subr.bf16.mxu1 %v6955_v52  ;;  %v17267_v52 = vld [vmem:[#allocation27_spill] sm:$0xff] }
 0xd12   :  { %v6951_v12 = vpop.permute.xlu1 %6950 }
 0xd14   :  { %10848 = vmatpush3.bf16.msra.mxu1 %v6939_v22  ;;  %v12108_v22 = vld [vmem:[%s17037_s11 + $0x1c8] ss:$12 sps:$4 sm:$0xff]  }
 0xd15   :  { %10849 = vmatprep.subr.bf16.mxu1 %v6953_v58  ;;  %v17268_v58 = vld [vmem:[#allocation32_spill] sm:$0xff] }
 0xd16   :  { %v5775_v19 = vpop.permute.xlu1 %5774 }
 0xd17   :  { %10625 = vmatprep.subr.bf16.mxu0 %v5775_v19  ;;  %6739 = vmatmul.mubr.bf16.gmra.mxu1 %v12105_v8 }
 0xd18   :  { %10850 = vmatpush3.bf16.msra.mxu1 %v6937_v23  ;;  %10626 = vmatpush3.bf16.msra.mxu0 %v5759_v56  ;;  %v17264_v23 = vld [vmem:[#allocation25_spill] sm:$0xff] }
 0xd19   :  { %10851 = vmatprep.subr.bf16.mxu1 %v6951_v12  ;;  %6746 = vmatprep.mubr.bf16.mxu1 %v12110_v48  ;;  %v4751_v60 = vsub.f32 %v17264_v23, %v14675_v40  ;;  %v17266_v56 = vld [vmem:[#allocation33_spill] sm:$0xff]  ;;  %v4788_v40 = vadd.f32 %v4770_v33, %v14615_v54 }
 0xd1a   :  { %v5773_v10 = vpop.permute.xlu1 %5772  ;;  %v4750_v21 = vsub.f32 %v17267_v52, %v17266_v56  ;;  %v12111_v48 = vld [vmem:[%s17037_s11 + $0x1e0] ss:$12 sps:$4 sm:$0xff]  }
 0xd1b   :  { %10627 = vmatprep.subr.bf16.mxu0 %v5773_v10 }
 0xd1c   :  { %10852 = vmatpush3.bf16.msra.mxu1 %v6935_v11  ;;  %10628 = vmatpush3.bf16.msra.mxu0 %v5757_v53  ;;  %v4769_v11 = vmul.f32 %v4751_v60, %v14714_v63  ;;  %v4749_v53 = vsub.f32 %v17268_v58, %v14669_v25  ;;  %v4768_v12 = vmul.f32 %v4750_v21, %v14693_v1  ;;  %v12116_v25 = vld [vmem:[%s17037_s11 + $0x1fc] ss:$12 sps:$4 sm:$0xff]   ;;  %v4806_v1 = vmax.f32 %v4788_v40, 0.0 }
 0xd1d   :  { %7229 = vmatprep.subr.mxu1 %v17243_v26 }
 0xd1e   :  { %v5771_v43 = vpop.permute.xlu1 %5770  ;;  %v4767_v19 = vmul.f32 %v4749_v53, %v14695_v27  ;;  %v4787_v63 = vadd.f32 %v4769_v11, %v14628_v2  ;;  %v4786_v54 = vadd.f32 %v4768_v12, %v14620_v4  ;;  %v5749_v27 = vpop.permute.xlu0 %5748  ;;  %v4765_v4 = vmul.f32 %v4747_v55, %v14691_v14  ;;  %v17275_v14 = vld [vmem:[#allocation41_spill] sm:$0xff]  ;;  %v17276_v53 = vld [vmem:[#allocation43_spill] sm:$0xff] }
 0xd1f   :  { %10629 = vmatprep.subr.bf16.mxu0 %v5771_v43  ;;  %6747 = vmatmul.mubr.bf16.gmra.mxu1 %v12108_v22  ;;  %v17274_v43 = vld [vmem:[#allocation39_spill] sm:$0xff]  ;;  %v4744_v11 = vsub.f32 %v17275_v14, %v14655_v5  ;;  %v4743_v12 = vsub.f32 %v17276_v53, %v14657_v31 }
 0xd20   :  { %10630 = vmatpush3.bf16.msra.mxu0 %v5755_v9  ;;  %7035 = vmatprep.mubr.bf16.mxu1 %v12113_v46  ;;  %v17269_v9 = vld [vmem:[#allocation31_spill] sm:$0xff]  ;;  %v17272_v46 = vld [vmem:[#allocation36_spill] sm:$0xff]  ;;  %v4785_v2 = vadd.f32 %v4767_v19, %v14633_v34  ;;  %v4804_v18 = vmax.f32 %v4786_v54, 0.0  ;;  %v4745_v56 = vsub.f32 %v17274_v43, %v14661_v35  ;;  %v4783_v35 = vadd.f32 %v4765_v4, %v14637_v59 }
 0xd21   :  { %v4748_v10 = vsub.f32 %v17269_v9, %v14663_v51  ;;  %v17273_v51 = vld [vmem:[#allocation37_spill] sm:$0xff]  ;;  %v4762_v40 = vmul.f32 %v4744_v11, %v14681_v39  ;;  %v17277_v59 = vld [vmem:[#allocation60_spill] sm:$0xff] }
 0xd22   :  { %v5769_v8 = vpop.permute.xlu1 %5768  ;;  %v4746_v60 = vsub.f32 %v17273_v51, %v14659_v62  ;;  %v4803_v21 = vmax.f32 %v4785_v2, 0.0  ;;  %v12114_v62 = vld [vmem:[%s17037_s11 + $0x1f8] ss:$12 sps:$4 sm:$0xff]   ;;  %v12125_v54 = vld [vmem:[%s17037_s11 + $0x94] ss:$12 sps:$4 sm:$0xff]  }
 0xd23   :  { %10631 = vmatprep.subr.bf16.mxu0 %v5769_v8  ;;  %v4766_v23 = vmul.f32 %v4748_v10, %v17272_v46  ;;  %v4780_v39 = vadd.f32 %v4762_v40, %v14639_v28  ;;  %v17280_v46 = vld [vmem:[#allocation57_spill] sm:$0xff]  ;;  %v17288_v11 = vld [vmem:[#allocation40_spill] sm:$0xff]  ;;  %v17292_v40 = vld [vmem:[#allocation46_spill] sm:$0xff] }
 0xd24   :  { %10632 = vmatpush3.bf16.msra.mxu0 %v5753_v30  ;;  %v4805_v30 = vmax.f32 %v4787_v63, 0.0  ;;  %v4764_v52 = vmul.f32 %v4746_v60, %v14685_v49  ;;  %v5747_v49 = vpop.permute.xlu0 %5746  ;;  %v4801_v63 = vmax.f32 %v4783_v35, 0.0 }
 0xd25   :  { %v4784_v34 = vadd.f32 %v4766_v23, %v14630_v17  ;;  %v12122_v17 = vld [vmem:[%s17037_s11 + $0x214] ss:$12 sps:$4 sm:$0xff]   ;;  %v4798_v3 = vmax.f32 %v4780_v39, 0.0  ;;  %v4739_v23 = vsub.f32 %v17280_v46, %v14649_v36  ;;  %v12123_v36 = vld [vmem:[%s17037_s11 + $0x90] ss:$12 sps:$4 sm:$0xff]   ;;  %v12338_v46 = vld [vmem:[#allocation12 + $0x10] sm:$0xff] }
 0xd26   :  { %v5767_v22 = vpop.permute.xlu1 %5766  ;;  %v4782_v5 = vadd.f32 %v4764_v52, %v14635_v47  ;;  %v17287_v52 = vld [vmem:[#allocation30_spill] sm:$0xff] }
 0xd27   :  { %10633 = vmatprep.subr.bf16.mxu0 %v5767_v22  ;;  %7036 = vmatmul.mubr.bf16.vlgmr.msra.gmra.mxu1 %v12111_v48  ;;  %v4802_v8 = vmax.f32 %v4784_v34, 0.0  ;;  %v4761_v48 = vmul.f32 %v4743_v12, %v14683_v50  ;;  %v17278_v50 = vld [vmem:[#allocation59_spill] sm:$0xff]  ;;  %v17279_v22 = vld [vmem:[#allocation58_spill] sm:$0xff]  ;;  %v4757_v60 = vmul.f32 %v4739_v23, %v14738_v15 }
 0xd28   :  { %7230 = vmatpush1.msra.mxu1 %v4806_v1  ;;  %10634 = vmatpush3.bf16.msra.mxu0 %v5751_v32  ;;  %v4763_v32 = vmul.f32 %v4745_v56, %v14687_v44  ;;  %v4742_v44 = vsub.f32 %v17277_v59, %v14651_v13  ;;  %v4800_v9 = vmax.f32 %v4782_v5, 0.0  ;;  %v5745_v10 = vpop.permute.xlu0 %5744  ;;  %v12117_v13 = vld [vmem:[%s17037_s11 + $0x78] ss:$12 sps:$4 sm:$0xff]   ;;  %v4740_v20 = vsub.f32 %v17279_v22, %v14645_v6  ;;  %v12129_v39 = vld [vmem:[%s17037_s11 + $0xa8] ss:$12 sps:$4 sm:$0xff]   ;;  %v12339_v23 = vld [vmem:[#allocation12 + $0x28] sm:$0xff] }
 0xd29   :  { %7231 = vmatprep.subr.mxu1 %v17243_v26  ;;  %7043 = vmatprep.mubr.bf16.mxu1 %v12116_v25  ;;  %v4779_v28 = vadd.f32 %v4761_v48, %v14647_v16  ;;  %v12128_v1 = vld [vmem:[%s17037_s11 + $0x22c] ss:$12 sps:$4 sm:$0xff]   ;;  %v17293_v59 = vld [vmem:[#allocation48_spill] sm:$0xff]  ;;  %v12140_v22 = vld [vmem:[%s17037_s11 + $0xdc] ss:$12 sps:$4 sm:$0xff]  }
 0xd2a   :  { %7232 = vmatpush1.msra.mxu1 %v4805_v30  ;;  %v5765_v33 = vpop.permute.xlu1 %5764  ;;  %v4781_v19 = vadd.f32 %v4763_v32, %v14641_v0  ;;  %v4760_v47 = vmul.f32 %v4742_v44, %v14677_v41  ;;  %v12120_v0 = vld [vmem:[%s17037_s11 + $0x210] ss:$12 sps:$4 sm:$0xff]   ;;  %v4741_v41 = vsub.f32 %v17278_v50, %v14653_v57  ;;  %v17294_v48 = vld [vmem:[#allocation49_spill] sm:$0xff] }
 0xd2b   :  { %7233 = vmatprep.subr.mxu1 %v17243_v26  ;;  %10635 = vmatprep.subr.bf16.mxu0 %v5765_v33  ;;  %v4797_v2 = vmax.f32 %v4779_v28, 0.0  ;;  %v17285_v33 = vld [vmem:[#allocation44_spill] sm:$0xff]  ;;  %v17286_v56 = vld [vmem:[#allocation47_spill] sm:$0xff]  ;;  %v17289_v32 = vld [vmem:[#allocation26_spill] sm:$0xff] }
 0xd2c   :  { %7234 = vmatpush1.msra.mxu1 %v4804_v18  ;;  %10636 = vmatpush3.bf16.msra.mxu0 %v5749_v27  ;;  %v4799_v25 = vmax.f32 %v4781_v19, 0.0  ;;  %v4778_v57 = vadd.f32 %v4760_v47, %v14643_v42  ;;  %v4759_v16 = vmul.f32 %v4741_v41, %v14679_v24  ;;  %v4758_v27 = vmul.f32 %v4740_v20, %v14673_v45  ;;  %v17281_v42 = vld [vmem:[#allocation56_spill] sm:$0xff]  ;;  %v17282_v45 = vld [vmem:[#allocation53_spill] sm:$0xff]  ;;  %v17284_v18 = vld [vmem:[#allocation55_spill] sm:$0xff]  ;;  %v5777_v12 = vpop.permute.xlu0 %5776 }
 0xd2d   :  { %7235 = vmatprep.subr.mxu1 %v17243_v26  ;;  %v4738_v6 = vsub.f32 %v17281_v42, %v14697_v7  ;;  %v12126_v7 = vld [vmem:[%s17037_s11 + $0x228] ss:$12 sps:$4 sm:$0xff]   ;;  %v4775_v43 = vadd.f32 %v4757_v60, %v17285_v33  ;;  %v4753_v34 = vsub.f32 %v17287_v52, %v17286_v56  ;;  %v4754_v35 = vsub.f32 %v17289_v32, %v17288_v11  ;;  %v12137_v50 = vld [vmem:[%s17037_s11 + $0xc4] ss:$12 sps:$4 sm:$0xff]   ;;  %v12351_v56 = vld [vmem:[#allocation12 + $0x88] sm:$0xff] }
 0xd2e   :  { %7236 = vmatpush1.msra.mxu1 %v4803_v21  ;;  %v5763_v58 = vpop.permute.xlu1 %5762  ;;  %v4777_v30 = vadd.f32 %v4759_v16, %v14727_v38  ;;  %v4796_v24 = vmax.f32 %v4778_v57, 0.0  ;;  %v4776_v51 = vadd.f32 %v4758_v27, %v14706_v29  ;;  %v17283_v29 = vld [vmem:[#allocation51_spill] sm:$0xff]  ;;  %v12337_v16 = vld [vmem:[#allocation12 + $0x18] sm:$0xff]  ;;  %v12354_v11 = vld [vmem:[#allocation12 + $0x90] sm:$0xff] }
 0xd2f   :  { %7237 = vmatprep.subr.mxu1 %v17243_v26  ;;  %10637 = vmatprep.subr.bf16.mxu0 %v5763_v58  ;;  %v4756_v38 = vmul.f32 %v4738_v6, %v17282_v45  ;;  %v4737_v15 = vsub.f32 %v17284_v18, %v17283_v29  ;;  %v12131_v21 = vld [vmem:[%s17037_s11 + $0xac] ss:$12 sps:$4 sm:$0xff]   ;;  %v4772_v5 = vmul.f32 %v4754_v35, %v17292_v40  ;;  %v12143_v33 = vld [vmem:[%s17037_s11 + $0xb0] ss:$12 sps:$4 sm:$0xff]  }
 0xd30   :  { %7044 = vmatmul.mubr.bf16.gmra.mxu1 %v12114_v62  ;;  %10638 = vmatpush3.bf16.msra.mxu0 %v5747_v49  ;;  %v4795_v4 = vmax.f32 %v4777_v30, 0.0  ;;  %v12134_v62 = vld [vmem:[%s17037_s11 + $0x244] ss:$12 sps:$4 sm:$0xff]   ;;  %v4794_v14 = vmax.f32 %v4776_v51, 0.0  ;;  %v17291_v58 = vld [vmem:[#allocation45_spill] sm:$0xff]  ;;  %v4771_v44 = vmul.f32 %v4753_v34, %v17293_v59  ;;  %v12336_v57 = vld [vmem:[#allocation12] sm:$0xff] }
 0xd31   :  { %7238 = vmatpush1.msra.mxu1 %v4802_v8  ;;  %7051 = vmatprep.mubr.bf16.mxu1 %v12122_v17  ;;  %v17290_v49 = vld [vmem:[#allocation42_spill] sm:$0xff]  ;;  %v4755_v53 = vmul.f32 %v4737_v15, %v17291_v58  ;;  %v4793_v8 = vmax.f32 %v4775_v43, 0.0  ;;  %v12141_v6 = vld [vmem:[%s17037_s11 + $0x80] ss:$12 sps:$4 sm:$0xff]   ;;  %v12350_v43 = vld [vmem:[#allocation12 + $0x70] sm:$0xff] }
 0xd32   :  { %7239 = vmatprep.subr.mxu1 %v17243_v26  ;;  %v5761_v31 = vpop.permute.xlu1 %5760  ;;  %v4774_v17 = vadd.f32 %v4756_v38, %v17290_v49  ;;  %v12341_v30 = vld [vmem:[#allocation12 + $0x38] sm:$0xff]  ;;  %v12343_v51 = vld [vmem:[#allocation12 + $0x48] sm:$0xff]  ;;  %v12348_v18 = vld [vmem:[#allocation12 + $0x60] sm:$0xff] }
 0xd33   :  { %7240 = vmatpush1.msra.mxu1 %v4801_v63  ;;  %10639 = vmatprep.subr.bf16.mxu0 %v5761_v31  ;;  %v4773_v19 = vadd.f32 %v4755_v53, %v17294_v48  ;;  %v17295_v31 = vld [vmem:[#allocation50_spill] sm:$0xff]  ;;  %v12355_v32 = vld [vmem:[#allocation12 + $0xa8] sm:$0xff] }
 0xd34   :  { %7241 = vmatprep.subr.mxu1 %v17243_v26  ;;  %10640 = vmatpush3.bf16.msra.mxu0 %v5745_v10  ;;  %v4792_v63 = vmax.f32 %v4774_v17, 0.0  ;;  %v4790_v47 = vadd.f32 %v4772_v5, %v17295_v31  ;;  %v17296_v10 = vld [vmem:[#allocation54_spill] sm:$0xff]  ;;  %v12145_v53 = vld [vmem:[%s17037_s11 + $0xe0] ss:$12 sps:$4 sm:$0xff]  }
 0xd35   :  { %7242 = vmatpush1.msra.mxu1 %v4800_v9  ;;  %11529 = vmatprep.subr.bf16.mxu0 %v17243_v26  ;;  %v12132_v9 = vld [vmem:[%s17037_s11 + $0x240] ss:$12 sps:$4 sm:$0xff]   ;;  %v12352_v34 = vld [vmem:[#allocation12 + $0x80] sm:$0xff] }
 0xd36   :  { %7243 = vmatprep.subr.mxu1 %v17243_v26  ;;  %v5779_v55 = vpop.permute.xlu1 %5778  ;;  %v4808_v41 = vmax.f32 %v4790_v47, 0.0  ;;  %v12345_v45 = vld [vmem:[#allocation12 + $0x58] sm:$0xff]  ;;  %v12356_v49 = vld [vmem:[#allocation12 + $0xa0] sm:$0xff]  ;;  %v12359_v40 = vld [vmem:[#allocation12 + $0xc8] sm:$0xff] }
 0xd37   :  { %7244 = vmatpush1.msra.mxu1 %v4799_v25  ;;  %5847 = vmatmul.mubr.bf16.vlgmr.msra.gmra.mxu0 %v12117_v13  ;;  %v4789_v13 = vadd.f32 %v4771_v44, %v17296_v10  ;;  %v15330_v25 = vpop.f32.mrf.mxu1  ;;  %v12349_v15 = vld [vmem:[#allocation12 + $0x78] sm:$0xff]  ;;  %v12146_v48 = vld [vmem:[%s17037_s11 + $0x8] ss:$12 sps:$4 sm:$0xff]  }
 0xd38   :  { %7245 = vmatprep.subr.mxu1 %v17243_v26  ;;  %7052 = vmatmul.mubr.bf16.gmra.mxu1 %v12120_v0  ;;  %v4791_v0 = vmax.f32 %v4773_v19, 0.0  ;;  %v12357_v17 = vld [vmem:[#allocation12 + $0xb8] sm:$0xff]  ;;  %v12362_v19 = vld [vmem:[#allocation12 + $0xd0] sm:$0xff] }
 0xd39   :  { %7246 = vmatpush1.msra.mxu1 %v4798_v3  ;;  %5854 = vmatprep.mubr.bf16.mxu0 %v12125_v54  ;;  %v4807_v28 = vmax.f32 %v4789_v13, 0.0  ;;  %v12335_v54 = vld [vmem:[#allocation12 + $0x8] sm:$0xff]  ;;  %v15340_v20 = vpop.f32.mrf.mxu1  ;;  %v12361_v59 = vld [vmem:[#allocation12 + $0xd8] sm:$0xff]  ;;  %v6325_v13 = vpop.permute.xlu0 %6324 }
 0xd3a   :  { %7247 = vmatprep.subr.mxu1 %v17243_v26  ;;  %7059 = vmatprep.mubr.bf16.mxu1 %v12128_v1  ;;  %v12135_v1 = vld [vmem:[%s17037_s11 + $0xc0] ss:$12 sps:$4 sm:$0xff]   ;;  %v6327_v47 = vpop.permute.xlu1 %6326 }
 0xd3b   :  { %7248 = vmatpush1.msra.mxu1 %v4797_v2  ;;  %11530 = vmatpush3.bf16.msra.mxu0 %v5779_v55  ;;  %v15343_v3 = vpop.f32.mrf.mxu1  ;;  %v12138_v55 = vld [vmem:[%s17037_s11 + $0xd8] ss:$12 sps:$4 sm:$0xff]   ;;  %v12365_v10 = vld [vmem:[#allocation12 + $0xf8] sm:$0xff] }
 0xd3c   :  { %7249 = vmatprep.subr.mxu1 %v17243_v26  ;;  %11531 = vmatprep.subr.bf16.mxu0 %v17243_v26  ;;  %v12340_v2 = vld [vmem:[#allocation12 + $0x20] sm:$0xff] }
 0xd3d   :  { %7250 = vmatpush1.msra.mxu1 %v4796_v24  ;;  %v15349_v27 = vpop.f32.mrf.mxu1  ;;  %v12342_v24 = vld [vmem:[#allocation12 + $0x30] sm:$0xff] }
 0xd3e   :  { %7251 = vmatprep.subr.mxu1 %v17243_v26 }
 0xd3f   :  { %7252 = vmatpush1.msra.mxu1 %v4795_v4  ;;  %5855 = vmatmul.mubr.bf16.gmra.mxu0 %v12123_v36  ;;  %v15354_v42 = vpop.f32.mrf.mxu1  ;;  %v12344_v36 = vld [vmem:[#allocation12 + $0x40] sm:$0xff]  ;;  %v12346_v4 = vld [vmem:[#allocation12 + $0x50] sm:$0xff] }
 0xd40   :  { %7253 = vmatprep.subr.mxu1 %v17243_v26  ;;  %7060 = vmatmul.mubr.bf16.gmra.mxu1 %v12126_v7  ;;  %v12142_v7 = vld [vmem:[%s17037_s11 + $0x98] ss:$12 sps:$4 sm:$0xff]  }
 0xd41   :  { %7254 = vmatpush1.msra.mxu1 %v4794_v14  ;;  %5862 = vmatprep.mubr.bf16.mxu0 %v12131_v21  ;;  %v15360_v60 = vpop.f32.mrf.mxu1  ;;  %v12353_v21 = vld [vmem:[#allocation12 + $0x98] sm:$0xff]  ;;  %v12144_v14 = vld [vmem:[%s17037_s11 + $0xc8] ss:$12 sps:$4 sm:$0xff]  }
 0xd42   :  { %7255 = vmatprep.subr.mxu1 %v17243_v26  ;;  %7067 = vmatprep.mubr.bf16.mxu1 %v12134_v62 }
 0xd43   :  { %7256 = vmatpush1.msra.mxu1 %v4793_v8  ;;  %11532 = vmatpush3.bf16.msra.mxu0 %v5777_v12  ;;  %v15366_v38 = vpop.f32.mrf.mxu1  ;;  %v12358_v12 = vld [vmem:[#allocation12 + $0xb0] sm:$0xff]  ;;  %v12360_v8 = vld [vmem:[#allocation12 + $0xc0] sm:$0xff] }
 0xd44   :  { %7257 = vmatprep.subr.mxu1 %v17243_v26  ;;  %11553 = vmatprep.subr.bf16.mxu0 %v17243_v26 }
 0xd45   :  { %7258 = vmatpush1.msra.mxu1 %v4792_v63  ;;  %v15375_v29 = vpop.f32.mrf.mxu1  ;;  %v12363_v63 = vld [vmem:[#allocation12 + $0xe8] sm:$0xff] }
 0xd46   :  { %7259 = vmatprep.subr.mxu1 %v17243_v26 }
 0xd47   :  { %7260 = vmatpush1.msra.mxu1 %v4791_v0  ;;  %5863 = vmatmul.mubr.bf16.gmra.mxu0 %v12129_v39  ;;  %v12364_v39 = vld [vmem:[#allocation12 + $0xe0] sm:$0xff]  ;;  %v12147_v0 = vld [vmem:[%s17037_s11 + $0x20] ss:$12 sps:$4 sm:$0xff]  }
 0xd48   :  { %7289 = vmatprep.subr.mxu1 %v17243_v26  ;;  %7068 = vmatmul.mubr.bf16.gmra.mxu1 %v12132_v9 }
 0xd49   :  { %7290 = vmatpush2.msra.mxu1 %v4808_v41  ;;  %5870 = vmatprep.mubr.bf16.mxu0 %v12137_v50  ;;  %v12366_v50 = vld [vmem:[#allocation12 + $0xf0] sm:$0xff] }
 0xd4a   :  { %7291 = vmatprep.subr.mxu1 %v17243_v26  ;;  %10315 = vmatprep.mubr.msk.f32.mxu1 %vm3768_vm5, %v12335_v54  ;;  %v12368_v54 = vld [vmem:[#allocation12 + $0x100] sm:$0xff] }
 0xd4b   :  { %7292 = vmatpush2.msra.mxu1 %v4807_v28  ;;  %v12367_v28 = vld [vmem:[#allocation12 + $0x108] sm:$0xff] }
 0xd4f   :  { %5871 = vmatmul.mubr.bf16.gmra.mxu0 %v12135_v1 }
 0xd50   :  { %7294 = vmatmul.mubr.f32.vlgmr.msra.gmra.mxu1 %v12336_v57  ;;  %5878 = vmatprep.mubr.bf16.mxu0 %v12140_v22  ;;  %v12369_v22 = vld [vmem:[#allocation12 + $0x118] sm:$0xff]  ;;  %v12148_v57 = vld [vmem:[%s17037_s11 + $0x38] ss:$12 sps:$4 sm:$0xff]  }
 0xd51   :  { %10316 = vmatprep.mubr.msk.f32.mxu1 %vm3768_vm5, %v12337_v16  ;;  %v12370_v16 = vld [vmem:[#allocation12 + $0x110] sm:$0xff] }
 0xd54   :  { %7299 = vmatmul.mubr.f32.gmra.mxu1 %v12338_v46  ;;  %v12371_v46 = vld [vmem:[#allocation12 + $0x128] sm:$0xff] }
 0xd55   :  { %10317 = vmatprep.mubr.msk.f32.mxu1 %vm3768_vm5, %v12339_v23 }
 0xd57   :  { %5879 = vmatmul.mubr.bf16.gmra.mxu0 %v12138_v55 }
 0xd58   :  { %7304 = vmatmul.mubr.f32.gmra.mxu1 %v12340_v2  ;;  %11533 = vmatprep.mubr.msk.bf16.mxu0 %vm12737_vm6, %v17243_v26  ;;  %v12372_v2 = vld [vmem:[#allocation12 + $0x120] sm:$0xff] }
 0xd59   :  { %10318 = vmatprep.mubr.msk.f32.mxu1 %vm3768_vm5, %v12341_v30 }
 0xd5c   :  { %7309 = vmatmul.mubr.f32.gmra.mxu1 %v12342_v24 }
 0xd5d   :  { %10319 = vmatprep.mubr.msk.f32.mxu1 %vm3768_vm5, %v12343_v51 }
 0xd5f   :  { %11534 = vmatmul.mubr.msk.bf16.vlgmr.msra.gmra.mxu0 %vm5798_vm7, %v12141_v6  ;;  %v12373_v6 = vld [vmem:[#allocation12 + $0x138] sm:$0xff] }
 0xd60   :  { %11554 = vmatpush3.bf16.msra.mxu0 %v15123_v61  ;;  %7314 = vmatmul.mubr.f32.gmra.mxu1 %v12344_v36  ;;  %v12347_v61 = vld [vmem:[#allocation12 + $0x68] sm:$0xff] }
 0xd61   :  { %11555 = vmatprep.subr.bf16.mxu0 %v17243_v26  ;;  %10320 = vmatprep.mubr.msk.f32.mxu1 %vm3768_vm5, %v12345_v45  ;;  %v12149_v36 = vld [vmem:[%s17037_s11 + $0x50] ss:$12 sps:$4 sm:$0xff]   ;;  %v12374_v45 = vld [vmem:[#allocation12 + $0x130] sm:$0xff] }
 0xd62   :  { %11537 = vmatprep.mubr.msk.bf16.mxu0 %vm12737_vm6, %v17243_v26 }
 0xd64   :  { %11556 = vmatpush3.bf16.msra.mxu0 %v15072_v37  ;;  %7319 = vmatmul.mubr.f32.gmra.mxu1 %v12346_v4  ;;  %v15382_v37 = vpop.f32.mrf.mxu1  ;;  %v12375_v4 = vld [vmem:[#allocation12 + $0x148] sm:$0xff] }
 0xd65   :  { %10321 = vmatprep.mubr.msk.f32.mxu1 %vm3768_vm5, %v12347_v61  ;;  %11577 = vmatprep.subr.bf16.mxu0 %v17243_v26 }
 0xd66   :  { %v15388_v52 = vpop.f32.mrf.mxu1 }
 0xd67   :  { %11538 = vmatmul.mubr.msk.bf16.gmra.mxu0 %vm5798_vm7, %v12142_v7 }
 0xd68   :  { %7324 = vmatmul.mubr.f32.gmra.mxu1 %v12348_v18  ;;  %11541 = vmatprep.mubr.msk.bf16.mxu0 %vm12737_vm6, %v17243_v26  ;;  %v15394_v62 = vpop.f32.mrf.mxu1 }
 0xd69   :  { %10322 = vmatprep.mubr.msk.f32.mxu1 %vm3768_vm5, %v12349_v15  ;;  %v12376_v15 = vld [vmem:[#allocation12 + $0x140] sm:$0xff] }
 0xd6a   :  { %v15400_v35 = vpop.f32.mrf.mxu1 }
 0xd6c   :  { %7329 = vmatmul.mubr.f32.gmra.mxu1 %v12350_v43  ;;  %v15406_v58 = vpop.f32.mrf.mxu1  ;;  %v12377_v43 = vld [vmem:[#allocation12 + $0x158] sm:$0xff] }
 0xd6d   :  { %10323 = vmatprep.mubr.msk.f32.mxu1 %vm3768_vm5, %v12351_v56 }
 0xd6e   :  { %v15412_v5 = vpop.f32.mrf.mxu1 }
 0xd6f   :  { %11542 = vmatmul.mubr.msk.bf16.gmra.mxu0 %vm5798_vm7, %v12143_v33 }
 0xd70   :  { %7334 = vmatmul.mubr.f32.gmra.mxu1 %v12352_v34  ;;  %11545 = vmatprep.mubr.msk.bf16.mxu0 %vm12737_vm6, %v17243_v26  ;;  %v15418_v44 = vpop.f32.mrf.mxu1 }
 0xd71   :  { %10324 = vmatprep.mubr.msk.f32.mxu1 %vm3768_vm5, %v12353_v21  ;;  %v12150_v21 = vld [vmem:[%s17037_s11 + $0x68] ss:$12 sps:$4 sm:$0xff]  }
 0xd72   :  { %v15424_v31 = vpop.f32.mrf.mxu1 }
 0xd74   :  { %7339 = vmatmul.mubr.f32.gmra.mxu1 %v12354_v11  ;;  %v15427_v9 = vpop.f32.mrf.mxu1 }
 0xd75   :  { %10325 = vmatprep.mubr.msk.f32.mxu1 %vm3768_vm5, %v12355_v32  ;;  %v12379_v32 = vld [vmem:[#allocation12 + $0x168] sm:$0xff] }
 0xd76   :  { %v15436_v41 = vpop.f32.mrf.mxu1 }
 0xd77   :  { %11546 = vmatmul.mubr.msk.bf16.gmra.mxu0 %vm5798_vm7, %v12144_v14  ;;  %v12378_v14 = vld [vmem:[#allocation12 + $0x150] sm:$0xff] }
 0xd78   :  { %7344 = vmatmul.mubr.f32.gmra.mxu1 %v12356_v49  ;;  %11549 = vmatprep.mubr.msk.bf16.mxu0 %vm12737_vm6, %v17243_v26  ;;  %v15443_v1 = vpop.f32.mrf.mxu1 }
 0xd79   :  { %10326 = vmatprep.mubr.msk.f32.mxu1 %vm3768_vm5, %v12357_v17 }
 0xd7a   :  { %v15449_v55 = vpop.f32.mrf.mxu1 }
 0xd7c   :  { %7349 = vmatmul.mubr.f32.gmra.mxu1 %v12358_v12 }
 0xd7d   :  { %10327 = vmatprep.mubr.msk.f32.mxu1 %vm3768_vm5, %v12359_v40  ;;  %v12381_v40 = vld [vmem:[#allocation12 + $0x178] sm:$0xff] }
 0xd7f   :  { %11550 = vmatmul.mubr.msk.bf16.gmra.mxu0 %vm5798_vm7, %v12145_v53  ;;  %v12380_v53 = vld [vmem:[#allocation12 + $0x160] sm:$0xff] }
 0xd80   :  { %7354 = vmatmul.mubr.f32.gmra.mxu1 %v12360_v8  ;;  %11557 = vmatprep.mubr.msk.bf16.mxu0 %vm12737_vm6, %v17243_v26 }
 0xd81   :  { %10328 = vmatprep.mubr.msk.f32.mxu1 %vm3768_vm5, %v12361_v59 }
 0xd84   :  { %7359 = vmatmul.mubr.f32.gmra.mxu1 %v12362_v19  ;;  %v12382_v19 = vld [vmem:[#allocation12 + $0x170] sm:$0xff] }
 0xd85   :  { %10329 = vmatprep.mubr.msk.f32.mxu1 %vm3768_vm5, %v12363_v63 }
 0xd87   :  { %11558 = vmatmul.mubr.msk.bf16.vlgmr.msra.gmra.mxu0 %vm5798_vm7, %v12146_v48  ;;  %v12151_v48 = vld [vmem:[%s17037_s11 + $0xf8] ss:$12 sps:$4 sm:$0xff]  }
 0xd88   :  { %11578 = vmatpush3.bf16.msra.mxu0 %v6327_v47  ;;  %7364 = vmatmul.mubr.f32.gmra.mxu1 %v12364_v39  ;;  %v12383_v47 = vld [vmem:[#allocation12 + $0x188] sm:$0xff] }
 0xd89   :  { %11579 = vmatprep.subr.bf16.mxu0 %v17243_v26  ;;  %10330 = vmatprep.mubr.msk.f32.mxu1 %vm3768_vm5, %v12365_v10  ;;  %v6648_v10 = vpop.permute.xlu1 %6647 }
 0xd8a   :  { %11561 = vmatprep.mubr.msk.bf16.mxu0 %vm12737_vm6, %v17243_v26 }
 0xd8c   :  { %11580 = vmatpush3.bf16.msra.mxu0 %v6325_v13  ;;  %7369 = vmatmul.mubr.f32.gmra.mxu1 %v12366_v50 }
 0xd8d   :  { %10331 = vmatprep.mubr.msk.f32.mxu1 %vm3768_vm5, %v12367_v28  ;;  %11601 = vmatprep.subr.bf16.mxu0 %v17243_v26  ;;  %v12385_v28 = vld [vmem:[#allocation12 + $0x198] sm:$0xff] }
 0xd8f   :  { %11562 = vmatmul.mubr.msk.bf16.gmra.mxu0 %vm5798_vm7, %v12147_v0  ;;  %v12384_v0 = vld [vmem:[#allocation12 + $0x180] sm:$0xff] }
 0xd90   :  { %7374 = vmatmul.mubr.f32.gmra.mxu1 %v12368_v54  ;;  %11565 = vmatprep.mubr.msk.bf16.mxu0 %vm12737_vm6, %v17243_v26 }
 0xd91   :  { %10332 = vmatprep.mubr.msk.f32.mxu1 %vm3768_vm5, %v12369_v22  ;;  %v6646_v22 = vpop.permute.xlu0 %6645 }
 0xd94   :  { %7379 = vmatmul.mubr.f32.gmra.mxu1 %v12370_v16  ;;  %v12152_v16 = vld [vmem:[%s17037_s11 + $0x110] ss:$12 sps:$4 sm:$0xff]  }
 0xd95   :  { %10333 = vmatprep.mubr.msk.f32.mxu1 %vm3768_vm5, %v12371_v46  ;;  %v12386_v46 = vld [vmem:[#allocation12 + $0x190] sm:$0xff] }
 0xd97   :  { %11566 = vmatmul.mubr.msk.bf16.gmra.mxu0 %vm5798_vm7, %v12148_v57  ;;  %v10747_v23 = vpop.f32.mrf.mxu1 }
 0xd98   :  { %7384 = vmatmul.mubr.f32.gmra.mxu1 %v12372_v2  ;;  %11569 = vmatprep.mubr.msk.bf16.mxu0 %vm12737_vm6, %v17243_v26  ;;  %v12387_v2 = vld [vmem:[#allocation12 + $0x1a8] sm:$0xff] }
 0xd99   :  { %v10748_v30 = vpop.f32.mrf.mxu1  ;;  %10334 = vmatprep.mubr.msk.f32.mxu1 %vm3768_vm5, %v12373_v6 }
 0xd9a   :  { %v15456_v24 = vadd.f32 %v10748_v30, %v10747_v23 }
 0xd9b   :  { %v10750_v51 = vpop.f32.mrf.mxu1 }
 0xd9c   :  { %7389 = vmatmul.mubr.f32.gmra.mxu1 %v12374_v45  ;;  %v12389_v45 = vld [vmem:[#allocation12 + $0x1b8] sm:$0xff] }
 0xd9d   :  { %v10751_v7 = vpop.f32.mrf.mxu1  ;;  %10335 = vmatprep.mubr.msk.f32.mxu1 %vm3768_vm5, %v12375_v4 }
 0xd9e   :  { %v15462_v61 = vadd.f32 %v10751_v7, %v10750_v51  ;;  %v12388_v51 = vld [vmem:[#allocation12 + $0x1a0] sm:$0xff] }
 0xd9f   :  { %11570 = vmatmul.mubr.msk.bf16.gmra.mxu0 %vm5798_vm7, %v12149_v36  ;;  %v10753_v18 = vpop.f32.mrf.mxu1 }
 0xda0   :  { %7394 = vmatmul.mubr.f32.gmra.mxu1 %v12376_v15  ;;  %11573 = vmatprep.mubr.msk.bf16.mxu0 %vm12737_vm6, %v17243_v26  ;;  %v12390_v15 = vld [vmem:[#allocation12 + $0x1b0] sm:$0xff] }
 0xda1   :  { %v10754_v33 = vpop.f32.mrf.mxu1  ;;  %10336 = vmatprep.mubr.msk.f32.mxu1 %vm3768_vm5, %v12377_v43  ;;  %v12391_v43 = vld [vmem:[#allocation12 + $0x1c8] sm:$0xff] }
 0xda2   :  { %v15468_v56 = vadd.f32 %v10754_v33, %v10753_v18  ;;  %v12153_v18 = vld [vmem:[%s17037_s11 + $0x128] ss:$12 sps:$4 sm:$0xff]  }
 0xda3   :  { %v10756_v34 = vpop.f32.mrf.mxu1 }
 0xda4   :  { %7399 = vmatmul.mubr.f32.gmra.mxu1 %v12378_v14  ;;  %v12392_v14 = vld [vmem:[#allocation12 + $0x1c0] sm:$0xff] }
 0xda5   :  { %v10757_v11 = vpop.f32.mrf.mxu1  ;;  %10337 = vmatprep.mubr.msk.f32.mxu1 %vm3768_vm5, %v12379_v32  ;;  %v12393_v32 = vld [vmem:[#allocation12 + $0x1d8] sm:$0xff] }
 0xda6   :  { %v15474_v49 = vadd.f32 %v10757_v11, %v10756_v34 }
 0xda7   :  { %11574 = vmatmul.mubr.msk.bf16.gmra.mxu0 %vm5798_vm7, %v12150_v21  ;;  %v10759_v17 = vpop.f32.mrf.mxu1 }
 0xda8   :  { %7404 = vmatmul.mubr.f32.gmra.mxu1 %v12380_v53  ;;  %11581 = vmatprep.mubr.msk.bf16.mxu0 %vm12737_vm6, %v17243_v26 }
 0xda9   :  { %v10760_v12 = vpop.f32.mrf.mxu1  ;;  %10338 = vmatprep.mubr.msk.f32.mxu1 %vm3768_vm5, %v12381_v40  ;;  %v12394_v40 = vld [vmem:[#allocation12 + $0x1d0] sm:$0xff] }
 0xdaa   :  { %v15480_v8 = vadd.f32 %v10760_v12, %v10759_v17  ;;  %v12154_v12 = vld [vmem:[%s17037_s11 + $0x140] ss:$12 sps:$4 sm:$0xff]  }
 0xdab   :  { %v10762_v59 = vpop.f32.mrf.mxu1 }
 0xdac   :  { %7409 = vmatmul.mubr.f32.gmra.mxu1 %v12382_v19 }
 0xdad   :  { %v10763_v63 = vpop.f32.mrf.mxu1  ;;  %10339 = vmatprep.mubr.msk.f32.mxu1 %vm3768_vm5, %v12383_v47 }
 0xdae   :  { %v15486_v39 = vadd.f32 %v10763_v63, %v10762_v59  ;;  %v12396_v63 = vld [vmem:[#allocation12 + $0x1e0] sm:$0xff] }
 0xdaf   :  { %v10765_v13 = vpop.f32.mrf.mxu1  ;;  %11582 = vmatmul.mubr.msk.bf16.vlgmr.msra.gmra.mxu0 %vm5798_vm7, %v12151_v48  ;;  %v12395_v48 = vld [vmem:[#allocation12 + $0x1e8] sm:$0xff] }
 0xdb0   :  { %11602 = vmatpush3.bf16.msra.mxu0 %v6648_v10  ;;  %7414 = vmatmul.mubr.f32.gmra.mxu1 %v12384_v0  ;;  %v12397_v10 = vld [vmem:[#allocation12 + $0x1f8] sm:$0xff] }
 0xdb1   :  { %v10766_v50 = vpop.f32.mrf.mxu1  ;;  %11603 = vmatprep.subr.bf16.mxu0 %v17243_v26  ;;  %10340 = vmatprep.mubr.msk.f32.mxu1 %vm3768_vm5, %v12385_v28  ;;  %v12398_v28 = vld [vmem:[#allocation12 + $0x1f0] sm:$0xff] }
 0xdb2   :  { %v15491_v54 = vadd.f32 %v10766_v50, %v10765_v13  ;;  %11585 = vmatprep.mubr.msk.bf16.mxu0 %vm12737_vm6, %v17243_v26  ;;  %v12155_v50 = vld [vmem:[%s17037_s11 + $0x158] ss:$12 sps:$4 sm:$0xff]  }
 0xdb3   :  { %v10768_v57 = vpop.f32.mrf.mxu1 }
 0xdb4   :  { %11604 = vmatpush3.bf16.msra.mxu0 %v6646_v22  ;;  %7419 = vmatmul.mubr.f32.gmra.mxu1 %v12386_v46  ;;  %v12400_v46 = vld [vmem:[#allocation12 + $0x200] sm:$0xff] }
 0xdb5   :  { %v10769_v23 = vpop.f32.mrf.mxu1  ;;  %10341 = vmatprep.mubr.msk.f32.mxu1 %vm3768_vm5, %v12387_v2  ;;  %11625 = vmatprep.subr.bf16.mxu0 %v17243_v26  ;;  %v12401_v2 = vld [vmem:[#allocation12 + $0x218] sm:$0xff] }
 0xdb6   :  { %v15500_v30 = vadd.f32 %v10769_v23, %v10768_v57  ;;  %v12399_v57 = vld [vmem:[#allocation12 + $0x208] sm:$0xff] }
 0xdb7   :  { %v10771_v6 = vpop.f32.mrf.mxu1  ;;  %11586 = vmatmul.mubr.msk.bf16.gmra.mxu0 %vm5798_vm7, %v12152_v16 }
 0xdb8   :  { %7424 = vmatmul.mubr.f32.gmra.mxu1 %v12388_v51  ;;  %11589 = vmatprep.mubr.msk.bf16.mxu0 %vm12737_vm6, %v17243_v26 }
 0xdb9   :  { %v10772_v36 = vpop.f32.mrf.mxu1  ;;  %10342 = vmatprep.mubr.msk.f32.mxu1 %vm3768_vm5, %v12389_v45  ;;  %v12402_v45 = vld [vmem:[#allocation12 + $0x210] sm:$0xff] }
 0xdba   :  { %v15506_v7 = vadd.f32 %v10772_v36, %v10771_v6  ;;  %v12156_v36 = vld [vmem:[%s17037_s11 + $0x170] ss:$12 sps:$4 sm:$0xff]  }
 0xdbb   :  { %v10774_v4 = vpop.f32.mrf.mxu1 }
 0xdbc   :  { %7429 = vmatmul.mubr.f32.gmra.mxu1 %v12390_v15  ;;  %v6969_v15 = vpop.permute.xlu1 %6968 }
 0xdbd   :  { %v10775_v33 = vpop.f32.mrf.mxu1  ;;  %10343 = vmatprep.mubr.msk.f32.mxu1 %vm3768_vm5, %v12391_v43 }
 0xdbe   :  { %v15512_v34 = vadd.f32 %v10775_v33, %v10774_v4 }
 0xdbf   :  { %11590 = vmatmul.mubr.msk.bf16.gmra.mxu0 %vm5798_vm7, %v12153_v18  ;;  %v10800_v21 = vpop.f32.mrf.mxu1  ;;  %v12403_v18 = vld [vmem:[#allocation12 + $0x228] sm:$0xff] }
 0xdc0   :  { %7434 = vmatmul.mubr.f32.gmra.mxu1 %v12392_v14  ;;  %11593 = vmatprep.mubr.msk.bf16.mxu0 %vm12737_vm6, %v17243_v26 }
 0xdc1   :  { %v10801_v11 = vpop.f32.mrf.mxu1  ;;  %10344 = vmatprep.mubr.msk.f32.mxu1 %vm3768_vm5, %v12393_v32  ;;  %v6967_v32 = vpop.permute.xlu0 %6966 }
 0xdc2   :  { %v15518_v17 = vadd.f32 %v10801_v11, %v10800_v21  ;;  %v12404_v21 = vld [vmem:[#allocation12 + $0x220] sm:$0xff]  ;;  %v12405_v11 = vld [vmem:[#allocation12 + $0x238] sm:$0xff] }
 0xdc3   :  { %v15520_v53 = vpop.f32.mrf.mxu1 }
 0xdc4   :  { %7439 = vmatmul.mubr.f32.gmra.mxu1 %v12394_v40  ;;  %v12157_v40 = vld [vmem:[%s17037_s11 + $0x188] ss:$12 sps:$4 sm:$0xff]  }
 0xdc5   :  { %v15525_v59 = vpop.f32.mrf.mxu1  ;;  %10345 = vmatprep.mubr.msk.f32.mxu1 %vm3768_vm5, %v12395_v48 }
 0xdc7   :  { %11594 = vmatmul.mubr.msk.bf16.gmra.mxu0 %vm5798_vm7, %v12154_v12  ;;  %v10806_v19 = vpop.f32.mrf.mxu1 }
 0xdc8   :  { %7444 = vmatmul.mubr.f32.gmra.mxu1 %v12396_v63  ;;  %11597 = vmatprep.mubr.msk.bf16.mxu0 %vm12737_vm6, %v17243_v26  ;;  %v12407_v63 = vld [vmem:[#allocation13 + $0x8] sm:$0xf] }
 0xdc9   :  { %v10807_v47 = vpop.f32.mrf.mxu1  ;;  %10346 = vmatprep.mubr.msk.f32.mxu1 %vm3768_vm5, %v12397_v10 }
 0xdca   :  { %v15532_v13 = vadd.f32 %v10807_v47, %v10806_v19  ;;  %v12406_v19 = vld [vmem:[#allocation12 + $0x230] sm:$0xff] }
 0xdcb   :  { %v15534_v0 = vpop.f32.mrf.mxu1  ;;  %v12408_v47 = vld [vmem:[%s17037_s11 + $0x4] ss:$12 sps:$4 sm:$0xff]  }
 0xdcc   :  { %7449 = vmatmul.mubr.f32.gmra.mxu1 %v12398_v28 }
 0xdcd   :  { %v15539_v22 = vpop.f32.mrf.mxu1  ;;  %10347 = vmatprep.mubr.msk.f32.mxu1 %vm3768_vm5, %v12399_v57 }
 0xdcf   :  { %11598 = vmatmul.mubr.msk.bf16.gmra.mxu0 %vm5798_vm7, %v12155_v50  ;;  %v10812_v16 = vpop.f32.mrf.mxu1 }
 0xdd0   :  { %7454 = vmatmul.mubr.f32.gmra.mxu1 %v12400_v46  ;;  %11605 = vmatprep.mubr.msk.bf16.mxu0 %vm12737_vm6, %v17243_v26 }
 0xdd1   :  { %v10813_v23 = vpop.f32.mrf.mxu1  ;;  %10348 = vmatprep.mubr.msk.f32.mxu1 %vm3768_vm5, %v12401_v2 }
 0xdd2   :  { %v15546_v6 = vadd.f32 %v10813_v23, %v10812_v16  ;;  %v12158_v16 = vld [vmem:[%s17037_s11 + $0x1a0] ss:$12 sps:$4 sm:$0xff]  }
 0xdd3   :  { %v15548_v51 = vpop.f32.mrf.mxu1 }
 0xdd4   :  { %17297 = vst [vmem:[#allocation52_spill] sm:$0xff] %v15546_v6  ;;  %17298 = vst [vmem:[#allocation34_spill] sm:$0xff] %v15548_v51  ;;  %7459 = vmatmul.mubr.f32.gmra.mxu1 %v12402_v45 }
 0xdd5   :  { %v15553_v4 = vpop.f32.mrf.mxu1  ;;  %10349 = vmatprep.mubr.msk.f32.mxu1 %vm3768_vm5, %v12403_v18  ;;  %v12159_v18 = vld [vmem:[%s17037_s11 + $0x1b8] ss:$12 sps:$4 sm:$0xff]  }
 0xdd6   :  { %17299 = vst [vmem:[#allocation28_spill] sm:$0xff] %v15553_v4 }
 0xdd7   :  { %v10818_v33 = vpop.f32.mrf.mxu1  ;;  %11606 = vmatmul.mubr.msk.bf16.vlgmr.msra.gmra.mxu0 %vm5798_vm7, %v12156_v36 }
 0xdd8   :  { %11626 = vmatpush3.bf16.msra.mxu0 %v6969_v15  ;;  %11609 = vmatprep.mubr.msk.bf16.mxu0 %vm12737_vm6, %v17243_v26 }
 0xdd9   :  { %v10819_v43 = vpop.f32.mrf.mxu1  ;;  %11627 = vmatprep.subr.bf16.mxu0 %v17243_v26  ;;  %7464 = vmatmul.mubr.f32.gmra.mxu1 %v12404_v21 }
 0xdda   :  { %v15560_v14 = vadd.f32 %v10819_v43, %v10818_v33  ;;  %10350 = vmatprep.mubr.msk.f32.mxu1 %vm3768_vm5, %v12405_v11  ;;  %v12160_v11 = vld [vmem:[%s17037_s11 + $0x1d0] ss:$12 sps:$4 sm:$0xff]  }
 0xddb   :  { %v15563_v12 = vpop.f32.mrf.mxu1 }
 0xddc   :  { %17300 = vst [vmem:[#allocation25_spill] sm:$0xff] %v15560_v14  ;;  %17301 = vst [vmem:[#allocation38_spill] sm:$0xff] %v15563_v12  ;;  %11628 = vmatpush3.bf16.msra.mxu0 %v6967_v32 }
 0xddd   :  { %v15568_v48 = vpop.f32.mrf.mxu1  ;;  %7469 = vmatmul.mubr.f32.gmra.mxu1 %v12406_v19  ;;  %11649 = vmatprep.subr.msk.mxu0 %vm571_vm1, %v12407_v63 }
 0xdde   :  { %17302 = vst [vmem:[#allocation33_spill] sm:$0xff] %v15568_v48  ;;  %8095 = vmatprep.mubr.bf16.mxu1 %v12408_v47 }
 0xddf   :  { %v10824_v10 = vpop.f32.mrf.mxu1  ;;  %11610 = vmatmul.mubr.msk.bf16.gmra.mxu0 %vm5798_vm7, %v12157_v40 }
 0xde0   :  { %11613 = vmatprep.mubr.msk.bf16.mxu0 %vm12737_vm6, %v17243_v26 }
 0xde1   :  { %v10825_v50 = vpop.f32.mrf.mxu1 }
 0xde2   :  { %v15577_v28 = vadd.f32 %v10825_v50, %v10824_v10 }
 0xde3   :  { %v15579_v57 = vpop.f32.mrf.mxu1 }
 0xde4   :  { %17303 = vst [vmem:[#allocation27_spill] sm:$0xff] %v15577_v28  ;;  %17304 = vst [vmem:[#allocation32_spill] sm:$0xff] %v15579_v57  ;;  %v12165_v28 = vld [vmem:[%s17037_s11 + $0x248] ss:$12 sps:$4 sm:$0xff]  }
 0xde5   :  { %v15584_v46 = vpop.f32.mrf.mxu1 }
 0xde6   :  { %17305 = vst [vmem:[#allocation31_spill] sm:$0xff] %v15584_v46 }
 0xde7   :  { %11614 = vmatmul.mubr.msk.bf16.gmra.mxu0 %vm5798_vm7, %v12158_v16  ;;  %v10853_v23 = vpop.f32.mrf.mxu1 }
 0xde8   :  { %11617 = vmatprep.mubr.msk.bf16.mxu0 %vm12737_vm6, %v17243_v26 }
 0xde9   :  { %v10854_v2 = vpop.f32.mrf.mxu1 }
 0xdea   :  { %v15589_v36 = vadd.f32 %v10854_v2, %v10853_v23 }
 0xdeb   :  { %v15591_v45 = vpop.f32.mrf.mxu1 }
 0xdec   :  { %17306 = vst [vmem:[#allocation29_spill] sm:$0xff] %v15589_v36  ;;  %17307 = vst [vmem:[#allocation35_spill] sm:$0xff] %v15591_v45 }
 0xded   :  { %v15596_v15 = vpop.f32.mrf.mxu1 }
 0xdee   :  { %17308 = vst [vmem:[#allocation36_spill] sm:$0xff] %v15596_v15 }
 0xdef   :  { %11618 = vmatmul.mubr.msk.bf16.gmra.mxu0 %vm5798_vm7, %v12159_v18  ;;  %v12161_v18 = vld [vmem:[%s17037_s11 + $0x1e8] ss:$12 sps:$4 sm:$0xff]  }
 0xdf0   :  { %v10859_v33 = vpop.f32.mrf.mxu1  ;;  %11621 = vmatprep.mubr.msk.bf16.mxu0 %vm12737_vm6, %v17243_v26 }
 0xdf2   :  { %v10860_v43 = vpop.f32.mrf.mxu1 }
 0xdf3   :  { %v15601_v21 = vadd.f32 %v10860_v43, %v10859_v33 }
 0xdf4   :  { %v15606_v32 = vpop.f32.mrf.mxu1 }
 0xdf5   :  { %17309 = vst [vmem:[#allocation37_spill] sm:$0xff] %v15601_v21  ;;  %17310 = vst [vmem:[#allocation39_spill] sm:$0xff] %v15606_v32 }
 0xdf6   :  { %v15608_v40 = vpop.f32.mrf.mxu1 }
 0xdf7   :  { %17311 = vst [vmem:[#allocation41_spill] sm:$0xff] %v15608_v40  ;;  %v10641_v19 = vpop.f32.mrf.mxu0  ;;  %11622 = vmatmul.mubr.msk.bf16.gmra.mxu0 %vm5798_vm7, %v12160_v11 }
 0xdf8   :  { %v10865_v47 = vpop.f32.mrf.mxu1  ;;  %11629 = vmatprep.mubr.msk.bf16.mxu0 %vm12737_vm6, %v17243_v26 }
 0xdf9   :  { %v10642_v10 = vpop.f32.mrf.mxu0 }
 0xdfa   :  { %v15613_v50 = vadd.f32 %v10642_v10, %v10641_v19  ;;  %v10866_v16 = vpop.f32.mrf.mxu1  ;;  %v12409_v10 = vld [vmem:[#allocation13] sm:$0xff] }
 0xdfb   :  { %v15615_v23 = vadd.f32 %v10866_v16, %v10865_v47  ;;  %v10644_v2 = vpop.f32.mrf.mxu0 }
 0xdfc   :  { %v15620_v33 = vpop.f32.mrf.mxu1 }
 0xdfd   :  { %17312 = vst [vmem:[#allocation43_spill] sm:$0xff] %v15615_v23  ;;  %17313 = vst [vmem:[#allocation60_spill] sm:$0xff] %v15620_v33  ;;  %v10645_v43 = vpop.f32.mrf.mxu0 }
 0xdfe   :  { %v15622_v40 = vadd.f32 %v10645_v43, %v10644_v2  ;;  %v15624_v11 = vpop.f32.mrf.mxu1 }
 0xdff   :  { %17314 = vst [vmem:[#allocation59_spill] sm:$0xff] %v15624_v11  ;;  %v10647_v32 = vpop.f32.mrf.mxu0  ;;  %11630 = vmatmul.mubr.msk.bf16.vlgmr.msra.gmra.mxu0 %vm5798_vm7, %v12161_v18  ;;  %v12162_v18 = vld [vmem:[%s17037_s11 + $0x200] ss:$12 sps:$4 sm:$0xff]  }
 0xe00   :  { %v10871_v19 = vpop.f32.mrf.mxu1  ;;  %11633 = vmatprep.mubr.msk.bf16.mxu0 %vm12737_vm6, %v17243_v26  ;;  %11650 = vmatpush3.msk.msra.mxu0 %vm571_vm1, %v12407_v63 }
 0xe01   :  { %v10648_v47 = vpop.f32.mrf.mxu0  ;;  %11651 = vmatprep.subr.mxu0 %v12409_v10 }
 0xe02   :  { %v15630_v16 = vadd.f32 %v10648_v47, %v10647_v32  ;;  %v10872_v33 = vpop.f32.mrf.mxu1  ;;  %11652 = vmatpush3.msra.mxu0 %v12409_v10 }
 0xe03   :  { %v15632_v2 = vadd.f32 %v10872_v33, %v10871_v19  ;;  %v10650_v43 = vpop.f32.mrf.mxu0 }
 0xe04   :  { %v15637_v11 = vpop.f32.mrf.mxu1 }
 0xe05   :  { %17315 = vst [vmem:[#allocation58_spill] sm:$0xff] %v15632_v2  ;;  %17316 = vst [vmem:[#allocation57_spill] sm:$0xff] %v15637_v11  ;;  %v10651_v23 = vpop.f32.mrf.mxu0 }
 0xe06   :  { %v15639_v21 = vadd.f32 %v10651_v23, %v10650_v43  ;;  %v15641_v63 = vpop.f32.mrf.mxu1  ;;  %v12163_v23 = vld [vmem:[%s17037_s11 + $0x218] ss:$12 sps:$4 sm:$0xff]  }
 0xe07   :  { %17317 = vst [vmem:[#allocation56_spill] sm:$0xff] %v15641_v63  ;;  %v10653_v15 = vpop.f32.mrf.mxu0  ;;  %11634 = vmatmul.mubr.msk.bf16.gmra.mxu0 %vm5798_vm7, %v12162_v18 }
 0xe08   :  { %v10877_v32 = vpop.f32.mrf.mxu1  ;;  %11637 = vmatprep.mubr.msk.bf16.mxu0 %vm12737_vm6, %v17243_v26 }
 0xe09   :  { %v10654_v33 = vpop.f32.mrf.mxu0 }
 0xe0a   :  { %v15646_v19 = vadd.f32 %v10654_v33, %v10653_v15  ;;  %v10878_v47 = vpop.f32.mrf.mxu1 }
 0xe0b   :  { %v15648_v10 = vadd.f32 %v10878_v47, %v10877_v32  ;;  %v10656_v2 = vpop.f32.mrf.mxu0 }
 0xe0c   :  { %v15653_v43 = vpop.f32.mrf.mxu1 }
 0xe0d   :  { %17318 = vst [vmem:[#allocation53_spill] sm:$0xff] %v15648_v10  ;;  %17319 = vst [vmem:[#allocation51_spill] sm:$0xff] %v15653_v43  ;;  %v10657_v63 = vpop.f32.mrf.mxu0  ;;  %v12164_v43 = vld [vmem:[%s17037_s11 + $0x230] ss:$12 sps:$4 sm:$0xff]  }
 0xe0e   :  { %v15655_v11 = vadd.f32 %v10657_v63, %v10656_v2  ;;  %v15657_v18 = vpop.f32.mrf.mxu1 }
 0xe0f   :  { %17320 = vst [vmem:[#allocation55_spill] sm:$0xff] %v15657_v18  ;;  %v10659_v45 = vpop.f32.mrf.mxu0  ;;  %11638 = vmatmul.mubr.msk.bf16.gmra.mxu0 %vm5798_vm7, %v12163_v23 }
 0xe10   :  { %v7295_v15 = vpop.f32.mrf.mxu1  ;;  %11641 = vmatprep.mubr.msk.bf16.mxu0 %vm12737_vm6, %v17243_v26 }
 0xe11   :  { %v10660_v32 = vpop.f32.mrf.mxu0 }
 0xe12   :  { %v15662_v33 = vadd.f32 %v10660_v32, %v10659_v45  ;;  %v7297_v47 = vpop.f32.mrf.mxu1 }
 0xe13   :  { %v10662_v10 = vpop.f32.mrf.mxu0 }
 0xe14   :  { %v7300_v2 = vpop.f32.mrf.mxu1 }
 0xe15   :  { %v10663_v63 = vpop.f32.mrf.mxu0 }
 0xe16   :  { %v15667_v36 = vadd.f32 %v10663_v63, %v10662_v10  ;;  %v7302_v18 = vpop.f32.mrf.mxu1 }
 0xe17   :  { %v10665_v46 = vpop.f32.mrf.mxu0  ;;  %11642 = vmatmul.mubr.msk.bf16.gmra.mxu0 %vm5798_vm7, %v12164_v43  ;;  %v10696_v43 = vadd.f32 %v15340_v20, %v15330_v25  ;;  %v10702_v20 = vadd.f32 %v15360_v60, %v15354_v42 }
 0xe18   :  { %v7305_v23 = vpop.f32.mrf.mxu1  ;;  %11645 = vmatprep.mubr.msk.bf16.mxu0 %vm12737_vm6, %v17243_v26 }
 0xe19   :  { %v10666_v45 = vpop.f32.mrf.mxu0 }
 0xe1a   :  { %v15672_v32 = vadd.f32 %v10666_v45, %v10665_v46  ;;  %v7307_v47 = vpop.f32.mrf.mxu1 }
 0xe1b   :  { %v10668_v57 = vpop.f32.mrf.mxu0 }
 0xe1c   :  { %v7310_v48 = vpop.f32.mrf.mxu1 }
 0xe1d   :  { %v10669_v10 = vpop.f32.mrf.mxu0 }
 0xe1e   :  { %v15677_v63 = vadd.f32 %v10669_v10, %v10668_v57  ;;  %v7312_v18 = vpop.f32.mrf.mxu1  ;;  %v10699_v57 = vadd.f32 %v15349_v27, %v15343_v3 }
 0xe1f   :  { %v5921_v12 = vpop.f32.mrf.mxu0  ;;  %11646 = vmatmul.mubr.msk.bf16.gmra.mxu0 %vm5798_vm7, %v12165_v28 }
 0xe20   :  { %v5922_v46 = vadd.f32 %v15613_v50, %v5921_v12  ;;  %v7315_v45 = vpop.f32.mrf.mxu1  ;;  %11653 = vmatprep.mubr.msk.f32.mxu0 %vm3475_vm4, %v7295_v15 }
 0xe21   :  { %v11535_v47 = vpop.f32.mrf.mxu0 }
 0xe22   :  { %v7317_v26 = vpop.f32.mrf.mxu1  ;;  %v15684_v14 = vadd.f32 %v10696_v43, %v5922_v46 }
 0xe23   :  { %v5924_v4 = vpop.f32.mrf.mxu0 }
 0xe24   :  { %v5925_v10 = vadd.f32 %v15622_v40, %v5924_v4  ;;  %v7320_v18 = vpop.f32.mrf.mxu1 }
 0xe25   :  { %v11536_v28 = vpop.f32.mrf.mxu0 }
 0xe26   :  { %v7322_v51 = vpop.f32.mrf.mxu1  ;;  %v15689_v6 = vadd.f32 %v10699_v57, %v5925_v10 }
 0xe27   :  { %v5929_v25 = vpop.f32.mrf.mxu0  ;;  %11654 = vmatmul.mubr.msk.f32.vlgmr.msra.gmra.mxu0 %vm3475_vm4, %v7300_v2  ;;  %v10705_v51 = vadd.f32 %v15375_v29, %v15366_v38 }
 0xe28   :  { %v5930_v26 = vadd.f32 %v15630_v16, %v5929_v25  ;;  %v7325_v12 = vpop.f32.mrf.mxu1  ;;  %11656 = vmatprep.mubr.msk.f32.mxu0 %vm3475_vm4, %v7305_v23  ;;  %v10708_v23 = vadd.f32 %v15388_v52, %v15382_v37 }
 0xe29   :  { %v11539_v50 = vpop.f32.mrf.mxu0 }
 0xe2a   :  { %v7327_v3 = vpop.f32.mrf.mxu1  ;;  %v15696_v27 = vadd.f32 %v10702_v20, %v5930_v26  ;;  %v10717_v26 = vadd.f32 %v15424_v31, %v15418_v44 }
 0xe2b   :  { %v5932_v4 = vpop.f32.mrf.mxu0  ;;  %11657 = vmatmul.mubr.msk.f32.gmra.mxu0 %vm3475_vm4, %v7310_v48 }
 0xe2c   :  { %v5933_v40 = vadd.f32 %v15639_v21, %v5932_v4  ;;  %v7330_v15 = vpop.f32.mrf.mxu1  ;;  %11659 = vmatprep.mubr.msk.f32.mxu0 %vm3475_vm4, %v7315_v45  ;;  %v10711_v45 = vadd.f32 %v15400_v35, %v15394_v62 }
 0xe2d   :  { %v11540_v42 = vpop.f32.mrf.mxu0 }
 0xe2e   :  { %v7332_v60 = vpop.f32.mrf.mxu1  ;;  %v15703_v16 = vadd.f32 %v10705_v51, %v5933_v40 }
 0xe2f   :  { %v5937_v2 = vpop.f32.mrf.mxu0  ;;  %11660 = vmatmul.mubr.msk.f32.gmra.mxu0 %vm3475_vm4, %v7320_v18  ;;  %v10714_v18 = vadd.f32 %v15412_v5, %v15406_v58 }
 0xe30   :  { %v5938_v48 = vadd.f32 %v15646_v19, %v5937_v2  ;;  %v7335_v43 = vpop.f32.mrf.mxu1  ;;  %11662 = vmatprep.mubr.msk.f32.mxu0 %vm3475_vm4, %v7325_v12 }
 0xe31   :  { %v11543_v38 = vpop.f32.mrf.mxu0 }
 0xe32   :  { %v7337_v29 = vpop.f32.mrf.mxu1  ;;  %v15710_v21 = vadd.f32 %v10708_v23, %v5938_v48 }
 0xe33   :  { %v5940_v46 = vpop.f32.mrf.mxu0  ;;  %11663 = vmatmul.mubr.msk.f32.gmra.mxu0 %vm3475_vm4, %v7330_v15 }
 0xe34   :  { %v5941_v47 = vadd.f32 %v15655_v11, %v5940_v46  ;;  %v7340_v57 = vpop.f32.mrf.mxu1  ;;  %11665 = vmatprep.mubr.msk.f32.mxu0 %vm3475_vm4, %v7335_v43 }
 0xe35   :  { %v11544_v37 = vpop.f32.mrf.mxu0 }
 0xe36   :  { %v7342_v52 = vpop.f32.mrf.mxu1  ;;  %v15717_v19 = vadd.f32 %v10711_v45, %v5941_v47 }
 0xe37   :  { %v5945_v10 = vpop.f32.mrf.mxu0  ;;  %11666 = vmatmul.mubr.msk.f32.gmra.mxu0 %vm3475_vm4, %v7340_v57 }
 0xe38   :  { %v5946_v28 = vadd.f32 %v15662_v33, %v5945_v10  ;;  %v7345_v25 = vpop.f32.mrf.mxu1  ;;  %v10720_v33 = vadd.f32 %v15436_v41, %v15427_v9 }
 0xe39   :  { %11668 = vmatprep.mubr.msk.f32.mxu0 %vm3475_vm4, %v7345_v25  ;;  %v11547_v62 = vpop.f32.mrf.mxu0 }
 0xe3a   :  { %v7347_v35 = vpop.f32.mrf.mxu1  ;;  %v6109_v11 = vadd.f32 %v10714_v18, %v5946_v28 }
 0xe3b   :  { %v5948_v20 = vpop.f32.mrf.mxu0 }
 0xe3c   :  { %v5949_v12 = vadd.f32 %v15667_v36, %v5948_v20  ;;  %v7350_v50 = vpop.f32.mrf.mxu1  ;;  %v10723_v36 = vadd.f32 %v15449_v55, %v15443_v1 }
 0xe3d   :  { %11669 = vmatmul.mubr.msk.f32.gmra.mxu0 %vm3475_vm4, %v7350_v50  ;;  %v11548_v3 = vpop.f32.mrf.mxu0 }
 0xe3e   :  { %v7352_v4 = vpop.f32.mrf.mxu1  ;;  %v6112_v58 = vadd.f32 %v10717_v26, %v5949_v12 }
 0xe3f   :  { %v5953_v5 = vpop.f32.mrf.mxu0 }
 0xe40   :  { %v5954_v51 = vadd.f32 %v15672_v32, %v5953_v5  ;;  %v7355_v40 = vpop.f32.mrf.mxu1 }
 0xe41   :  { %11671 = vmatprep.mubr.msk.f32.mxu0 %vm3475_vm4, %v7355_v40  ;;  %v11551_v15 = vpop.f32.mrf.mxu0 }
 0xe42   :  { %v7357_v42 = vpop.f32.mrf.mxu1  ;;  %v6117_v44 = vadd.f32 %v10720_v33, %v5954_v51 }
 0xe43   :  { %v5956_v31 = vpop.f32.mrf.mxu0 }
 0xe44   :  { %v5957_v60 = vadd.f32 %v15677_v63, %v5956_v31  ;;  %v7360_v2 = vpop.f32.mrf.mxu1 }
 0xe45   :  { %11672 = vmatmul.mubr.msk.f32.gmra.mxu0 %vm3475_vm4, %v7360_v2  ;;  %v11552_v23 = vpop.f32.mrf.mxu0 }
 0xe46   :  { %v7362_v48 = vpop.f32.mrf.mxu1  ;;  %v6120_v9 = vadd.f32 %v10723_v36, %v5957_v60 }
 0xe47   :  { %v6157_v41 = vpop.f32.mrf.mxu0 }
 0xe48   :  { %v15737_v32 = vadd.f32 %v6157_v41, %v15684_v14  ;;  %v7365_v43 = vpop.f32.mrf.mxu1 }
 0xe49   :  { %11674 = vmatprep.mubr.msk.f32.mxu0 %vm3475_vm4, %v7365_v43  ;;  %v11559_v38 = vpop.f32.mrf.mxu0 }
 0xe4a   :  { %v7367_v29 = vpop.f32.mrf.mxu1 }
 0xe4b   :  { %v6160_v46 = vpop.f32.mrf.mxu0 }
 0xe4c   :  { %v15741_v1 = vadd.f32 %v6160_v46, %v15689_v6  ;;  %v7370_v55 = vpop.f32.mrf.mxu1 }
 0xe4d   :  { %11675 = vmatmul.mubr.msk.f32.gmra.mxu0 %vm3475_vm4, %v7370_v55  ;;  %v11560_v63 = vpop.f32.mrf.mxu0 }
 0xe4e   :  { %v7372_v45 = vpop.f32.mrf.mxu1 }
 0xe4f   :  { %v6165_v47 = vpop.f32.mrf.mxu0 }
 0xe50   :  { %v15745_v57 = vadd.f32 %v6165_v47, %v15696_v27  ;;  %v7375_v14 = vpop.f32.mrf.mxu1 }
 0xe51   :  { %11677 = vmatprep.mubr.msk.f32.mxu0 %vm3475_vm4, %v7375_v14  ;;  %v11563_v37 = vpop.f32.mrf.mxu0 }
 0xe52   :  { %v7377_v52 = vpop.f32.mrf.mxu1 }
 0xe53   :  { %v6168_v10 = vpop.f32.mrf.mxu0 }
 0xe54   :  { %v15749_v18 = vadd.f32 %v6168_v10, %v15703_v16  ;;  %v7380_v6 = vpop.f32.mrf.mxu1 }
 0xe55   :  { %11678 = vmatmul.mubr.msk.f32.gmra.mxu0 %vm3475_vm4, %v7380_v6  ;;  %v11564_v28 = vpop.f32.mrf.mxu0 }
 0xe56   :  { %v7382_v25 = vpop.f32.mrf.mxu1 }
 0xe57   :  { %v6173_v62 = vpop.f32.mrf.mxu0 }
 0xe58   :  { %v15753_v35 = vadd.f32 %v6173_v62, %v15710_v21  ;;  %v7385_v27 = vpop.f32.mrf.mxu1 }
 0xe59   :  { %11680 = vmatprep.mubr.msk.f32.mxu0 %vm3475_vm4, %v7385_v27  ;;  %v11567_v20 = vpop.f32.mrf.mxu0 }
 0xe5a   :  { %v7387_v26 = vpop.f32.mrf.mxu1 }
 0xe5b   :  { %v6176_v12 = vpop.f32.mrf.mxu0 }
 0xe5c   :  { %v15757_v50 = vadd.f32 %v6176_v12, %v15717_v19  ;;  %v7390_v16 = vpop.f32.mrf.mxu1 }
 0xe5d   :  { %11681 = vmatmul.mubr.msk.f32.gmra.mxu0 %vm3475_vm4, %v7390_v16  ;;  %v11568_v3 = vpop.f32.mrf.mxu0 }
 0xe5e   :  { %v7392_v4 = vpop.f32.mrf.mxu1 }
 0xe5f   :  { %v6181_v5 = vpop.f32.mrf.mxu0 }
 0xe60   :  { %v15760_v33 = vadd.f32 %v6181_v5, %v6109_v11  ;;  %v7395_v51 = vpop.f32.mrf.mxu1 }
 0xe61   :  { %11683 = vmatprep.mubr.msk.f32.mxu0 %vm3475_vm4, %v7395_v51  ;;  %v11571_v21 = vpop.f32.mrf.mxu0 }
 0xe62   :  { %v7397_v40 = vpop.f32.mrf.mxu1 }
 0xe63   :  { %v6184_v15 = vpop.f32.mrf.mxu0 }
 0xe64   :  { %v15763_v42 = vadd.f32 %v6184_v15, %v6112_v58  ;;  %v7400_v31 = vpop.f32.mrf.mxu1 }
 0xe65   :  { %11684 = vmatmul.mubr.msk.f32.gmra.mxu0 %vm3475_vm4, %v7400_v31  ;;  %v11572_v19 = vpop.f32.mrf.mxu0 }
 0xe66   :  { %v7402_v36 = vpop.f32.mrf.mxu1 }
 0xe67   :  { %v6189_v60 = vpop.f32.mrf.mxu0 }
 0xe68   :  { %v15766_v2 = vadd.f32 %v6189_v60, %v6117_v44  ;;  %v7405_v23 = vpop.f32.mrf.mxu1 }
 0xe69   :  { %11686 = vmatprep.mubr.msk.f32.mxu0 %vm3475_vm4, %v7405_v23  ;;  %v11575_v11 = vpop.f32.mrf.mxu0 }
 0xe6a   :  { %v7407_v48 = vpop.f32.mrf.mxu1 }
 0xe6b   :  { %v6192_v41 = vpop.f32.mrf.mxu0 }
 0xe6c   :  { %v15769_v43 = vadd.f32 %v6192_v41, %v6120_v9  ;;  %v7410_v38 = vpop.f32.mrf.mxu1 }
 0xe6d   :  { %11687 = vmatmul.mubr.msk.f32.gmra.mxu0 %vm3475_vm4, %v7410_v38  ;;  %v11576_v58 = vpop.f32.mrf.mxu0 }
 0xe6e   :  { %v7412_v29 = vpop.f32.mrf.mxu1 }
 0xe6f   :  { %v6468_v46 = vpop.f32.mrf.mxu0 }
 0xe70   :  { %v6469_v55 = vadd.f32 %v15456_v24, %v6468_v46  ;;  %v7415_v63 = vpop.f32.mrf.mxu1 }
 0xe71   :  { %11689 = vmatprep.mubr.msk.f32.mxu0 %vm3475_vm4, %v7415_v63  ;;  %v11583_v44 = vpop.f32.mrf.mxu0 }
 0xe72   :  { %v15775_v45 = vadd.f32 %v6469_v55, %v15737_v32  ;;  %v7417_v47 = vpop.f32.mrf.mxu1 }
 0xe73   :  { %v6471_v14 = vpop.f32.mrf.mxu0 }
 0xe74   :  { %v6472_v9 = vadd.f32 %v15462_v61, %v6471_v14  ;;  %v7420_v37 = vpop.f32.mrf.mxu1 }
 0xe75   :  { %11690 = vmatmul.mubr.msk.f32.gmra.mxu0 %vm3475_vm4, %v7420_v37  ;;  %v11584_v52 = vpop.f32.mrf.mxu0 }
 0xe76   :  { %v15780_v10 = vadd.f32 %v6472_v9, %v15741_v1  ;;  %v7422_v6 = vpop.f32.mrf.mxu1 }
 0xe77   :  { %v6476_v24 = vpop.f32.mrf.mxu0  ;;  %v10805_v6 = vadd.f32 %v15525_v59, %v15520_v53 }
 0xe78   :  { %v6477_v28 = vadd.f32 %v15468_v56, %v6476_v24  ;;  %v7425_v25 = vpop.f32.mrf.mxu1 }
 0xe79   :  { %11692 = vmatprep.mubr.msk.f32.mxu0 %vm3475_vm4, %v7425_v25  ;;  %v11587_v32 = vpop.f32.mrf.mxu0 }
 0xe7a   :  { %v15785_v62 = vadd.f32 %v6477_v28, %v15745_v57  ;;  %v7427_v27 = vpop.f32.mrf.mxu1 }
 0xe7b   :  { %v6479_v61 = vpop.f32.mrf.mxu0 }
 0xe7c   :  { %v6480_v20 = vadd.f32 %v15474_v49, %v6479_v61  ;;  %v7430_v26 = vpop.f32.mrf.mxu1  ;;  %v12410_v61 = vld [vmem:[%s17037_s11 + $0x7c] ss:$12 sps:$4 sm:$0xff]  }
 0xe7d   :  { %11693 = vmatmul.mubr.msk.f32.gmra.mxu0 %vm3475_vm4, %v7430_v26  ;;  %v11588_v1 = vpop.f32.mrf.mxu0 }
 0xe7e   :  { %v15790_v12 = vadd.f32 %v6480_v20, %v15749_v18  ;;  %v7432_v16 = vpop.f32.mrf.mxu1 }
 0xe7f   :  { %v6484_v56 = vpop.f32.mrf.mxu0 }
 0xe80   :  { %v6485_v3 = vadd.f32 %v15480_v8, %v6484_v56  ;;  %v7435_v4 = vpop.f32.mrf.mxu1 }
 0xe81   :  { %11695 = vmatprep.mubr.msk.f32.mxu0 %vm3475_vm4, %v7435_v4  ;;  %v11591_v57 = vpop.f32.mrf.mxu0 }
 0xe82   :  { %v15795_v5 = vadd.f32 %v6485_v3, %v15753_v35  ;;  %v7437_v51 = vpop.f32.mrf.mxu1  ;;  %v17321_v3 = vld [vmem:[#allocation52_spill] sm:$0xff] }
 0xe83   :  { %v6487_v49 = vpop.f32.mrf.mxu0  ;;  %v17322_v51 = vld [vmem:[#allocation34_spill] sm:$0xff] }
 0xe84   :  { %v6488_v21 = vadd.f32 %v15486_v39, %v6487_v49  ;;  %v7440_v40 = vpop.f32.mrf.mxu1  ;;  %v17323_v49 = vld [vmem:[#allocation28_spill] sm:$0xff] }
 0xe85   :  { %11696 = vmatmul.mubr.msk.f32.gmra.mxu0 %vm3475_vm4, %v7440_v40  ;;  %v11592_v18 = vpop.f32.mrf.mxu0 }
 0xe86   :  { %v15800_v15 = vadd.f32 %v6488_v21, %v15757_v50  ;;  %v7442_v31 = vpop.f32.mrf.mxu1  ;;  %v10817_v21 = vadd.f32 %v17323_v49, %v17322_v51 }
 0xe87   :  { %v6492_v8 = vpop.f32.mrf.mxu0 }
 0xe88   :  { %v6493_v19 = vadd.f32 %v15491_v54, %v6492_v8  ;;  %v7445_v36 = vpop.f32.mrf.mxu1 }
 0xe89   :  { %11698 = vmatprep.mubr.msk.f32.mxu0 %vm3475_vm4, %v7445_v36  ;;  %v11595_v35 = vpop.f32.mrf.mxu0  ;;  %v17325_v36 = vld [vmem:[#allocation38_spill] sm:$0xff] }
 0xe8a   :  { %v6513_v60 = vadd.f32 %v6493_v19, %v15760_v33  ;;  %v7447_v23 = vpop.f32.mrf.mxu1 }
 0xe8b   :  { %v6495_v11 = vpop.f32.mrf.mxu0 }
 0xe8c   :  { %v6496_v39 = vadd.f32 %v15500_v30, %v6495_v11  ;;  %v7450_v48 = vpop.f32.mrf.mxu1 }
 0xe8d   :  { %11699 = vmatmul.mubr.msk.f32.gmra.mxu0 %vm3475_vm4, %v7450_v48  ;;  %v11596_v41 = vpop.f32.mrf.mxu0 }
 0xe8e   :  { %v6514_v50 = vadd.f32 %v6496_v39, %v15763_v42  ;;  %v7452_v38 = vpop.f32.mrf.mxu1 }
 0xe8f   :  { %v6500_v58 = vpop.f32.mrf.mxu0 }
 0xe90   :  { %v6501_v54 = vadd.f32 %v15506_v7, %v6500_v58  ;;  %v7455_v29 = vpop.f32.mrf.mxu1  ;;  %v17327_v58 = vld [vmem:[#allocation27_spill] sm:$0xff] }
 0xe91   :  { %v11599_v46 = vpop.f32.mrf.mxu0  ;;  %11701 = vmatprep.mubr.msk.f32.mxu0 %vm3475_vm4, %v7455_v29  ;;  %v17328_v29 = vld [vmem:[#allocation32_spill] sm:$0xff] }
 0xe92   :  { %v6515_v33 = vadd.f32 %v6501_v54, %v15766_v2  ;;  %v7457_v55 = vpop.f32.mrf.mxu1  ;;  %v17329_v46 = vld [vmem:[#allocation31_spill] sm:$0xff] }
 0xe93   :  { %v6503_v63 = vpop.f32.mrf.mxu0  ;;  %v10829_v55 = vadd.f32 %v17329_v46, %v17328_v29 }
 0xe94   :  { %v6504_v30 = vadd.f32 %v15512_v34, %v6503_v63  ;;  %v7460_v44 = vpop.f32.mrf.mxu1 }
 0xe95   :  { %11702 = vmatmul.mubr.msk.f32.gmra.mxu0 %vm3475_vm4, %v7460_v44  ;;  %v11600_v47 = vpop.f32.mrf.mxu0 }
 0xe96   :  { %v6516_v42 = vadd.f32 %v6504_v30, %v15769_v43  ;;  %v7462_v14 = vpop.f32.mrf.mxu1 }
 0xe97   :  { %v6789_v9 = vpop.f32.mrf.mxu0 }
 0xe98   :  { %v6790_v7 = vadd.f32 %v15518_v17, %v6789_v9  ;;  %v17330_v9 = vld [vmem:[#allocation29_spill] sm:$0xff] }
 0xe99   :  { %v11607_v37 = vpop.f32.mrf.mxu0  ;;  %v7465_v52 = vpop.f32.mrf.mxu1 }
 0xe9a   :  { %v6828_v2 = vadd.f32 %v6790_v7, %v15775_v45  ;;  %11704 = vmatprep.mubr.msk.f32.mxu0 %vm3475_vm4, %v7465_v52  ;;  %v10811_v45 = vadd.f32 %v15539_v22, %v15534_v0  ;;  %v17331_v37 = vld [vmem:[#allocation35_spill] sm:$0xff]  ;;  %v17332_v52 = vld [vmem:[#allocation36_spill] sm:$0xff] }
 0xe9b   :  { %v6792_v34 = vpop.f32.mrf.mxu0  ;;  %v7467_v24 = vpop.f32.mrf.mxu1 }
 0xe9c   :  { %v6793_v28 = vadd.f32 %v10805_v6, %v6792_v34  ;;  %v10858_v6 = vadd.f32 %v17332_v52, %v17331_v37 }
 0xe9d   :  { %v11608_v25 = vpop.f32.mrf.mxu0  ;;  %v7470_v32 = vpop.f32.mrf.mxu1 }
 0xe9e   :  { %v6829_v43 = vadd.f32 %v6793_v28, %v15780_v10  ;;  %11705 = vmatmul.mubr.msk.f32.gmra.mxu0 %vm3475_vm4, %v7470_v32 }
 0xe9f   :  { %v6797_v27 = vpop.f32.mrf.mxu0  ;;  %v7472_v17 = vpop.f32.mrf.mxu1  ;;  %7949 = vmatprep.mubr.bf16.mxu0 %v12410_v61  ;;  %v17334_v61 = vld [vmem:[#allocation39_spill] sm:$0xff] }
 0xea0   :  { %v6798_v53 = vadd.f32 %v15532_v13, %v6797_v27 }
 0xea1   :  { %v11611_v59 = vpop.f32.mrf.mxu0 }
 0xea2   :  { %v6830_v20 = vadd.f32 %v6798_v53, %v15785_v62  ;;  %v17324_v62 = vld [vmem:[#allocation25_spill] sm:$0xff] }
 0xea3   :  { %v6800_v26 = vpop.f32.mrf.mxu0 }
 0xea4   :  { %v6801_v1 = vadd.f32 %v10811_v45, %v6800_v26 }
 0xea5   :  { %v11612_v10 = vpop.f32.mrf.mxu0 }
 0xea6   :  { %v6831_v16 = vadd.f32 %v6801_v1, %v15790_v12  ;;  %v17326_v12 = vld [vmem:[#allocation33_spill] sm:$0xff] }
 0xea7   :  { %v6805_v56 = vpop.f32.mrf.mxu0  ;;  %v10823_v35 = vadd.f32 %v17326_v12, %v17325_v36 }
 0xea8   :  { %v6806_v4 = vadd.f32 %v17321_v3, %v6805_v56  ;;  %v17336_v56 = vld [vmem:[#allocation43_spill] sm:$0xff] }
 0xea9   :  { %v11615_v57 = vpop.f32.mrf.mxu0 }
 0xeaa   :  { %v6832_v13 = vadd.f32 %v6806_v4, %v15795_v5  ;;  %v17338_v57 = vld [vmem:[#allocation59_spill] sm:$0xff] }
 0xeab   :  { %v6808_v40 = vpop.f32.mrf.mxu0 }
 0xeac   :  { %v6809_v18 = vadd.f32 %v10817_v21, %v6808_v40 }
 0xead   :  { %v11616_v31 = vpop.f32.mrf.mxu0 }
 0xeae   :  { %v6833_v0 = vadd.f32 %v6809_v18, %v15800_v15 }
 0xeaf   :  { %v6813_v22 = vpop.f32.mrf.mxu0 }
 0xeb0   :  { %v6814_v8 = vadd.f32 %v17324_v62, %v6813_v22  ;;  %v17339_v22 = vld [vmem:[#allocation58_spill] sm:$0xff] }
 0xeb1   :  { %v11619_v19 = vpop.f32.mrf.mxu0 }
 0xeb2   :  { %v6834_v23 = vadd.f32 %v6814_v8, %v6513_v60  ;;  %v17341_v19 = vld [vmem:[#allocation56_spill] sm:$0xff] }
 0xeb3   :  { %v6816_v11 = vpop.f32.mrf.mxu0 }
 0xeb4   :  { %v6817_v39 = vadd.f32 %v10823_v35, %v6816_v11 }
 0xeb5   :  { %v11620_v48 = vpop.f32.mrf.mxu0 }
 0xeb6   :  { %v6835_v41 = vadd.f32 %v6817_v39, %v6514_v50 }
 0xeb7   :  { %v6821_v38 = vpop.f32.mrf.mxu0 }
 0xeb8   :  { %v6822_v5 = vadd.f32 %v17327_v58, %v6821_v38  ;;  %v17342_v38 = vld [vmem:[#allocation53_spill] sm:$0xff] }
 0xeb9   :  { %v11623_v54 = vpop.f32.mrf.mxu0 }
 0xeba   :  { %v6836_v15 = vadd.f32 %v6822_v5, %v6515_v33  ;;  %v17333_v33 = vld [vmem:[#allocation37_spill] sm:$0xff]  ;;  %v17344_v54 = vld [vmem:[#allocation55_spill] sm:$0xff] }
 0xebb   :  { %v6824_v63 = vpop.f32.mrf.mxu0 }
 0xebc   :  { %v6825_v30 = vadd.f32 %v10829_v55, %v6824_v63 }
 0xebd   :  { %v11624_v44 = vpop.f32.mrf.mxu0 }
 0xebe   :  { %v6837_v47 = vadd.f32 %v6825_v30, %v6516_v42  ;;  %v17335_v42 = vld [vmem:[#allocation41_spill] sm:$0xff] }
 0xebf   :  { %v7110_v14 = vpop.f32.mrf.mxu0  ;;  %v10864_v53 = vadd.f32 %v17335_v42, %v17334_v61 }
 0xec0   :  { %v7111_v7 = vadd.f32 %v17330_v9, %v7110_v14 }
 0xec1   :  { %v11631_v60 = vpop.f32.mrf.mxu0 }
 0xec2   :  { %v15843_v50 = vadd.f32 %v7111_v7, %v6828_v2 }
 0xec3   :  { %v7113_v34 = vpop.f32.mrf.mxu0 }
 0xec4   :  { %v7114_v24 = vadd.f32 %v10858_v6, %v7113_v34 }
 0xec5   :  { %v11632_v28 = vpop.f32.mrf.mxu0 }
 0xec6   :  { %v15845_v25 = vadd.f32 %v7114_v24, %v6829_v43  ;;  %v17337_v43 = vld [vmem:[#allocation60_spill] sm:$0xff] }
 0xec7   :  { %v7118_v32 = vpop.f32.mrf.mxu0  ;;  %v10870_v51 = vadd.f32 %v17338_v57, %v17337_v43 }
 0xec8   :  { %v7119_v27 = vadd.f32 %v17333_v33, %v7118_v32 }
 0xec9   :  { %v11635_v17 = vpop.f32.mrf.mxu0 }
 0xeca   :  { %v15850_v59 = vadd.f32 %v7119_v27, %v6830_v20 }
 0xecb   :  { %v7121_v45 = vpop.f32.mrf.mxu0 }
 0xecc   :  { %v7122_v26 = vadd.f32 %v10864_v53, %v7121_v45 }
 0xecd   :  { %v11636_v1 = vpop.f32.mrf.mxu0 }
 0xece   :  { %v15852_v10 = vadd.f32 %v7122_v26, %v6831_v16  ;;  %v17340_v16 = vld [vmem:[#allocation57_spill] sm:$0xff] }
 0xecf   :  { %v7126_v2 = vpop.f32.mrf.mxu0  ;;  %v10876_v36 = vadd.f32 %v17341_v19, %v17340_v16 }
 0xed0   :  { %v7127_v3 = vadd.f32 %v17336_v56, %v7126_v2 }
 0xed1   :  { %v11639_v4 = vpop.f32.mrf.mxu0 }
 0xed2   :  { %v15857_v49 = vadd.f32 %v7127_v3, %v6832_v13 }
 0xed3   :  { %v7129_v21 = vpop.f32.mrf.mxu0 }
 0xed4   :  { %v7130_v40 = vadd.f32 %v10870_v51, %v7129_v21 }
 0xed5   :  { %v11640_v18 = vpop.f32.mrf.mxu0 }
 0xed6   :  { %v15859_v31 = vadd.f32 %v7130_v40, %v6833_v0  ;;  %v17343_v0 = vld [vmem:[#allocation51_spill] sm:$0xff] }
 0xed7   :  { %v7134_v20 = vpop.f32.mrf.mxu0  ;;  %v10882_v29 = vadd.f32 %v17344_v54, %v17343_v0 }
 0xed8   :  { %v7135_v62 = vadd.f32 %v17339_v22, %v7134_v20 }
 0xed9   :  { %v11643_v8 = vpop.f32.mrf.mxu0 }
 0xeda   :  { %v15864_v12 = vadd.f32 %v7135_v62, %v6834_v23 }
 0xedb   :  { %v7137_v35 = vpop.f32.mrf.mxu0 }
 0xedc   :  { %v7138_v11 = vadd.f32 %v10876_v36, %v7137_v35 }
 0xedd   :  { %v11644_v39 = vpop.f32.mrf.mxu0 }
 0xede   :  { %v15866_v48 = vadd.f32 %v7138_v11, %v6835_v41 }
 0xedf   :  { %v7142_v13 = vpop.f32.mrf.mxu0 }
 0xee0   :  { %v7143_v58 = vadd.f32 %v17342_v38, %v7142_v13 }
 0xee1   :  { %v11647_v5 = vpop.f32.mrf.mxu0 }
 0xee2   :  { %v15871_v46 = vadd.f32 %v7143_v58, %v6836_v15 }
 0xee3   :  { %v7145_v55 = vpop.f32.mrf.mxu0 }
 0xee4   :  { %v7146_v63 = vadd.f32 %v10882_v29, %v7145_v55 }
 0xee5   :  { %v11648_v30 = vpop.f32.mrf.mxu0 }
 0xee6   :  { %v15873_v44 = vadd.f32 %v7146_v63, %v6837_v47 }
 0xee7   :  { %v11655_v23 = vpop.f32.mrf.mxu0 }
 0xee9   :  { %v7648_v14 = vpop.f32.mrf.mxu0 }
 0xeea   :  { %v15903_v3 = vpack.c.bf16 %v11655_v23, %v7648_v14  ;;  %v12411_v23 = vld [vmem:[%s17037_s11] ss:$12 sps:$4 sm:$0xff]   ;;  %v12412_v14 = vld [vmem:[%s17037_s11 + $0x1c] ss:$12 sps:$4 sm:$0xff]  }
 0xeeb   :  { %v11658_v9 = vpop.f32.mrf.mxu0 }
 0xeed   :  { %v7658_v7 = vpop.f32.mrf.mxu0 }
 0xeee   :  { %v15899_v2 = vpack.c.bf16 %v11658_v9, %v7658_v7  ;;  %v12413_v9 = vld [vmem:[%s17037_s11 + $0x18] ss:$12 sps:$4 sm:$0xff]   ;;  %v12414_v7 = vld [vmem:[%s17037_s11 + $0x34] ss:$12 sps:$4 sm:$0xff]  }
 0xeef   :  { %v11661_v41 = vpop.f32.mrf.mxu0 }
 0xef1   :  { %v7668_v60 = vpop.f32.mrf.mxu0 }
 0xef2   :  { %v15895_v26 = vpack.c.bf16 %v11661_v41, %v7668_v60  ;;  %v12415_v41 = vld [vmem:[%s17037_s11 + $0x30] ss:$12 sps:$4 sm:$0xff]   ;;  %v12416_v60 = vld [vmem:[%s17037_s11 + $0x4c] ss:$12 sps:$4 sm:$0xff]  }
 0xef3   :  { %v11664_v37 = vpop.f32.mrf.mxu0 }
 0xef5   :  { %v7678_v52 = vpop.f32.mrf.mxu0 }
 0xef6   :  { %v15891_v53 = vpack.c.bf16 %v11664_v37, %v7678_v52  ;;  %v12417_v37 = vld [vmem:[%s17037_s11 + $0x48] ss:$12 sps:$4 sm:$0xff]   ;;  %v12418_v52 = vld [vmem:[%s17037_s11 + $0x64] ss:$12 sps:$4 sm:$0xff]  }
 0xef7   :  { %v11667_v6 = vpop.f32.mrf.mxu0 }
 0xef9   :  { %v7688_v34 = vpop.f32.mrf.mxu0 }
 0xefa   :  { %v15887_v42 = vpack.c.bf16 %v11667_v6, %v7688_v34  ;;  %v12419_v6 = vld [vmem:[%s17037_s11 + $0x60] ss:$12 sps:$4 sm:$0xff]  }
 0xefb   :  { %v12420_v34 = vld [vmem:[%s17037_s11 + $0xf4] ss:$12 sps:$4 sm:$0xff]  }
 0xefd   :  { %v11670_v24 = vpop.f32.mrf.mxu0 }
 0xeff   :  { %v7698_v28 = vpop.f32.mrf.mxu0 }
 0xf00   :  { %v15883_v61 = vpack.c.bf16 %v11670_v24, %v7698_v28 }
 0xf05   :  { %v11673_v32 = vpop.f32.mrf.mxu0 }
 0xf07   :  { %v7708_v15 = vpop.f32.mrf.mxu0 }
 0xf08   :  { %v15879_v47 = vpack.c.bf16 %v11673_v32, %v7708_v15 }
 0xf0d   :  { %v11676_v33 = vpop.f32.mrf.mxu0 }
 0xf0f   :  { %v7718_v27 = vpop.f32.mrf.mxu0 }
 0xf10   :  { %v15875_v17 = vpack.c.bf16 %v11676_v33, %v7718_v27 }
 0xf12   :  { %7877 = vrot.lane.b32.xlu0 %v15875_v17, %s12733_s2 }
 0xf15   :  { %v11679_v45 = vpop.f32.mrf.mxu0 }
 0xf16   :  { %7875 = vrot.lane.b32.xlu0 %v15879_v47, %s12733_s2 }
 0xf17   :  { %v7728_v1 = vpop.f32.mrf.mxu0 }
 0xf18   :  { %v15956_v55 = vpack.c.bf16 %v11679_v45, %v7728_v1  ;;  %v7165_v45 = vld [vmem:[#allocation15 + $0x30] sm:$0xff] }
 0xf1a   :  { %7873 = vrot.lane.b32.xlu0 %v15883_v61, %s12733_s2 }
 0xf1d   :  { %v11682_v56 = vpop.f32.mrf.mxu0 }
 0xf1e   :  { %7871 = vrot.lane.b32.xlu0 %v15887_v42, %s12733_s2 }
 0xf1f   :  { %v7738_v4 = vpop.f32.mrf.mxu0 }
 0xf20   :  { %v15948_v54 = vpack.c.bf16 %v11682_v56, %v7738_v4  ;;  %v7161_v4 = vld [vmem:[#allocation15 + $0x10] sm:$0xff] }
 0xf22   :  { %7869 = vrot.lane.b32.xlu0 %v15891_v53, %s12733_s2 }
 0xf25   :  { %v11685_v43 = vpop.f32.mrf.mxu0 }
 0xf26   :  { %7867 = vrot.lane.b32.xlu0 %v15895_v26, %s12733_s2 }
 0xf27   :  { %v7748_v57 = vpop.f32.mrf.mxu0 }
 0xf28   :  { %v15940_v0 = vpack.c.bf16 %v11685_v43, %v7748_v57 }
 0xf2a   :  { %7865 = vrot.lane.b32.xlu0 %v15899_v2, %s12733_s2 }
 0xf2d   :  { %v11688_v51 = vpop.f32.mrf.mxu0 }
 0xf2e   :  { %7863 = vrot.lane.b32.xlu0 %v15903_v3, %s12733_s2 }
 0xf2f   :  { %v7758_v21 = vpop.f32.mrf.mxu0 }
 0xf30   :  { %v15932_v5 = vpack.c.bf16 %v11688_v51, %v7758_v21  ;;  %v7159_v51 = vld [vmem:[#allocation15] sm:$0xff] }
 0xf35   :  { %v11691_v40 = vpop.f32.mrf.mxu0 }
 0xf37   :  { %v7768_v18 = vpop.f32.mrf.mxu0 }
 0xf38   :  { %v15924_v58 = vpack.c.bf16 %v11691_v40, %v7768_v18 }
 0xf3d   :  { %v11694_v20 = vpop.f32.mrf.mxu0 }
 0xf3f   :  { %v7778_v22 = vpop.f32.mrf.mxu0 }
 0xf40   :  { %v15916_v39 = vpack.c.bf16 %v11694_v20, %v7778_v22 }
 0xf45   :  { %v11697_v62 = vpop.f32.mrf.mxu0 }
 0xf47   :  { %v7788_v8 = vpop.f32.mrf.mxu0 }
 0xf48   :  { %v15909_v35 = vpack.c.bf16 %v11697_v62, %v7788_v8  ;;  %v7168_v8 = vld [vmem:[#allocation15 + $0x48] sm:$0xff] }
 0xf4d   :  { %v11700_v16 = vpop.f32.mrf.mxu0 }
 0xf4f   :  { %v7798_v19 = vpop.f32.mrf.mxu0 }
 0xf50   :  { %v15907_v36 = vpack.c.bf16 %v11700_v16, %v7798_v19  ;;  %v17345_v16 = vmov 0.0  }
 0xf52   :  { %7893 = vrot.lane.b32.xlu1 %v15907_v36, %s12733_s2  ;;  %10981 = vmatprep.subr.bf16.mxu1 %v15907_v36 }
 0xf53   :  { %10982 = vmatpush3.bf16.msra.mxu1 %v15875_v17 }
 0xf54   :  { %10983 = vmatprep.subr.bf16.mxu1 %v15909_v35 }
 0xf55   :  { %v11703_v11 = vpop.f32.mrf.mxu0 }
 0xf56   :  { %7891 = vrot.lane.b32.xlu1 %v15909_v35, %s12733_s2 }
 0xf57   :  { %v7808_v13 = vpop.f32.mrf.mxu0  ;;  %10984 = vmatpush3.bf16.msra.mxu1 %v15879_v47 }
 0xf58   :  { %v15921_v38 = vpack.c.bf16 %v11703_v11, %v7808_v13  ;;  %10985 = vmatprep.subr.bf16.mxu1 %v15916_v39  ;;  %v12421_v11 = vld [vmem:[%s17037_s11 + $0x78] ss:$12 sps:$4 sm:$0xff]  }
 0xf5a   :  { %7889 = vrot.lane.b32.xlu1 %v15916_v39, %s12733_s2  ;;  %7895 = vrot.lane.b32.xlu0 %v15921_v38, %s12733_s2 }
 0xf5b   :  { %10986 = vmatpush3.bf16.msra.mxu1 %v15883_v61 }
 0xf5c   :  { %10987 = vmatprep.subr.bf16.mxu1 %v15924_v58 }
 0xf5e   :  { %7887 = vrot.lane.b32.xlu1 %v15924_v58, %s12733_s2  ;;  %8223 = vrot.lane.b32.xlu0 %v15875_v17, %s12734_s23  ;;  %v11706_v29 = vpop.f32.mrf.mxu0 }
 0xf5f   :  { %10988 = vmatpush3.bf16.msra.mxu1 %v15887_v42 }
 0xf60   :  { %10989 = vmatprep.subr.bf16.mxu1 %v15932_v5  ;;  %v7818_v63 = vpop.f32.mrf.mxu0 }
 0xf61   :  { %v15968_v30 = vpack.c.bf16 %v11706_v29, %v7818_v63  ;;  %v7162_v29 = vld [vmem:[#allocation15 + $0x18] sm:$0xff]  ;;  %v12424_v63 = vld [vmem:[%s17037_s11 + $0xac] ss:$12 sps:$4 sm:$0xff]  }
 0xf62   :  { %7885 = vrot.lane.b32.xlu1 %v15932_v5, %s12733_s2  ;;  %8221 = vrot.lane.b32.xlu0 %v15879_v47, %s12734_s23 }
 0xf63   :  { %10990 = vmatpush3.bf16.msra.mxu1 %v15891_v53 }
 0xf64   :  { %10991 = vmatprep.subr.bf16.mxu1 %v15940_v0 }
 0xf66   :  { %7883 = vrot.lane.b32.xlu1 %v15940_v0, %s12733_s2  ;;  %8219 = vrot.lane.b32.xlu0 %v15883_v61, %s12734_s23 }
 0xf67   :  { %10992 = vmatpush3.bf16.msra.mxu1 %v15895_v26 }
 0xf68   :  { %10993 = vmatprep.subr.bf16.mxu1 %v15948_v54 }
 0xf6a   :  { %7881 = vrot.lane.b32.xlu1 %v15948_v54, %s12733_s2  ;;  %8217 = vrot.lane.b32.xlu0 %v15887_v42, %s12734_s23 }
 0xf6b   :  { %10994 = vmatpush3.bf16.msra.mxu1 %v15899_v2 }
 0xf6c   :  { %10995 = vmatprep.subr.bf16.mxu1 %v15956_v55 }
 0xf6e   :  { %7879 = vrot.lane.b32.xlu1 %v15956_v55, %s12733_s2  ;;  %8215 = vrot.lane.b32.xlu0 %v15891_v53, %s12734_s23 }
 0xf6f   :  { %10996 = vmatpush3.bf16.msra.mxu1 %v15903_v3 }
 0xf72   :  { %8213 = vrot.lane.b32.xlu0 %v15895_v26, %s12734_s23  ;;  %7897 = vrot.lane.b32.xlu1 %v15968_v30, %s12733_s2 }
 0xf73   :  { %8096 = vmatmul.mubr.bf16.vlgmr.msra.gmra.mxu1 %v12411_v23 }
 0xf74   :  { %8103 = vmatprep.mubr.bf16.mxu1 %v12412_v14 }
 0xf76   :  { %8211 = vrot.lane.b32.xlu0 %v15899_v2, %s12734_s23  ;;  %8239 = vrot.lane.b32.xlu1 %v15907_v36, %s12734_s23 }
 0xf7a   :  { %8209 = vrot.lane.b32.xlu0 %v15903_v3, %s12734_s23  ;;  %8237 = vrot.lane.b32.xlu1 %v15909_v35, %s12734_s23 }
 0xf7b   :  { %8104 = vmatmul.mubr.bf16.gmra.mxu1 %v12413_v9  ;;  %v7160_v9 = vld [vmem:[#allocation15 + $0x8] sm:$0xff] }
 0xf7c   :  { %8111 = vmatprep.mubr.bf16.mxu1 %v12414_v7 }
 0xf7e   :  { %8241 = vrot.lane.b32.xlu0 %v15921_v38, %s12734_s23  ;;  %8235 = vrot.lane.b32.xlu1 %v15916_v39, %s12734_s23 }
 0xf82   :  { %8433 = vrot.lane.b32.xlu0 %v15875_v17, %s12732_s3  ;;  %8233 = vrot.lane.b32.xlu1 %v15924_v58, %s12734_s23 }
 0xf83   :  { %8112 = vmatmul.mubr.bf16.gmra.mxu1 %v12415_v41 }
 0xf84   :  { %8119 = vmatprep.mubr.bf16.mxu1 %v12416_v60  ;;  %v7878_v24 = vpop.permute.xlu0 %7877  ;;  %v12425_v60 = vld [vmem:[%s17037_s11 + $0xa8] ss:$12 sps:$4 sm:$0xff]  }
 0xf86   :  { %8431 = vrot.lane.b32.xlu0 %v15879_v47, %s12732_s3  ;;  %8231 = vrot.lane.b32.xlu1 %v15932_v5, %s12734_s23 }
 0xf88   :  { %v7876_v28 = vpop.permute.xlu0 %7875 }
 0xf8a   :  { %8429 = vrot.lane.b32.xlu0 %v15883_v61, %s12732_s3  ;;  %8229 = vrot.lane.b32.xlu1 %v15940_v0, %s12734_s23 }
 0xf8b   :  { %8120 = vmatmul.mubr.bf16.gmra.mxu1 %v12417_v37  ;;  %v12426_v37 = vld [vmem:[%s17037_s11 + $0xc4] ss:$12 sps:$4 sm:$0xff]  }
 0xf8c   :  { %8127 = vmatprep.mubr.bf16.mxu1 %v12418_v52  ;;  %v7874_v32 = vpop.permute.xlu0 %7873 }
 0xf8e   :  { %8427 = vrot.lane.b32.xlu0 %v15887_v42, %s12732_s3  ;;  %8227 = vrot.lane.b32.xlu1 %v15948_v54, %s12734_s23 }
 0xf90   :  { %v7872_v15 = vpop.permute.xlu0 %7871 }
 0xf92   :  { %8425 = vrot.lane.b32.xlu0 %v15891_v53, %s12732_s3  ;;  %8225 = vrot.lane.b32.xlu1 %v15956_v55, %s12734_s23 }
 0xf93   :  { %8128 = vmatmul.mubr.bf16.gmra.mxu1 %v12419_v6 }
 0xf94   :  { %8295 = vmatprep.mubr.bf16.mxu1 %v12420_v34  ;;  %v7870_v33 = vpop.permute.xlu0 %7869 }
 0xf96   :  { %8423 = vrot.lane.b32.xlu0 %v15895_v26, %s12732_s3  ;;  %8243 = vrot.lane.b32.xlu1 %v15968_v30, %s12734_s23 }
 0xf98   :  { %v7868_v27 = vpop.permute.xlu0 %7867 }
 0xf9a   :  { %8421 = vrot.lane.b32.xlu0 %v15899_v2, %s12732_s3  ;;  %8449 = vrot.lane.b32.xlu1 %v15907_v36, %s12732_s3 }
 0xf9e   :  { %8419 = vrot.lane.b32.xlu0 %v15903_v3, %s12732_s3  ;;  %8447 = vrot.lane.b32.xlu1 %v15909_v35, %s12732_s3 }
 0xfa2   :  { %8451 = vrot.lane.b32.xlu0 %v15921_v38, %s12732_s3  ;;  %8445 = vrot.lane.b32.xlu1 %v15916_v39, %s12732_s3 }
 0xfa6   :  { %8643 = vrot.lane.b32.xlu0 %v15875_v17, %s12735_s10  ;;  %8443 = vrot.lane.b32.xlu1 %v15924_v58, %s12732_s3  ;;  %v7866_v17 = vpop.permute.xlu0 %7865 }
 0xfaa   :  { %8641 = vrot.lane.b32.xlu0 %v15879_v47, %s12735_s10  ;;  %8441 = vrot.lane.b32.xlu1 %v15932_v5, %s12732_s3 }
 0xfae   :  { %8639 = vrot.lane.b32.xlu0 %v15883_v61, %s12735_s10  ;;  %8439 = vrot.lane.b32.xlu1 %v15940_v0, %s12732_s3  ;;  %v7167_v61 = vld [vmem:[#allocation15 + $0x40] sm:$0xff] }
 0xfb2   :  { %8637 = vrot.lane.b32.xlu0 %v15887_v42, %s12735_s10  ;;  %8437 = vrot.lane.b32.xlu1 %v15948_v54, %s12732_s3  ;;  %v7864_v42 = vpop.permute.xlu0 %7863 }
 0xfb6   :  { %8635 = vrot.lane.b32.xlu0 %v15891_v53, %s12735_s10  ;;  %8435 = vrot.lane.b32.xlu1 %v15956_v55, %s12732_s3 }
 0xfba   :  { %8633 = vrot.lane.b32.xlu0 %v15895_v26, %s12735_s10  ;;  %8453 = vrot.lane.b32.xlu1 %v15968_v30, %s12732_s3 }
 0xfbe   :  { %8631 = vrot.lane.b32.xlu0 %v15899_v2, %s12735_s10  ;;  %8659 = vrot.lane.b32.xlu1 %v15907_v36, %s12735_s10  ;;  %v7163_v2 = vld [vmem:[#allocation15 + $0x20] sm:$0xff] }
 0xfc2   :  { %8629 = vrot.lane.b32.xlu0 %v15903_v3, %s12735_s10  ;;  %8657 = vrot.lane.b32.xlu1 %v15909_v35, %s12735_s10  ;;  %v7166_v35 = vld [vmem:[#allocation15 + $0x38] sm:$0xff] }
 0xfc4   :  { %v7894_v47 = vpop.permute.xlu1 %7893 }
 0xfc5   :  { %10928 = vmatprep.subr.bf16.mxu0 %v7894_v47  ;;  %v12429_v47 = vld [vmem:[%s17037_s11 + $0xd8] ss:$12 sps:$4 sm:$0xff]  }
 0xfc6   :  { %10929 = vmatpush3.bf16.msra.mxu0 %v7878_v24  ;;  %8661 = vrot.lane.b32.xlu0 %v15921_v38, %s12735_s10 }
 0xfc7   :  { %8655 = vrot.lane.b32.xlu1 %v15916_v39, %s12735_s10  ;;  %v12422_v39 = vld [vmem:[%s17037_s11 + $0x94] ss:$12 sps:$4 sm:$0xff]  }
 0xfc8   :  { %v7892_v53 = vpop.permute.xlu1 %7891 }
 0xfc9   :  { %10930 = vmatprep.subr.bf16.mxu0 %v7892_v53  ;;  %v12430_v53 = vld [vmem:[%s17037_s11 + $0xf0] ss:$12 sps:$4 sm:$0xff]  }
 0xfca   :  { %10931 = vmatpush3.bf16.msra.mxu0 %v7876_v28  ;;  %7211 = vperm.xlu0 %11929, %v7167_v61   ;;  %v12427_v28 = vld [vmem:[%s17037_s11 + $0xc0] ss:$12 sps:$4 sm:$0xff]  }
 0xfcb   :  { %8653 = vrot.lane.b32.xlu1 %v15924_v58, %s12735_s10 }
 0xfcc   :  { %v7890_v26 = vpop.permute.xlu1 %7889  ;;  %v7896_v1 = vpop.permute.xlu0 %7895 }
 0xfcd   :  { %10932 = vmatprep.subr.bf16.mxu0 %v7890_v26 }
 0xfce   :  { %10933 = vmatpush3.bf16.msra.mxu0 %v7874_v32  ;;  %7201 = vperm.xlu0 %11929, %v7165_v45   ;;  %v12428_v32 = vld [vmem:[%s17037_s11 + $0xdc] ss:$12 sps:$4 sm:$0xff]   ;;  %v12431_v45 = vld [vmem:[%s17037_s11 + $0x10c] ss:$12 sps:$4 sm:$0xff]  }
 0xfcf   :  { %8651 = vrot.lane.b32.xlu1 %v15932_v5, %s12735_s10  ;;  %v7164_v5 = vld [vmem:[#allocation15 + $0x28] sm:$0xff] }
 0xfd0   :  { %v7888_v56 = vpop.permute.xlu1 %7887  ;;  %v8224_v3 = vpop.permute.xlu0 %8223 }
 0xfd1   :  { %10934 = vmatprep.subr.bf16.mxu0 %v7888_v56 }
 0xfd2   :  { %10935 = vmatpush3.bf16.msra.mxu0 %v7872_v15  ;;  %7191 = vperm.xlu0 %11929, %v7163_v2   ;;  %v12432_v2 = vld [vmem:[%s17037_s11 + $0x80] ss:$12 sps:$4 sm:$0xff]  }
 0xfd3   :  { %8649 = vrot.lane.b32.xlu1 %v15940_v0, %s12735_s10 }
 0xfd4   :  { %v7886_v43 = vpop.permute.xlu1 %7885  ;;  %v8222_v57 = vpop.permute.xlu0 %8221 }
 0xfd5   :  { %10936 = vmatprep.subr.bf16.mxu0 %v7886_v43 }
 0xfd6   :  { %10937 = vmatpush3.bf16.msra.mxu0 %v7870_v33  ;;  %7181 = vperm.xlu0 %11929, %v7161_v4   ;;  %v12433_v4 = vld [vmem:[%s17037_s11 + $0x108] ss:$12 sps:$4 sm:$0xff]  }
 0xfd7   :  { %8647 = vrot.lane.b32.xlu1 %v15948_v54, %s12735_s10 }
 0xfd8   :  { %v7884_v21 = vpop.permute.xlu1 %7883  ;;  %v8220_v40 = vpop.permute.xlu0 %8219 }
 0xfd9   :  { %10938 = vmatprep.subr.bf16.mxu0 %v7884_v21 }
 0xfda   :  { %10939 = vmatpush3.bf16.msra.mxu0 %v7868_v27  ;;  %7171 = vperm.xlu0 %11929, %v7159_v51   ;;  %v12435_v51 = vld [vmem:[%s17037_s11 + $0x98] ss:$12 sps:$4 sm:$0xff]  }
 0xfdb   :  { %8645 = vrot.lane.b32.xlu1 %v15956_v55, %s12735_s10  ;;  %v12423_v55 = vld [vmem:[%s17037_s11 + $0x90] ss:$12 sps:$4 sm:$0xff]  }
 0xfdc   :  { %v7882_v18 = vpop.permute.xlu1 %7881  ;;  %v8218_v20 = vpop.permute.xlu0 %8217 }
 0xfdd   :  { %10940 = vmatprep.subr.bf16.mxu0 %v7882_v18  ;;  %v12437_v18 = vld [vmem:[%s17037_s11 + $0x13c] ss:$12 sps:$4 sm:$0xff]  }
 0xfde   :  { %10941 = vmatpush3.bf16.msra.mxu0 %v7866_v17 }
 0xfdf   :  { %8663 = vrot.lane.b32.xlu1 %v15968_v30, %s12735_s10 }
 0xfe0   :  { %v7880_v22 = vpop.permute.xlu1 %7879  ;;  %v8216_v62 = vpop.permute.xlu0 %8215 }
 0xfe1   :  { %10942 = vmatprep.subr.bf16.mxu0 %v7880_v22 }
 0xfe2   :  { %10943 = vmatpush3.bf16.msra.mxu0 %v7864_v42 }
 0xfe3   :  { %7216 = vperm.xlu1 %11930, %v7168_v8   ;;  %11707 = vmatprep.subr.bf16.mxu0 %v17345_v16 }
 0xfe4   :  { %v8214_v19 = vpop.permute.xlu0 %8213  ;;  %v7898_v36 = vpop.permute.xlu1 %7897 }
 0xfe5   :  { %7950 = vmatmul.mubr.bf16.vlgmr.msra.gmra.mxu0 %v12421_v11 }
 0xfe6   :  { %7957 = vmatprep.mubr.bf16.mxu0 %v12422_v39  ;;  %11708 = vmatpush3.bf16.msra.mxu0 %v7898_v36  ;;  %v12439_v36 = vld [vmem:[%s17037_s11 + $0x138] ss:$12 sps:$4 sm:$0xff]  }
 0xfe7   :  { %7206 = vperm.xlu1 %11930, %v7166_v35   ;;  %11709 = vmatprep.subr.bf16.mxu0 %v17345_v16  ;;  %v12440_v35 = vld [vmem:[%s17037_s11 + $0x154] ss:$12 sps:$4 sm:$0xff]  }
 0xfe8   :  { %v8212_v13 = vpop.permute.xlu0 %8211  ;;  %v8240_v58 = vpop.permute.xlu1 %8239 }
 0xfe9   :  { %11034 = vmatprep.subr.bf16.mxu1 %v8240_v58 }
 0xfea   :  { %11035 = vmatpush3.bf16.msra.mxu1 %v8224_v3  ;;  %11710 = vmatpush3.bf16.msra.mxu0 %v7896_v1 }
 0xfeb   :  { %7196 = vperm.xlu1 %11930, %v7164_v5   ;;  %11731 = vmatprep.subr.bf16.mxu0 %v17345_v16 }
 0xfec   :  { %v8210_v0 = vpop.permute.xlu0 %8209  ;;  %v8238_v54 = vpop.permute.xlu1 %8237 }
 0xfed   :  { %7958 = vmatmul.mubr.bf16.gmra.mxu0 %v12423_v55  ;;  %11036 = vmatprep.subr.bf16.mxu1 %v8238_v54  ;;  %v12443_v54 = vld [vmem:[%s17037_s11 + $0x16c] ss:$12 sps:$4 sm:$0xff]  }
 0xfee   :  { %11037 = vmatpush3.bf16.msra.mxu1 %v8222_v57  ;;  %7965 = vmatprep.mubr.bf16.mxu0 %v12424_v63  ;;  %v12444_v55 = vld [vmem:[%s17037_s11 + $0xe0] ss:$12 sps:$4 sm:$0xff]  }
 0xfef   :  { %7186 = vperm.xlu1 %11930, %v7162_v29  }
 0xff0   :  { %v16116_v23 = vpop.permute.xlu0 %8241  ;;  %v8236_v14 = vpop.permute.xlu1 %8235 }
 0xff1   :  { %11038 = vmatprep.subr.bf16.mxu1 %v8236_v14 }
 0xff2   :  { %11039 = vmatpush3.bf16.msra.mxu1 %v8220_v40  ;;  %v12436_v40 = vld [vmem:[%s17037_s11 + $0x120] ss:$12 sps:$4 sm:$0xff]  }
 0xff3   :  { %7176 = vperm.xlu1 %11930, %v7160_v9   ;;  %v12445_v9 = vld [vmem:[%s17037_s11 + $0x168] ss:$12 sps:$4 sm:$0xff]  }
 0xff4   :  { %v8434_v7 = vpop.permute.xlu0 %8433  ;;  %v8234_v41 = vpop.permute.xlu1 %8233 }
 0xff5   :  { %7966 = vmatmul.mubr.bf16.gmra.mxu0 %v12425_v60  ;;  %11040 = vmatprep.subr.bf16.mxu1 %v8234_v41 }
 0xff6   :  { %11041 = vmatpush3.bf16.msra.mxu1 %v8218_v20  ;;  %7973 = vmatprep.mubr.bf16.mxu0 %v12426_v37  ;;  %v12447_v37 = vld [vmem:[%s17037_s11 + $0x8] ss:$12 sps:$4 sm:$0xff]  }
 0xff8   :  { %v8432_v52 = vpop.permute.xlu0 %8431  ;;  %v8232_v6 = vpop.permute.xlu1 %8231 }
 0xff9   :  { %11042 = vmatprep.subr.bf16.mxu1 %v8232_v6  ;;  %v12448_v6 = vld [vmem:[%s17037_s11 + $0x180] ss:$12 sps:$4 sm:$0xff]  }
 0xffa   :  { %11043 = vmatpush3.bf16.msra.mxu1 %v8216_v62  ;;  %v12438_v62 = vld [vmem:[%s17037_s11 + $0xb0] ss:$12 sps:$4 sm:$0xff]  }
 0xffc   :  { %v8430_v34 = vpop.permute.xlu0 %8429  ;;  %v8230_v24 = vpop.permute.xlu1 %8229 }
 0xffd   :  { %7974 = vmatmul.mubr.bf16.gmra.mxu0 %v12427_v28  ;;  %11044 = vmatprep.subr.bf16.mxu1 %v8230_v24  ;;  %v12449_v24 = vld [vmem:[%s17037_s11 + $0x19c] ss:$12 sps:$4 sm:$0xff]  }
 0xffe   :  { %11045 = vmatpush3.bf16.msra.mxu1 %v8214_v19  ;;  %7981 = vmatprep.mubr.bf16.mxu0 %v12428_v32  ;;  %v12450_v32 = vld [vmem:[%s17037_s11 + $0x20] ss:$12 sps:$4 sm:$0xff]  }
0x1000   :  { %v8428_v15 = vpop.permute.xlu0 %8427  ;;  %v8228_v33 = vpop.permute.xlu1 %8227 }
0x1001   :  { %11046 = vmatprep.subr.bf16.mxu1 %v8228_v33  ;;  %v12451_v33 = vld [vmem:[%s17037_s11 + $0x198] ss:$12 sps:$4 sm:$0xff]  }
0x1002   :  { %11047 = vmatpush3.bf16.msra.mxu1 %v8212_v13  ;;  %v12441_v13 = vld [vmem:[%s17037_s11 + $0xc8] ss:$12 sps:$4 sm:$0xff]  }
0x1004   :  { %v8426_v27 = vpop.permute.xlu0 %8425  ;;  %v8226_v17 = vpop.permute.xlu1 %8225 }
0x1005   :  { %7982 = vmatmul.mubr.bf16.gmra.mxu0 %v12429_v47  ;;  %11048 = vmatprep.subr.bf16.mxu1 %v8226_v17 }
0x1006   :  { %11049 = vmatpush3.bf16.msra.mxu1 %v8210_v0  ;;  %11711 = vmatprep.mubr.msk.bf16.mxu0 %vm12737_vm6, %v17345_v16  ;;  %v12442_v0 = vld [vmem:[%s17037_s11 + $0x150] ss:$12 sps:$4 sm:$0xff]  }
0x1008   :  { %v8424_v61 = vpop.permute.xlu0 %8423  ;;  %v16135_v42 = vpop.permute.xlu1 %8243 }
0x1009   :  { %8296 = vmatmul.mubr.bf16.vlgmr.msra.gmra.mxu1 %v12430_v53 }
0x100a   :  { %8303 = vmatprep.mubr.bf16.mxu1 %v12431_v45 }
0x100c   :  { %v8422_v26 = vpop.permute.xlu0 %8421  ;;  %v8450_v1 = vpop.permute.xlu1 %8449 }
0x100d   :  { %11712 = vmatmul.mubr.msk.bf16.vlgmr.msra.gmra.mxu0 %vm5798_vm7, %v12432_v2  ;;  %11087 = vmatprep.subr.bf16.mxu1 %v8450_v1 }
0x100e   :  { %11732 = vmatpush3.bf16.msra.mxu0 %v15968_v30  ;;  %11088 = vmatpush3.bf16.msra.mxu1 %v8434_v7  ;;  %v12434_v30 = vld [vmem:[%s17037_s11 + $0x124] ss:$12 sps:$4 sm:$0xff]  }
0x100f   :  { %11733 = vmatprep.subr.bf16.mxu0 %v17345_v16  ;;  %11715 = vmatprep.mubr.msk.bf16.mxu0 %vm12737_vm6, %v17345_v16  ;;  %v12446_v7 = vld [vmem:[%s17037_s11 + $0x184] ss:$12 sps:$4 sm:$0xff]  }
0x1010   :  { %v8420_v56 = vpop.permute.xlu0 %8419  ;;  %v8448_v3 = vpop.permute.xlu1 %8447 }
0x1011   :  { %11089 = vmatprep.subr.bf16.mxu1 %v8448_v3  ;;  %8304 = vmatmul.mubr.bf16.gmra.mxu1 %v12433_v4 }
0x1012   :  { %11734 = vmatpush3.bf16.msra.mxu0 %v15921_v38  ;;  %11090 = vmatpush3.bf16.msra.mxu1 %v8432_v52 }
0x1013   :  { %8311 = vmatprep.mubr.bf16.mxu1 %v12434_v30  ;;  %11755 = vmatprep.subr.bf16.mxu0 %v17345_v16 }
0x1014   :  { %v16159_v43 = vpop.permute.xlu0 %8451  ;;  %v8446_v57 = vpop.permute.xlu1 %8445 }
0x1015   :  { %11716 = vmatmul.mubr.msk.bf16.gmra.mxu0 %vm5798_vm7, %v12435_v51  ;;  %11091 = vmatprep.subr.bf16.mxu1 %v8446_v57  ;;  %v12457_v57 = vld [vmem:[%s17037_s11 + $0x1c8] ss:$12 sps:$4 sm:$0xff]   ;;  %v12458_v51 = vld [vmem:[%s17037_s11 + $0x1e4] ss:$12 sps:$4 sm:$0xff]  }
0x1016   :  { %11092 = vmatpush3.bf16.msra.mxu1 %v8430_v34  ;;  %11719 = vmatprep.mubr.msk.bf16.mxu0 %vm12737_vm6, %v17345_v16 }
0x1018   :  { %v8644_v38 = vpop.permute.xlu0 %8643  ;;  %v8444_v21 = vpop.permute.xlu1 %8443 }
0x1019   :  { %11093 = vmatprep.subr.bf16.mxu1 %v8444_v21  ;;  %8312 = vmatmul.mubr.bf16.gmra.mxu1 %v12436_v40 }
0x101a   :  { %11094 = vmatpush3.bf16.msra.mxu1 %v8428_v15  ;;  %8319 = vmatprep.mubr.bf16.mxu1 %v12437_v18  ;;  %v12459_v18 = vld [vmem:[%s17037_s11 + $0x68] ss:$12 sps:$4 sm:$0xff]  }
0x101c   :  { %v8642_v20 = vpop.permute.xlu0 %8641  ;;  %v8442_v22 = vpop.permute.xlu1 %8441 }
0x101d   :  { %11720 = vmatmul.mubr.msk.bf16.gmra.mxu0 %vm5798_vm7, %v12438_v62  ;;  %11095 = vmatprep.subr.bf16.mxu1 %v8442_v22 }
0x101e   :  { %11096 = vmatpush3.bf16.msra.mxu1 %v8426_v27  ;;  %11723 = vmatprep.mubr.msk.bf16.mxu0 %vm12737_vm6, %v17345_v16  ;;  %v12452_v27 = vld [vmem:[%s17037_s11 + $0x1b4] ss:$12 sps:$4 sm:$0xff]  }
0x1020   :  { %v8640_v8 = vpop.permute.xlu0 %8639  ;;  %v8440_v19 = vpop.permute.xlu1 %8439 }
0x1021   :  { %11097 = vmatprep.subr.bf16.mxu1 %v8440_v19  ;;  %8320 = vmatmul.mubr.bf16.gmra.mxu1 %v12439_v36  ;;  %v12461_v36 = vld [vmem:[%s17037_s11 + $0x1fc] ss:$12 sps:$4 sm:$0xff]  }
0x1022   :  { %11098 = vmatpush3.bf16.msra.mxu1 %v8424_v61  ;;  %8327 = vmatprep.mubr.bf16.mxu1 %v12440_v35  ;;  %v12453_v61 = vld [vmem:[%s17037_s11 + $0x38] ss:$12 sps:$4 sm:$0xff]  }
0x1024   :  { %v8638_v11 = vpop.permute.xlu0 %8637  ;;  %v8438_v39 = vpop.permute.xlu1 %8437 }
0x1025   :  { %11724 = vmatmul.mubr.msk.bf16.gmra.mxu0 %vm5798_vm7, %v12441_v13  ;;  %11099 = vmatprep.subr.bf16.mxu1 %v8438_v39  ;;  %v12462_v13 = vld [vmem:[%s17037_s11 + $0xf8] ss:$12 sps:$4 sm:$0xff]  }
0x1026   :  { %11100 = vmatpush3.bf16.msra.mxu1 %v8422_v26  ;;  %11727 = vmatprep.mubr.msk.bf16.mxu0 %vm12737_vm6, %v17345_v16  ;;  %v12454_v26 = vld [vmem:[%s17037_s11 + $0x1b0] ss:$12 sps:$4 sm:$0xff]  }
0x1028   :  { %v8436_v58 = vpop.permute.xlu1 %8435  ;;  %v8636_v5 = vpop.permute.xlu0 %8635 }
0x1029   :  { %11101 = vmatprep.subr.bf16.mxu1 %v8436_v58  ;;  %8328 = vmatmul.mubr.bf16.gmra.mxu1 %v12442_v0 }
0x102a   :  { %11102 = vmatpush3.bf16.msra.mxu1 %v8420_v56  ;;  %8505 = vmatprep.mubr.bf16.mxu1 %v12443_v54  ;;  %v12456_v56 = vld [vmem:[%s17037_s11 + $0x50] ss:$12 sps:$4 sm:$0xff]  }
0x102c   :  { %v16197_v29 = vpop.permute.xlu1 %8453  ;;  %v8634_v63 = vpop.permute.xlu0 %8633 }
0x102d   :  { %11728 = vmatmul.mubr.msk.bf16.gmra.mxu0 %vm5798_vm7, %v12444_v55 }
0x102e   :  { %11735 = vmatprep.mubr.msk.bf16.mxu0 %vm12737_vm6, %v17345_v16 }
0x1030   :  { %v8660_v14 = vpop.permute.xlu1 %8659  ;;  %v8632_v60 = vpop.permute.xlu0 %8631 }
0x1031   :  { %11140 = vmatprep.subr.bf16.mxu1 %v8660_v14  ;;  %8506 = vmatmul.mubr.bf16.vlgmr.msra.gmra.mxu1 %v12445_v9  ;;  %v12463_v14 = vld [vmem:[%s17037_s11 + $0x1f8] ss:$12 sps:$4 sm:$0xff]  }
0x1032   :  { %11141 = vmatpush3.bf16.msra.mxu1 %v8644_v38  ;;  %8513 = vmatprep.mubr.bf16.mxu1 %v12446_v7 }
0x1033   :  { %v10997_v1 = vpop.f32.mrf.mxu1 }
0x1034   :  { %v8658_v41 = vpop.permute.xlu1 %8657  ;;  %v8630_v34 = vpop.permute.xlu0 %8629 }
0x1035   :  { %11736 = vmatmul.mubr.msk.bf16.vlgmr.msra.gmra.mxu0 %vm5798_vm7, %v12447_v37  ;;  %11142 = vmatprep.subr.bf16.mxu1 %v8658_v41  ;;  %v10998_v3 = vpop.f32.mrf.mxu1  ;;  %v12464_v41 = vld [vmem:[%s17037_s11 + $0x214] ss:$12 sps:$4 sm:$0xff]  }
0x1036   :  { %11756 = vmatpush3.bf16.msra.mxu0 %v16135_v42  ;;  %11143 = vmatpush3.bf16.msra.mxu1 %v8642_v20  ;;  %v16267_v4 = vadd.f32 %v10998_v3, %v10997_v1  ;;  %v12469_v3 = vld [vmem:[%s17037_s11 + $0x228] ss:$12 sps:$4 sm:$0xff]  }
0x1037   :  { %11757 = vmatprep.subr.bf16.mxu0 %v17345_v16  ;;  %11739 = vmatprep.mubr.msk.bf16.mxu0 %vm12737_vm6, %v17345_v16  ;;  %v11000_v30 = vpop.f32.mrf.mxu1 }
0x1039   :  { %v8656_v52 = vpop.permute.xlu1 %8655  ;;  %8514 = vmatmul.mubr.bf16.gmra.mxu1 %v12448_v6  ;;  %v11001_v38 = vpop.f32.mrf.mxu1 }
0x103a   :  { %11758 = vmatpush3.bf16.msra.mxu0 %v16116_v23  ;;  %11144 = vmatprep.subr.bf16.mxu1 %v8656_v52  ;;  %v16233_v23 = vpop.permute.xlu0 %8661  ;;  %v16276_v21 = vadd.f32 %v11001_v38, %v11000_v30  ;;  %v12465_v52 = vld [vmem:[%s17037_s11 + $0x110] ss:$12 sps:$4 sm:$0xff]  }
0x103b   :  { %11145 = vmatpush3.bf16.msra.mxu1 %v8640_v8  ;;  %11779 = vmatprep.subr.bf16.mxu0 %v17345_v16  ;;  %v11003_v40 = vpop.f32.mrf.mxu1  ;;  %v12460_v8 = vld [vmem:[%s17037_s11 + $0x1e0] ss:$12 sps:$4 sm:$0xff]  }
0x103c   :  { %8521 = vmatprep.mubr.bf16.mxu1 %v12449_v24 }
0x103d   :  { %v8654_v28 = vpop.permute.xlu1 %8653  ;;  %11740 = vmatmul.mubr.msk.bf16.gmra.mxu0 %vm5798_vm7, %v12450_v32  ;;  %v11004_v20 = vpop.f32.mrf.mxu1 }
0x103e   :  { %11146 = vmatprep.subr.bf16.mxu1 %v8654_v28  ;;  %11743 = vmatprep.mubr.msk.bf16.mxu0 %vm12737_vm6, %v17345_v16  ;;  %v16284_v22 = vadd.f32 %v11004_v20, %v11003_v40  ;;  %v12472_v20 = vld [vmem:[%s17037_s11 + $0x240] ss:$12 sps:$4 sm:$0xff]  }
0x103f   :  { %11147 = vmatpush3.bf16.msra.mxu1 %v8638_v11  ;;  %v11006_v62 = vpop.f32.mrf.mxu1 }
0x1041   :  { %v8652_v15 = vpop.permute.xlu1 %8651  ;;  %8522 = vmatmul.mubr.bf16.gmra.mxu1 %v12451_v33  ;;  %v11007_v35 = vpop.f32.mrf.mxu1 }
0x1042   :  { %11148 = vmatprep.subr.bf16.mxu1 %v8652_v15  ;;  %8529 = vmatprep.mubr.bf16.mxu1 %v12452_v27  ;;  %v16294_v11 = vadd.f32 %v11007_v35, %v11006_v62  ;;  %v12466_v15 = vld [vmem:[%s17037_s11 + $0x210] ss:$12 sps:$4 sm:$0xff]   ;;  %v12467_v27 = vld [vmem:[%s17037_s11 + $0x22c] ss:$12 sps:$4 sm:$0xff]  }
0x1043   :  { %11149 = vmatpush3.bf16.msra.mxu1 %v8636_v5  ;;  %v11009_v39 = vpop.f32.mrf.mxu1 }
0x1045   :  { %v8650_v17 = vpop.permute.xlu1 %8649  ;;  %v16241_v47 = vpop.permute.xlu0 %7211  ;;  %11744 = vmatmul.mubr.msk.bf16.gmra.mxu0 %vm5798_vm7, %v12453_v61 }
0x1046   :  { %17346 = vst [vmem:[#allocation44_spill] sm:$0xff] %v16241_v47  ;;  %v16249_v42 = vadd.f32 %v16241_v47, %v15871_v46  ;;  %11150 = vmatprep.subr.bf16.mxu1 %v8650_v17  ;;  %11747 = vmatprep.mubr.msk.bf16.mxu0 %vm12737_vm6, %v17345_v16  ;;  %v12455_v46 = vld [vmem:[%s17037_s11 + $0x1cc] ss:$12 sps:$4 sm:$0xff]   ;;  %v11010_v5 = vpop.f32.mrf.mxu1 }
0x1047   :  { %11151 = vmatpush3.bf16.msra.mxu1 %v8634_v63  ;;  %v16310_v54 = vadd.f32 %v11010_v5, %v11009_v39  ;;  %v12475_v39 = vld [vmem:[%s17037_s11 + $0x188] ss:$12 sps:$4 sm:$0xff]   ;;  %v12478_v5 = vld [vmem:[%s17037_s11 + $0x1d0] ss:$12 sps:$4 sm:$0xff]  }
0x1048   :  { %17347 = vst [vmem:[#allocation47_spill] sm:$0xff] %v16249_v42  ;;  %v8874_v53 = vsel %vm8849_vm8, %v16249_v42, 0.0  ;;  %v11012_v55 = vpop.f32.mrf.mxu1 }
0x1049   :  { %v8648_v45 = vpop.permute.xlu1 %8647  ;;  %8875 = vadd.xlane.f32.xlu0 %v8874_v53  ;;  %8530 = vmatmul.mubr.bf16.gmra.mxu1 %v12454_v26  ;;  %v16312_v63 = vpop.permute.xlu0 %7201 }
0x104a   :  { %11152 = vmatprep.subr.bf16.mxu1 %v8648_v45  ;;  %8537 = vmatprep.mubr.bf16.mxu1 %v12455_v46  ;;  %17350 = vst [vmem:[#allocation26_spill] sm:$0xff] %v16312_v63  ;;  %v11013_v9 = vpop.f32.mrf.mxu1  ;;  %v12468_v45 = vld [vmem:[%s17037_s11 + $0x128] ss:$12 sps:$4 sm:$0xff]  }
0x104b   :  { %11153 = vmatpush3.bf16.msra.mxu1 %v8632_v60  ;;  %v16330_v60 = vadd.f32 %v11013_v9, %v11012_v55 }
0x104c   :  { %v11015_v37 = vpop.f32.mrf.mxu1 }
0x104d   :  { %v8646_v2 = vpop.permute.xlu1 %8645  ;;  %11748 = vmatmul.mubr.msk.bf16.gmra.mxu0 %vm5798_vm7, %v12456_v56  ;;  %v16357_v33 = vpop.permute.xlu0 %7191 }
0x104e   :  { %11154 = vmatprep.subr.bf16.mxu1 %v8646_v2  ;;  %11751 = vmatprep.mubr.msk.bf16.mxu0 %vm12737_vm6, %v17345_v16  ;;  %v16366_v53 = vadd.f32 %v16357_v33, %v15857_v49 }
0x104f   :  { %11155 = vmatpush3.bf16.msra.mxu1 %v8630_v34  ;;  %v11016_v34 = vpop.f32.mrf.mxu1 }
0x1050   :  { %11827 = vmatprep.subr.mxu1 %v17345_v16  ;;  %v16346_v24 = vadd.f32 %v11016_v34, %v11015_v37  ;;  %17355 = vst [vmem:[#allocation49_spill] sm:$0xff] %v16366_v53  ;;  %v8862_v56 = vsel %vm8849_vm8, %v16366_v53, 0.0 }
0x1051   :  { %8538 = vmatmul.mubr.bf16.gmra.mxu1 %v12457_v57  ;;  %v16289_v19 = vpop.permute.xlu1 %8663  ;;  %v16389_v30 = vpop.permute.xlu0 %7181  ;;  %v12470_v57 = vld [vmem:[%s17037_s11 + $0x244] ss:$12 sps:$4 sm:$0xff]  }
0x1052   :  { %8715 = vmatprep.mubr.bf16.mxu1 %v12458_v51  ;;  %v12471_v51 = vld [vmem:[%s17037_s11 + $0x140] ss:$12 sps:$4 sm:$0xff]  }
0x1055   :  { %11752 = vmatmul.mubr.msk.bf16.gmra.mxu0 %vm5798_vm7, %v12459_v18  ;;  %v16417_v62 = vpop.permute.xlu0 %7171 }
0x1056   :  { %11759 = vmatprep.mubr.msk.bf16.mxu0 %vm12737_vm6, %v17345_v16 }
0x1059   :  { %8716 = vmatmul.mubr.bf16.vlgmr.msra.gmra.mxu1 %v12460_v8  ;;  %v16423_v8 = vadd.f32 %v16417_v62, %v15843_v50  ;;  %v12474_v50 = vld [vmem:[%s17037_s11 + $0x170] ss:$12 sps:$4 sm:$0xff]  }
0x105a   :  { %8723 = vmatprep.mubr.bf16.mxu1 %v12461_v36 }
0x105b   :  { %17359 = vst [vmem:[#allocation34_spill] sm:$0xff] %v16423_v8  ;;  %v8850_v35 = vsel %vm8849_vm8, %v16423_v8, 0.0 }
0x105d   :  { %11760 = vmatmul.mubr.msk.bf16.vlgmr.msra.gmra.mxu0 %vm5798_vm7, %v12462_v13 }
0x105e   :  { %11780 = vmatpush3.bf16.msra.mxu0 %v16197_v29  ;;  %v16301_v58 = vpop.permute.xlu1 %7216  ;;  %11763 = vmatprep.mubr.msk.bf16.mxu0 %vm12737_vm6, %v17345_v16 }
0x105f   :  { %17348 = vst [vmem:[#allocation30_spill] sm:$0xff] %v16301_v58  ;;  %v16307_v0 = vadd.f32 %v16301_v58, %v15873_v44  ;;  %11781 = vmatprep.subr.bf16.mxu0 %v17345_v16 }
0x1061   :  { %17349 = vst [vmem:[#allocation40_spill] sm:$0xff] %v16307_v0  ;;  %v8877_v29 = vsel %vm8849_vm8, %v16307_v0, 0.0  ;;  %8724 = vmatmul.mubr.bf16.gmra.mxu1 %v12463_v14 }
0x1062   :  { %11782 = vmatpush3.bf16.msra.mxu0 %v16159_v43  ;;  %8878 = vadd.xlane.f32.xlu1 %v8877_v29  ;;  %v16320_v44 = vpop.permute.xlu1 %7206  ;;  %v16334_v43 = vadd.f32 %v16312_v63, %v15864_v12  ;;  %v11018_v12 = vpop.f32.mrf.mxu1 }
0x1063   :  { %17351 = vst [vmem:[#allocation42_spill] sm:$0xff] %v16320_v44  ;;  %v16324_v7 = vadd.f32 %v16320_v44, %v15866_v48  ;;  %11803 = vmatprep.subr.bf16.mxu0 %v17345_v16  ;;  %8731 = vmatprep.mubr.bf16.mxu1 %v12464_v41 }
0x1064   :  { %17353 = vst [vmem:[#allocation46_spill] sm:$0xff] %v16334_v43  ;;  %v8868_v32 = vsel %vm8849_vm8, %v16334_v43, 0.0  ;;  %v11019_v17 = vpop.f32.mrf.mxu1 }
0x1065   :  { %17352 = vst [vmem:[#allocation45_spill] sm:$0xff] %v16324_v7  ;;  %11764 = vmatmul.mubr.msk.bf16.gmra.mxu0 %vm5798_vm7, %v12465_v52  ;;  %v8871_v48 = vsel %vm8849_vm8, %v16324_v7, 0.0  ;;  %v16362_v61 = vadd.f32 %v11019_v17, %v11018_v12  ;;  %v12479_v52 = vld [vmem:[%s17037_s11 + $0x1e8] ss:$12 sps:$4 sm:$0xff]   ;;  %v12480_v17 = vld [vmem:[%s17037_s11 + $0x200] ss:$12 sps:$4 sm:$0xff]  }
0x1066   :  { %8872 = vadd.xlane.f32.xlu0 %v8871_v48  ;;  %v16342_v6 = vpop.permute.xlu1 %7196  ;;  %11767 = vmatprep.mubr.msk.bf16.mxu0 %vm12737_vm6, %v17345_v16 }
0x1067   :  { %v16350_v28 = vadd.f32 %v16342_v6, %v15859_v31  ;;  %v11021_v31 = vpop.f32.mrf.mxu1 }
0x1069   :  { %17354 = vst [vmem:[#allocation48_spill] sm:$0xff] %v16350_v28  ;;  %8732 = vmatmul.mubr.bf16.gmra.mxu1 %v12466_v15  ;;  %v8865_v26 = vsel %vm8849_vm8, %v16350_v28, 0.0  ;;  %v11022_v1 = vpop.f32.mrf.mxu1 }
0x106a   :  { %8869 = vadd.xlane.f32.xlu0 %v8868_v32  ;;  %8739 = vmatprep.mubr.bf16.mxu1 %v12467_v27  ;;  %v16374_v46 = vpop.permute.xlu1 %7186  ;;  %v16378_v2 = vadd.f32 %v11022_v1, %v11021_v31 }
0x106b   :  { %v16382_v49 = vadd.f32 %v16374_v46, %v15852_v10  ;;  %v16396_v10 = vadd.f32 %v16389_v30, %v15850_v59 }
0x106d   :  { %11768 = vmatmul.mubr.msk.bf16.gmra.mxu0 %vm5798_vm7, %v12468_v45  ;;  %17356 = vst [vmem:[#allocation50_spill] sm:$0xff] %v16382_v49  ;;  %17357 = vst [vmem:[#allocation54_spill] sm:$0xff] %v16396_v10  ;;  %v8859_v38 = vsel %vm8849_vm8, %v16382_v49, 0.0  ;;  %v8856_v59 = vsel %vm8849_vm8, %v16396_v10, 0.0 }
0x106e   :  { %8866 = vadd.xlane.f32.xlu0 %v8865_v26  ;;  %11771 = vmatprep.mubr.msk.bf16.mxu0 %vm12737_vm6, %v17345_v16  ;;  %v16404_v40 = vpop.permute.xlu1 %7176 }
0x106f   :  { %v16410_v18 = vadd.f32 %v16404_v40, %v15845_v25  ;;  %v12473_v25 = vld [vmem:[%s17037_s11 + $0x158] ss:$12 sps:$4 sm:$0xff]  }
0x1071   :  { %8740 = vmatmul.mubr.bf16.gmra.mxu1 %v12469_v3  ;;  %17358 = vst [vmem:[#allocation52_spill] sm:$0xff] %v16410_v18  ;;  %v8853_v36 = vsel %vm8849_vm8, %v16410_v18, 0.0 }
0x1072   :  { %8863 = vadd.xlane.f32.xlu0 %v8862_v56  ;;  %8747 = vmatprep.mubr.bf16.mxu1 %v12470_v57  ;;  %v12481_v56 = vld [vmem:[%s17037_s11 + $0x218] ss:$12 sps:$4 sm:$0xff]  }
0x1075   :  { %11772 = vmatmul.mubr.msk.bf16.gmra.mxu0 %vm5798_vm7, %v12471_v51 }
0x1076   :  { %8860 = vadd.xlane.f32.xlu0 %v8859_v38  ;;  %11775 = vmatprep.mubr.msk.bf16.mxu0 %vm12737_vm6, %v17345_v16  ;;  %v16492_v38 = vpop.f32.mrf.mxu1 }
0x1079   :  { %8748 = vmatmul.mubr.bf16.gmra.mxu1 %v12472_v20  ;;  %v12482_v20 = vld [vmem:[%s17037_s11 + $0x230] ss:$12 sps:$4 sm:$0xff]  }
0x107a   :  { %8857 = vadd.xlane.f32.xlu0 %v8856_v59  ;;  %11847 = vmatprep.mubr.msk.f32.mxu1 %vm12737_vm6, %v17345_v16 }
0x107d   :  { %11776 = vmatmul.mubr.msk.bf16.gmra.mxu0 %vm5798_vm7, %v12473_v25 }
0x107e   :  { %8854 = vadd.xlane.f32.xlu0 %v8853_v36  ;;  %11783 = vmatprep.mubr.msk.bf16.mxu0 %vm12737_vm6, %v17345_v16  ;;  %v16504_v36 = vpop.f32.mrf.mxu1 }
0x1082   :  { %8851 = vadd.xlane.f32.xlu0 %v8850_v35 }
0x1085   :  { %11784 = vmatmul.mubr.msk.bf16.vlgmr.msra.gmra.mxu0 %vm5798_vm7, %v12474_v50 }
0x1086   :  { %11804 = vmatpush3.bf16.msra.mxu0 %v16289_v19  ;;  %11787 = vmatprep.mubr.msk.bf16.mxu0 %vm12737_vm6, %v17345_v16  ;;  %v12476_v19 = vld [vmem:[%s17037_s11 + $0x1a0] ss:$12 sps:$4 sm:$0xff]  }
0x1087   :  { %11805 = vmatprep.subr.bf16.mxu0 %v17345_v16 }
0x108a   :  { %11806 = vmatpush3.bf16.msra.mxu0 %v16233_v23  ;;  %v12477_v23 = vld [vmem:[%s17037_s11 + $0x1b8] ss:$12 sps:$4 sm:$0xff]  }
0x108d   :  { %11788 = vmatmul.mubr.msk.bf16.gmra.mxu0 %vm5798_vm7, %v12475_v39 }
0x108e   :  { %11791 = vmatprep.mubr.msk.bf16.mxu0 %vm12737_vm6, %v17345_v16 }
0x1095   :  { %11792 = vmatmul.mubr.msk.bf16.gmra.mxu0 %vm5798_vm7, %v12476_v19 }
0x1096   :  { %11795 = vmatprep.mubr.msk.bf16.mxu0 %vm12737_vm6, %v17345_v16 }
0x109d   :  { %11796 = vmatmul.mubr.msk.bf16.gmra.mxu0 %vm5798_vm7, %v12477_v23 }
0x109e   :  { %11799 = vmatprep.mubr.msk.bf16.mxu0 %vm12737_vm6, %v17345_v16 }
0x10a5   :  { %v10944_v13 = vpop.f32.mrf.mxu0  ;;  %11800 = vmatmul.mubr.msk.bf16.gmra.mxu0 %vm5798_vm7, %v12478_v5 }
0x10a6   :  { %11807 = vmatprep.mubr.msk.bf16.mxu0 %vm12737_vm6, %v17345_v16 }
0x10a7   :  { %v10945_v55 = vpop.f32.mrf.mxu0 }
0x10a8   :  { %v10946_v29 = vadd.f32 %v10945_v55, %v10944_v13  ;;  %v12483_v55 = vld [vmem:[%s17037_s11 + $0x248] ss:$12 sps:$4 sm:$0xff]  }
0x10a9   :  { %v10947_v14 = vpop.f32.mrf.mxu0 }
0x10ab   :  { %v10948_v9 = vpop.f32.mrf.mxu0 }
0x10ac   :  { %v10949_v41 = vadd.f32 %v10948_v9, %v10947_v14 }
0x10ad   :  { %v10950_v37 = vpop.f32.mrf.mxu0  ;;  %11808 = vmatmul.mubr.msk.bf16.vlgmr.msra.gmra.mxu0 %vm5798_vm7, %v12479_v52 }
0x10ae   :  { %11811 = vmatprep.mubr.msk.bf16.mxu0 %vm12737_vm6, %v17345_v16 }
0x10af   :  { %v10951_v48 = vpop.f32.mrf.mxu0 }
0x10b0   :  { %v10952_v34 = vadd.f32 %v10951_v48, %v10950_v37 }
0x10b1   :  { %v10953_v12 = vpop.f32.mrf.mxu0 }
0x10b3   :  { %v10954_v32 = vpop.f32.mrf.mxu0 }
0x10b4   :  { %v10955_v15 = vadd.f32 %v10954_v32, %v10953_v12 }
0x10b5   :  { %v10956_v27 = vpop.f32.mrf.mxu0  ;;  %11812 = vmatmul.mubr.msk.bf16.gmra.mxu0 %vm5798_vm7, %v12480_v17 }
0x10b6   :  { %11815 = vmatprep.mubr.msk.bf16.mxu0 %vm12737_vm6, %v17345_v16 }
0x10b7   :  { %v10957_v31 = vpop.f32.mrf.mxu0 }
0x10b9   :  { %v10959_v45 = vpop.f32.mrf.mxu0 }
0x10bb   :  { %v10960_v26 = vpop.f32.mrf.mxu0 }
0x10bc   :  { %v10961_v8 = vadd.f32 %v10960_v26, %v10959_v45 }
0x10bd   :  { %v16480_v1 = vpop.f32.mrf.mxu0  ;;  %11816 = vmatmul.mubr.msk.bf16.gmra.mxu0 %vm5798_vm7, %v12481_v56 }
0x10be   :  { %11819 = vmatprep.mubr.msk.bf16.mxu0 %vm12737_vm6, %v17345_v16 }
0x10bf   :  { %v10963_v3 = vpop.f32.mrf.mxu0 }
0x10c1   :  { %v16488_v57 = vpop.f32.mrf.mxu0 }
0x10c3   :  { %v16490_v51 = vpop.f32.mrf.mxu0 }
0x10c5   :  { %v16494_v59 = vpop.f32.mrf.mxu0  ;;  %11820 = vmatmul.mubr.msk.bf16.gmra.mxu0 %vm5798_vm7, %v12482_v20 }
0x10c6   :  { %11823 = vmatprep.mubr.msk.bf16.mxu0 %vm12737_vm6, %v17345_v16  ;;  %v10958_v16 = vadd.f32 %v10957_v31, %v10956_v27  ;;  %v10964_v27 = vadd.f32 %v10963_v3, %v16480_v1 }
0x10c7   :  { %v16502_v25 = vpop.f32.mrf.mxu0 }
0x10c9   :  { %v10971_v35 = vpop.f32.mrf.mxu0  ;;  %v11050_v50 = vpop.f32.mrf.mxu1 }
0x10cb   :  { %v10972_v39 = vpop.f32.mrf.mxu0  ;;  %v11051_v19 = vpop.f32.mrf.mxu1 }
0x10cc   :  { %v16506_v23 = vadd.f32 %v10972_v39, %v10971_v35  ;;  %v16508_v13 = vadd.f32 %v11051_v19, %v11050_v50 }
0x10cd   :  { %v8024_v5 = vpop.f32.mrf.mxu0  ;;  %11824 = vmatmul.mubr.msk.bf16.gmra.mxu0 %vm5798_vm7, %v12483_v55  ;;  %v11053_v14 = vpop.f32.mrf.mxu1 }
0x10ce   :  { %v8025_v9 = vadd.f32 %v10946_v29, %v8024_v5 }
0x10cf   :  { %v11713_v37 = vpop.f32.mrf.mxu0  ;;  %v11054_v52 = vpop.f32.mrf.mxu1 }
0x10d0   :  { %v16515_v48 = vadd.f32 %v16267_v4, %v8025_v9  ;;  %v16517_v12 = vadd.f32 %v11054_v52, %v11053_v14 }
0x10d1   :  { %v8027_v32 = vpop.f32.mrf.mxu0  ;;  %v11056_v17 = vpop.f32.mrf.mxu1 }
0x10d2   :  { %v8028_v56 = vadd.f32 %v10949_v41, %v8027_v32 }
0x10d3   :  { %v11714_v20 = vpop.f32.mrf.mxu0  ;;  %v11057_v35 = vpop.f32.mrf.mxu1 }
0x10d4   :  { %v16520_v50 = vadd.f32 %v16276_v21, %v8028_v56  ;;  %v16522_v39 = vadd.f32 %v11057_v35, %v11056_v17 }
0x10d5   :  { %v8032_v19 = vpop.f32.mrf.mxu0  ;;  %v11059_v55 = vpop.f32.mrf.mxu1 }
0x10d6   :  { %v8033_v29 = vadd.f32 %v10952_v34, %v8032_v19 }
0x10d7   :  { %v11717_v5 = vpop.f32.mrf.mxu0  ;;  %v11060_v37 = vpop.f32.mrf.mxu1 }
0x10d8   :  { %v16525_v4 = vadd.f32 %v16284_v22, %v8033_v29  ;;  %v16527_v14 = vadd.f32 %v11060_v37, %v11059_v55 }
0x10d9   :  { %v8035_v9 = vpop.f32.mrf.mxu0  ;;  %v11062_v52 = vpop.f32.mrf.mxu1 }
0x10da   :  { %v8036_v41 = vadd.f32 %v10955_v15, %v8035_v9 }
0x10db   :  { %v11718_v32 = vpop.f32.mrf.mxu0  ;;  %v11063_v20 = vpop.f32.mrf.mxu1 }
0x10dc   :  { %v8109_v21 = vadd.f32 %v16294_v11, %v8036_v41  ;;  %v16530_v17 = vadd.f32 %v11063_v20, %v11062_v52 }
0x10dd   :  { %v8040_v56 = vpop.f32.mrf.mxu0  ;;  %v11065_v35 = vpop.f32.mrf.mxu1 }
0x10de   :  { %v8041_v34 = vadd.f32 %v10958_v16, %v8040_v56 }
0x10df   :  { %v11721_v19 = vpop.f32.mrf.mxu0  ;;  %v11066_v5 = vpop.f32.mrf.mxu1 }
0x10e0   :  { %v8114_v22 = vadd.f32 %v16310_v54, %v8041_v34  ;;  %v16533_v55 = vadd.f32 %v11066_v5, %v11065_v35  ;;  %v10967_v54 = vadd.f32 %v16490_v51, %v16488_v57 }
0x10e1   :  { %v8043_v29 = vpop.f32.mrf.mxu0  ;;  %v11068_v37 = vpop.f32.mrf.mxu1 }
0x10e2   :  { %v8044_v15 = vadd.f32 %v10961_v8, %v8043_v29 }
0x10e3   :  { %v11722_v9 = vpop.f32.mrf.mxu0  ;;  %v11069_v32 = vpop.f32.mrf.mxu1 }
0x10e4   :  { %v8117_v11 = vadd.f32 %v16330_v60, %v8044_v15  ;;  %v16537_v31 = vadd.f32 %v11069_v32, %v11068_v37  ;;  %v10970_v60 = vadd.f32 %v16502_v25, %v16494_v59 }
0x10e5   :  { %v8048_v52 = vpop.f32.mrf.mxu0  ;;  %v11071_v16 = vpop.f32.mrf.mxu1 }
0x10e6   :  { %v8049_v41 = vadd.f32 %v10964_v27, %v8048_v52 }
0x10e7   :  { %v11725_v20 = vpop.f32.mrf.mxu0  ;;  %v11072_v45 = vpop.f32.mrf.mxu1 }
0x10e8   :  { %v8122_v26 = vadd.f32 %v16346_v24, %v8049_v41  ;;  %v16542_v56 = vadd.f32 %v11072_v45, %v11071_v16  ;;  %v11026_v24 = vadd.f32 %v16504_v36, %v16492_v38 }
0x10e9   :  { %v8051_v8 = vpop.f32.mrf.mxu0  ;;  %v11074_v35 = vpop.f32.mrf.mxu1 }
0x10ea   :  { %v8052_v34 = vadd.f32 %v10967_v54, %v8051_v8 }
0x10eb   :  { %v11726_v1 = vpop.f32.mrf.mxu0  ;;  %v11075_v19 = vpop.f32.mrf.mxu1 }
0x10ec   :  { %v8125_v3 = vadd.f32 %v16362_v61, %v8052_v34  ;;  %v16547_v29 = vadd.f32 %v11075_v19, %v11074_v35 }
0x10ed   :  { %v8056_v5 = vpop.f32.mrf.mxu0  ;;  %v11077_v15 = vpop.f32.mrf.mxu1 }
0x10ee   :  { %v8057_v37 = vadd.f32 %v10970_v60, %v8056_v5 }
0x10ef   :  { %v11729_v57 = vpop.f32.mrf.mxu0  ;;  %v11078_v9 = vpop.f32.mrf.mxu1 }
0x10f0   :  { %v8130_v51 = vadd.f32 %v16378_v2, %v8057_v37  ;;  %v16552_v27 = vadd.f32 %v11078_v9, %v11077_v15 }
0x10f1   :  { %v8059_v32 = vpop.f32.mrf.mxu0  ;;  %v16555_v25 = vpop.f32.mrf.mxu1 }
0x10f2   :  { %v8060_v59 = vadd.f32 %v16506_v23, %v8059_v32 }
0x10f3   :  { %v11730_v61 = vpop.f32.mrf.mxu0  ;;  %v16557_v41 = vpop.f32.mrf.mxu1 }
0x10f4   :  { %v8133_v52 = vadd.f32 %v11026_v24, %v8060_v59 }
0x10f5   :  { %v8170_v16 = vpop.f32.mrf.mxu0  ;;  %v16560_v38 = vpop.f32.mrf.mxu1 }
0x10f6   :  { %v8171_v20 = vadd.f32 %v8170_v16, %v16515_v48 }
0x10f7   :  { %v11737_v45 = vpop.f32.mrf.mxu0  ;;  %v16563_v35 = vpop.f32.mrf.mxu1 }
0x10f8   :  { %v11108_v44 = vadd.f32 %v16563_v35, %v16560_v38 }
0x10f9   :  { %v8173_v54 = vpop.f32.mrf.mxu0  ;;  %v16566_v60 = vpop.f32.mrf.mxu1 }
0x10fa   :  { %v8174_v2 = vadd.f32 %v8173_v54, %v16520_v50 }
0x10fb   :  { %v11738_v36 = vpop.f32.mrf.mxu0  ;;  %v16568_v48 = vpop.f32.mrf.mxu1 }
0x10fd   :  { %v8178_v8 = vpop.f32.mrf.mxu0  ;;  %v16570_v9 = vpop.f32.mrf.mxu1 }
0x10fe   :  { %v8179_v23 = vadd.f32 %v8178_v8, %v16525_v4 }
0x10ff   :  { %v11741_v34 = vpop.f32.mrf.mxu0  ;;  %v16572_v61 = vpop.f32.mrf.mxu1 }
0x1101   :  { %v8181_v1 = vpop.f32.mrf.mxu0  ;;  %v16574_v54 = vpop.f32.mrf.mxu1 }
0x1102   :  { %v8182_v19 = vadd.f32 %v8181_v1, %v8109_v21 }
0x1103   :  { %v11742_v5 = vpop.f32.mrf.mxu0  ;;  %v16576_v34 = vpop.f32.mrf.mxu1 }
0x1105   :  { %v8186_v37 = vpop.f32.mrf.mxu0 }
0x1106   :  { %v8187_v15 = vadd.f32 %v8186_v37, %v8114_v22  ;;  %v16578_v37 = vpop.f32.mrf.mxu1 }
0x1107   :  { %v11745_v57 = vpop.f32.mrf.mxu0 }
0x1109   :  { %v8189_v24 = vpop.f32.mrf.mxu0 }
0x110a   :  { %v8190_v50 = vadd.f32 %v8189_v24, %v8117_v11 }
0x110b   :  { %v11746_v32 = vpop.f32.mrf.mxu0 }
0x110c   :  { %v16580_v32 = vpop.f32.mrf.mxu1 }
0x110d   :  { %v8194_v59 = vpop.f32.mrf.mxu0 }
0x110e   :  { %v8195_v4 = vadd.f32 %v8194_v59, %v8122_v26 }
0x110f   :  { %v11749_v16 = vpop.f32.mrf.mxu0 }
0x1111   :  { %v8197_v45 = vpop.f32.mrf.mxu0 }
0x1112   :  { %v8198_v21 = vadd.f32 %v8197_v45, %v8125_v3  ;;  %v16585_v45 = vpop.f32.mrf.mxu1 }
0x1113   :  { %v11750_v36 = vpop.f32.mrf.mxu0 }
0x1114   :  { %v16590_v18 = vpop.f32.mrf.mxu1 }
0x1115   :  { %v8202_v8 = vpop.f32.mrf.mxu0 }
0x1116   :  { %v8203_v22 = vadd.f32 %v8202_v8, %v8130_v51 }
0x1117   :  { %v11753_v1 = vpop.f32.mrf.mxu0 }
0x1119   :  { %v8205_v5 = vpop.f32.mrf.mxu0 }
0x111a   :  { %v8206_v11 = vadd.f32 %v8205_v5, %v8133_v52 }
0x111b   :  { %v11754_v57 = vpop.f32.mrf.mxu0 }
0x111d   :  { %v8370_v24 = vpop.f32.mrf.mxu0 }
0x111e   :  { %v8371_v26 = vadd.f32 %v16508_v13, %v8370_v24  ;;  %v16595_v24 = vpop.f32.mrf.mxu1 }
0x111f   :  { %v11761_v59 = vpop.f32.mrf.mxu0 }
0x1120   :  { %v16583_v16 = vadd.f32 %v8371_v26, %v8171_v20 }
0x1121   :  { %v8373_v3 = vpop.f32.mrf.mxu0 }
0x1122   :  { %v8374_v36 = vadd.f32 %v16517_v12, %v8373_v3  ;;  %v16600_v3 = vpop.f32.mrf.mxu1 }
0x1123   :  { %v11762_v51 = vpop.f32.mrf.mxu0 }
0x1124   :  { %v16588_v8 = vadd.f32 %v8374_v36, %v8174_v2 }
0x1125   :  { %v8378_v1 = vpop.f32.mrf.mxu0 }
0x1126   :  { %v8379_v52 = vadd.f32 %v16522_v39, %v8378_v1  ;;  %v16605_v1 = vpop.f32.mrf.mxu1 }
0x1127   :  { %v11765_v5 = vpop.f32.mrf.mxu0 }
0x1128   :  { %v16593_v57 = vadd.f32 %v8379_v52, %v8179_v23 }
0x1129   :  { %v8381_v13 = vpop.f32.mrf.mxu0 }
0x112a   :  { %v8382_v20 = vadd.f32 %v16527_v14, %v8381_v13  ;;  %v16610_v13 = vpop.f32.mrf.mxu1 }
0x112b   :  { %v11766_v26 = vpop.f32.mrf.mxu0 }
0x112c   :  { %v16598_v59 = vadd.f32 %v8382_v20, %v8182_v19 }
0x112d   :  { %v8386_v12 = vpop.f32.mrf.mxu0 }
0x112e   :  { %v8387_v2 = vadd.f32 %v16530_v17, %v8386_v12  ;;  %v16615_v12 = vpop.f32.mrf.mxu1 }
0x112f   :  { %v11769_v36 = vpop.f32.mrf.mxu0  ;;  %17360 = vst [vmem:[#allocation28_spill] sm:$0xff] %v16615_v12 }
0x1130   :  { %v16603_v51 = vadd.f32 %v8387_v2, %v8187_v15 }
0x1131   :  { %v8389_v39 = vpop.f32.mrf.mxu0 }
0x1132   :  { %v8390_v23 = vadd.f32 %v16533_v55, %v8389_v39  ;;  %v16620_v39 = vpop.f32.mrf.mxu1 }
0x1133   :  { %v11770_v52 = vpop.f32.mrf.mxu0  ;;  %17362 = vst [vmem:[#allocation38_spill] sm:$0xff] %v16620_v39 }
0x1134   :  { %v16608_v5 = vadd.f32 %v8390_v23, %v8190_v50 }
0x1135   :  { %v8394_v14 = vpop.f32.mrf.mxu0 }
0x1136   :  { %v8395_v19 = vadd.f32 %v16537_v31, %v8394_v14  ;;  %v11156_v14 = vpop.f32.mrf.mxu1 }
0x1137   :  { %v11773_v20 = vpop.f32.mrf.mxu0 }
0x1138   :  { %v16613_v26 = vadd.f32 %v8395_v19, %v8195_v4 }
0x1139   :  { %v8397_v17 = vpop.f32.mrf.mxu0 }
0x113a   :  { %v8398_v15 = vadd.f32 %v16542_v56, %v8397_v17  ;;  %v11157_v56 = vpop.f32.mrf.mxu1 }
0x113b   :  { %v11774_v2 = vpop.f32.mrf.mxu0 }
0x113c   :  { %v16618_v36 = vadd.f32 %v8398_v15, %v8198_v21  ;;  %v11159_v15 = vpop.f32.mrf.mxu1 }
0x113d   :  { %v8402_v55 = vpop.f32.mrf.mxu0 }
0x113e   :  { %17361 = vst [vmem:[#allocation25_spill] sm:$0xff] %v16618_v36  ;;  %v8403_v50 = vadd.f32 %v16547_v29, %v8402_v55  ;;  %v11160_v53 = vpop.f32.mrf.mxu1 }
0x113f   :  { %v11777_v23 = vpop.f32.mrf.mxu0 }
0x1140   :  { %v16623_v52 = vadd.f32 %v8403_v50, %v8203_v22  ;;  %v11162_v55 = vpop.f32.mrf.mxu1 }
0x1141   :  { %v8405_v31 = vpop.f32.mrf.mxu0 }
0x1142   :  { %17363 = vst [vmem:[#allocation33_spill] sm:$0xff] %v16623_v52  ;;  %v8406_v4 = vadd.f32 %v16552_v27, %v8405_v31  ;;  %v11163_v23 = vpop.f32.mrf.mxu1 }
0x1143   :  { %v11778_v19 = vpop.f32.mrf.mxu0 }
0x1144   :  { %v16626_v20 = vadd.f32 %v8406_v4, %v8206_v11  ;;  %v11165_v27 = vpop.f32.mrf.mxu1 }
0x1145   :  { %v8580_v10 = vpop.f32.mrf.mxu0 }
0x1146   :  { %17364 = vst [vmem:[#allocation27_spill] sm:$0xff] %v16626_v20  ;;  %v11166_v4 = vpop.f32.mrf.mxu1 }
0x1147   :  { %v11785_v17 = vpop.f32.mrf.mxu0 }
0x1149   :  { %v8583_v21 = vpop.f32.mrf.mxu0 }
0x114a   :  { %v8584_v12 = vadd.f32 %v11108_v44, %v8583_v21  ;;  %v11114_v44 = vadd.f32 %v16572_v61, %v16570_v9  ;;  %v11167_v61 = vadd.f32 %v11166_v4, %v11165_v27 }
0x114b   :  { %v11786_v2 = vpop.f32.mrf.mxu0 }
0x114c   :  { %v11168_v2 = vpop.f32.mrf.mxu1 }
0x114d   :  { %v8588_v49 = vpop.f32.mrf.mxu0 }
0x114f   :  { %v11789_v28 = vpop.f32.mrf.mxu0 }
0x1150   :  { %v11169_v28 = vpop.f32.mrf.mxu1 }
0x1151   :  { %v8591_v29 = vpop.f32.mrf.mxu0 }
0x1152   :  { %v11171_v47 = vpop.f32.mrf.mxu1 }
0x1153   :  { %v11790_v22 = vpop.f32.mrf.mxu0 }
0x1154   :  { %v11105_v22 = vadd.f32 %v16557_v41, %v16555_v25  ;;  %v11172_v39 = vpop.f32.mrf.mxu1  ;;  %v11161_v41 = vadd.f32 %v11160_v53, %v11159_v15 }
0x1155   :  { %v8596_v50 = vpop.f32.mrf.mxu0 }
0x1156   :  { %v8581_v20 = vadd.f32 %v11105_v22, %v8580_v10  ;;  %v11174_v36 = vpop.f32.mrf.mxu1  ;;  %v8620_v10 = vadd.f32 %v8584_v12, %v16588_v8  ;;  %v8592_v8 = vadd.f32 %v11114_v44, %v8591_v29 }
0x1157   :  { %v11793_v43 = vpop.f32.mrf.mxu0 }
0x1158   :  { %v11175_v53 = vpop.f32.mrf.mxu1  ;;  %v8622_v15 = vadd.f32 %v8592_v8, %v16598_v59 }
0x1159   :  { %v16628_v7 = vpop.f32.mrf.mxu0 }
0x115a   :  { %v11177_v21 = vpop.f32.mrf.mxu1 }
0x115b   :  { %v11794_v11 = vpop.f32.mrf.mxu0 }
0x115d   :  { %v16630_v31 = vpop.f32.mrf.mxu0 }
0x115f   :  { %v11797_v19 = vpop.f32.mrf.mxu0 }
0x1160   :  { %v11158_v19 = vadd.f32 %v11157_v56, %v11156_v14 }
0x1161   :  { %v16632_v17 = vpop.f32.mrf.mxu0 }
0x1163   :  { %v11798_v42 = vpop.f32.mrf.mxu0 }
0x1164   :  { %v8619_v42 = vadd.f32 %v8581_v20, %v16583_v16 }
0x1165   :  { %v16634_v0 = vpop.f32.mrf.mxu0 }
0x1166   :  { %17365 = vst [vmem:[#allocation32_spill] sm:$0xff] %v16634_v0 }
0x1167   :  { %v11801_v58 = vpop.f32.mrf.mxu0 }
0x1168   :  { %v11111_v58 = vadd.f32 %v16568_v48, %v16566_v60 }
0x1169   :  { %v16638_v43 = vpop.f32.mrf.mxu0 }
0x116a   :  { %17366 = vst [vmem:[#allocation31_spill] sm:$0xff] %v16638_v43  ;;  %v8589_v22 = vadd.f32 %v11111_v58, %v8588_v49 }
0x116b   :  { %v11802_v11 = vpop.f32.mrf.mxu0 }
0x116c   :  { %v8621_v48 = vadd.f32 %v8589_v22, %v16593_v57 }
0x116d   :  { %v8790_v52 = vpop.f32.mrf.mxu0 }
0x116e   :  { %v8791_v63 = vadd.f32 %v11158_v19, %v8790_v52  ;;  %v11117_v52 = vadd.f32 %v16576_v34, %v16574_v54  ;;  %v11170_v34 = vadd.f32 %v11169_v28, %v11168_v2  ;;  %v11173_v2 = vadd.f32 %v11172_v39, %v11171_v47 }
0x116f   :  { %v11809_v0 = vpop.f32.mrf.mxu0  ;;  %v11176_v47 = vadd.f32 %v11175_v53, %v11174_v36  ;;  %v17369_v53 = vld [vmem:[#allocation26_spill] sm:$0xff] }
0x1170   :  { %v8829_v25 = vadd.f32 %v8791_v63, %v8619_v42  ;;  %v11164_v0 = vadd.f32 %v11163_v23, %v11162_v55  ;;  %v8597_v57 = vadd.f32 %v11117_v52, %v8596_v50  ;;  %v11120_v23 = vadd.f32 %v16580_v32, %v16578_v37 }
0x1171   :  { %v8793_v43 = vpop.f32.mrf.mxu0  ;;  %v11123_v37 = vadd.f32 %v16590_v18, %v16585_v45  ;;  %v11126_v18 = vadd.f32 %v16600_v3, %v16595_v24  ;;  %v11129_v24 = vadd.f32 %v16610_v13, %v16605_v1 }
0x1172   :  { %v16647_v38 = vadd.f32 %v8829_v25, %v16417_v62  ;;  %v8794_v35 = vadd.f32 %v11161_v41, %v8793_v43  ;;  %v11178_v43 = vpop.f32.mrf.mxu1  ;;  %v8623_v11 = vadd.f32 %v8597_v57, %v16603_v51  ;;  %v8600_v59 = vadd.f32 %v11120_v23, %v16628_v7 }
0x1173   :  { %v11810_v14 = vpop.f32.mrf.mxu0  ;;  %v8605_v7 = vadd.f32 %v11123_v37, %v16630_v31  ;;  %v8608_v31 = vadd.f32 %v11126_v18, %v16632_v17  ;;  %v11179_v36 = vadd.f32 %v11178_v43, %v11177_v21 }
0x1174   :  { %v8830_v16 = vadd.f32 %v8794_v35, %v8620_v10  ;;  %v8920_v60 = vsel %vm8849_vm8, %v16647_v38, 0.0  ;;  %v11180_v58 = vpop.f32.mrf.mxu1  ;;  %v8624_v51 = vadd.f32 %v8600_v59, %v16608_v5 }
0x1175   :  { %v8798_v63 = vpop.f32.mrf.mxu0  ;;  %8921 = vadd.xlane.f32.xlu1 %v8920_v60  ;;  %v8625_v5 = vadd.f32 %v8605_v7, %v16613_v26  ;;  %v17367_v60 = vld [vmem:[#allocation25_spill] sm:$0xff] }
0x1176   :  { %v16655_v49 = vadd.f32 %v8830_v16, %v16404_v40  ;;  %v8799_v62 = vadd.f32 %v11164_v0, %v8798_v63  ;;  %v11181_v22 = vpop.f32.mrf.mxu1  ;;  %v8626_v26 = vadd.f32 %v8608_v31, %v17367_v60  ;;  %v17368_v63 = vld [vmem:[#allocation32_spill] sm:$0xff] }
0x1177   :  { %v11813_v12 = vpop.f32.mrf.mxu0  ;;  %v8613_v17 = vadd.f32 %v11129_v24, %v17368_v63  ;;  %v11182_v52 = vadd.f32 %v11181_v22, %v11180_v58  ;;  %v17377_v58 = vld [vmem:[#allocation30_spill] sm:$0xff] }
0x1178   :  { %v8831_v9 = vadd.f32 %v8799_v62, %v8621_v48  ;;  %v8923_v20 = vsel %vm8849_vm8, %v16655_v49, 0.0  ;;  %v11183_v0 = vpop.f32.mrf.mxu1  ;;  %v17370_v62 = vld [vmem:[#allocation28_spill] sm:$0xff]  ;;  %v17371_v12 = vld [vmem:[#allocation38_spill] sm:$0xff] }
0x1179   :  { %v8801_v56 = vpop.f32.mrf.mxu0  ;;  %8924 = vadd.xlane.f32.xlu1 %v8923_v20  ;;  %v11132_v1 = vadd.f32 %v17371_v12, %v17370_v62  ;;  %v17383_v12 = vld [vmem:[#allocation49_spill] sm:$0xff] }
0x117a   :  { %v16663_v29 = vadd.f32 %v8831_v9, %v16389_v30  ;;  %v8802_v40 = vadd.f32 %v11167_v61, %v8801_v56  ;;  %v11184_v20 = vpop.f32.mrf.mxu1  ;;  %v17372_v56 = vld [vmem:[#allocation33_spill] sm:$0xff] }
0x117b   :  { %v11814_v55 = vpop.f32.mrf.mxu0  ;;  %v8627_v21 = vadd.f32 %v8613_v17, %v17372_v56  ;;  %v17382_v17 = vld [vmem:[#allocation48_spill] sm:$0xff] }
0x117c   :  { %v8832_v54 = vadd.f32 %v8802_v40, %v8622_v15  ;;  %v8926_v27 = vsel %vm8849_vm8, %v16663_v29, 0.0  ;;  %v17373_v15 = vld [vmem:[#allocation31_spill] sm:$0xff]  ;;  %v17374_v40 = vld [vmem:[#allocation42_spill] sm:$0xff]  ;;  %v8962_v56 = vmul.f32 %v16663_v29, %v16663_v29 }
0x117d   :  { %v8806_v4 = vpop.f32.mrf.mxu0  ;;  %8927 = vadd.xlane.f32.xlu1 %v8926_v27  ;;  %v8616_v57 = vadd.f32 %v11132_v1, %v17373_v15  ;;  %v11185_v27 = vadd.f32 %v11184_v20, %v11183_v0  ;;  %v8884_v1 = vmul.f32 %v17383_v12, %v17383_v12 }
0x117e   :  { %v16672_v30 = vadd.f32 %v8832_v54, %v16374_v46  ;;  %v8807_v50 = vadd.f32 %v11170_v34, %v8806_v4  ;;  %v8976_v15 = vsel %vm8849_vm8, %v8962_v56, 0.0  ;;  %v17388_v56 = vmov 0.0  }
0x117f   :  { %v11817_v19 = vpop.f32.mrf.mxu0 }
0x1180   :  { %v8833_v32 = vadd.f32 %v8807_v50, %v8623_v11  ;;  %v8929_v28 = vsel %vm8849_vm8, %v16672_v30, 0.0  ;;  %v17375_v11 = vld [vmem:[#allocation27_spill] sm:$0xff]  ;;  %v17376_v50 = vld [vmem:[#allocation44_spill] sm:$0xff] }
0x1181   :  { %v8809_v42 = vpop.f32.mrf.mxu0  ;;  %8930 = vadd.xlane.f32.xlu1 %v8929_v28  ;;  %v8628_v59 = vadd.f32 %v8616_v57, %v17375_v11  ;;  %v17385_v57 = vld [vmem:[#allocation54_spill] sm:$0xff] }
0x1182   :  { %v16681_v46 = vadd.f32 %v8833_v32, %v16357_v33  ;;  %v8810_v25 = vadd.f32 %v11173_v2, %v8809_v42 }
0x1183   :  { %v11818_v41 = vpop.f32.mrf.mxu0 }
0x1184   :  { %v8834_v45 = vadd.f32 %v8810_v25, %v8624_v51  ;;  %v8932_v39 = vsel %vm8849_vm8, %v16681_v46, 0.0  ;;  %v17378_v41 = vld [vmem:[#allocation40_spill] sm:$0xff] }
0x1185   :  { %v8814_v10 = vpop.f32.mrf.mxu0  ;;  %8933 = vadd.xlane.f32.xlu1 %v8932_v39  ;;  %v8889_v18 = vmul.f32 %v17378_v41, %v17378_v41 }
0x1186   :  { %v16690_v33 = vadd.f32 %v8834_v45, %v16342_v6  ;;  %v8815_v35 = vadd.f32 %v11176_v47, %v8814_v10  ;;  %v17379_v10 = vld [vmem:[#allocation47_spill] sm:$0xff] }
0x1187   :  { %v11821_v14 = vpop.f32.mrf.mxu0  ;;  %v8917_v47 = vsel %vm8849_vm8, %v8889_v18, 0.0  ;;  %v8888_v22 = vmul.f32 %v17379_v10, %v17379_v10  ;;  %v9591_v18 = vld [vmem:[%s17040_s14 + $0x28] sm:$0xff] }
0x1188   :  { %v8835_v3 = vadd.f32 %v8815_v35, %v8625_v5  ;;  %v8935_v44 = vsel %vm8849_vm8, %v16690_v33, 0.0  ;;  %v17380_v14 = vld [vmem:[#allocation45_spill] sm:$0xff] }
0x1189   :  { %v8817_v16 = vpop.f32.mrf.mxu0  ;;  %8936 = vadd.xlane.f32.xlu1 %v8935_v44  ;;  %v8914_v31 = vsel %vm8849_vm8, %v8888_v22, 0.0  ;;  %v8887_v24 = vmul.f32 %v17380_v14, %v17380_v14  ;;  %v8879_v22 = vpop.xlane.xlu1 %8878 }
0x118a   :  { %v16699_v6 = vadd.f32 %v8835_v3, %v17369_v53  ;;  %v8818_v48 = vadd.f32 %v11179_v36, %v8817_v16  ;;  %v8965_v3 = vmul.f32 %v16690_v33, %v16690_v33  ;;  %v17381_v16 = vld [vmem:[#allocation46_spill] sm:$0xff]  ;;  %v8885_v53 = vmul.f32 %v17382_v17, %v17382_v17 }
0x118b   :  { %v11822_v8 = vpop.f32.mrf.mxu0  ;;  %v8911_v36 = vsel %vm8849_vm8, %v8887_v24, 0.0  ;;  %v8886_v0 = vmul.f32 %v17381_v16, %v17381_v16 }
0x118c   :  { %v8836_v13 = vadd.f32 %v8818_v48, %v8626_v26  ;;  %v8938_v9 = vsel %vm8849_vm8, %v16699_v6, 0.0  ;;  %v8966_v5 = vmul.f32 %v16699_v6, %v16699_v6  ;;  %v8985_v44 = vsel %vm8849_vm8, %v8965_v3, 0.0 }
0x118d   :  { %v8822_v61 = vpop.f32.mrf.mxu0  ;;  %8939 = vadd.xlane.f32.xlu1 %v8938_v9  ;;  %v8908_v26 = vsel %vm8849_vm8, %v8886_v0, 0.0  ;;  %v8964_v48 = vmul.f32 %v16681_v46, %v16681_v46  ;;  %v8905_v8 = vsel %vm8849_vm8, %v8885_v53, 0.0 }
0x118e   :  { %v16708_v55 = vadd.f32 %v8836_v13, %v17374_v40  ;;  %v8823_v23 = vadd.f32 %v11182_v52, %v8822_v61  ;;  %v8988_v35 = vsel %vm8849_vm8, %v8966_v5, 0.0  ;;  %v8963_v13 = vmul.f32 %v16672_v30, %v16672_v30  ;;  %v17384_v61 = vld [vmem:[#allocation50_spill] sm:$0xff] }
0x118f   :  { %v11825_v54 = vpop.f32.mrf.mxu0  ;;  %v8982_v62 = vsel %vm8849_vm8, %v8964_v48, 0.0  ;;  %v8902_v52 = vsel %vm8849_vm8, %v8884_v1, 0.0  ;;  %v8883_v20 = vmul.f32 %v17384_v61, %v17384_v61  ;;  %v8882_v40 = vmul.f32 %v17385_v57, %v17385_v57 }
0x1190   :  { %v8837_v34 = vadd.f32 %v8823_v23, %v8627_v21  ;;  %v8941_v4 = vsel %vm8849_vm8, %v16708_v55, 0.0  ;;  %v8967_v45 = vmul.f32 %v16708_v55, %v16708_v55  ;;  %v8979_v9 = vsel %vm8849_vm8, %v8963_v13, 0.0 }
0x1191   :  { %v8825_v43 = vpop.f32.mrf.mxu0  ;;  %8942 = vadd.xlane.f32.xlu1 %v8941_v4  ;;  %v8899_v21 = vsel %vm8849_vm8, %v8883_v20, 0.0  ;;  %v8961_v23 = vmul.f32 %v16655_v49, %v16655_v49  ;;  %v8896_v54 = vsel %vm8849_vm8, %v8882_v40, 0.0 }
0x1192   :  { %v16714_v19 = vadd.f32 %v8837_v34, %v17376_v50  ;;  %v8826_v37 = vadd.f32 %v11185_v27, %v8825_v43  ;;  %v8991_v39 = vsel %vm8849_vm8, %v8967_v45, 0.0  ;;  %v17386_v27 = vld [vmem:[#allocation52_spill] sm:$0xff]  ;;  %v8960_v43 = vmul.f32 %v16647_v38, %v16647_v38  ;;  %v17387_v50 = vld [vmem:[#allocation34_spill] sm:$0xff]  ;;  %v9593_v45 = vld [vmem:[%s17040_s14 + $0x38] sm:$0xff] }
0x1193   :  { %v11826_v32 = vpop.f32.mrf.mxu0  ;;  %v8973_v34 = vsel %vm8849_vm8, %v8961_v23, 0.0  ;;  %v8881_v4 = vmul.f32 %v17386_v27, %v17386_v27 }
0x1194   :  { %v8838_v2 = vadd.f32 %v8826_v37, %v8628_v59  ;;  %v8944_v28 = vsel %vm8849_vm8, %v16714_v19, 0.0  ;;  %v8968_v42 = vmul.f32 %v16714_v19, %v16714_v19  ;;  %v8970_v59 = vsel %vm8849_vm8, %v8960_v43, 0.0 }
0x1195   :  { %8945 = vadd.xlane.f32.xlu1 %v8944_v28  ;;  %v8893_v11 = vsel %vm8849_vm8, %v8881_v4, 0.0  ;;  %v8880_v37 = vmul.f32 %v17387_v50, %v17387_v50  ;;  %v9588_v28 = vld [vmem:[%s17040_s14 + $0x10] sm:$0xff] }
0x1196   :  { %v16721_v51 = vadd.f32 %v8838_v2, %v17377_v58  ;;  %v8994_v25 = vsel %vm8849_vm8, %v8968_v42, 0.0  ;;  %v9586_v2 = vld [vmem:[%s17040_s14] sm:$0xff]  ;;  %v9587_v58 = vld [vmem:[%s17040_s14 + $0x8] sm:$0xff] }
0x1197   :  { %v8890_v32 = vsel %vm8849_vm8, %v8880_v37, 0.0  ;;  %v9590_v42 = vld [vmem:[%s17040_s14 + $0x20] sm:$0xff] }
0x1198   :  { %v8947_v7 = vsel %vm8849_vm8, %v16721_v51, 0.0  ;;  %v8969_v60 = vmul.f32 %v16721_v51, %v16721_v51 }
0x1199   :  { %8948 = vadd.xlane.f32.xlu0 %v8947_v7  ;;  %8995 = vadd.xlane.f32.xlu1 %v8994_v25  ;;  %v9592_v7 = vld [vmem:[%s17040_s14 + $0x30] sm:$0xff]  ;;  %v9589_v25 = vld [vmem:[%s17040_s14 + $0x18] sm:$0xff] }
0x119a   :  { %v8997_v63 = vsel %vm8849_vm8, %v8969_v60, 0.0 }
0x119d   :  { %8918 = vadd.xlane.f32.xlu0 %v8917_v47  ;;  %8992 = vadd.xlane.f32.xlu1 %v8991_v39  ;;  %v8876_v47 = vpop.xlane.xlu0 %8875 }
0x11a1   :  { %8915 = vadd.xlane.f32.xlu0 %v8914_v31  ;;  %8989 = vadd.xlane.f32.xlu1 %v8988_v35  ;;  %v8873_v39 = vpop.xlane.xlu0 %8872 }
0x11a5   :  { %8912 = vadd.xlane.f32.xlu0 %v8911_v36  ;;  %8986 = vadd.xlane.f32.xlu1 %v8985_v44  ;;  %v8870_v5 = vpop.xlane.xlu0 %8869 }
0x11a9   :  { %8909 = vadd.xlane.f32.xlu0 %v8908_v26  ;;  %8998 = vadd.xlane.f32.xlu1 %v8997_v63  ;;  %v8867_v35 = vpop.xlane.xlu0 %8866 }
0x11ad   :  { %8906 = vadd.xlane.f32.xlu0 %v8905_v8  ;;  %8983 = vadd.xlane.f32.xlu1 %v8982_v62  ;;  %v8864_v3 = vpop.xlane.xlu0 %8863 }
0x11b1   :  { %8903 = vadd.xlane.f32.xlu0 %v8902_v52  ;;  %8980 = vadd.xlane.f32.xlu1 %v8979_v9  ;;  %v8861_v0 = vpop.xlane.xlu0 %8860 }
0x11b5   :  { %8900 = vadd.xlane.f32.xlu0 %v8899_v21  ;;  %8977 = vadd.xlane.f32.xlu1 %v8976_v15  ;;  %v8858_v26 = vpop.xlane.xlu0 %8857 }
0x11b9   :  { %8897 = vadd.xlane.f32.xlu0 %v8896_v54  ;;  %8974 = vadd.xlane.f32.xlu1 %v8973_v34  ;;  %v8855_v48 = vpop.xlane.xlu0 %8854 }
0x11bd   :  { %8894 = vadd.xlane.f32.xlu0 %v8893_v11  ;;  %8971 = vadd.xlane.f32.xlu1 %v8970_v59  ;;  %v8852_v62 = vpop.xlane.xlu0 %8851 }
0x11c1   :  { %8891 = vadd.xlane.f32.xlu0 %v8890_v32 }
0x11ce   :  { %9598 = vperm.xlu1 %11930, %v9586_v2  }
0x11d2   :  { %9608 = vperm.xlu1 %11930, %v9588_v28  }
0x11d6   :  { %9618 = vperm.xlu1 %11930, %v9590_v42  }
0x11d7   :  { %9603 = vperm.xlu0 %11929, %v9587_v58  }
0x11da   :  { %9628 = vperm.xlu1 %11930, %v9592_v7   ;;  %v9010_v7 = vld [vmem:[#allocation16] sm:$0xf] }
0x11db   :  { %9613 = vperm.xlu0 %11929, %v9589_v25  }
0x11df   :  { %9623 = vperm.xlu0 %11929, %v9591_v18  }
0x11e3   :  { %9633 = vperm.xlu0 %11929, %v9593_v45  }
0x11fe   :  { %v8922_v31 = vpop.xlane.xlu1 %8921 }
0x11ff   :  { %v8950_v58 = vadd.f32 %v8922_v31, %v8852_v62 }
0x1202   :  { %v8925_v24 = vpop.xlane.xlu1 %8924 }
0x1203   :  { %v8951_v42 = vadd.f32 %v8925_v24, %v8855_v48 }
0x1206   :  { %v8928_v36 = vpop.xlane.xlu1 %8927 }
0x1207   :  { %v8952_v32 = vadd.f32 %v8928_v36, %v8858_v26 }
0x120a   :  { %v8931_v44 = vpop.xlane.xlu1 %8930 }
0x120b   :  { %v8953_v37 = vadd.f32 %v8931_v44, %v8861_v0 }
0x120e   :  { %v8934_v60 = vpop.xlane.xlu1 %8933 }
0x120f   :  { %v8954_v43 = vadd.f32 %v8934_v60, %v8864_v3 }
0x1212   :  { %v8937_v63 = vpop.xlane.xlu1 %8936 }
0x1213   :  { %v8955_v4 = vadd.f32 %v8937_v63, %v8867_v35 }
0x1216   :  { %v8940_v53 = vpop.xlane.xlu1 %8939 }
0x1217   :  { %v8956_v23 = vadd.f32 %v8940_v53, %v8870_v5 }
0x121a   :  { %v8943_v8 = vpop.xlane.xlu1 %8942 }
0x121b   :  { %v8957_v40 = vadd.f32 %v8943_v8, %v8873_v39 }
0x121e   :  { %v8946_v1 = vpop.xlane.xlu1 %8945 }
0x121f   :  { %v8958_v20 = vadd.f32 %v8946_v1, %v8876_v47  ;;  %v9160_v1 = vld [vmem:[#allocation18] sm:$0xff] }
0x1220   :  { %11875 = vmatprep.mubr.msk.f32.mxu0 %vm498_vm2, %v9160_v1 }
0x1222   :  { %v8949_v13 = vpop.xlane.xlu0 %8948  ;;  %v8996_v52 = vpop.xlane.xlu1 %8995 }
0x1223   :  { %v8959_v9 = vadd.f32 %v8949_v13, %v8879_v22 }
0x1225   :  { %11828 = vmatpush3.msra.mxu1 %v8959_v9  ;;  %v9161_v9 = vld [vmem:[#allocation18 + $0x8] sm:$0xff] }
0x1226   :  { %11829 = vmatprep.subr.mxu1 %v17388_v56  ;;  %v8919_v21 = vpop.xlane.xlu0 %8918  ;;  %v8993_v15 = vpop.xlane.xlu1 %8992 }
0x1227   :  { %11830 = vmatpush3.msra.mxu1 %v8958_v20 }
0x1228   :  { %11831 = vmatprep.subr.mxu1 %v17388_v56 }
0x1229   :  { %11832 = vmatpush3.msra.mxu1 %v8957_v40  ;;  %v9165_v40 = vld [vmem:[#allocation18 + $0x28] sm:$0xff] }
0x122a   :  { %v8916_v54 = vpop.xlane.xlu0 %8915  ;;  %11833 = vmatprep.subr.mxu1 %v17388_v56  ;;  %v8990_v34 = vpop.xlane.xlu1 %8989 }
0x122b   :  { %11834 = vmatpush3.msra.mxu1 %v8956_v23  ;;  %v9008_v47 = vadd.f32 %v8996_v52, %v8916_v54  ;;  %v9166_v23 = vld [vmem:[#allocation18 + $0x30] sm:$0xff]  ;;  %v9167_v54 = vld [vmem:[#allocation18 + $0x38] sm:$0xff] }
0x122c   :  { %11835 = vmatprep.subr.mxu1 %v17388_v56 }
0x122d   :  { %11836 = vmatpush3.msra.mxu1 %v8955_v4  ;;  %v9169_v4 = vld [vmem:[#allocation18 + $0x48] sm:$0xff] }
0x122e   :  { %v8913_v11 = vpop.xlane.xlu0 %8912  ;;  %11837 = vmatprep.subr.mxu1 %v17388_v56  ;;  %v8987_v59 = vpop.xlane.xlu1 %8986 }
0x122f   :  { %11838 = vmatpush3.msra.mxu1 %v8954_v43  ;;  %v9007_v5 = vadd.f32 %v8993_v15, %v8913_v11  ;;  %v9164_v15 = vld [vmem:[#allocation18 + $0x20] sm:$0xff] }
0x1230   :  { %11839 = vmatprep.subr.mxu1 %v17388_v56 }
0x1231   :  { %11840 = vmatpush3.msra.mxu1 %v8953_v37 }
0x1232   :  { %v8910_v2 = vpop.xlane.xlu0 %8909  ;;  %11841 = vmatprep.subr.mxu1 %v17388_v56  ;;  %v8999_v28 = vpop.xlane.xlu1 %8998 }
0x1233   :  { %11842 = vmatpush3.msra.mxu1 %v8952_v32  ;;  %v9009_v45 = vadd.f32 %v8999_v28, %v8919_v21  ;;  %v9006_v31 = vadd.f32 %v8990_v34, %v8910_v2  ;;  %v9162_v21 = vld [vmem:[#allocation18 + $0x10] sm:$0xff]  ;;  %v9168_v34 = vld [vmem:[#allocation18 + $0x40] sm:$0xff] }
0x1234   :  { %11843 = vmatprep.subr.mxu1 %v17388_v56 }
0x1235   :  { %11844 = vmatpush3.msra.mxu1 %v8951_v42 }
0x1236   :  { %v8907_v25 = vpop.xlane.xlu0 %8906  ;;  %11845 = vmatprep.subr.mxu1 %v17388_v56  ;;  %v8984_v18 = vpop.xlane.xlu1 %8983 }
0x1237   :  { %11846 = vmatpush3.msra.mxu1 %v8950_v58  ;;  %v9005_v3 = vadd.f32 %v8987_v59, %v8907_v25 }
0x1238   :  { %11848 = vmatmul.mubr.msk.f32.vlgmr.msra.gmra.mxu1 %vm9011_vm9, %v9010_v7  ;;  %11850 = vmatprep.subr.mxu1 %v17388_v56 }
0x1239   :  { %11851 = vmatpush3.msra.mxu1 %v9009_v45  ;;  %11870 = vmatprep.mubr.msk.f32.mxu1 %vm12737_vm6, %v17388_v56 }
0x123a   :  { %v8904_v39 = vpop.xlane.xlu0 %8903  ;;  %11852 = vmatprep.subr.mxu1 %v17388_v56  ;;  %v8981_v22 = vpop.xlane.xlu1 %8980 }
0x123b   :  { %11853 = vmatpush3.msra.mxu1 %v9008_v47  ;;  %v9004_v36 = vadd.f32 %v8984_v18, %v8904_v39 }
0x123c   :  { %11854 = vmatprep.subr.mxu1 %v17388_v56 }
0x123d   :  { %11855 = vmatpush3.msra.mxu1 %v9007_v5 }
0x123e   :  { %v8901_v35 = vpop.xlane.xlu0 %8900  ;;  %11856 = vmatprep.subr.mxu1 %v17388_v56  ;;  %v8978_v24 = vpop.xlane.xlu1 %8977 }
0x123f   :  { %11857 = vmatpush3.msra.mxu1 %v9006_v31  ;;  %v9003_v0 = vadd.f32 %v8981_v22, %v8901_v35 }
0x1240   :  { %11858 = vmatprep.subr.mxu1 %v17388_v56 }
0x1241   :  { %11859 = vmatpush3.msra.mxu1 %v9005_v3 }
0x1242   :  { %v8898_v44 = vpop.xlane.xlu0 %8897  ;;  %11860 = vmatprep.subr.mxu1 %v17388_v56  ;;  %v8975_v60 = vpop.xlane.xlu1 %8974 }
0x1243   :  { %11861 = vmatpush3.msra.mxu1 %v9004_v36  ;;  %v9002_v26 = vadd.f32 %v8978_v24, %v8898_v44 }
0x1244   :  { %11862 = vmatprep.subr.mxu1 %v17388_v56 }
0x1245   :  { %11863 = vmatpush3.msra.mxu1 %v9003_v0 }
0x1246   :  { %v8895_v63 = vpop.xlane.xlu0 %8894  ;;  %11864 = vmatprep.subr.mxu1 %v17388_v56  ;;  %v8972_v48 = vpop.xlane.xlu1 %8971 }
0x1247   :  { %v9001_v53 = vadd.f32 %v8975_v60, %v8895_v63  ;;  %11865 = vmatpush3.msra.mxu1 %v9002_v26 }
0x1248   :  { %11866 = vmatprep.subr.mxu1 %v17388_v56 }
0x1249   :  { %11867 = vmatpush3.msra.mxu1 %v9001_v53 }
0x124a   :  { %v8892_v8 = vpop.xlane.xlu0 %8891  ;;  %11868 = vmatprep.subr.mxu1 %v17388_v56  ;;  %v9163_v56 = vld [vmem:[#allocation18 + $0x18] sm:$0xff] }
0x124b   :  { %v9000_v62 = vadd.f32 %v8972_v48, %v8892_v8 }
0x124d   :  { %11869 = vmatpush3.msra.mxu1 %v9000_v62 }
0x124e   :  { %11871 = vmatmul.mubr.msk.f32.vlgmr.msra.gmra.mxu1 %vm9011_vm9, %v9010_v7 }
0x124f   :  { %11892 = vmatprep.mubr.msk.f32.mxu1 %vm498_vm2, %v9160_v1  ;;  %v9319_v1 = vld [vmem:[%s17039_s13 + $0x8] sm:$0xff] }
0x12f8   :  { %v9081_v13 = vpop.f32.mrf.mxu1 }
0x12f9   :  { %v9085_v52 = vmul.f32 0.00125, %v9081_v13 }
0x12fa   :  { %v11849_v20 = vpop.f32.mrf.mxu1 }
0x12fb   :  { %11873 = vmatprep.subr.msk.mxu0 %vm571_vm1, %v9085_v52  ;;  %v9157_v59 = vmul.f32 %v9085_v52, %v9085_v52  ;;  %v9318_v20 = vld [vmem:[%s17039_s13] sm:$0xff] }
0x12fc   :  { %11874 = vmatpush3.msk.msra.mxu0 %vm571_vm1, %v9085_v52 }
0x12fd   :  { %11876 = vmatmul.mubr.msk.f32.vlgmr.msra.gmra.mxu0 %vm498_vm2, %v9161_v9 }
0x12fe   :  { %11878 = vmatprep.mubr.msk.f32.mxu0 %vm498_vm2, %v9162_v21 }
0x1301   :  { %11879 = vmatmul.mubr.msk.f32.gmra.mxu0 %vm498_vm2, %v9163_v56 }
0x1302   :  { %11881 = vmatprep.mubr.msk.f32.mxu0 %vm498_vm2, %v9164_v15 }
0x1305   :  { %11882 = vmatmul.mubr.msk.f32.gmra.mxu0 %vm498_vm2, %v9165_v40 }
0x1306   :  { %11884 = vmatprep.mubr.msk.f32.mxu0 %vm498_vm2, %v9166_v23 }
0x1309   :  { %11885 = vmatmul.mubr.msk.f32.gmra.mxu0 %vm498_vm2, %v9167_v54 }
0x130a   :  { %11887 = vmatprep.mubr.msk.f32.mxu0 %vm498_vm2, %v9168_v34 }
0x130d   :  { %11888 = vmatmul.mubr.msk.f32.gmra.mxu0 %vm498_vm2, %v9169_v4 }
0x130e   :  { %v9152_v43 = vpop.f32.mrf.mxu1 }
0x130f   :  { %v9156_v11 = vmul.f32 0.00125, %v9152_v43  ;;  %v9320_v43 = vld [vmem:[%s17039_s13 + $0x10] sm:$0xff] }
0x1310   :  { %v11872_v37 = vpop.f32.mrf.mxu1 }
0x1311   :  { %v9158_v32 = vsub.f32 %v9156_v11, %v9157_v59  ;;  %v9323_v37 = vld [vmem:[%s17039_s13 + $0x28] sm:$0xff] }
0x1313   :  { %v9159_v2 = vmax.f32 %v9158_v32, 0.0 }
0x1315   :  { %11890 = vmatprep.subr.msk.mxu1 %vm571_vm1, %v9159_v2 }
0x1316   :  { %11891 = vmatpush3.msk.msra.mxu1 %vm571_vm1, %v9159_v2 }
0x1317   :  { %11893 = vmatmul.mubr.msk.f32.vlgmr.msra.gmra.mxu1 %vm498_vm2, %v9161_v9 }
0x1318   :  { %11895 = vmatprep.mubr.msk.f32.mxu1 %vm498_vm2, %v9162_v21 }
0x131b   :  { %11896 = vmatmul.mubr.msk.f32.gmra.mxu1 %vm498_vm2, %v9163_v56 }
0x131c   :  { %11898 = vmatprep.mubr.msk.f32.mxu1 %vm498_vm2, %v9164_v15 }
0x131f   :  { %11899 = vmatmul.mubr.msk.f32.gmra.mxu1 %vm498_vm2, %v9165_v40 }
0x1320   :  { %11901 = vmatprep.mubr.msk.f32.mxu1 %vm498_vm2, %v9166_v23  ;;  %v9321_v23 = vld [vmem:[%s17039_s13 + $0x18] sm:$0xff] }
0x1323   :  { %11902 = vmatmul.mubr.msk.f32.gmra.mxu1 %vm498_vm2, %v9167_v54 }
0x1324   :  { %11904 = vmatprep.mubr.msk.f32.mxu1 %vm498_vm2, %v9168_v34 }
0x1327   :  { %11905 = vmatmul.mubr.msk.f32.gmra.mxu1 %vm498_vm2, %v9169_v4 }
0x13bd   :  { %v11877_v28 = vpop.f32.mrf.mxu0 }
0x13be   :  { %9473 = vperm.xlu1 %11930, %v11877_v28   ;;  %v9322_v28 = vld [vmem:[%s17039_s13 + $0x20] sm:$0xff] }
0x13bf   :  { %v9269_v42 = vpop.f32.mrf.mxu0 }
0x13c0   :  { %9468 = vperm.xlu0 %11929, %v9269_v42  }
0x13c1   :  { %v11880_v58 = vpop.f32.mrf.mxu0 }
0x13c3   :  { %v9279_v7 = vpop.f32.mrf.mxu0 }
0x13c4   :  { %9483 = vperm.xlu0 %11929, %v11880_v58   ;;  %9478 = vperm.xlu1 %11930, %v9279_v7   ;;  %v9325_v7 = vld [vmem:[%s17039_s13 + $0x38] sm:$0xff] }
0x13c5   :  { %v11883_v25 = vpop.f32.mrf.mxu0 }
0x13c7   :  { %v9289_v18 = vpop.f32.mrf.mxu0 }
0x13c8   :  { %9493 = vperm.xlu0 %11929, %v11883_v25   ;;  %9488 = vperm.xlu1 %11930, %v9289_v18  }
0x13c9   :  { %v11886_v45 = vpop.f32.mrf.mxu0 }
0x13cb   :  { %v9299_v47 = vpop.f32.mrf.mxu0 }
0x13cc   :  { %9503 = vperm.xlu0 %11929, %v11886_v45   ;;  %9498 = vperm.xlu1 %11930, %v9299_v47   ;;  %v9324_v45 = vld [vmem:[%s17039_s13 + $0x30] sm:$0xff] }
0x13cd   :  { %v11889_v39 = vpop.f32.mrf.mxu0 }
0x13cf   :  { %v9309_v22 = vpop.f32.mrf.mxu0 }
0x13d0   :  { %9513 = vperm.xlu0 %11929, %v11889_v39   ;;  %9508 = vperm.xlu1 %11930, %v9309_v22   ;;  %v9327_v22 = vld [vmem:[%s17039_s13 + $0x48] sm:$0xff] }
0x13d7   :  { %v11894_v5 = vpop.f32.mrf.mxu1 }
0x13d8   :  { %v9403_v31 = vadd.f32 1e-05, %v11894_v5 }
0x13d9   :  { %v9397_v35 = vpop.f32.mrf.mxu1 }
0x13da   :  { %12202 = vrsqrt.f32 %v9403_v31  ;;  %v9398_v24 = vadd.f32 1e-05, %v9397_v35  ;;  %v9326_v35 = vld [vmem:[%s17039_s13 + $0x40] sm:$0xff] }
0x13db   :  { %v11897_v3 = vpop.f32.mrf.mxu1 }
0x13dc   :  { %12204 = vrsqrt.f32 %v9398_v24  ;;  %v9413_v36 = vadd.f32 1e-05, %v11897_v3 }
0x13dd   :  { %v9407_v44 = vpop.f32.mrf.mxu1 }
0x13de   :  { %12206 = vrsqrt.f32 %v9413_v36  ;;  %v9408_v0 = vadd.f32 1e-05, %v9407_v44  ;;  %v9595_v44 = vld [vmem:[%s17040_s14 + $0x48] sm:$0xff] }
0x13df   :  { %v11900_v60 = vpop.f32.mrf.mxu1 }
0x13e0   :  { %12208 = vrsqrt.f32 %v9408_v0  ;;  %v9423_v26 = vadd.f32 1e-05, %v11900_v60  ;;  %v9594_v0 = vld [vmem:[%s17040_s14 + $0x40] sm:$0xff]  ;;  %v9604_v60 = vpop.permute.xlu0 %9603 }
0x13e1   :  { %v9417_v63 = vpop.f32.mrf.mxu1 }
0x13e2   :  { %12210 = vrsqrt.f32 %v9423_v26  ;;  %v9418_v53 = vadd.f32 1e-05, %v9417_v63  ;;  %v9599_v26 = vpop.permute.xlu1 %9598 }
0x13e3   :  { %v11903_v48 = vpop.f32.mrf.mxu1 }
0x13e4   :  { %12212 = vrsqrt.f32 %v9418_v53  ;;  %v9433_v8 = vadd.f32 1e-05, %v11903_v48  ;;  %v9614_v63 = vpop.permute.xlu0 %9613 }
0x13e5   :  { %v9427_v62 = vpop.f32.mrf.mxu1 }
0x13e6   :  { %12214 = vrsqrt.f32 %v9433_v8  ;;  %v9428_v13 = vadd.f32 1e-05, %v9427_v62  ;;  %v9609_v53 = vpop.permute.xlu1 %9608 }
0x13e7   :  { %v12203_v52 = vpop.eup %12202  ;;  %v11906_v9 = vpop.f32.mrf.mxu1 }
0x13e8   :  { %12216 = vrsqrt.f32 %v9428_v13  ;;  %v9443_v21 = vadd.f32 1e-05, %v11906_v9  ;;  %v9457_v56 = vmul.f32 %v12203_v52, %v9319_v1  ;;  %v16890_v48 = vpop.permute.xlu0 %9623 }
0x13e9   :  { %v12205_v15 = vpop.eup %12204  ;;  %v9437_v40 = vpop.f32.mrf.mxu1 }
0x13ea   :  { %12218 = vrsqrt.f32 %v9443_v21  ;;  %v9438_v54 = vadd.f32 1e-05, %v9437_v40  ;;  %9533 = vperm.xlu0 %11929, %v9457_v56   ;;  %v9456_v34 = vmul.f32 %v12205_v15, %v9318_v20  ;;  %v16892_v8 = vpop.permute.xlu1 %9618 }
0x13eb   :  { %v12207_v4 = vpop.eup %12206 }
0x13ec   :  { %12220 = vrsqrt.f32 %v9438_v54  ;;  %9528 = vperm.xlu1 %11930, %v9456_v34   ;;  %v9459_v11 = vmul.f32 %v12207_v4, %v9321_v23  ;;  %v16894_v62 = vpop.permute.xlu0 %9633 }
0x13ed   :  { %v12209_v59 = vpop.eup %12208 }
0x13ee   :  { %9543 = vperm.xlu0 %11929, %v9459_v11   ;;  %v9458_v32 = vmul.f32 %v12209_v59, %v9320_v43  ;;  %v16896_v1 = vpop.permute.xlu1 %9628 }
0x13ef   :  { %v12211_v2 = vpop.eup %12210 }
0x13f0   :  { %9538 = vperm.xlu1 %11930, %v9458_v32   ;;  %v9461_v42 = vmul.f32 %v12211_v2, %v9323_v37 }
0x13f1   :  { %v12213_v58 = vpop.eup %12212 }
0x13f2   :  { %9553 = vperm.xlu0 %11929, %v9461_v42   ;;  %v9460_v25 = vmul.f32 %v12213_v58, %v9322_v28 }
0x13f3   :  { %v12215_v18 = vpop.eup %12214 }
0x13f4   :  { %9548 = vperm.xlu1 %11930, %v9460_v25   ;;  %v9463_v47 = vmul.f32 %v12215_v18, %v9325_v7 }
0x13f5   :  { %v12217_v39 = vpop.eup %12216 }
0x13f6   :  { %9563 = vperm.xlu0 %11929, %v9463_v47   ;;  %v9462_v5 = vmul.f32 %v12217_v39, %v9324_v45 }
0x13f7   :  { %v12219_v31 = vpop.eup %12218 }
0x13f8   :  { %9558 = vperm.xlu1 %11930, %v9462_v5   ;;  %v9465_v24 = vmul.f32 %v12219_v31, %v9327_v22 }
0x13f9   :  { %v12221_v3 = vpop.eup %12220 }
0x13fa   :  { %9573 = vperm.xlu0 %11929, %v9465_v24   ;;  %v9464_v36 = vmul.f32 %v12221_v3, %v9326_v35 }
0x13fc   :  { %9568 = vperm.xlu1 %11930, %v9464_v36  }
0x13fe   :  { %9643 = vperm.xlu0 %11929, %v9595_v44  }
0x1400   :  { %9638 = vperm.xlu1 %11930, %v9594_v0  }
0x1439   :  { %v9474_v52 = vpop.permute.xlu1 %9473 }
0x143a   :  { %v9517_v34 = vsub.f32 %v17386_v27, %v9474_v52  ;;  %v9667_v4 = vsub.f32 %v16655_v49, %v9474_v52 }
0x143b   :  { %v9469_v13 = vpop.permute.xlu0 %9468 }
0x143c   :  { %v9516_v11 = vsub.f32 %v17387_v50, %v9469_v13  ;;  %v9666_v59 = vsub.f32 %v16647_v38, %v9469_v13 }
0x143f   :  { %v9484_v9 = vpop.permute.xlu0 %9483  ;;  %v9479_v20 = vpop.permute.xlu1 %9478 }
0x1440   :  { %v9519_v25 = vsub.f32 %v17384_v61, %v9484_v9  ;;  %v9669_v18 = vsub.f32 %v16672_v30, %v9484_v9  ;;  %v9518_v27 = vsub.f32 %v17385_v57, %v9479_v20  ;;  %v9668_v49 = vsub.f32 %v16663_v29, %v9479_v20 }
0x1443   :  { %v9494_v21 = vpop.permute.xlu0 %9493  ;;  %v16898_v56 = vpop.permute.xlu1 %9488 }
0x1444   :  { %v9521_v22 = vsub.f32 %v17382_v17, %v9494_v21  ;;  %v9671_v5 = vsub.f32 %v16690_v33, %v9494_v21  ;;  %v9520_v33 = vsub.f32 %v17383_v12, %v16898_v56  ;;  %v9670_v17 = vsub.f32 %v16681_v46, %v16898_v56 }
0x1447   :  { %v16900_v15 = vpop.permute.xlu0 %9503  ;;  %v16902_v40 = vpop.permute.xlu1 %9498 }
0x1448   :  { %v9523_v46 = vsub.f32 %v17380_v14, %v16900_v15 }
0x144b   :  { %v16904_v23 = vpop.permute.xlu0 %9513  ;;  %v16906_v54 = vpop.permute.xlu1 %9508 }
0x1465   :  { %v9534_v43 = vpop.permute.xlu0 %9533 }
0x1466   :  { %v9577_v37 = vmul.f32 %v9534_v43, %v9517_v34  ;;  %v9677_v32 = vmul.f32 %v9667_v4, %v9534_v43  ;;  %v9672_v4 = vsub.f32 %v16699_v6, %v16902_v40 }
0x1467   :  { %v9529_v2 = vpop.permute.xlu1 %9528 }
0x1468   :  { %v9647_v28 = vadd.f32 %v9604_v60, %v9577_v37  ;;  %v9687_v42 = vadd.f32 %v9677_v32, %v9604_v60  ;;  %v9576_v58 = vmul.f32 %v9529_v2, %v9516_v11  ;;  %v9676_v7 = vmul.f32 %v9666_v59, %v9529_v2 }
0x1469   :  { %v9544_v45 = vpop.permute.xlu0 %9543 }
0x146a   :  { %v9657_v47 = vmax.f32 %v9647_v28, 0.0  ;;  %v9697_v50 = vmax.f32 %v9687_v42, 0.0  ;;  %v9646_v39 = vadd.f32 %v9599_v26, %v9576_v58  ;;  %v9686_v38 = vadd.f32 %v9676_v7, %v9599_v26 }
0x146b   :  { %v9579_v31 = vmul.f32 %v9544_v45, %v9519_v25  ;;  %v9679_v35 = vmul.f32 %v9669_v18, %v9544_v45  ;;  %v9539_v24 = vpop.permute.xlu1 %9538  ;;  %v9675_v42 = vsub.f32 %v16721_v51, %v16904_v23 }
0x146c   :  { %9707 = vst.msk [vmem:[%s17043_s17 + $0x8] sm:$0xff] %vm8849_vm8, %v9657_v47  ;;  %9717 = vst.msk [vmem:[%s17043_s17 + $0x58] sm:$0xff] %vm8849_vm8, %v9697_v50  ;;  %v9656_v29 = vmax.f32 %v9646_v39, 0.0  ;;  %v9696_v30 = vmax.f32 %v9686_v38, 0.0  ;;  %v9578_v61 = vmul.f32 %v9539_v24, %v9518_v27  ;;  %v9678_v57 = vmul.f32 %v9668_v49, %v9539_v24 }
0x146d   :  { %v9649_v3 = vadd.f32 %v9614_v63, %v9579_v31  ;;  %v9689_v36 = vadd.f32 %v9679_v35, %v9614_v63  ;;  %v9554_v44 = vpop.permute.xlu0 %9553  ;;  %v9673_v63 = vsub.f32 %v16708_v55, %v16900_v15  ;;  %v9674_v47 = vsub.f32 %v16714_v19, %v16906_v54 }
0x146e   :  { %9706 = vst.msk [vmem:[%s17043_s17] sm:$0xff] %vm8849_vm8, %v9656_v29  ;;  %9716 = vst.msk [vmem:[%s17043_s17 + $0x50] sm:$0xff] %vm8849_vm8, %v9696_v30  ;;  %v9648_v0 = vadd.f32 %v9609_v53, %v9578_v61  ;;  %v9688_v60 = vadd.f32 %v9678_v57, %v9609_v53  ;;  %v9581_v26 = vmul.f32 %v9554_v44, %v9521_v22 }
0x146f   :  { %v9681_v12 = vmul.f32 %v9671_v5, %v9554_v44  ;;  %v9659_v13 = vmax.f32 %v9649_v3, 0.0  ;;  %v9699_v52 = vmax.f32 %v9689_v36, 0.0  ;;  %v9549_v9 = vpop.permute.xlu1 %9548  ;;  %v9522_v53 = vsub.f32 %v17381_v16, %v16902_v40 }
0x1470   :  { %v9658_v20 = vmax.f32 %v9648_v0, 0.0  ;;  %v9698_v21 = vmax.f32 %v9688_v60, 0.0  ;;  %v9651_v56 = vadd.f32 %v16890_v48, %v9581_v26  ;;  %v9580_v55 = vmul.f32 %v9549_v9, %v9520_v33 }
0x1471   :  { %v9691_v34 = vadd.f32 %v9681_v12, %v16890_v48  ;;  %9709 = vst.msk [vmem:[%s17043_s17 + $0x18] sm:$0xff] %vm8849_vm8, %v9659_v13  ;;  %9719 = vst.msk [vmem:[%s17043_s17 + $0x68] sm:$0xff] %vm8849_vm8, %v9699_v52  ;;  %v9680_v14 = vmul.f32 %v9670_v17, %v9549_v9  ;;  %v9564_v15 = vpop.permute.xlu0 %9563 }
0x1472   :  { %9708 = vst.msk [vmem:[%s17043_s17 + $0x10] sm:$0xff] %vm8849_vm8, %v9658_v20  ;;  %9718 = vst.msk [vmem:[%s17043_s17 + $0x60] sm:$0xff] %vm8849_vm8, %v9698_v21  ;;  %v9661_v6 = vmax.f32 %v9651_v56, 0.0  ;;  %v9583_v48 = vmul.f32 %v9564_v15, %v9523_v46  ;;  %v9683_v40 = vmul.f32 %v9673_v63, %v9564_v15  ;;  %v9650_v43 = vadd.f32 %v16892_v8, %v9580_v55 }
0x1473   :  { %v9701_v16 = vmax.f32 %v9691_v34, 0.0  ;;  %v9690_v11 = vadd.f32 %v9680_v14, %v16892_v8  ;;  %v9559_v59 = vpop.permute.xlu1 %9558  ;;  %v9525_v8 = vsub.f32 %v17378_v41, %v16904_v23 }
0x1474   :  { %9711 = vst.msk [vmem:[%s17043_s17 + $0x28] sm:$0xff] %vm8849_vm8, %v9661_v6  ;;  %v9653_v37 = vadd.f32 %v16894_v62, %v9583_v48  ;;  %v9693_v32 = vadd.f32 %v9683_v40, %v16894_v62  ;;  %v9582_v2 = vmul.f32 %v9559_v59, %v9522_v53  ;;  %v9682_v28 = vmul.f32 %v9672_v4, %v9559_v59 }
0x1475   :  { %9721 = vst.msk [vmem:[%s17043_s17 + $0x78] sm:$0xff] %vm8849_vm8, %v9701_v16  ;;  %v9660_v58 = vmax.f32 %v9650_v43, 0.0  ;;  %v9700_v7 = vmax.f32 %v9690_v11, 0.0  ;;  %v9574_v25 = vpop.permute.xlu0 %9573  ;;  %v9524_v62 = vsub.f32 %v17379_v10, %v16906_v54 }
0x1476   :  { %v9663_v18 = vmax.f32 %v9653_v37, 0.0  ;;  %v9703_v27 = vmax.f32 %v9693_v32, 0.0  ;;  %v9652_v49 = vadd.f32 %v16896_v1, %v9582_v2  ;;  %v9692_v45 = vadd.f32 %v9682_v28, %v16896_v1 }
0x1477   :  { %9710 = vst.msk [vmem:[%s17043_s17 + $0x20] sm:$0xff] %vm8849_vm8, %v9660_v58  ;;  %9720 = vst.msk [vmem:[%s17043_s17 + $0x70] sm:$0xff] %vm8849_vm8, %v9700_v7  ;;  %v9569_v51 = vpop.permute.xlu1 %9568  ;;  %v9585_v10 = vmul.f32 %v9574_v25, %v9525_v8  ;;  %v9685_v1 = vmul.f32 %v9675_v42, %v9574_v25 }
0x1478   :  { %9713 = vst.msk [vmem:[%s17043_s17 + $0x38] sm:$0xff] %vm8849_vm8, %v9663_v18  ;;  %9723 = vst.msk [vmem:[%s17043_s17 + $0x88] sm:$0xff] %vm8849_vm8, %v9703_v27  ;;  %v9662_v19 = vmax.f32 %v9652_v49, 0.0  ;;  %v9702_v41 = vmax.f32 %v9692_v45, 0.0  ;;  %v9584_v54 = vmul.f32 %v9569_v51, %v9524_v62  ;;  %v9684_v50 = vmul.f32 %v9674_v47, %v9569_v51 }
0x1479   :  { %v9644_v23 = vpop.permute.xlu0 %9643 }
0x147a   :  { %9712 = vst.msk [vmem:[%s17043_s17 + $0x30] sm:$0xff] %vm8849_vm8, %v9662_v19  ;;  %9722 = vst.msk [vmem:[%s17043_s17 + $0x80] sm:$0xff] %vm8849_vm8, %v9702_v41  ;;  %v9655_v39 = vadd.f32 %v9644_v23, %v9585_v10  ;;  %v9695_v38 = vadd.f32 %v9685_v1, %v9644_v23 }
0x147b   :  { %v9639_v22 = vpop.permute.xlu1 %9638 }
0x147c   :  { %v9665_v5 = vmax.f32 %v9655_v39, 0.0  ;;  %v9705_v31 = vmax.f32 %v9695_v38, 0.0  ;;  %v9654_v35 = vadd.f32 %v9639_v22, %v9584_v54  ;;  %v9694_v24 = vadd.f32 %v9684_v50, %v9639_v22 }
0x147e   :  { %9715 = vst.msk [vmem:[%s17043_s17 + $0x48] sm:$0xff] %vm8849_vm8, %v9665_v5  ;;  %9725 = vst.msk [vmem:[%s17043_s17 + $0x98] sm:$0xff] %vm8849_vm8, %v9705_v31  ;;  %v9664_v29 = vmax.f32 %v9654_v35, 0.0  ;;  %v9704_v30 = vmax.f32 %v9694_v24, 0.0 }
0x1480   :  { %9714 = vst.msk [vmem:[%s17043_s17 + $0x40] sm:$0xff] %vm8849_vm8, %v9664_v29  ;;  %9724 = vst.msk [vmem:[%s17043_s17 + $0x90] sm:$0xff] %vm8849_vm8, %v9704_v30 }
0x1481   :  { %9730 = vsyncpa [#allocation3], 1 }
0x1482   :  { %9731 = vsyncpa [#allocation5], 1 }
0x1483   :  { %9732 = vsyncpa [#allocation8], 1 }
0x1484   :  { %9733 = vsyncpa [#allocation11], 1 }
0x1485   :  { %9734 = vsyncpa [#allocation14], 1 }
0x1486   :  { %9735 = vsyncpa [#allocation17], 1 }

</bundles_post_ra>
